<compile_context>
chip_gen: v5e
topology: v5e:2x2
jax: 0.10.0
libtpu: 0.0.40
codegen_flags: <defaults>
</compile_context>

<pallas_src>
import numpy as np
import jax
import jax.numpy as jnp
from jax.experimental import pallas as pl
from jax.experimental.pallas import tpu as pltpu

C = 30          # feature channels
KLEN = 32       # ConvTranspose1d kernel size -> initial sequence length
BN_EPS = 1e-5


def _elu(x):
    return jnp.where(x > 0, x, jnp.exp(x) - 1.0)


# --------------------------------------------------------------------------
# Fused kernel: head + 5x (upsample / reflect-pad / conv / BN / ELU) pipeline
# grid = (B,), one batch element per program; all weights are resident constants
# --------------------------------------------------------------------------
def tcoil_kernel(x_ref, w1_ref, b1_ref, w2_ref, b2_ref, wt_ref, bt_ref,
                 cw1_ref, cb1_ref, cw2_ref, cb2_ref,
                 cw3_ref, cb3_ref, cw4_ref, cb4_ref,
                 cw5_ref, cb5_ref, out_ref):
    # ---- head: lin1 -> ELU -> lin2 -> ELU -> ConvTranspose1d(k=32, L_in=1) -> ELU ----
    xr = x_ref[0]                                                        # (1, 5)
    h = _elu(jnp.dot(xr, w1_ref[...], preferred_element_type=jnp.float32) + b1_ref[...])
    h = _elu(jnp.dot(h, w2_ref[...], preferred_element_type=jnp.float32) + b2_ref[...])
    t = jnp.dot(h, wt_ref[...], preferred_element_type=jnp.float32)     # (1, 30*32), co-major

    # scatter the (1, 960) row into the (30, 32) channels-on-sublanes layout
    row_id = jax.lax.broadcasted_iota(jnp.int32, (C, KLEN), 0)
    feat = jnp.zeros((C, KLEN), jnp.float32)
    for co in range(C):
        feat = feat + jnp.where(row_id == co,
                                t[:, co * KLEN:(co + 1) * KLEN], 0.0)
    feat = _elu(feat + bt_ref[...])                                      # (30, 32)

    def up_pad(f):
        # nearest x2 upsample along lanes as one MXU matmul against an in-kernel
        # generated 0/1 matrix rep[j, m] = (m // 2 == j), then ReflectionPad1d(1).
        cc, L = f.shape
        row = jax.lax.broadcasted_iota(jnp.int32, (L, 2 * L), 0)
        col = jax.lax.broadcasted_iota(jnp.int32, (L, 2 * L), 1)
        d = col - 2 * row
        rep = jnp.logical_or(d == 0, d == 1).astype(jnp.float32)         # (L, 2L)
        u = jnp.dot(f, rep, preferred_element_type=jnp.float32)          # (cc, 2L)
        return jnp.concatenate([f[:, 0:1], u, f[:, L - 1:L]], axis=1)    # (cc, 2L+2)

    def conv3(p, w_ref):
        # Conv1d(k=3): 3 lane-shifted (Cout,Cin)@(Cin,L) matmuls
        Lo = p.shape[1] - 2
        acc = jnp.dot(w_ref[0], p[:, 0:Lo], preferred_element_type=jnp.float32)
        acc = acc + jnp.dot(w_ref[1], p[:, 1:Lo + 1], preferred_element_type=jnp.float32)
        acc = acc + jnp.dot(w_ref[2], p[:, 2:Lo + 2], preferred_element_type=jnp.float32)
        return acc

    for cw_ref, cb_ref in ((cw1_ref, cb1_ref), (cw2_ref, cb2_ref),
                           (cw3_ref, cb3_ref), (cw4_ref, cb4_ref)):
        p = up_pad(feat)                                                 # (30, 2L+2)
        feat = _elu(conv3(p, cw_ref) + cb_ref[...])                      # BN folded into w/b

    # final stage: upsample5 + reflection5 + addCoords_1D + conv5
    p = up_pad(feat)                                                     # (30, 1026)
    out_ref[0] = conv3(p, cw5_ref) + cb5_ref[...]                        # (12, 1024), lane-dense


# --------------------------------------------------------------------------
# Wrapper / glue (host-side operand preparation, BN / coord folding)
# --------------------------------------------------------------------------
def _const_spec(a):
    nd = a.ndim
    return pl.BlockSpec(tuple(int(s) for s in a.shape),
                        lambda b, _nd=nd: (0,) * _nd)


def tcoil_forward(x, P):
    B = x.shape[0]
    x3 = x[:, None, :].astype(jnp.float32)                               # (B, 1, 5)

    # head weights
    w1 = P['lin1_w'].T                                                   # (5, 30)
    b1 = P['lin1_b'][None]                                               # (1, 30)
    w2 = P['lin2_w'].T                                                   # (30, 30)
    b2 = P['lin2_b'][None]
    wt = P['tconv_w'].reshape(C, C * KLEN)                               # (30, 960), col = co*32+k
    bt = P['tconv_b'][:, None]                                           # (30, 1)

    ops = [x3, w1, b1, w2, b2, wt, bt]
    specs = [pl.BlockSpec((1, 1, 5), lambda b: (b, 0, 0))]
    specs += [_const_spec(a) for a in ops[1:]]

    # conv stages 1..4 with eval-mode BatchNorm folded in
    for i in range(1, 5):
        scale = P[f'bn{i}_g'] / jnp.sqrt(P[f'bn{i}_v'] + BN_EPS)
        shift = P[f'bn{i}_b'] - P[f'bn{i}_m'] * scale
        w = jnp.transpose(P[f'conv{i}_w'], (2, 0, 1)) * scale[None, :, None]   # (3, co, ci)
        b = (P[f'conv{i}_b'] * scale + shift)[:, None]                   # (30, 1)
        ops += [w, b]
        specs += [_const_spec(w), _const_spec(b)]

    # conv5: feature part + precomputed coord-channel contribution folded into a bias map
    w5 = jnp.transpose(P['conv5_w'][:, :C, :], (2, 0, 1))                # (3, 12, 30)
    wc5 = P['conv5_w'][:, C, :]                                          # (12, 3) coord taps
    lpad = 2 * 512 + 2                                                   # 1026
    coords = jnp.arange(lpad, dtype=jnp.float32) / (lpad - 1) * 2.0 - 1.0
    taps = jnp.stack([coords[k:k + 1024] for k in range(3)], axis=0)     # (3, 1024)
    b5 = P['conv5_b'][:, None] + jnp.dot(wc5, taps)                      # (12, 1024)
    ops += [w5, b5]
    specs += [_const_spec(w5), _const_spec(b5)]

    out = pl.pallas_call(
        tcoil_kernel,
        out_shape=jax.ShapeDtypeStruct((B, 12, 1024), jnp.float32),
        grid=(B,),
        in_specs=specs,
        out_specs=pl.BlockSpec((1, 12, 1024), lambda b: (b, 0, 0)),
        compiler_params=pltpu.CompilerParams(
            dimension_semantics=("parallel",),
            vmem_limit_bytes=32 * 1024 * 1024),
    )(*ops)

    # already in PyTorch NCL order; crop like recons_y[..., :1000]
    return out[:, :, :1000]


# --------------------------------------------------------------------------
# Pure-JAX reference (for correctness checking)
# --------------------------------------------------------------------------
def reference_forward(x, P):
    hp = jax.lax.Precision.HIGHEST
    h = _elu(jnp.dot(x, P['lin1_w'].T, precision=hp) + P['lin1_b'])
    h = _elu(jnp.dot(h, P['lin2_w'].T, precision=hp) + P['lin2_b'])
    feat = _elu(jnp.einsum('bc,cok->bko', h, P['tconv_w'], precision=hp) + P['tconv_b'])

    def up_pad(f):
        u = jnp.repeat(f, 2, axis=1)
        return jnp.pad(u, ((0, 0), (1, 1), (0, 0)), mode='reflect')

    for i in range(1, 5):
        p = up_pad(feat)
        L = p.shape[1] - 2
        w = P[f'conv{i}_w']                                              # (Cout, Cin, 3)
        y = sum(jnp.einsum('blc,oc->blo', p[:, k:k + L], w[:, :, k], precision=hp)
                for k in range(3)) + P[f'conv{i}_b']
        y = (y - P[f'bn{i}_m']) / jnp.sqrt(P[f'bn{i}_v'] + BN_EPS) * P[f'bn{i}_g'] + P[f'bn{i}_b']
        feat = _elu(y)

    p = up_pad(feat)                                                     # (B, 1026, 30)
    Lp = p.shape[1]
    coords = jnp.arange(Lp, dtype=jnp.float32) / (Lp - 1) * 2.0 - 1.0
    coords = jnp.broadcast_to(coords[None, :, None], (p.shape[0], Lp, 1))
    p = jnp.concatenate([p, coords], axis=-1)                            # (B, 1026, 31)
    L = Lp - 2
    w5 = P['conv5_w']
    y = sum(jnp.einsum('blc,oc->blo', p[:, k:k + L], w5[:, :, k], precision=hp)
            for k in range(3)) + P['conv5_b']
    return jnp.transpose(y, (0, 2, 1))[:, :, :1000]


# --------------------------------------------------------------------------
# Deterministic synthetic parameters (shapes follow the nn.Module __init__)
# --------------------------------------------------------------------------
def init_params(key):
    ks = iter(jax.random.split(key, 40))

    def nrm(shape, scale):
        return scale * jax.random.normal(next(ks), shape, jnp.float32)

    P = {}
    P['lin1_w'] = nrm((30, 5), 1.0 / np.sqrt(5.0))
    P['lin1_b'] = nrm((30,), 0.1)
    P['lin2_w'] = nrm((30, 30), 1.0 / np.sqrt(30.0))
    P['lin2_b'] = nrm((30,), 0.1)
    P['tconv_w'] = nrm((30, 30, 32), 1.0 / np.sqrt(30.0))                # (Cin, Cout, K)
    P['tconv_b'] = nrm((30,), 0.1)
    for i in range(1, 5):
        P[f'conv{i}_w'] = nrm((30, 30, 3), 1.0 / np.sqrt(90.0))          # (Cout, Cin, K)
        P[f'conv{i}_b'] = nrm((30,), 0.1)
        P[f'bn{i}_g'] = 1.0 + 0.1 * jax.random.normal(next(ks), (30,), jnp.float32)
        P[f'bn{i}_b'] = nrm((30,), 0.1)
        P[f'bn{i}_m'] = nrm((30,), 0.1)
        P[f'bn{i}_v'] = jax.random.uniform(next(ks), (30,), jnp.float32, 0.5, 1.5)
    P['conv5_w'] = nrm((12, 31, 3), 1.0 / np.sqrt(93.0))                 # (Cout, Cin=30+coord, K)
    P['conv5_b'] = nrm((12,), 0.1)
    return P


if __name__ == "__main__":
    key = jax.random.PRNGKey(0)
    pkey, xkey = jax.random.split(key)
    params = init_params(pkey)

    B = 2
    x = jax.random.normal(xkey, (B, 5), jnp.float32)                     # module input: (batch, 5)

    out = jax.block_until_ready(tcoil_forward(x, params))
    assert out.shape == (B, 12, 1000), out.shape

    ref = jax.block_until_ready(reference_forward(x, params))
    np.testing.assert_allclose(np.asarray(out), np.asarray(ref), rtol=2e-2, atol=2e-2)

    print("KERNEL_OK")
</pallas_src>

<mosaic_0001>
module attributes {stable_mosaic.version = 11 : i64} {
  func.func @tcoil_kernel(%arg0: i32, %arg1: memref<1x1x5xf32, #tpu.memory_space<vmem>>, %arg2: memref<5x30xf32, #tpu.memory_space<vmem>>, %arg3: memref<1x30xf32, #tpu.memory_space<vmem>>, %arg4: memref<30x30xf32, #tpu.memory_space<vmem>>, %arg5: memref<1x30xf32, #tpu.memory_space<vmem>>, %arg6: memref<30x960xf32, #tpu.memory_space<vmem>>, %arg7: memref<30x1xf32, #tpu.memory_space<vmem>>, %arg8: memref<3x30x30xf32, #tpu.memory_space<vmem>>, %arg9: memref<30x1xf32, #tpu.memory_space<vmem>>, %arg10: memref<3x30x30xf32, #tpu.memory_space<vmem>>, %arg11: memref<30x1xf32, #tpu.memory_space<vmem>>, %arg12: memref<3x30x30xf32, #tpu.memory_space<vmem>>, %arg13: memref<30x1xf32, #tpu.memory_space<vmem>>, %arg14: memref<3x30x30xf32, #tpu.memory_space<vmem>>, %arg15: memref<30x1xf32, #tpu.memory_space<vmem>>, %arg16: memref<3x12x30xf32, #tpu.memory_space<vmem>>, %arg17: memref<12x1024xf32, #tpu.memory_space<vmem>>, %arg18: memref<1x12x1024xf32, #tpu.memory_space<vmem>>) attributes {dimension_semantics = [#tpu.dimension_semantics<parallel>], iteration_bounds = array<i64: 2>, scalar_prefetch = 0 : i64, scratch_operands = 0 : i64, tpu.core_type = #tpu.core_type<tc>, window_params = [{transform_indices = @transform_0, window_bounds = array<i64: 1, 1, 5>}, {pipeline_mode = #tpu.pipeline_mode<synchronous>, transform_indices = @transform_1, window_bounds = array<i64: 5, 30>}, {pipeline_mode = #tpu.pipeline_mode<synchronous>, transform_indices = @transform_2, window_bounds = array<i64: 1, 30>}, {pipeline_mode = #tpu.pipeline_mode<synchronous>, transform_indices = @transform_3, window_bounds = array<i64: 30, 30>}, {pipeline_mode = #tpu.pipeline_mode<synchronous>, transform_indices = @transform_4, window_bounds = array<i64: 1, 30>}, {pipeline_mode = #tpu.pipeline_mode<synchronous>, transform_indices = @transform_5, window_bounds = array<i64: 30, 960>}, {pipeline_mode = #tpu.pipeline_mode<synchronous>, transform_indices = @transform_6, window_bounds = array<i64: 30, 1>}, {pipeline_mode = #tpu.pipeline_mode<synchronous>, transform_indices = @transform_7, window_bounds = array<i64: 3, 30, 30>}, {pipeline_mode = #tpu.pipeline_mode<synchronous>, transform_indices = @transform_8, window_bounds = array<i64: 30, 1>}, {pipeline_mode = #tpu.pipeline_mode<synchronous>, transform_indices = @transform_9, window_bounds = array<i64: 3, 30, 30>}, {pipeline_mode = #tpu.pipeline_mode<synchronous>, transform_indices = @transform_10, window_bounds = array<i64: 30, 1>}, {pipeline_mode = #tpu.pipeline_mode<synchronous>, transform_indices = @transform_11, window_bounds = array<i64: 3, 30, 30>}, {pipeline_mode = #tpu.pipeline_mode<synchronous>, transform_indices = @transform_12, window_bounds = array<i64: 30, 1>}, {pipeline_mode = #tpu.pipeline_mode<synchronous>, transform_indices = @transform_13, window_bounds = array<i64: 3, 30, 30>}, {pipeline_mode = #tpu.pipeline_mode<synchronous>, transform_indices = @transform_14, window_bounds = array<i64: 30, 1>}, {pipeline_mode = #tpu.pipeline_mode<synchronous>, transform_indices = @transform_15, window_bounds = array<i64: 3, 12, 30>}, {pipeline_mode = #tpu.pipeline_mode<synchronous>, transform_indices = @transform_16, window_bounds = array<i64: 12, 1024>}, {transform_indices = @transform_17, window_bounds = array<i64: 1, 12, 1024>}]} {
    %c0 = arith.constant 0 : index
    %c0_0 = arith.constant 0 : index
    %c0_1 = arith.constant 0 : index
    %0 = vector.load %arg1[%c0, %c0_0, %c0_1] : memref<1x1x5xf32, #tpu.memory_space<vmem>>, vector<1x1x5xf32>
    %1 = vector.shape_cast %0 : vector<1x1x5xf32> to vector<1x5xf32>
    %c0_2 = arith.constant 0 : index
    %c0_3 = arith.constant 0 : index
    %2 = vector.load %arg2[%c0_2, %c0_3] : memref<5x30xf32, #tpu.memory_space<vmem>>, vector<5x30xf32>
    %cst = arith.constant dense<0.000000e+00> : vector<1x30xf32>
    %3 = tpu.matmul %1, %2, %cst {dimension_numbers = #tpu.dot_dimension_numbers<[1], [0], [0], [1], [0, 0, 1, 1], [], []>} : vector<1x5xf32>, vector<5x30xf32>, vector<1x30xf32> -> vector<1x30xf32>
    %c0_4 = arith.constant 0 : index
    %c0_5 = arith.constant 0 : index
    %4 = vector.load %arg3[%c0_4, %c0_5] : memref<1x30xf32, #tpu.memory_space<vmem>>, vector<1x30xf32>
    %5 = arith.addf %3, %4 : vector<1x30xf32>
    %cst_6 = arith.constant 0.000000e+00 : f32
    %6 = vector.broadcast %cst_6 : f32 to vector<1x30xf32>
    %7 = arith.cmpf ogt, %5, %6 : vector<1x30xf32>
    %8 = math.exp %5 : vector<1x30xf32>
    %cst_7 = arith.constant 1.000000e+00 : f32
    %9 = vector.broadcast %cst_7 : f32 to vector<1x30xf32>
    %10 = arith.subf %8, %9 : vector<1x30xf32>
    %11 = arith.select %7, %5, %10 : vector<1x30xi1>, vector<1x30xf32>
    %c0_8 = arith.constant 0 : index
    %c0_9 = arith.constant 0 : index
    %12 = vector.load %arg4[%c0_8, %c0_9] : memref<30x30xf32, #tpu.memory_space<vmem>>, vector<30x30xf32>
    %cst_10 = arith.constant dense<0.000000e+00> : vector<1x30xf32>
    %13 = tpu.matmul %11, %12, %cst_10 {dimension_numbers = #tpu.dot_dimension_numbers<[1], [0], [0], [1], [0, 0, 1, 1], [], []>} : vector<1x30xf32>, vector<30x30xf32>, vector<1x30xf32> -> vector<1x30xf32>
    %c0_11 = arith.constant 0 : index
    %c0_12 = arith.constant 0 : index
    %14 = vector.load %arg5[%c0_11, %c0_12] : memref<1x30xf32, #tpu.memory_space<vmem>>, vector<1x30xf32>
    %15 = arith.addf %13, %14 : vector<1x30xf32>
    %cst_13 = arith.constant 0.000000e+00 : f32
    %16 = vector.broadcast %cst_13 : f32 to vector<1x30xf32>
    %17 = arith.cmpf ogt, %15, %16 : vector<1x30xf32>
    %18 = math.exp %15 : vector<1x30xf32>
    %cst_14 = arith.constant 1.000000e+00 : f32
    %19 = vector.broadcast %cst_14 : f32 to vector<1x30xf32>
    %20 = arith.subf %18, %19 : vector<1x30xf32>
    %21 = arith.select %17, %15, %20 : vector<1x30xi1>, vector<1x30xf32>
    %c0_15 = arith.constant 0 : index
    %c0_16 = arith.constant 0 : index
    %22 = vector.load %arg6[%c0_15, %c0_16] : memref<30x960xf32, #tpu.memory_space<vmem>>, vector<30x960xf32>
    %cst_17 = arith.constant dense<0.000000e+00> : vector<1x960xf32>
    %23 = tpu.matmul %21, %22, %cst_17 {dimension_numbers = #tpu.dot_dimension_numbers<[1], [0], [0], [1], [0, 0, 1, 1], [], []>} : vector<1x30xf32>, vector<30x960xf32>, vector<1x960xf32> -> vector<1x960xf32>
    %24 = tpu.iota {dimensions = array<i32: 0>} : vector<30x32xi32>
    %cst_18 = arith.constant 0.000000e+00 : f32
    %25 = vector.broadcast %cst_18 : f32 to vector<30x32xf32>
    %c0_i32 = arith.constant 0 : i32
    %26 = vector.broadcast %c0_i32 : i32 to vector<30x32xi32>
    %27 = arith.cmpi eq, %24, %26 : vector<30x32xi32>
    %28 = vector.extract_strided_slice %23 {offsets = [0, 0], sizes = [1, 32], strides = [1, 1]} : vector<1x960xf32> to vector<1x32xf32>
    %cst_19 = arith.constant 0.000000e+00 : f32
    %29 = vector.shape_cast %28 : vector<1x32xf32> to vector<1x32xf32>
    %30 = vector.broadcast %29 : vector<1x32xf32> to vector<30x32xf32>
    %31 = vector.broadcast %cst_19 : f32 to vector<30x32xf32>
    %32 = arith.select %27, %30, %31 : vector<30x32xi1>, vector<30x32xf32>
    %33 = arith.addf %25, %32 : vector<30x32xf32>
    %c1_i32 = arith.constant 1 : i32
    %34 = vector.broadcast %c1_i32 : i32 to vector<30x32xi32>
    %35 = arith.cmpi eq, %24, %34 : vector<30x32xi32>
    %36 = vector.extract_strided_slice %23 {offsets = [0, 32], sizes = [1, 32], strides = [1, 1]} : vector<1x960xf32> to vector<1x32xf32>
    %cst_20 = arith.constant 0.000000e+00 : f32
    %37 = vector.shape_cast %36 : vector<1x32xf32> to vector<1x32xf32>
    %38 = vector.broadcast %37 : vector<1x32xf32> to vector<30x32xf32>
    %39 = vector.broadcast %cst_20 : f32 to vector<30x32xf32>
    %40 = arith.select %35, %38, %39 : vector<30x32xi1>, vector<30x32xf32>
    %41 = arith.addf %33, %40 : vector<30x32xf32>
    %c2_i32 = arith.constant 2 : i32
    %42 = vector.broadcast %c2_i32 : i32 to vector<30x32xi32>
    %43 = arith.cmpi eq, %24, %42 : vector<30x32xi32>
    %44 = vector.extract_strided_slice %23 {offsets = [0, 64], sizes = [1, 32], strides = [1, 1]} : vector<1x960xf32> to vector<1x32xf32>
    %cst_21 = arith.constant 0.000000e+00 : f32
    %45 = vector.shape_cast %44 : vector<1x32xf32> to vector<1x32xf32>
    %46 = vector.broadcast %45 : vector<1x32xf32> to vector<30x32xf32>
    %47 = vector.broadcast %cst_21 : f32 to vector<30x32xf32>
    %48 = arith.select %43, %46, %47 : vector<30x32xi1>, vector<30x32xf32>
    %49 = arith.addf %41, %48 : vector<30x32xf32>
    %c3_i32 = arith.constant 3 : i32
    %50 = vector.broadcast %c3_i32 : i32 to vector<30x32xi32>
    %51 = arith.cmpi eq, %24, %50 : vector<30x32xi32>
    %52 = vector.extract_strided_slice %23 {offsets = [0, 96], sizes = [1, 32], strides = [1, 1]} : vector<1x960xf32> to vector<1x32xf32>
    %cst_22 = arith.constant 0.000000e+00 : f32
    %53 = vector.shape_cast %52 : vector<1x32xf32> to vector<1x32xf32>
    %54 = vector.broadcast %53 : vector<1x32xf32> to vector<30x32xf32>
    %55 = vector.broadcast %cst_22 : f32 to vector<30x32xf32>
    %56 = arith.select %51, %54, %55 : vector<30x32xi1>, vector<30x32xf32>
    %57 = arith.addf %49, %56 : vector<30x32xf32>
    %c4_i32 = arith.constant 4 : i32
    %58 = vector.broadcast %c4_i32 : i32 to vector<30x32xi32>
    %59 = arith.cmpi eq, %24, %58 : vector<30x32xi32>
    %60 = vector.extract_strided_slice %23 {offsets = [0, 128], sizes = [1, 32], strides = [1, 1]} : vector<1x960xf32> to vector<1x32xf32>
    %cst_23 = arith.constant 0.000000e+00 : f32
    %61 = vector.shape_cast %60 : vector<1x32xf32> to vector<1x32xf32>
    %62 = vector.broadcast %61 : vector<1x32xf32> to vector<30x32xf32>
    %63 = vector.broadcast %cst_23 : f32 to vector<30x32xf32>
    %64 = arith.select %59, %62, %63 : vector<30x32xi1>, vector<30x32xf32>
    %65 = arith.addf %57, %64 : vector<30x32xf32>
    %c5_i32 = arith.constant 5 : i32
    %66 = vector.broadcast %c5_i32 : i32 to vector<30x32xi32>
    %67 = arith.cmpi eq, %24, %66 : vector<30x32xi32>
    %68 = vector.extract_strided_slice %23 {offsets = [0, 160], sizes = [1, 32], strides = [1, 1]} : vector<1x960xf32> to vector<1x32xf32>
    %cst_24 = arith.constant 0.000000e+00 : f32
    %69 = vector.shape_cast %68 : vector<1x32xf32> to vector<1x32xf32>
    %70 = vector.broadcast %69 : vector<1x32xf32> to vector<30x32xf32>
    %71 = vector.broadcast %cst_24 : f32 to vector<30x32xf32>
    %72 = arith.select %67, %70, %71 : vector<30x32xi1>, vector<30x32xf32>
    %73 = arith.addf %65, %72 : vector<30x32xf32>
    %c6_i32 = arith.constant 6 : i32
    %74 = vector.broadcast %c6_i32 : i32 to vector<30x32xi32>
    %75 = arith.cmpi eq, %24, %74 : vector<30x32xi32>
    %76 = vector.extract_strided_slice %23 {offsets = [0, 192], sizes = [1, 32], strides = [1, 1]} : vector<1x960xf32> to vector<1x32xf32>
    %cst_25 = arith.constant 0.000000e+00 : f32
    %77 = vector.shape_cast %76 : vector<1x32xf32> to vector<1x32xf32>
    %78 = vector.broadcast %77 : vector<1x32xf32> to vector<30x32xf32>
    %79 = vector.broadcast %cst_25 : f32 to vector<30x32xf32>
    %80 = arith.select %75, %78, %79 : vector<30x32xi1>, vector<30x32xf32>
    %81 = arith.addf %73, %80 : vector<30x32xf32>
    %c7_i32 = arith.constant 7 : i32
    %82 = vector.broadcast %c7_i32 : i32 to vector<30x32xi32>
    %83 = arith.cmpi eq, %24, %82 : vector<30x32xi32>
    %84 = vector.extract_strided_slice %23 {offsets = [0, 224], sizes = [1, 32], strides = [1, 1]} : vector<1x960xf32> to vector<1x32xf32>
    %cst_26 = arith.constant 0.000000e+00 : f32
    %85 = vector.shape_cast %84 : vector<1x32xf32> to vector<1x32xf32>
    %86 = vector.broadcast %85 : vector<1x32xf32> to vector<30x32xf32>
    %87 = vector.broadcast %cst_26 : f32 to vector<30x32xf32>
    %88 = arith.select %83, %86, %87 : vector<30x32xi1>, vector<30x32xf32>
    %89 = arith.addf %81, %88 : vector<30x32xf32>
    %c8_i32 = arith.constant 8 : i32
    %90 = vector.broadcast %c8_i32 : i32 to vector<30x32xi32>
    %91 = arith.cmpi eq, %24, %90 : vector<30x32xi32>
    %92 = vector.extract_strided_slice %23 {offsets = [0, 256], sizes = [1, 32], strides = [1, 1]} : vector<1x960xf32> to vector<1x32xf32>
    %cst_27 = arith.constant 0.000000e+00 : f32
    %93 = vector.shape_cast %92 : vector<1x32xf32> to vector<1x32xf32>
    %94 = vector.broadcast %93 : vector<1x32xf32> to vector<30x32xf32>
    %95 = vector.broadcast %cst_27 : f32 to vector<30x32xf32>
    %96 = arith.select %91, %94, %95 : vector<30x32xi1>, vector<30x32xf32>
    %97 = arith.addf %89, %96 : vector<30x32xf32>
    %c9_i32 = arith.constant 9 : i32
    %98 = vector.broadcast %c9_i32 : i32 to vector<30x32xi32>
    %99 = arith.cmpi eq, %24, %98 : vector<30x32xi32>
    %100 = vector.extract_strided_slice %23 {offsets = [0, 288], sizes = [1, 32], strides = [1, 1]} : vector<1x960xf32> to vector<1x32xf32>
    %cst_28 = arith.constant 0.000000e+00 : f32
    %101 = vector.shape_cast %100 : vector<1x32xf32> to vector<1x32xf32>
    %102 = vector.broadcast %101 : vector<1x32xf32> to vector<30x32xf32>
    %103 = vector.broadcast %cst_28 : f32 to vector<30x32xf32>
    %104 = arith.select %99, %102, %103 : vector<30x32xi1>, vector<30x32xf32>
    %105 = arith.addf %97, %104 : vector<30x32xf32>
    %c10_i32 = arith.constant 10 : i32
    %106 = vector.broadcast %c10_i32 : i32 to vector<30x32xi32>
    %107 = arith.cmpi eq, %24, %106 : vector<30x32xi32>
    %108 = vector.extract_strided_slice %23 {offsets = [0, 320], sizes = [1, 32], strides = [1, 1]} : vector<1x960xf32> to vector<1x32xf32>
    %cst_29 = arith.constant 0.000000e+00 : f32
    %109 = vector.shape_cast %108 : vector<1x32xf32> to vector<1x32xf32>
    %110 = vector.broadcast %109 : vector<1x32xf32> to vector<30x32xf32>
    %111 = vector.broadcast %cst_29 : f32 to vector<30x32xf32>
    %112 = arith.select %107, %110, %111 : vector<30x32xi1>, vector<30x32xf32>
    %113 = arith.addf %105, %112 : vector<30x32xf32>
    %c11_i32 = arith.constant 11 : i32
    %114 = vector.broadcast %c11_i32 : i32 to vector<30x32xi32>
    %115 = arith.cmpi eq, %24, %114 : vector<30x32xi32>
    %116 = vector.extract_strided_slice %23 {offsets = [0, 352], sizes = [1, 32], strides = [1, 1]} : vector<1x960xf32> to vector<1x32xf32>
    %cst_30 = arith.constant 0.000000e+00 : f32
    %117 = vector.shape_cast %116 : vector<1x32xf32> to vector<1x32xf32>
    %118 = vector.broadcast %117 : vector<1x32xf32> to vector<30x32xf32>
    %119 = vector.broadcast %cst_30 : f32 to vector<30x32xf32>
    %120 = arith.select %115, %118, %119 : vector<30x32xi1>, vector<30x32xf32>
    %121 = arith.addf %113, %120 : vector<30x32xf32>
    %c12_i32 = arith.constant 12 : i32
    %122 = vector.broadcast %c12_i32 : i32 to vector<30x32xi32>
    %123 = arith.cmpi eq, %24, %122 : vector<30x32xi32>
    %124 = vector.extract_strided_slice %23 {offsets = [0, 384], sizes = [1, 32], strides = [1, 1]} : vector<1x960xf32> to vector<1x32xf32>
    %cst_31 = arith.constant 0.000000e+00 : f32
    %125 = vector.shape_cast %124 : vector<1x32xf32> to vector<1x32xf32>
    %126 = vector.broadcast %125 : vector<1x32xf32> to vector<30x32xf32>
    %127 = vector.broadcast %cst_31 : f32 to vector<30x32xf32>
    %128 = arith.select %123, %126, %127 : vector<30x32xi1>, vector<30x32xf32>
    %129 = arith.addf %121, %128 : vector<30x32xf32>
    %c13_i32 = arith.constant 13 : i32
    %130 = vector.broadcast %c13_i32 : i32 to vector<30x32xi32>
    %131 = arith.cmpi eq, %24, %130 : vector<30x32xi32>
    %132 = vector.extract_strided_slice %23 {offsets = [0, 416], sizes = [1, 32], strides = [1, 1]} : vector<1x960xf32> to vector<1x32xf32>
    %cst_32 = arith.constant 0.000000e+00 : f32
    %133 = vector.shape_cast %132 : vector<1x32xf32> to vector<1x32xf32>
    %134 = vector.broadcast %133 : vector<1x32xf32> to vector<30x32xf32>
    %135 = vector.broadcast %cst_32 : f32 to vector<30x32xf32>
    %136 = arith.select %131, %134, %135 : vector<30x32xi1>, vector<30x32xf32>
    %137 = arith.addf %129, %136 : vector<30x32xf32>
    %c14_i32 = arith.constant 14 : i32
    %138 = vector.broadcast %c14_i32 : i32 to vector<30x32xi32>
    %139 = arith.cmpi eq, %24, %138 : vector<30x32xi32>
    %140 = vector.extract_strided_slice %23 {offsets = [0, 448], sizes = [1, 32], strides = [1, 1]} : vector<1x960xf32> to vector<1x32xf32>
    %cst_33 = arith.constant 0.000000e+00 : f32
    %141 = vector.shape_cast %140 : vector<1x32xf32> to vector<1x32xf32>
    %142 = vector.broadcast %141 : vector<1x32xf32> to vector<30x32xf32>
    %143 = vector.broadcast %cst_33 : f32 to vector<30x32xf32>
    %144 = arith.select %139, %142, %143 : vector<30x32xi1>, vector<30x32xf32>
    %145 = arith.addf %137, %144 : vector<30x32xf32>
    %c15_i32 = arith.constant 15 : i32
    %146 = vector.broadcast %c15_i32 : i32 to vector<30x32xi32>
    %147 = arith.cmpi eq, %24, %146 : vector<30x32xi32>
    %148 = vector.extract_strided_slice %23 {offsets = [0, 480], sizes = [1, 32], strides = [1, 1]} : vector<1x960xf32> to vector<1x32xf32>
    %cst_34 = arith.constant 0.000000e+00 : f32
    %149 = vector.shape_cast %148 : vector<1x32xf32> to vector<1x32xf32>
    %150 = vector.broadcast %149 : vector<1x32xf32> to vector<30x32xf32>
    %151 = vector.broadcast %cst_34 : f32 to vector<30x32xf32>
    %152 = arith.select %147, %150, %151 : vector<30x32xi1>, vector<30x32xf32>
    %153 = arith.addf %145, %152 : vector<30x32xf32>
    %c16_i32 = arith.constant 16 : i32
    %154 = vector.broadcast %c16_i32 : i32 to vector<30x32xi32>
    %155 = arith.cmpi eq, %24, %154 : vector<30x32xi32>
    %156 = vector.extract_strided_slice %23 {offsets = [0, 512], sizes = [1, 32], strides = [1, 1]} : vector<1x960xf32> to vector<1x32xf32>
    %cst_35 = arith.constant 0.000000e+00 : f32
    %157 = vector.shape_cast %156 : vector<1x32xf32> to vector<1x32xf32>
    %158 = vector.broadcast %157 : vector<1x32xf32> to vector<30x32xf32>
    %159 = vector.broadcast %cst_35 : f32 to vector<30x32xf32>
    %160 = arith.select %155, %158, %159 : vector<30x32xi1>, vector<30x32xf32>
    %161 = arith.addf %153, %160 : vector<30x32xf32>
    %c17_i32 = arith.constant 17 : i32
    %162 = vector.broadcast %c17_i32 : i32 to vector<30x32xi32>
    %163 = arith.cmpi eq, %24, %162 : vector<30x32xi32>
    %164 = vector.extract_strided_slice %23 {offsets = [0, 544], sizes = [1, 32], strides = [1, 1]} : vector<1x960xf32> to vector<1x32xf32>
    %cst_36 = arith.constant 0.000000e+00 : f32
    %165 = vector.shape_cast %164 : vector<1x32xf32> to vector<1x32xf32>
    %166 = vector.broadcast %165 : vector<1x32xf32> to vector<30x32xf32>
    %167 = vector.broadcast %cst_36 : f32 to vector<30x32xf32>
    %168 = arith.select %163, %166, %167 : vector<30x32xi1>, vector<30x32xf32>
    %169 = arith.addf %161, %168 : vector<30x32xf32>
    %c18_i32 = arith.constant 18 : i32
    %170 = vector.broadcast %c18_i32 : i32 to vector<30x32xi32>
    %171 = arith.cmpi eq, %24, %170 : vector<30x32xi32>
    %172 = vector.extract_strided_slice %23 {offsets = [0, 576], sizes = [1, 32], strides = [1, 1]} : vector<1x960xf32> to vector<1x32xf32>
    %cst_37 = arith.constant 0.000000e+00 : f32
    %173 = vector.shape_cast %172 : vector<1x32xf32> to vector<1x32xf32>
    %174 = vector.broadcast %173 : vector<1x32xf32> to vector<30x32xf32>
    %175 = vector.broadcast %cst_37 : f32 to vector<30x32xf32>
    %176 = arith.select %171, %174, %175 : vector<30x32xi1>, vector<30x32xf32>
    %177 = arith.addf %169, %176 : vector<30x32xf32>
    %c19_i32 = arith.constant 19 : i32
    %178 = vector.broadcast %c19_i32 : i32 to vector<30x32xi32>
    %179 = arith.cmpi eq, %24, %178 : vector<30x32xi32>
    %180 = vector.extract_strided_slice %23 {offsets = [0, 608], sizes = [1, 32], strides = [1, 1]} : vector<1x960xf32> to vector<1x32xf32>
    %cst_38 = arith.constant 0.000000e+00 : f32
    %181 = vector.shape_cast %180 : vector<1x32xf32> to vector<1x32xf32>
    %182 = vector.broadcast %181 : vector<1x32xf32> to vector<30x32xf32>
    %183 = vector.broadcast %cst_38 : f32 to vector<30x32xf32>
    %184 = arith.select %179, %182, %183 : vector<30x32xi1>, vector<30x32xf32>
    %185 = arith.addf %177, %184 : vector<30x32xf32>
    %c20_i32 = arith.constant 20 : i32
    %186 = vector.broadcast %c20_i32 : i32 to vector<30x32xi32>
    %187 = arith.cmpi eq, %24, %186 : vector<30x32xi32>
    %188 = vector.extract_strided_slice %23 {offsets = [0, 640], sizes = [1, 32], strides = [1, 1]} : vector<1x960xf32> to vector<1x32xf32>
    %cst_39 = arith.constant 0.000000e+00 : f32
    %189 = vector.shape_cast %188 : vector<1x32xf32> to vector<1x32xf32>
    %190 = vector.broadcast %189 : vector<1x32xf32> to vector<30x32xf32>
    %191 = vector.broadcast %cst_39 : f32 to vector<30x32xf32>
    %192 = arith.select %187, %190, %191 : vector<30x32xi1>, vector<30x32xf32>
    %193 = arith.addf %185, %192 : vector<30x32xf32>
    %c21_i32 = arith.constant 21 : i32
    %194 = vector.broadcast %c21_i32 : i32 to vector<30x32xi32>
    %195 = arith.cmpi eq, %24, %194 : vector<30x32xi32>
    %196 = vector.extract_strided_slice %23 {offsets = [0, 672], sizes = [1, 32], strides = [1, 1]} : vector<1x960xf32> to vector<1x32xf32>
    %cst_40 = arith.constant 0.000000e+00 : f32
    %197 = vector.shape_cast %196 : vector<1x32xf32> to vector<1x32xf32>
    %198 = vector.broadcast %197 : vector<1x32xf32> to vector<30x32xf32>
    %199 = vector.broadcast %cst_40 : f32 to vector<30x32xf32>
    %200 = arith.select %195, %198, %199 : vector<30x32xi1>, vector<30x32xf32>
    %201 = arith.addf %193, %200 : vector<30x32xf32>
    %c22_i32 = arith.constant 22 : i32
    %202 = vector.broadcast %c22_i32 : i32 to vector<30x32xi32>
    %203 = arith.cmpi eq, %24, %202 : vector<30x32xi32>
    %204 = vector.extract_strided_slice %23 {offsets = [0, 704], sizes = [1, 32], strides = [1, 1]} : vector<1x960xf32> to vector<1x32xf32>
    %cst_41 = arith.constant 0.000000e+00 : f32
    %205 = vector.shape_cast %204 : vector<1x32xf32> to vector<1x32xf32>
    %206 = vector.broadcast %205 : vector<1x32xf32> to vector<30x32xf32>
    %207 = vector.broadcast %cst_41 : f32 to vector<30x32xf32>
    %208 = arith.select %203, %206, %207 : vector<30x32xi1>, vector<30x32xf32>
    %209 = arith.addf %201, %208 : vector<30x32xf32>
    %c23_i32 = arith.constant 23 : i32
    %210 = vector.broadcast %c23_i32 : i32 to vector<30x32xi32>
    %211 = arith.cmpi eq, %24, %210 : vector<30x32xi32>
    %212 = vector.extract_strided_slice %23 {offsets = [0, 736], sizes = [1, 32], strides = [1, 1]} : vector<1x960xf32> to vector<1x32xf32>
    %cst_42 = arith.constant 0.000000e+00 : f32
    %213 = vector.shape_cast %212 : vector<1x32xf32> to vector<1x32xf32>
    %214 = vector.broadcast %213 : vector<1x32xf32> to vector<30x32xf32>
    %215 = vector.broadcast %cst_42 : f32 to vector<30x32xf32>
    %216 = arith.select %211, %214, %215 : vector<30x32xi1>, vector<30x32xf32>
    %217 = arith.addf %209, %216 : vector<30x32xf32>
    %c24_i32 = arith.constant 24 : i32
    %218 = vector.broadcast %c24_i32 : i32 to vector<30x32xi32>
    %219 = arith.cmpi eq, %24, %218 : vector<30x32xi32>
    %220 = vector.extract_strided_slice %23 {offsets = [0, 768], sizes = [1, 32], strides = [1, 1]} : vector<1x960xf32> to vector<1x32xf32>
    %cst_43 = arith.constant 0.000000e+00 : f32
    %221 = vector.shape_cast %220 : vector<1x32xf32> to vector<1x32xf32>
    %222 = vector.broadcast %221 : vector<1x32xf32> to vector<30x32xf32>
    %223 = vector.broadcast %cst_43 : f32 to vector<30x32xf32>
    %224 = arith.select %219, %222, %223 : vector<30x32xi1>, vector<30x32xf32>
    %225 = arith.addf %217, %224 : vector<30x32xf32>
    %c25_i32 = arith.constant 25 : i32
    %226 = vector.broadcast %c25_i32 : i32 to vector<30x32xi32>
    %227 = arith.cmpi eq, %24, %226 : vector<30x32xi32>
    %228 = vector.extract_strided_slice %23 {offsets = [0, 800], sizes = [1, 32], strides = [1, 1]} : vector<1x960xf32> to vector<1x32xf32>
    %cst_44 = arith.constant 0.000000e+00 : f32
    %229 = vector.shape_cast %228 : vector<1x32xf32> to vector<1x32xf32>
    %230 = vector.broadcast %229 : vector<1x32xf32> to vector<30x32xf32>
    %231 = vector.broadcast %cst_44 : f32 to vector<30x32xf32>
    %232 = arith.select %227, %230, %231 : vector<30x32xi1>, vector<30x32xf32>
    %233 = arith.addf %225, %232 : vector<30x32xf32>
    %c26_i32 = arith.constant 26 : i32
    %234 = vector.broadcast %c26_i32 : i32 to vector<30x32xi32>
    %235 = arith.cmpi eq, %24, %234 : vector<30x32xi32>
    %236 = vector.extract_strided_slice %23 {offsets = [0, 832], sizes = [1, 32], strides = [1, 1]} : vector<1x960xf32> to vector<1x32xf32>
    %cst_45 = arith.constant 0.000000e+00 : f32
    %237 = vector.shape_cast %236 : vector<1x32xf32> to vector<1x32xf32>
    %238 = vector.broadcast %237 : vector<1x32xf32> to vector<30x32xf32>
    %239 = vector.broadcast %cst_45 : f32 to vector<30x32xf32>
    %240 = arith.select %235, %238, %239 : vector<30x32xi1>, vector<30x32xf32>
    %241 = arith.addf %233, %240 : vector<30x32xf32>
    %c27_i32 = arith.constant 27 : i32
    %242 = vector.broadcast %c27_i32 : i32 to vector<30x32xi32>
    %243 = arith.cmpi eq, %24, %242 : vector<30x32xi32>
    %244 = vector.extract_strided_slice %23 {offsets = [0, 864], sizes = [1, 32], strides = [1, 1]} : vector<1x960xf32> to vector<1x32xf32>
    %cst_46 = arith.constant 0.000000e+00 : f32
    %245 = vector.shape_cast %244 : vector<1x32xf32> to vector<1x32xf32>
    %246 = vector.broadcast %245 : vector<1x32xf32> to vector<30x32xf32>
    %247 = vector.broadcast %cst_46 : f32 to vector<30x32xf32>
    %248 = arith.select %243, %246, %247 : vector<30x32xi1>, vector<30x32xf32>
    %249 = arith.addf %241, %248 : vector<30x32xf32>
    %c28_i32 = arith.constant 28 : i32
    %250 = vector.broadcast %c28_i32 : i32 to vector<30x32xi32>
    %251 = arith.cmpi eq, %24, %250 : vector<30x32xi32>
    %252 = vector.extract_strided_slice %23 {offsets = [0, 896], sizes = [1, 32], strides = [1, 1]} : vector<1x960xf32> to vector<1x32xf32>
    %cst_47 = arith.constant 0.000000e+00 : f32
    %253 = vector.shape_cast %252 : vector<1x32xf32> to vector<1x32xf32>
    %254 = vector.broadcast %253 : vector<1x32xf32> to vector<30x32xf32>
    %255 = vector.broadcast %cst_47 : f32 to vector<30x32xf32>
    %256 = arith.select %251, %254, %255 : vector<30x32xi1>, vector<30x32xf32>
    %257 = arith.addf %249, %256 : vector<30x32xf32>
    %c29_i32 = arith.constant 29 : i32
    %258 = vector.broadcast %c29_i32 : i32 to vector<30x32xi32>
    %259 = arith.cmpi eq, %24, %258 : vector<30x32xi32>
    %260 = vector.extract_strided_slice %23 {offsets = [0, 928], sizes = [1, 32], strides = [1, 1]} : vector<1x960xf32> to vector<1x32xf32>
    %cst_48 = arith.constant 0.000000e+00 : f32
    %261 = vector.shape_cast %260 : vector<1x32xf32> to vector<1x32xf32>
    %262 = vector.broadcast %261 : vector<1x32xf32> to vector<30x32xf32>
    %263 = vector.broadcast %cst_48 : f32 to vector<30x32xf32>
    %264 = arith.select %259, %262, %263 : vector<30x32xi1>, vector<30x32xf32>
    %265 = arith.addf %257, %264 : vector<30x32xf32>
    %c0_49 = arith.constant 0 : index
    %c0_50 = arith.constant 0 : index
    %266 = vector.load %arg7[%c0_49, %c0_50] : memref<30x1xf32, #tpu.memory_space<vmem>>, vector<30x1xf32>
    %267 = vector.broadcast %266 : vector<30x1xf32> to vector<30x32xf32>
    %268 = arith.addf %265, %267 : vector<30x32xf32>
    %cst_51 = arith.constant 0.000000e+00 : f32
    %269 = vector.broadcast %cst_51 : f32 to vector<30x32xf32>
    %270 = arith.cmpf ogt, %268, %269 : vector<30x32xf32>
    %271 = math.exp %268 : vector<30x32xf32>
    %cst_52 = arith.constant 1.000000e+00 : f32
    %272 = vector.broadcast %cst_52 : f32 to vector<30x32xf32>
    %273 = arith.subf %271, %272 : vector<30x32xf32>
    %274 = arith.select %270, %268, %273 : vector<30x32xi1>, vector<30x32xf32>
    %275 = tpu.iota {dimensions = array<i32: 0>} : vector<32x64xi32>
    %276 = tpu.iota {dimensions = array<i32: 1>} : vector<32x64xi32>
    %c2_i32_53 = arith.constant 2 : i32
    %277 = vector.broadcast %c2_i32_53 : i32 to vector<32x64xi32>
    %278 = arith.muli %277, %275 : vector<32x64xi32>
    %279 = arith.subi %276, %278 : vector<32x64xi32>
    %c0_i32_54 = arith.constant 0 : i32
    %280 = vector.broadcast %c0_i32_54 : i32 to vector<32x64xi32>
    %281 = arith.cmpi eq, %279, %280 : vector<32x64xi32>
    %c1_i32_55 = arith.constant 1 : i32
    %282 = vector.broadcast %c1_i32_55 : i32 to vector<32x64xi32>
    %283 = arith.cmpi eq, %279, %282 : vector<32x64xi32>
    %284 = arith.ori %281, %283 : vector<32x64xi1>
    %285 = arith.extui %284 : vector<32x64xi1> to vector<32x64xi32>
    %286 = arith.sitofp %285 : vector<32x64xi32> to vector<32x64xf32>
    %cst_56 = arith.constant dense<0.000000e+00> : vector<30x64xf32>
    %287 = tpu.matmul %274, %286, %cst_56 {dimension_numbers = #tpu.dot_dimension_numbers<[1], [0], [0], [1], [0, 0, 1, 1], [], []>} : vector<30x32xf32>, vector<32x64xf32>, vector<30x64xf32> -> vector<30x64xf32>
    %288 = vector.extract_strided_slice %274 {offsets = [0, 0], sizes = [30, 1], strides = [1, 1]} : vector<30x32xf32> to vector<30x1xf32>
    %289 = vector.extract_strided_slice %274 {offsets = [0, 31], sizes = [30, 1], strides = [1, 1]} : vector<30x32xf32> to vector<30x1xf32>
    %290 = tpu.concatenate %288, %287, %289 in 1 : vector<30x1xf32>, vector<30x64xf32>, vector<30x1xf32> -> vector<30x66xf32>
    %c0_57 = arith.constant 0 : index
    %c0_58 = arith.constant 0 : index
    %c0_59 = arith.constant 0 : index
    %291 = vector.load %arg8[%c0_57, %c0_58, %c0_59] : memref<3x30x30xf32, #tpu.memory_space<vmem>>, vector<1x30x30xf32>
    %292 = vector.shape_cast %291 : vector<1x30x30xf32> to vector<30x30xf32>
    %293 = vector.extract_strided_slice %290 {offsets = [0, 0], sizes = [30, 64], strides = [1, 1]} : vector<30x66xf32> to vector<30x64xf32>
    %cst_60 = arith.constant dense<0.000000e+00> : vector<30x64xf32>
    %294 = tpu.matmul %292, %293, %cst_60 {dimension_numbers = #tpu.dot_dimension_numbers<[1], [0], [0], [1], [0, 0, 1, 1], [], []>} : vector<30x30xf32>, vector<30x64xf32>, vector<30x64xf32> -> vector<30x64xf32>
    %c1 = arith.constant 1 : index
    %c0_61 = arith.constant 0 : index
    %c0_62 = arith.constant 0 : index
    %295 = vector.load %arg8[%c1, %c0_61, %c0_62] : memref<3x30x30xf32, #tpu.memory_space<vmem>>, vector<1x30x30xf32>
    %296 = vector.shape_cast %295 : vector<1x30x30xf32> to vector<30x30xf32>
    %297 = vector.extract_strided_slice %290 {offsets = [0, 1], sizes = [30, 64], strides = [1, 1]} : vector<30x66xf32> to vector<30x64xf32>
    %cst_63 = arith.constant dense<0.000000e+00> : vector<30x64xf32>
    %298 = tpu.matmul %296, %297, %cst_63 {dimension_numbers = #tpu.dot_dimension_numbers<[1], [0], [0], [1], [0, 0, 1, 1], [], []>} : vector<30x30xf32>, vector<30x64xf32>, vector<30x64xf32> -> vector<30x64xf32>
    %299 = arith.addf %294, %298 : vector<30x64xf32>
    %c2 = arith.constant 2 : index
    %c0_64 = arith.constant 0 : index
    %c0_65 = arith.constant 0 : index
    %300 = vector.load %arg8[%c2, %c0_64, %c0_65] : memref<3x30x30xf32, #tpu.memory_space<vmem>>, vector<1x30x30xf32>
    %301 = vector.shape_cast %300 : vector<1x30x30xf32> to vector<30x30xf32>
    %302 = vector.extract_strided_slice %290 {offsets = [0, 2], sizes = [30, 64], strides = [1, 1]} : vector<30x66xf32> to vector<30x64xf32>
    %cst_66 = arith.constant dense<0.000000e+00> : vector<30x64xf32>
    %303 = tpu.matmul %301, %302, %cst_66 {dimension_numbers = #tpu.dot_dimension_numbers<[1], [0], [0], [1], [0, 0, 1, 1], [], []>} : vector<30x30xf32>, vector<30x64xf32>, vector<30x64xf32> -> vector<30x64xf32>
    %304 = arith.addf %299, %303 : vector<30x64xf32>
    %c0_67 = arith.constant 0 : index
    %c0_68 = arith.constant 0 : index
    %305 = vector.load %arg9[%c0_67, %c0_68] : memref<30x1xf32, #tpu.memory_space<vmem>>, vector<30x1xf32>
    %306 = vector.broadcast %305 : vector<30x1xf32> to vector<30x64xf32>
    %307 = arith.addf %304, %306 : vector<30x64xf32>
    %cst_69 = arith.constant 0.000000e+00 : f32
    %308 = vector.broadcast %cst_69 : f32 to vector<30x64xf32>
    %309 = arith.cmpf ogt, %307, %308 : vector<30x64xf32>
    %310 = math.exp %307 : vector<30x64xf32>
    %cst_70 = arith.constant 1.000000e+00 : f32
    %311 = vector.broadcast %cst_70 : f32 to vector<30x64xf32>
    %312 = arith.subf %310, %311 : vector<30x64xf32>
    %313 = arith.select %309, %307, %312 : vector<30x64xi1>, vector<30x64xf32>
    %314 = tpu.iota {dimensions = array<i32: 0>} : vector<64x128xi32>
    %315 = tpu.iota {dimensions = array<i32: 1>} : vector<64x128xi32>
    %c2_i32_71 = arith.constant 2 : i32
    %316 = vector.broadcast %c2_i32_71 : i32 to vector<64x128xi32>
    %317 = arith.muli %316, %314 : vector<64x128xi32>
    %318 = arith.subi %315, %317 : vector<64x128xi32>
    %c0_i32_72 = arith.constant 0 : i32
    %319 = vector.broadcast %c0_i32_72 : i32 to vector<64x128xi32>
    %320 = arith.cmpi eq, %318, %319 : vector<64x128xi32>
    %c1_i32_73 = arith.constant 1 : i32
    %321 = vector.broadcast %c1_i32_73 : i32 to vector<64x128xi32>
    %322 = arith.cmpi eq, %318, %321 : vector<64x128xi32>
    %323 = arith.ori %320, %322 : vector<64x128xi1>
    %324 = arith.extui %323 : vector<64x128xi1> to vector<64x128xi32>
    %325 = arith.sitofp %324 : vector<64x128xi32> to vector<64x128xf32>
    %cst_74 = arith.constant dense<0.000000e+00> : vector<30x128xf32>
    %326 = tpu.matmul %313, %325, %cst_74 {dimension_numbers = #tpu.dot_dimension_numbers<[1], [0], [0], [1], [0, 0, 1, 1], [], []>} : vector<30x64xf32>, vector<64x128xf32>, vector<30x128xf32> -> vector<30x128xf32>
    %327 = vector.extract_strided_slice %313 {offsets = [0, 0], sizes = [30, 1], strides = [1, 1]} : vector<30x64xf32> to vector<30x1xf32>
    %328 = vector.extract_strided_slice %313 {offsets = [0, 63], sizes = [30, 1], strides = [1, 1]} : vector<30x64xf32> to vector<30x1xf32>
    %329 = tpu.concatenate %327, %326, %328 in 1 : vector<30x1xf32>, vector<30x128xf32>, vector<30x1xf32> -> vector<30x130xf32>
    %c0_75 = arith.constant 0 : index
    %c0_76 = arith.constant 0 : index
    %c0_77 = arith.constant 0 : index
    %330 = vector.load %arg10[%c0_75, %c0_76, %c0_77] : memref<3x30x30xf32, #tpu.memory_space<vmem>>, vector<1x30x30xf32>
    %331 = vector.shape_cast %330 : vector<1x30x30xf32> to vector<30x30xf32>
    %332 = vector.extract_strided_slice %329 {offsets = [0, 0], sizes = [30, 128], strides = [1, 1]} : vector<30x130xf32> to vector<30x128xf32>
    %cst_78 = arith.constant dense<0.000000e+00> : vector<30x128xf32>
    %333 = tpu.matmul %331, %332, %cst_78 {dimension_numbers = #tpu.dot_dimension_numbers<[1], [0], [0], [1], [0, 0, 1, 1], [], []>} : vector<30x30xf32>, vector<30x128xf32>, vector<30x128xf32> -> vector<30x128xf32>
    %c1_79 = arith.constant 1 : index
    %c0_80 = arith.constant 0 : index
    %c0_81 = arith.constant 0 : index
    %334 = vector.load %arg10[%c1_79, %c0_80, %c0_81] : memref<3x30x30xf32, #tpu.memory_space<vmem>>, vector<1x30x30xf32>
    %335 = vector.shape_cast %334 : vector<1x30x30xf32> to vector<30x30xf32>
    %336 = vector.extract_strided_slice %329 {offsets = [0, 1], sizes = [30, 128], strides = [1, 1]} : vector<30x130xf32> to vector<30x128xf32>
    %cst_82 = arith.constant dense<0.000000e+00> : vector<30x128xf32>
    %337 = tpu.matmul %335, %336, %cst_82 {dimension_numbers = #tpu.dot_dimension_numbers<[1], [0], [0], [1], [0, 0, 1, 1], [], []>} : vector<30x30xf32>, vector<30x128xf32>, vector<30x128xf32> -> vector<30x128xf32>
    %338 = arith.addf %333, %337 : vector<30x128xf32>
    %c2_83 = arith.constant 2 : index
    %c0_84 = arith.constant 0 : index
    %c0_85 = arith.constant 0 : index
    %339 = vector.load %arg10[%c2_83, %c0_84, %c0_85] : memref<3x30x30xf32, #tpu.memory_space<vmem>>, vector<1x30x30xf32>
    %340 = vector.shape_cast %339 : vector<1x30x30xf32> to vector<30x30xf32>
    %341 = vector.extract_strided_slice %329 {offsets = [0, 2], sizes = [30, 128], strides = [1, 1]} : vector<30x130xf32> to vector<30x128xf32>
    %cst_86 = arith.constant dense<0.000000e+00> : vector<30x128xf32>
    %342 = tpu.matmul %340, %341, %cst_86 {dimension_numbers = #tpu.dot_dimension_numbers<[1], [0], [0], [1], [0, 0, 1, 1], [], []>} : vector<30x30xf32>, vector<30x128xf32>, vector<30x128xf32> -> vector<30x128xf32>
    %343 = arith.addf %338, %342 : vector<30x128xf32>
    %c0_87 = arith.constant 0 : index
    %c0_88 = arith.constant 0 : index
    %344 = vector.load %arg11[%c0_87, %c0_88] : memref<30x1xf32, #tpu.memory_space<vmem>>, vector<30x1xf32>
    %345 = vector.broadcast %344 : vector<30x1xf32> to vector<30x128xf32>
    %346 = arith.addf %343, %345 : vector<30x128xf32>
    %cst_89 = arith.constant 0.000000e+00 : f32
    %347 = vector.broadcast %cst_89 : f32 to vector<30x128xf32>
    %348 = arith.cmpf ogt, %346, %347 : vector<30x128xf32>
    %349 = math.exp %346 : vector<30x128xf32>
    %cst_90 = arith.constant 1.000000e+00 : f32
    %350 = vector.broadcast %cst_90 : f32 to vector<30x128xf32>
    %351 = arith.subf %349, %350 : vector<30x128xf32>
    %352 = arith.select %348, %346, %351 : vector<30x128xi1>, vector<30x128xf32>
    %353 = tpu.iota {dimensions = array<i32: 0>} : vector<128x256xi32>
    %354 = tpu.iota {dimensions = array<i32: 1>} : vector<128x256xi32>
    %c2_i32_91 = arith.constant 2 : i32
    %355 = vector.broadcast %c2_i32_91 : i32 to vector<128x256xi32>
    %356 = arith.muli %355, %353 : vector<128x256xi32>
    %357 = arith.subi %354, %356 : vector<128x256xi32>
    %c0_i32_92 = arith.constant 0 : i32
    %358 = vector.broadcast %c0_i32_92 : i32 to vector<128x256xi32>
    %359 = arith.cmpi eq, %357, %358 : vector<128x256xi32>
    %c1_i32_93 = arith.constant 1 : i32
    %360 = vector.broadcast %c1_i32_93 : i32 to vector<128x256xi32>
    %361 = arith.cmpi eq, %357, %360 : vector<128x256xi32>
    %362 = arith.ori %359, %361 : vector<128x256xi1>
    %363 = arith.extui %362 : vector<128x256xi1> to vector<128x256xi32>
    %364 = arith.sitofp %363 : vector<128x256xi32> to vector<128x256xf32>
    %cst_94 = arith.constant dense<0.000000e+00> : vector<30x256xf32>
    %365 = tpu.matmul %352, %364, %cst_94 {dimension_numbers = #tpu.dot_dimension_numbers<[1], [0], [0], [1], [0, 0, 1, 1], [], []>} : vector<30x128xf32>, vector<128x256xf32>, vector<30x256xf32> -> vector<30x256xf32>
    %366 = vector.extract_strided_slice %352 {offsets = [0, 0], sizes = [30, 1], strides = [1, 1]} : vector<30x128xf32> to vector<30x1xf32>
    %367 = vector.extract_strided_slice %352 {offsets = [0, 127], sizes = [30, 1], strides = [1, 1]} : vector<30x128xf32> to vector<30x1xf32>
    %368 = tpu.concatenate %366, %365, %367 in 1 : vector<30x1xf32>, vector<30x256xf32>, vector<30x1xf32> -> vector<30x258xf32>
    %c0_95 = arith.constant 0 : index
    %c0_96 = arith.constant 0 : index
    %c0_97 = arith.constant 0 : index
    %369 = vector.load %arg12[%c0_95, %c0_96, %c0_97] : memref<3x30x30xf32, #tpu.memory_space<vmem>>, vector<1x30x30xf32>
    %370 = vector.shape_cast %369 : vector<1x30x30xf32> to vector<30x30xf32>
    %371 = vector.extract_strided_slice %368 {offsets = [0, 0], sizes = [30, 256], strides = [1, 1]} : vector<30x258xf32> to vector<30x256xf32>
    %cst_98 = arith.constant dense<0.000000e+00> : vector<30x256xf32>
    %372 = tpu.matmul %370, %371, %cst_98 {dimension_numbers = #tpu.dot_dimension_numbers<[1], [0], [0], [1], [0, 0, 1, 1], [], []>} : vector<30x30xf32>, vector<30x256xf32>, vector<30x256xf32> -> vector<30x256xf32>
    %c1_99 = arith.constant 1 : index
    %c0_100 = arith.constant 0 : index
    %c0_101 = arith.constant 0 : index
    %373 = vector.load %arg12[%c1_99, %c0_100, %c0_101] : memref<3x30x30xf32, #tpu.memory_space<vmem>>, vector<1x30x30xf32>
    %374 = vector.shape_cast %373 : vector<1x30x30xf32> to vector<30x30xf32>
    %375 = vector.extract_strided_slice %368 {offsets = [0, 1], sizes = [30, 256], strides = [1, 1]} : vector<30x258xf32> to vector<30x256xf32>
    %cst_102 = arith.constant dense<0.000000e+00> : vector<30x256xf32>
    %376 = tpu.matmul %374, %375, %cst_102 {dimension_numbers = #tpu.dot_dimension_numbers<[1], [0], [0], [1], [0, 0, 1, 1], [], []>} : vector<30x30xf32>, vector<30x256xf32>, vector<30x256xf32> -> vector<30x256xf32>
    %377 = arith.addf %372, %376 : vector<30x256xf32>
    %c2_103 = arith.constant 2 : index
    %c0_104 = arith.constant 0 : index
    %c0_105 = arith.constant 0 : index
    %378 = vector.load %arg12[%c2_103, %c0_104, %c0_105] : memref<3x30x30xf32, #tpu.memory_space<vmem>>, vector<1x30x30xf32>
    %379 = vector.shape_cast %378 : vector<1x30x30xf32> to vector<30x30xf32>
    %380 = vector.extract_strided_slice %368 {offsets = [0, 2], sizes = [30, 256], strides = [1, 1]} : vector<30x258xf32> to vector<30x256xf32>
    %cst_106 = arith.constant dense<0.000000e+00> : vector<30x256xf32>
    %381 = tpu.matmul %379, %380, %cst_106 {dimension_numbers = #tpu.dot_dimension_numbers<[1], [0], [0], [1], [0, 0, 1, 1], [], []>} : vector<30x30xf32>, vector<30x256xf32>, vector<30x256xf32> -> vector<30x256xf32>
    %382 = arith.addf %377, %381 : vector<30x256xf32>
    %c0_107 = arith.constant 0 : index
    %c0_108 = arith.constant 0 : index
    %383 = vector.load %arg13[%c0_107, %c0_108] : memref<30x1xf32, #tpu.memory_space<vmem>>, vector<30x1xf32>
    %384 = vector.broadcast %383 : vector<30x1xf32> to vector<30x256xf32>
    %385 = arith.addf %382, %384 : vector<30x256xf32>
    %cst_109 = arith.constant 0.000000e+00 : f32
    %386 = vector.broadcast %cst_109 : f32 to vector<30x256xf32>
    %387 = arith.cmpf ogt, %385, %386 : vector<30x256xf32>
    %388 = math.exp %385 : vector<30x256xf32>
    %cst_110 = arith.constant 1.000000e+00 : f32
    %389 = vector.broadcast %cst_110 : f32 to vector<30x256xf32>
    %390 = arith.subf %388, %389 : vector<30x256xf32>
    %391 = arith.select %387, %385, %390 : vector<30x256xi1>, vector<30x256xf32>
    %392 = tpu.iota {dimensions = array<i32: 0>} : vector<256x512xi32>
    %393 = tpu.iota {dimensions = array<i32: 1>} : vector<256x512xi32>
    %c2_i32_111 = arith.constant 2 : i32
    %394 = vector.broadcast %c2_i32_111 : i32 to vector<256x512xi32>
    %395 = arith.muli %394, %392 : vector<256x512xi32>
    %396 = arith.subi %393, %395 : vector<256x512xi32>
    %c0_i32_112 = arith.constant 0 : i32
    %397 = vector.broadcast %c0_i32_112 : i32 to vector<256x512xi32>
    %398 = arith.cmpi eq, %396, %397 : vector<256x512xi32>
    %c1_i32_113 = arith.constant 1 : i32
    %399 = vector.broadcast %c1_i32_113 : i32 to vector<256x512xi32>
    %400 = arith.cmpi eq, %396, %399 : vector<256x512xi32>
    %401 = arith.ori %398, %400 : vector<256x512xi1>
    %402 = arith.extui %401 : vector<256x512xi1> to vector<256x512xi32>
    %403 = arith.sitofp %402 : vector<256x512xi32> to vector<256x512xf32>
    %cst_114 = arith.constant dense<0.000000e+00> : vector<30x512xf32>
    %404 = tpu.matmul %391, %403, %cst_114 {dimension_numbers = #tpu.dot_dimension_numbers<[1], [0], [0], [1], [0, 0, 1, 1], [], []>} : vector<30x256xf32>, vector<256x512xf32>, vector<30x512xf32> -> vector<30x512xf32>
    %405 = vector.extract_strided_slice %391 {offsets = [0, 0], sizes = [30, 1], strides = [1, 1]} : vector<30x256xf32> to vector<30x1xf32>
    %406 = vector.extract_strided_slice %391 {offsets = [0, 255], sizes = [30, 1], strides = [1, 1]} : vector<30x256xf32> to vector<30x1xf32>
    %407 = tpu.concatenate %405, %404, %406 in 1 : vector<30x1xf32>, vector<30x512xf32>, vector<30x1xf32> -> vector<30x514xf32>
    %c0_115 = arith.constant 0 : index
    %c0_116 = arith.constant 0 : index
    %c0_117 = arith.constant 0 : index
    %408 = vector.load %arg14[%c0_115, %c0_116, %c0_117] : memref<3x30x30xf32, #tpu.memory_space<vmem>>, vector<1x30x30xf32>
    %409 = vector.shape_cast %408 : vector<1x30x30xf32> to vector<30x30xf32>
    %410 = vector.extract_strided_slice %407 {offsets = [0, 0], sizes = [30, 512], strides = [1, 1]} : vector<30x514xf32> to vector<30x512xf32>
    %cst_118 = arith.constant dense<0.000000e+00> : vector<30x512xf32>
    %411 = tpu.matmul %409, %410, %cst_118 {dimension_numbers = #tpu.dot_dimension_numbers<[1], [0], [0], [1], [0, 0, 1, 1], [], []>} : vector<30x30xf32>, vector<30x512xf32>, vector<30x512xf32> -> vector<30x512xf32>
    %c1_119 = arith.constant 1 : index
    %c0_120 = arith.constant 0 : index
    %c0_121 = arith.constant 0 : index
    %412 = vector.load %arg14[%c1_119, %c0_120, %c0_121] : memref<3x30x30xf32, #tpu.memory_space<vmem>>, vector<1x30x30xf32>
    %413 = vector.shape_cast %412 : vector<1x30x30xf32> to vector<30x30xf32>
    %414 = vector.extract_strided_slice %407 {offsets = [0, 1], sizes = [30, 512], strides = [1, 1]} : vector<30x514xf32> to vector<30x512xf32>
    %cst_122 = arith.constant dense<0.000000e+00> : vector<30x512xf32>
    %415 = tpu.matmul %413, %414, %cst_122 {dimension_numbers = #tpu.dot_dimension_numbers<[1], [0], [0], [1], [0, 0, 1, 1], [], []>} : vector<30x30xf32>, vector<30x512xf32>, vector<30x512xf32> -> vector<30x512xf32>
    %416 = arith.addf %411, %415 : vector<30x512xf32>
    %c2_123 = arith.constant 2 : index
    %c0_124 = arith.constant 0 : index
    %c0_125 = arith.constant 0 : index
    %417 = vector.load %arg14[%c2_123, %c0_124, %c0_125] : memref<3x30x30xf32, #tpu.memory_space<vmem>>, vector<1x30x30xf32>
    %418 = vector.shape_cast %417 : vector<1x30x30xf32> to vector<30x30xf32>
    %419 = vector.extract_strided_slice %407 {offsets = [0, 2], sizes = [30, 512], strides = [1, 1]} : vector<30x514xf32> to vector<30x512xf32>
    %cst_126 = arith.constant dense<0.000000e+00> : vector<30x512xf32>
    %420 = tpu.matmul %418, %419, %cst_126 {dimension_numbers = #tpu.dot_dimension_numbers<[1], [0], [0], [1], [0, 0, 1, 1], [], []>} : vector<30x30xf32>, vector<30x512xf32>, vector<30x512xf32> -> vector<30x512xf32>
    %421 = arith.addf %416, %420 : vector<30x512xf32>
    %c0_127 = arith.constant 0 : index
    %c0_128 = arith.constant 0 : index
    %422 = vector.load %arg15[%c0_127, %c0_128] : memref<30x1xf32, #tpu.memory_space<vmem>>, vector<30x1xf32>
    %423 = vector.broadcast %422 : vector<30x1xf32> to vector<30x512xf32>
    %424 = arith.addf %421, %423 : vector<30x512xf32>
    %cst_129 = arith.constant 0.000000e+00 : f32
    %425 = vector.broadcast %cst_129 : f32 to vector<30x512xf32>
    %426 = arith.cmpf ogt, %424, %425 : vector<30x512xf32>
    %427 = math.exp %424 : vector<30x512xf32>
    %cst_130 = arith.constant 1.000000e+00 : f32
    %428 = vector.broadcast %cst_130 : f32 to vector<30x512xf32>
    %429 = arith.subf %427, %428 : vector<30x512xf32>
    %430 = arith.select %426, %424, %429 : vector<30x512xi1>, vector<30x512xf32>
    %431 = tpu.iota {dimensions = array<i32: 0>} : vector<512x1024xi32>
    %432 = tpu.iota {dimensions = array<i32: 1>} : vector<512x1024xi32>
    %c2_i32_131 = arith.constant 2 : i32
    %433 = vector.broadcast %c2_i32_131 : i32 to vector<512x1024xi32>
    %434 = arith.muli %433, %431 : vector<512x1024xi32>
    %435 = arith.subi %432, %434 : vector<512x1024xi32>
    %c0_i32_132 = arith.constant 0 : i32
    %436 = vector.broadcast %c0_i32_132 : i32 to vector<512x1024xi32>
    %437 = arith.cmpi eq, %435, %436 : vector<512x1024xi32>
    %c1_i32_133 = arith.constant 1 : i32
    %438 = vector.broadcast %c1_i32_133 : i32 to vector<512x1024xi32>
    %439 = arith.cmpi eq, %435, %438 : vector<512x1024xi32>
    %440 = arith.ori %437, %439 : vector<512x1024xi1>
    %441 = arith.extui %440 : vector<512x1024xi1> to vector<512x1024xi32>
    %442 = arith.sitofp %441 : vector<512x1024xi32> to vector<512x1024xf32>
    %cst_134 = arith.constant dense<0.000000e+00> : vector<30x1024xf32>
    %443 = tpu.matmul %430, %442, %cst_134 {dimension_numbers = #tpu.dot_dimension_numbers<[1], [0], [0], [1], [0, 0, 1, 1], [], []>} : vector<30x512xf32>, vector<512x1024xf32>, vector<30x1024xf32> -> vector<30x1024xf32>
    %444 = vector.extract_strided_slice %430 {offsets = [0, 0], sizes = [30, 1], strides = [1, 1]} : vector<30x512xf32> to vector<30x1xf32>
    %445 = vector.extract_strided_slice %430 {offsets = [0, 511], sizes = [30, 1], strides = [1, 1]} : vector<30x512xf32> to vector<30x1xf32>
    %446 = tpu.concatenate %444, %443, %445 in 1 : vector<30x1xf32>, vector<30x1024xf32>, vector<30x1xf32> -> vector<30x1026xf32>
    %c0_135 = arith.constant 0 : index
    %c0_136 = arith.constant 0 : index
    %c0_137 = arith.constant 0 : index
    %447 = vector.load %arg16[%c0_135, %c0_136, %c0_137] : memref<3x12x30xf32, #tpu.memory_space<vmem>>, vector<1x12x30xf32>
    %448 = vector.shape_cast %447 : vector<1x12x30xf32> to vector<12x30xf32>
    %449 = vector.extract_strided_slice %446 {offsets = [0, 0], sizes = [30, 1024], strides = [1, 1]} : vector<30x1026xf32> to vector<30x1024xf32>
    %cst_138 = arith.constant dense<0.000000e+00> : vector<12x1024xf32>
    %450 = tpu.matmul %448, %449, %cst_138 {dimension_numbers = #tpu.dot_dimension_numbers<[1], [0], [0], [1], [0, 0, 1, 1], [], []>} : vector<12x30xf32>, vector<30x1024xf32>, vector<12x1024xf32> -> vector<12x1024xf32>
    %c1_139 = arith.constant 1 : index
    %c0_140 = arith.constant 0 : index
    %c0_141 = arith.constant 0 : index
    %451 = vector.load %arg16[%c1_139, %c0_140, %c0_141] : memref<3x12x30xf32, #tpu.memory_space<vmem>>, vector<1x12x30xf32>
    %452 = vector.shape_cast %451 : vector<1x12x30xf32> to vector<12x30xf32>
    %453 = vector.extract_strided_slice %446 {offsets = [0, 1], sizes = [30, 1024], strides = [1, 1]} : vector<30x1026xf32> to vector<30x1024xf32>
    %cst_142 = arith.constant dense<0.000000e+00> : vector<12x1024xf32>
    %454 = tpu.matmul %452, %453, %cst_142 {dimension_numbers = #tpu.dot_dimension_numbers<[1], [0], [0], [1], [0, 0, 1, 1], [], []>} : vector<12x30xf32>, vector<30x1024xf32>, vector<12x1024xf32> -> vector<12x1024xf32>
    %455 = arith.addf %450, %454 : vector<12x1024xf32>
    %c2_143 = arith.constant 2 : index
    %c0_144 = arith.constant 0 : index
    %c0_145 = arith.constant 0 : index
    %456 = vector.load %arg16[%c2_143, %c0_144, %c0_145] : memref<3x12x30xf32, #tpu.memory_space<vmem>>, vector<1x12x30xf32>
    %457 = vector.shape_cast %456 : vector<1x12x30xf32> to vector<12x30xf32>
    %458 = vector.extract_strided_slice %446 {offsets = [0, 2], sizes = [30, 1024], strides = [1, 1]} : vector<30x1026xf32> to vector<30x1024xf32>
    %cst_146 = arith.constant dense<0.000000e+00> : vector<12x1024xf32>
    %459 = tpu.matmul %457, %458, %cst_146 {dimension_numbers = #tpu.dot_dimension_numbers<[1], [0], [0], [1], [0, 0, 1, 1], [], []>} : vector<12x30xf32>, vector<30x1024xf32>, vector<12x1024xf32> -> vector<12x1024xf32>
    %460 = arith.addf %455, %459 : vector<12x1024xf32>
    %c0_147 = arith.constant 0 : index
    %c0_148 = arith.constant 0 : index
    %461 = vector.load %arg17[%c0_147, %c0_148] : memref<12x1024xf32, #tpu.memory_space<vmem>>, vector<12x1024xf32>
    %462 = arith.addf %460, %461 : vector<12x1024xf32>
    %c0_149 = arith.constant 0 : index
    %c0_150 = arith.constant 0 : index
    %c0_151 = arith.constant 0 : index
    %463 = vector.load %arg18[%c0_149, %c0_150, %c0_151] : memref<1x12x1024xf32, #tpu.memory_space<vmem>>, vector<1x12x1024xf32>
    %464 = vector.shape_cast %463 : vector<1x12x1024xf32> to vector<12x1024xf32>
    %465 = vector.shape_cast %462 : vector<12x1024xf32> to vector<1x12x1024xf32>
    tpu.vector_store %arg18[%c0_149, %c0_150, %c0_151], %465 {strides = array<i32>} : memref<1x12x1024xf32, #tpu.memory_space<vmem>>, vector<1x12x1024xf32>,
    return
  }
  func.func @transform_0(%arg0: i32) -> (i32, i32, i32) {
    %c0_i32 = arith.constant 0 : i32
    %c0_i32_0 = arith.constant 0 : i32
    %c0_i32_1 = arith.constant 0 : i32
    return %arg0, %c0_i32, %c0_i32_0 : i32, i32, i32
  }
  func.func @transform_1(%arg0: i32) -> (i32, i32) {
    %c0_i32 = arith.constant 0 : i32
    %c0_i32_0 = arith.constant 0 : i32
    %c0_i32_1 = arith.constant 0 : i32
    return %c0_i32, %c0_i32_0 : i32, i32
  }
  func.func @transform_2(%arg0: i32) -> (i32, i32) {
    %c0_i32 = arith.constant 0 : i32
    %c0_i32_0 = arith.constant 0 : i32
    %c0_i32_1 = arith.constant 0 : i32
    return %c0_i32, %c0_i32_0 : i32, i32
  }
  func.func @transform_3(%arg0: i32) -> (i32, i32) {
    %c0_i32 = arith.constant 0 : i32
    %c0_i32_0 = arith.constant 0 : i32
    %c0_i32_1 = arith.constant 0 : i32
    return %c0_i32, %c0_i32_0 : i32, i32
  }
  func.func @transform_4(%arg0: i32) -> (i32, i32) {
    %c0_i32 = arith.constant 0 : i32
    %c0_i32_0 = arith.constant 0 : i32
    %c0_i32_1 = arith.constant 0 : i32
    return %c0_i32, %c0_i32_0 : i32, i32
  }
  func.func @transform_5(%arg0: i32) -> (i32, i32) {
    %c0_i32 = arith.constant 0 : i32
    %c0_i32_0 = arith.constant 0 : i32
    %c0_i32_1 = arith.constant 0 : i32
    return %c0_i32, %c0_i32_0 : i32, i32
  }
  func.func @transform_6(%arg0: i32) -> (i32, i32) {
    %c0_i32 = arith.constant 0 : i32
    %c0_i32_0 = arith.constant 0 : i32
    %c0_i32_1 = arith.constant 0 : i32
    return %c0_i32, %c0_i32_0 : i32, i32
  }
  func.func @transform_7(%arg0: i32) -> (i32, i32, i32) {
    %c0_i32 = arith.constant 0 : i32
    %c0_i32_0 = arith.constant 0 : i32
    %c0_i32_1 = arith.constant 0 : i32
    %c0_i32_2 = arith.constant 0 : i32
    return %c0_i32, %c0_i32_0, %c0_i32_1 : i32, i32, i32
  }
  func.func @transform_8(%arg0: i32) -> (i32, i32) {
    %c0_i32 = arith.constant 0 : i32
    %c0_i32_0 = arith.constant 0 : i32
    %c0_i32_1 = arith.constant 0 : i32
    return %c0_i32, %c0_i32_0 : i32, i32
  }
  func.func @transform_9(%arg0: i32) -> (i32, i32, i32) {
    %c0_i32 = arith.constant 0 : i32
    %c0_i32_0 = arith.constant 0 : i32
    %c0_i32_1 = arith.constant 0 : i32
    %c0_i32_2 = arith.constant 0 : i32
    return %c0_i32, %c0_i32_0, %c0_i32_1 : i32, i32, i32
  }
  func.func @transform_10(%arg0: i32) -> (i32, i32) {
    %c0_i32 = arith.constant 0 : i32
    %c0_i32_0 = arith.constant 0 : i32
    %c0_i32_1 = arith.constant 0 : i32
    return %c0_i32, %c0_i32_0 : i32, i32
  }
  func.func @transform_11(%arg0: i32) -> (i32, i32, i32) {
    %c0_i32 = arith.constant 0 : i32
    %c0_i32_0 = arith.constant 0 : i32
    %c0_i32_1 = arith.constant 0 : i32
    %c0_i32_2 = arith.constant 0 : i32
    return %c0_i32, %c0_i32_0, %c0_i32_1 : i32, i32, i32
  }
  func.func @transform_12(%arg0: i32) -> (i32, i32) {
    %c0_i32 = arith.constant 0 : i32
    %c0_i32_0 = arith.constant 0 : i32
    %c0_i32_1 = arith.constant 0 : i32
    return %c0_i32, %c0_i32_0 : i32, i32
  }
  func.func @transform_13(%arg0: i32) -> (i32, i32, i32) {
    %c0_i32 = arith.constant 0 : i32
    %c0_i32_0 = arith.constant 0 : i32
    %c0_i32_1 = arith.constant 0 : i32
    %c0_i32_2 = arith.constant 0 : i32
    return %c0_i32, %c0_i32_0, %c0_i32_1 : i32, i32, i32
  }
  func.func @transform_14(%arg0: i32) -> (i32, i32) {
    %c0_i32 = arith.constant 0 : i32
    %c0_i32_0 = arith.constant 0 : i32
    %c0_i32_1 = arith.constant 0 : i32
    return %c0_i32, %c0_i32_0 : i32, i32
  }
  func.func @transform_15(%arg0: i32) -> (i32, i32, i32) {
    %c0_i32 = arith.constant 0 : i32
    %c0_i32_0 = arith.constant 0 : i32
    %c0_i32_1 = arith.constant 0 : i32
    %c0_i32_2 = arith.constant 0 : i32
    return %c0_i32, %c0_i32_0, %c0_i32_1 : i32, i32, i32
  }
  func.func @transform_16(%arg0: i32) -> (i32, i32) {
    %c0_i32 = arith.constant 0 : i32
    %c0_i32_0 = arith.constant 0 : i32
    %c0_i32_1 = arith.constant 0 : i32
    return %c0_i32, %c0_i32_0 : i32, i32
  }
  func.func @transform_17(%arg0: i32) -> (i32, i32, i32) {
    %c0_i32 = arith.constant 0 : i32
    %c0_i32_0 = arith.constant 0 : i32
    %c0_i32_1 = arith.constant 0 : i32
    return %arg0, %c0_i32, %c0_i32_0 : i32, i32, i32
  }
}

</mosaic_0001>

<bundles_post_ra>
// kernel: tpu_custom_call.1
= control target key start
LH: loop header
LB: loop body
LE: loop exit
PB: predicated region body
PF: predicated region fallthrough
CT: control target
= control target key end

     0   :  { %s17777_s0 = inlined_call_operand.vmem [shape: f32[2,1,5], index: 0, kind: input, shape index: {}]   ;;  %s17778_s1 = inlined_call_operand.vmem [shape: f32[5,30], index: 1, kind: input, shape index: {}]   ;;  %s17779_s2 = inlined_call_operand.vmem [shape: f32[1,30], index: 2, kind: input, shape index: {}]   ;;  %s17780_s3 = inlined_call_operand.vmem [shape: f32[30,30], index: 3, kind: input, shape index: {}]   ;;  %s17781_s4 = inlined_call_operand.vmem [shape: f32[1,30], index: 4, kind: input, shape index: {}]   ;;  %s17782_s5 = inlined_call_operand.hbm [shape: f32[30,960], index: 5, kind: input, shape index: {}]   ;;  %s17783_s6 = inlined_call_operand.vmem [shape: f32[30,1], index: 6, kind: input, shape index: {}]   ;;  %s17784_s7 = inlined_call_operand.hbm [shape: f32[3,30,30], index: 7, kind: input, shape index: {}]   ;;  %s17785_s8 = inlined_call_operand.vmem [shape: f32[30,1], index: 8, kind: input, shape index: {}]   ;;  %s17786_s9 = inlined_call_operand.hbm [shape: f32[3,30,30], index: 9, kind: input, shape index: {}]   ;;  %s17787_s10 = inlined_call_operand.vmem [shape: f32[30,1], index: 10, kind: input, shape index: {}]   ;;  %s17788_s11 = inlined_call_operand.hbm [shape: f32[3,30,30], index: 11, kind: input, shape index: {}]   ;;  %s17789_s12 = inlined_call_operand.vmem [shape: f32[30,1], index: 12, kind: input, shape index: {}]   ;;  %s17790_s13 = inlined_call_operand.hbm [shape: f32[3,30,30], index: 13, kind: input, shape index: {}]   ;;  %s17791_s14 = inlined_call_operand.vmem [shape: f32[30,1], index: 14, kind: input, shape index: {}]   ;;  %s17792_s15 = inlined_call_operand.vmem [shape: f32[3,12,30], index: 15, kind: input, shape index: {}]   ;;  %s17793_s16 = inlined_call_operand.hbm [shape: f32[12,1024], index: 16, kind: input, shape index: {}]   ;;  %s17794_s17 = inlined_call_operand.vmem [shape: f32[2,12,1024], index: 17, kind: output, shape index: {}]  }
   0x1   :  { %18241 = sst [smem:[#allocation155_spill]] %s17777_s0 }
   0x2   :  { %18242 = sst [smem:[#allocation156_spill]] %s17778_s1 }
   0x3   :  { %18243 = sst [smem:[#allocation157_spill]] %s17782_s5 }
   0x4   :  { %18244 = sst [smem:[#allocation158_spill]] %s17784_s7 }
   0x5   :  { %18245 = sst [smem:[#allocation159_spill]] %s17788_s11 }
   0x6   :  { %18246 = sst [smem:[#allocation160_spill]] %s17792_s15 }
   0x7   :  { %18247 = sst [smem:[#allocation161_spill]] %s17794_s17 }
   0x8   :  { %22 = vsyncpa [#allocation3], 0 }
   0x9   :  { %23 = vsyncpa [#allocation5], 0 }
   0xa   :  { %24 = vsyncpa [#allocation8], 0 }
   0xb   :  { %25 = vsyncpa [#allocation11], 0  ;;  %s11811_s24 = smov 0  }
   0xc LB: > { %18248 = sst [smem:[#allocation16_spill]] %s11697_s24  ;;  %s11820_s28 = sadd.s32 4294967295, %s11697_s24   ;;  %s11697_s24 = sphi %s11811_s24, %s31_s24  }
   0xd   : > { %s18249_s7 = sld [smem:[#allocation158_spill]]  ;;  %p9273_p0 = scmp.ge.s32.totalorder %s11697_s24, 1 }
   0xe   : > { %p424_p1 = scmp.lt.s32.totalorder %s11697_s24, 3  ;;  %p10794_p2 = scmp.eq.s32.totalorder %s11820_s28, 0 }
   0xf   : > { %s11699_s0 = smov [#allocation4]   ;;  %s18251_s11 = sld [smem:[#allocation159_spill]] }
  0x10   : > { %p11825_p3 = pnand %p9273_p0, %p424_p1  ;;  %s466_s30 = sshll.u32 %s11699_s0, 4  ;;  %s467_s30 = int_to_ptr.vmem [resolvable:$true] %s466_s30 }
  0x11   : > { %s11700_s21 = smov [#allocation7]   ;;  %s18253_s5 = sld [smem:[#allocation157_spill]] }
  0x12   : > { %p10775_p4 = pneg %p11825_p3  ;;  %s500_s22 = sshll.u32 %s11700_s21, 4  ;;  %s501_s22 = int_to_ptr.vmem [resolvable:$true] %s500_s22 }
  0x13   : > { %s464_s27 = sshll.u32 %s18249_s7, 4  ;;  %s11701_s0 = smov 128   ;;  %s465_s27 = int_to_ptr.hbm [resolvable:$true] %s464_s27 }
  0x14   : > { %p11836_p5 = pnand %p10794_p2, %p10775_p4  ;;  %s11702_s7 = smov 8  }
  0x15   : > { %s498_s1 = sshll.u32 %s18251_s11, 4  ;;  %s11703_s18 = smov [#allocation2]   ;;  %s499_s1 = int_to_ptr.hbm [resolvable:$true] %s498_s1 }
  0x16   : > { %10781 = dma.hbm_to_vmem [thread:$0]  (!%p11836_p5), %s465_s27, 1536, %s467_s30, [#allocation5], %s11701_s0, %s11701_s0, %s11702_s7  }
  0x17   : > { %s447_s26 = sshll.u32 %s18253_s5, 4  ;;  %s449_s19 = sshll.u32 %s11703_s18, 4  ;;  %s448_s26 = int_to_ptr.hbm [resolvable:$true] %s447_s26  ;;  %s450_s19 = int_to_ptr.vmem [resolvable:$true] %s449_s19 }
  0x18   : > { %10787 = dma.hbm_to_vmem [thread:$0]  (!%p11836_p5), %s499_s1, 1536, %s501_s22, [#allocation8], %s11701_s0, %s11701_s0, %s11702_s7  }
  0x19   : > { %s11704_s11 = smov 1024   ;;  %s11705_s24 = smov 64  }
  0x1a   : > { %10778 = dma.hbm_to_vmem [thread:$0]  (!%p11836_p5), %s448_s26, 4096, %s450_s19, [#allocation3], %s11704_s11, %s11704_s11, %s11705_s24  }
  0x1b   : > { %s481_s25 = sshll.u32 %s17786_s9, 4  ;;  %s11706_s5 = smov [#allocation6]   ;;  %s482_s25 = int_to_ptr.hbm [resolvable:$true] %s481_s25 }
  0x1c   : > { %s483_s17 = sshll.u32 %s11706_s5, 4  ;;  %s515_s1 = sshll.u32 %s17790_s13, 4  ;;  %s484_s17 = int_to_ptr.vmem [resolvable:$true] %s483_s17  ;;  %s516_s1 = int_to_ptr.hbm [resolvable:$true] %s515_s1 }
  0x1d   : > { %10784 = dma.hbm_to_vmem [thread:$0]  (!%p11836_p5), %s482_s25, 1536, %s484_s17, [#allocation5], %s11701_s0, %s11701_s0, %s11702_s7  }
  0x1e   : > { %s11707_s22 = smov [#allocation9]   ;;  %s535_s19 = sshll.u32 %s17793_s16, 4  ;;  %s536_s19 = int_to_ptr.hbm [resolvable:$true] %s535_s19 }
  0x1f   : > { %s517_s18 = sshll.u32 %s11707_s22, 4  ;;  %s11708_s21 = smov [#allocation10]   ;;  %s518_s18 = int_to_ptr.vmem [resolvable:$true] %s517_s18 }
  0x20   : > { %10790 = dma.hbm_to_vmem [thread:$0]  (!%p11836_p5), %s516_s1, 1536, %s518_s18, [#allocation8], %s11701_s0, %s11701_s0, %s11702_s7  }
  0x21   : > { %s537_s5 = sshll.u32 %s11708_s21, 4  ;;  %559 = sbr.rel (%p11825_p3) target bundleno = 4010 (0xfaa), region = 88  ;;  %s538_s5 = int_to_ptr.vmem [resolvable:$true] %s537_s5 }
  0x22   : > { %10793 = dma.hbm_to_vmem [thread:$0]  (!%p11836_p5), %s536_s19, 2048, %s538_s5, [#allocation11], %s11704_s11, %s11704_s11, %s11705_s24  }
  0x26   : > { %11680 = dma.done.wait (%p10794_p2), [#allocation3], 4096  }
  0x27   : > { %11682 = vsyncadd (%p10794_p2), [#allocation3], 4294963200 }
  0x28   : > { %11684 = dma.done.wait (%p10794_p2), [#allocation5], 3072  }
  0x29   : > { %11686 = vsyncadd (%p10794_p2), [#allocation5], 4294964224 }
  0x2a   : > { %11688 = dma.done.wait (%p10794_p2), [#allocation8], 3072  }
  0x2b   : > { %11690 = vsyncadd (%p10794_p2), [#allocation8], 4294964224 }
  0x2c   : > { %11692 = dma.done.wait (%p10794_p2), [#allocation11], 2048  }
  0x2d   : > { %11694 = vsyncadd (%p10794_p2), [#allocation11], 4294965248  ;;  %p635_p6 = scmp.lt.s32.totalorder %s11820_s28, 1  ;;  %s18254_s15 = sld [smem:[#allocation155_spill]]  ;;  %vm650_vm0 = vcmask 1044480   ;;  %vm646_vm1 = vcmask 39936   ;;  %v936_v53 = vlaneseq }
  0x2e   : > { %s18255_s20 = sld [smem:[#allocation156_spill]]  ;;  %v682_v2 = vld [vmem:[%s17780_s3 + $0x18] sm:$0x3f]  ;;  %vm17799_vm2 = vcmask 1045504   ;;  %v681_v3 = vld [vmem:[%s17780_s3 + $0x10] sm:$0xff]  ;;  %v680_v4 = vld [vmem:[%s17780_s3 + $0x8] sm:$0xff] }
  0x2f   : > { %s19496_s28 = smov (!%p635_p6, %s11820_s28), 1  ;;  %9293 = vmatpush.msk.msra.mxu1 %vm17799_vm2, %v682_v2  ;;  %v679_v5 = vld [vmem:[%s17780_s3] sm:$0xff]  ;;  %v11709_v6 = vmov 0.0   ;;  %s11710_s26 = smov 96   ;;  %vm17801_vm3 = vcmask 244736   ;;  %v734_v19 = vld [vmem:[#allocation2 + $0x88] sm:$0xff] }
  0x30   : > { %10837 = vrot.lane.b32.xlu1 %v11709_v6, %s11710_s26  ;;  %v645_v7 = vld [vmem:[%s17779_s2] sm:$0x1]  ;;  %s11711_s5 = smov 32   ;;  %s11712_s7 = smov 64   ;;  %v742_v15 = vld [vmem:[#allocation2 + $0xc8] sm:$0x3f] }
  0x31   : > { %705 = vmatpush.msra.mxu1 %v681_v3  ;;  %10847 = vrot.lane.b32.xlu0 %v11709_v6, %s11711_s5  ;;  %v741_v14 = vld [vmem:[#allocation2 + $0xc0] sm:$0x3f]  ;;  %v743_v16 = vld [vmem:[#allocation2 + $0xd0] sm:$0x3f]  ;;  %v744_v17 = vld [vmem:[#allocation2 + $0xd8] sm:$0x3f] }
  0x32   : > { %10842 = vrot.lane.b32.xlu2 %v11709_v6, %s11712_s7  ;;  %9296 = vmatpush.msk.msra.mxu2 %vm17799_vm2, %v741_v14  ;;  %v733_v18 = vld [vmem:[#allocation2 + $0x80] sm:$0xff]  ;;  %v735_v20 = vld [vmem:[#allocation2 + $0x90] sm:$0xff]  ;;  %v736_v21 = vld [vmem:[#allocation2 + $0x98] sm:$0xff]  ;;  %v11976_v54 = vshrl.u32 %v936_v53, 7  ;;  %v11713_v3 = vmov 0   ;;  %s11715_s30 = smov 34  }
  0x33   : > { %s637_s17 = scalar_lea.vmem %s18254_s15, %s19496_s28  ;;  %706 = vmatpush.msra.mxu1 %v680_v4  ;;  %9298 = vmatpush.msk.msra.mxu3 %vm17799_vm2, %v742_v15  ;;  %v725_v22 = vld [vmem:[#allocation2 + $0x40] sm:$0xff]  ;;  %v726_v23 = vld [vmem:[#allocation2 + $0x48] sm:$0xff]  ;;  %v727_v24 = vld [vmem:[#allocation2 + $0x50] sm:$0xff]  ;;  %s11716_s1 = smov 1  }
  0x34   : > { %v644_v0 = vld [vmem:[%s18255_s20] sm:$0x1f]  ;;  %789 = vmatpush.msra.mxu2 %v733_v18  ;;  %v728_v25 = vld [vmem:[#allocation2 + $0x58] sm:$0xff]  ;;  %v718_v27 = vld [vmem:[#allocation2 + $0x8] sm:$0xff]  ;;  %18256 = vst [vmem:[#allocation17_spill] sm:$0xff] %v11976_v54  ;;  %v11979_v55 = vadd.s32 8, %v11976_v54  ;;  %10976 = vset.pattern.permute.xlu1 %v11713_v3 }
  0x35   : > { %v643_v1 = vld [vmem:[%s637_s17] sm:$0x1]  ;;  %9290 = vmatpush.msk.msra.mxu0 %vm650_vm0, %v644_v0  ;;  %707 = vmatpush.msra.mxu1 %v679_v5  ;;  %v719_v28 = vld [vmem:[#allocation2 + $0x10] sm:$0xff]  ;;  %v720_v29 = vld [vmem:[#allocation2 + $0x18] sm:$0xff]  ;;  %vm1051_vm8 = vcmp.eq.s32.totalorder %v11976_v54, 5  ;;  %vm1107_vm11 = vcmp.eq.s32.totalorder %v11976_v54, 7 }
  0x36   : > { %9291 = vmatmul.msk.f32.vlgmr.msra.gmra.mxu0 %vm646_vm1, %v643_v1  ;;  %809 = vmatpush.msra.mxu3 %v734_v19  ;;  %v717_v26 = vld [vmem:[#allocation2] sm:$0xff]  ;;  %v746_v31 = vld [vmem:[#allocation2 + $0xe8] sm:$0x3f]  ;;  %v747_v32 = vld [vmem:[#allocation2 + $0xf0] sm:$0x3f]  ;;  %vm1177_vm6 = vcmp.eq.s32.totalorder %v11979_v55, 10 }
  0x37   : > { %9300 = vmatpush.msk.msrb.mxu0 %vm17799_vm2, %v743_v16  ;;  %9302 = vmatpush.msk.msrb.mxu1 %vm17799_vm2, %v744_v17  ;;  %v745_v30 = vld [vmem:[#allocation2 + $0xe0] sm:$0x3f]  ;;  %v748_v33 = vld [vmem:[#allocation2 + $0xf8] sm:$0x3f]  ;;  %v738_v35 = vld [vmem:[#allocation2 + $0xa8] sm:$0xff]  ;;  %vm1149_vm7 = vcmp.eq.s32.totalorder %v11979_v55, 9 }
  0x38   : > { %10857 = vrot.lane.b32.xlu1 %v11709_v6, %s11712_s7  ;;  %790 = vmatpush.msra.mxu2 %v725_v22  ;;  %v737_v34 = vld [vmem:[#allocation2 + $0xa0] sm:$0xff]  ;;  %v739_v36 = vld [vmem:[#allocation2 + $0xb0] sm:$0xff]  ;;  %v740_v37 = vld [vmem:[#allocation2 + $0xb8] sm:$0xff]  ;;  %vm1274_vm9 = vcmp.eq.s32.totalorder %v11979_v55, 14  ;;  %vm1205_vm10 = vcmp.eq.s32.totalorder %v11979_v55, 11  ;;  %vm1302_vm12 = vcmp.eq.s32.totalorder %v11979_v55, 15 }
  0x39   : > { %829 = vmatpush.msrb.mxu0 %v735_v20  ;;  %849 = vmatpush.msrb.mxu1 %v736_v21  ;;  %v729_v38 = vld [vmem:[#allocation2 + $0x60] sm:$0xff]  ;;  %v730_v39 = vld [vmem:[#allocation2 + $0x68] sm:$0xff]  ;;  %v731_v40 = vld [vmem:[#allocation2 + $0x70] sm:$0xff]  ;;  %vm1246_vm13 = vcmp.eq.s32.totalorder %v11979_v55, 13  ;;  %vm1010_vm14 = vcmp.eq.s32.totalorder %v11976_v54, 3  ;;  %vm954_vm15 = vcmp.eq.s32.totalorder %v11976_v54, 1 }
  0x3a   : > { %10852 = vrot.lane.b32.xlu0 %v11709_v6, %s11710_s26  ;;  %810 = vmatpush.msra.mxu3 %v726_v23  ;;  %v732_v41 = vld [vmem:[#allocation2 + $0x78] sm:$0xff]  ;;  %v721_v42 = vld [vmem:[#allocation2 + $0x20] sm:$0xff]  ;;  %v722_v43 = vld [vmem:[#allocation2 + $0x28] sm:$0xff]  ;;  %vm1079_vm0 = vcmp.eq.s32.totalorder %v11976_v54, 6  ;;  %vm982_vm1 = vcmp.eq.s32.totalorder %v11976_v54, 2  ;;  %v12037_v17 = vadd.s32 16, %v11976_v54 }
  0x3b   : > { %830 = vmatpush.msrb.mxu0 %v727_v24  ;;  %850 = vmatpush.msrb.mxu1 %v728_v25  ;;  %v723_v44 = vld [vmem:[#allocation2 + $0x30] sm:$0xff]  ;;  %v724_v45 = vld [vmem:[#allocation2 + $0x38] sm:$0xff]  ;;  %v683_v46 = vld [vmem:[%s17781_s4] sm:$0x1]  ;;  %v12058_v25 = vadd.s32 24, %v11976_v54  ;;  %s11717_s22 = smov 127  }
  0x3c   : > { %10862 = vrot.lane.b32.xlu2 %v11709_v6, %s11711_s5  ;;  %791 = vmatpush.msra.mxu2 %v717_v26  ;;  %v1661_v16 = vld [vmem:[%s17783_s6] sm:$0xff]  ;;  %s11718_s18 = smov 126   ;;  %s11719_s24 = smov 66  }
  0x3d   : > { %811 = vmatpush.msra.mxu3 %v718_v27  ;;  %831 = vmatpush.msrb.mxu0 %v719_v28  ;;  %s11720_s19 = smov 2   ;;  %s10750_s23 = sshll.u32 %s19496_s28, 7 }
  0x3e   : > { %851 = vmatpush.msrb.mxu1 %v720_v29  ;;  %9304 = vmatpush.msk.msrb.mxu2 %vm17799_vm2, %v745_v30 }
  0x3f   : > { %9306 = vmatpush.msk.msrb.mxu3 %vm17799_vm2, %v746_v31  ;;  %9308 = vmatpush.msk.msra.mxu0 %vm17799_vm2, %v747_v32 }
  0x40   : > { %10877 = vrot.lane.b32.xlu1 %v11709_v6, %s11710_s26  ;;  %869 = vmatpush.msrb.mxu2 %v737_v34 }
  0x41   : > { %889 = vmatpush.msrb.mxu3 %v738_v35  ;;  %909 = vmatpush.msra.mxu0 %v739_v36 }
  0x42   : > { %10867 = vrot.lane.b32.xlu0 %v11709_v6, %s11710_s26  ;;  %870 = vmatpush.msrb.mxu2 %v729_v38 }
  0x43   : > { %890 = vmatpush.msrb.mxu3 %v730_v39  ;;  %910 = vmatpush.msra.mxu0 %v731_v40 }
  0x44   : > { %10872 = vrot.lane.b32.xlu2 %v11709_v6, %s11712_s7  ;;  %871 = vmatpush.msrb.mxu2 %v721_v42 }
  0x45   : > { %891 = vmatpush.msrb.mxu3 %v722_v43  ;;  %911 = vmatpush.msra.mxu0 %v723_v44  ;;  %v1662_v44 = vld [vmem:[%s17783_s6 + $0x8] sm:$0xff] }
  0x46   : > { %10997 = vset.pattern.permute.xlu0 %v11713_v3  ;;  %11018 = vset.pattern.permute.xlu2 %v11713_v3 }
  0x48   : > { %10907 = vrot.lane.b32.xlu1 %v11709_v6, %s11711_s5 }
  0x4a   : > { %10887 = vrot.lane.b32.xlu0 %v11709_v6, %s11711_s5 }
  0x4c   : > { %10882 = vrot.lane.b32.xlu2 %v11709_v6, %s11712_s7 }
  0x50   : > { %10917 = vrot.lane.b32.xlu1 %v11709_v6, %s11710_s26 }
  0x52   : > { %10897 = vrot.lane.b32.xlu0 %v11709_v6, %s11710_s26 }
  0x54   : > { %10892 = vrot.lane.b32.xlu2 %v11709_v6, %s11711_s5 }
  0x58   : > { %10932 = vrot.lane.b32.xlu1 %v11709_v6, %s11711_s5 }
  0x5a   : > { %10927 = vrot.lane.b32.xlu0 %v11709_v6, %s11712_s7 }
  0x5c   : > { %10902 = vrot.lane.b32.xlu2 %v11709_v6, %s11712_s7 }
  0x64   : > { %10912 = vrot.lane.b32.xlu2 %v11709_v6, %s11710_s26 }
  0x6c   : > { %10922 = vrot.lane.b32.xlu2 %v11709_v6, %s11712_s7 }
  0x74   : > { %10937 = vrot.lane.b32.xlu2 %v11709_v6, %s11711_s5 }
  0x7c   : > { %10947 = vrot.lane.b32.xlu2 %v11709_v6, %s11710_s26 }
  0x84   : > { %10957 = vrot.lane.b32.xlu2 %v11709_v6, %s11712_s7 }
  0x8c   : > { %v12029_v14 = vpop.permute.xlu2 %10842 }
  0x96   : > { %v12044_v19 = vpop.permute.xlu2 %10862 }
  0x9e   : > { %v12055_v23 = vpop.permute.xlu2 %10872 }
  0xa2   : > { %v10838_v27 = vpop.permute.xlu1 %10837 }
  0xa3   : > { %v10848_v29 = vpop.permute.xlu0 %10847 }
  0xa6   : > { %v12074_v32 = vpop.permute.xlu2 %10882 }
  0xaa   : > { %v12082_v35 = vpop.permute.xlu1 %10857 }
  0xac   : > { %v12084_v36 = vpop.permute.xlu0 %10852 }
  0xae   : > { %v12094_v39 = vpop.permute.xlu2 %10892 }
  0xb2   : > { %v12096_v40 = vpop.permute.xlu1 %10877 }
  0xb3   : > { %v671_v8 = vpop.f32.mrf.mxu0 }
  0xb4   : > { %v672_v9 = vadd.f32 %v671_v8, %v645_v7 }
  0xb6   : > { %v675_v10 = vmul.f32 1.442695, %v672_v9  ;;  %vm674_vm4 = vcmp.gt.f32.partialorder %v672_v9, 0.0  ;;  %v12105_v43 = vpop.permute.xlu2 %10902 }
  0xb8   : > { %11419 = vpow2.f32 %v675_v10 }
  0xbe   : > { %v11420_v11 = vpop.eup %11419 }
  0xbf   : > { %v9292_v12 = vadd.f32 -1.0, %v11420_v11 }
  0xc1   : > { %v678_v13 = vsel %vm674_vm4, %v672_v9, %v9292_v12  ;;  %vm1441_vm4 = vcmp.eq.s32.totalorder %v12037_v17, 21 }
  0xc2   : > { %9294 = vmatmul.msk.f32.vlgmr.msra.gmra.mxu1 %vm17801_vm3, %v678_v13 }
  0xc3   : > { %9310 = vmatpush.msk.msra.mxu1 %vm17799_vm2, %v748_v33 }
  0xc5   : > { %929 = vmatpush.msra.mxu1 %v740_v37 }
  0xc7   : > { %930 = vmatpush.msra.mxu1 %v732_v41  ;;  %v12099_v41 = vpop.permute.xlu0 %10867 }
  0xc9   : > { %931 = vmatpush.msra.mxu1 %v724_v45  ;;  %v12111_v45 = vpop.permute.xlu1 %10907 }
 0x13f   : > { %v709_v47 = vpop.f32.mrf.mxu1 }
 0x140   : > { %v710_v48 = vadd.f32 %v709_v47, %v683_v46  ;;  %v12114_v47 = vpop.permute.xlu0 %10887 }
 0x142   : > { %v713_v49 = vmul.f32 1.442695, %v710_v48  ;;  %vm712_vm5 = vcmp.gt.f32.partialorder %v710_v48, 0.0 }
 0x144   : > { %11421 = vpow2.f32 %v713_v49  ;;  %v12119_v49 = vpop.permute.xlu2 %10912 }
 0x14a   : > { %v11422_v50 = vpop.eup %11421 }
 0x14b   : > { %v9295_v51 = vadd.f32 -1.0, %v11422_v50  ;;  %v1663_v50 = vld [vmem:[%s17783_s6 + $0x10] sm:$0xff] }
 0x14c   : > { %v12135_v3 = vpop.permute.xlu2 %10922 }
 0x14d   : > { %v716_v52 = vsel %vm712_vm5, %v710_v48, %v9295_v51  ;;  %vm1344_vm5 = vcmp.eq.s32.totalorder %v12037_v17, 17  ;;  %v10839_v48 = vunpack.i.l.bf16 %v10838_v27 }
 0x14e   : > { %9297 = vmatmul.msk.f32.vlgmr.msra.gmra.mxu2 %vm17801_vm3, %v716_v52  ;;  %9299 = vmatmul.msk.f32.vlgmr.msra.gmra.mxu3 %vm17801_vm3, %v716_v52 }
 0x14f   : > { %9301 = vmatmul.msk.f32.vlgmr.msrb.gmra.mxu0 %vm17801_vm3, %v716_v52  ;;  %9303 = vmatmul.msk.f32.vlgmr.msrb.gmra.mxu1 %vm17801_vm3, %v716_v52 }
 0x156   : > { %9305 = vmatmul.msk.f32.vlgmr.msrb.gmra.mxu2 %vm17801_vm3, %v716_v52  ;;  %9307 = vmatmul.msk.f32.vlgmr.msrb.gmra.mxu3 %vm17801_vm3, %v716_v52 }
 0x157   : > { %9309 = vmatmul.msk.f32.vlgmr.msra.gmra.mxu0 %vm17801_vm3, %v716_v52  ;;  %9311 = vmatmul.msk.f32.vlgmr.msra.gmra.mxu1 %vm17801_vm3, %v716_v52  ;;  %v10849_v52 = vunpack.i.l.bf16 %v10848_v29 }
 0x1cc   : > { %v833_v56 = vpop.f32.mrf.mxu0  ;;  %v853_v60 = vpop.f32.mrf.mxu1 }
 0x1cd   : > { %v11983_v57 = vperm.slane %v833_v56, 0  ;;  %v11992_v63 = vperm.slane %v853_v60, 0  ;;  %v10840_v60 = vunpack.i.h.bf16 %v10838_v27 }
 0x1cf   : > { %v1181_v58 = vsel %vm1177_vm6, %v11983_v57, 0.0  ;;  %v1153_v59 = vsel %vm1149_vm7, %v11983_v57, 0.0  ;;  %v1278_v1 = vsel %vm1274_vm9, %v11992_v63, 0.0  ;;  %v1209_v2 = vsel %vm1205_vm10, %v11983_v57, 0.0 }
 0x1d0   : > { %1190 = vrot.lane.b32.xlu0 %v1181_v58, %s11712_s7  ;;  %1162 = vrot.lane.b32.xlu1 %v1153_v59, %s11710_s26  ;;  %v1306_v5 = vsel %vm1302_vm12, %v11992_v63, 0.0  ;;  %v1250_v7 = vsel %vm1246_vm13, %v11992_v63, 0.0  ;;  %vm1567_vm6 = vcmp.eq.s32.totalorder %v12058_v25, 26  ;;  %vm1372_vm7 = vcmp.eq.s32.totalorder %v12037_v17, 18  ;;  %v12125_v58 = vpop.permute.xlu1 %10917  ;;  %v12127_v59 = vpop.permute.xlu0 %10897 }
 0x1d1   : > { %v813_v61 = vpop.f32.mrf.mxu3  ;;  %v793_v8 = vpop.f32.mrf.mxu2  ;;  %vm1400_vm9 = vcmp.eq.s32.totalorder %v12037_v17, 19  ;;  %vm1469_vm10 = vcmp.eq.s32.totalorder %v12037_v17, 22  ;;  %vm1539_vm12 = vcmp.eq.s32.totalorder %v12058_v25, 25  ;;  %vm1595_vm13 = vcmp.eq.s32.totalorder %v12058_v25, 27 }
 0x1d2   : > { %v11990_v62 = vperm.slane %v813_v61, 0  ;;  %v12011_v9 = vperm.slane %v793_v8, 0  ;;  %v10850_v8 = vunpack.i.h.bf16 %v10848_v29 }
 0x1d4   : > { %v1055_v0 = vsel %vm1051_vm8, %v11990_v62, 0.0  ;;  %v1111_v4 = vsel %vm1107_vm11, %v11990_v62, 0.0  ;;  %v1014_v10 = vsel %vm1010_vm14, %v12011_v9, 0.0  ;;  %v958_v11 = vsel %vm954_vm15, %v12011_v9, 0.0  ;;  %v913_v24 = vpop.f32.mrf.mxu0  ;;  %v12071_v31 = vpop.f32.mrf.mxu1 }
 0x1d5   : > { %1063 = vrot.lane.b32.xlu2 %v1055_v0, %s11710_s26  ;;  %v1083_v12 = vsel %vm1079_vm0, %v11990_v62, 0.0  ;;  %v986_v13 = vsel %vm982_vm1, %v12011_v9, 0.0  ;;  %v12063_v28 = vperm.slane %v913_v24, 0  ;;  %v1624_v34 = vperm.slane %v12071_v31, 0  ;;  %v1664_v0 = vld [vmem:[%s17783_s6 + $0x18] sm:$0x3f] }
 0x1d6   : > { %vm1636_vm8 = vcmp.eq.s32.totalorder %v12058_v25, 29  ;;  %vm1497_vm11 = vcmp.eq.s32.totalorder %v12037_v17, 23  ;;  %vm1136_vm14 = vcmp.eq.s32.totalorder %v11979_v55, 8  ;;  %vm1233_vm15 = vcmp.eq.s32.totalorder %v11979_v55, 12 }
 0x1d7   : > { %v1571_v30 = vsel %vm1567_vm6, %v12063_v28, 0.0  ;;  %v1640_v37 = vsel %vm1636_vm8, %v1624_v34, 0.0  ;;  %v1543_v56 = vsel %vm1539_vm12, %v12063_v28, 0.0  ;;  %vm941_vm0 = vcmp.eq.s32.totalorder %v11976_v54, 0 }
 0x1d8   : > { %1287 = vrot.lane.b32.xlu0 %v1278_v1, %s11712_s7  ;;  %1218 = vrot.lane.b32.xlu1 %v1209_v2, %s11711_s5  ;;  %v10845_v1 = vunpack.i.h.bf16 %v12029_v14  ;;  %vm1038_vm1 = vcmp.eq.s32.totalorder %v11976_v54, 4 }
 0x1d9   : > { %v893_v15 = vpop.f32.mrf.mxu3  ;;  %v873_v21 = vpop.f32.mrf.mxu2 }
 0x1da   : > { %v12039_v18 = vperm.slane %v893_v15, 0  ;;  %v12052_v22 = vperm.slane %v873_v21, 0 }
 0x1dc   : > { %v1445_v20 = vsel %vm1441_vm4, %v12039_v18, 0.0  ;;  %v1348_v26 = vsel %vm1344_vm5, %v12052_v22, 0.0  ;;  %v1376_v33 = vsel %vm1372_vm7, %v12052_v22, 0.0  ;;  %v1404_v38 = vsel %vm1400_vm9, %v12052_v22, 0.0 }
 0x1dd   : > { %1119 = vrot.lane.b32.xlu2 %v1111_v4, %s11711_s5  ;;  %v1473_v42 = vsel %vm1469_vm10, %v12039_v18, 0.0  ;;  %v1501_v46 = vsel %vm1497_vm11, %v12039_v18, 0.0  ;;  %v1599_v4 = vsel %vm1595_vm13, %v12063_v28, 0.0 }
 0x1e0   : > { %1315 = vrot.lane.b32.xlu0 %v1306_v5, %s11711_s5  ;;  %1259 = vrot.lane.b32.xlu1 %v1250_v7, %s11710_s26  ;;  %v12139_v5 = vpop.permute.xlu1 %10932  ;;  %v12141_v7 = vpop.permute.xlu0 %10927 }
 0x1e5   : > { %10967 = vrot.lane.b32.xlu2 %v11709_v6, %s11711_s5 }
 0x1e8   : > { %1022 = vrot.lane.b32.xlu1 %v1014_v10, %s11711_s5  ;;  %966 = vrot.lane.b32.xlu0 %v958_v11, %s11710_s26 }
 0x1ed   : > { %10983 = vrot.lane.b32.xlu2 %v11709_v6, %s11711_s5 }
 0x1f0   : > { %1091 = vrot.lane.b32.xlu1 %v1083_v12, %s11712_s7  ;;  %994 = vrot.lane.b32.xlu0 %v986_v13, %s11712_s7  ;;  %v12144_v12 = vpop.permute.xlu2 %10937  ;;  %v1141_v13 = vsel %vm1136_vm14, %v11983_v57, 0.0  ;;  %v10859_v57 = vunpack.i.l.bf16 %v12082_v35 }
 0x1f5   : > { %10993 = vrot.lane.b32.xlu2 %v11709_v6, %s11710_s26 }
 0x1f8   : > { %1667 = vperm.xlu1 %10976, %v1661_v16   ;;  %10942 = vrot.lane.b32.xlu0 %v11709_v6, %s11710_s26  ;;  %v12147_v21 = vpop.permute.xlu2 %10947 }
 0x1fd   : > { %1455 = vrot.lane.b32.xlu2 %v1445_v20, %s11710_s26 }
 0x200   : > { %1580 = vrot.lane.b32.xlu1 %v11709_v6, %s11712_s7  ;;  %10952 = vrot.lane.b32.xlu0 %v11709_v6, %s11712_s7 }
 0x205   : > { %1608 = vrot.lane.b32.xlu2 %v11709_v6, %s11711_s5 }
 0x208   : > { %10962 = vrot.lane.b32.xlu0 %v11709_v6, %s11711_s5  ;;  %1358 = vrot.lane.b32.xlu1 %v1348_v26, %s11710_s26 }
 0x20d   : > { %1582 = vrot.lane.b32.xlu2 %v1571_v30, %s11712_s7  ;;  %v1238_v30 = vsel %vm1233_vm15, %v11992_v63, 0.0  ;;  %v946_v63 = vsel %vm941_vm0, %v12011_v9, 0.0  ;;  %v10894_v9 = vunpack.i.l.bf16 %v12094_v39  ;;  %vm1331_vm0 = vcmp.eq.s32.totalorder %v12037_v17, 16 }
 0x210   : > { %10972 = vrot.lane.b32.xlu0 %v11709_v6, %s11710_s26  ;;  %1386 = vrot.lane.b32.xlu1 %v1376_v33, %s11712_s7 }
 0x215   : > { %1651 = vrot.lane.b32.xlu2 %v1640_v37, %s11710_s26 }
 0x218   : > { %10978 = vrot.lane.b32.xlu0 %v11709_v6, %s11712_s7  ;;  %1414 = vrot.lane.b32.xlu1 %v1404_v38, %s11711_s5 }
 0x220   : > { %10988 = vrot.lane.b32.xlu0 %v11709_v6, %s11710_s26  ;;  %1483 = vrot.lane.b32.xlu1 %v1473_v42, %s11712_s7  ;;  %v10844_v6 = vunpack.i.l.bf16 %v12029_v14  ;;  %v12153_v42 = vpop.permute.xlu2 %10957 }
 0x222   : > { %v1007_v51 = vadd.f32 %v10844_v6, %v10839_v48 }
 0x224   : > { %v1035_v61 = vadd.f32 %v10849_v52, %v1007_v51  ;;  %v10869_v51 = vunpack.i.l.bf16 %v12099_v41 }
 0x226   : > { %v1076_v2 = vadd.f32 %v10840_v60, %v1035_v61  ;;  %v10874_v60 = vunpack.i.l.bf16 %v12055_v23 }
 0x228   : > { %1672 = vperm.xlu0 %10997, %v1662_v44   ;;  %1511 = vrot.lane.b32.xlu1 %v1501_v46, %s11711_s5  ;;  %v1104_v10 = vadd.f32 %v10845_v1, %v1076_v2  ;;  %v10855_v44 = vunpack.i.h.bf16 %v12084_v36  ;;  %v10864_v46 = vunpack.i.l.bf16 %v12044_v19 }
 0x22a   : > { %v1132_v11 = vadd.f32 %v10850_v8, %v1104_v10  ;;  %v1008_v6 = vadd.f32 %v10859_v57, %v10855_v44  ;;  %v10879_v8 = vunpack.i.l.bf16 %v12096_v40 }
 0x22c   : > { %v1145_v16 = vadd.f32 %v1141_v13, %v1132_v11  ;;  %v1036_v52 = vadd.f32 %v10864_v46, %v1008_v6  ;;  %v10889_v11 = vunpack.i.l.bf16 %v12114_v47  ;;  %v10900_v46 = vunpack.i.h.bf16 %v12127_v59 }
 0x22e   : > { %v1077_v61 = vadd.f32 %v10869_v51, %v1036_v52 }
 0x230   : > { %1677 = vperm.xlu0 %10997, %v1663_v50   ;;  %1554 = vrot.lane.b32.xlu1 %v1543_v56, %s11710_s26  ;;  %v1064_v56 = vpop.permute.xlu2 %1063  ;;  %v1105_v13 = vadd.f32 %v10874_v60, %v1077_v61  ;;  %v10860_v60 = vunpack.i.h.bf16 %v12082_v35  ;;  %v12188_v35 = vand.u32 127, %v936_v53 }
 0x232   : > { %18257 = vst [vmem:[#allocation18_spill] sm:$0xff] %v12188_v35 }
 0x238   : > { %1682 = vperm.xlu0 %10997, %v1664_v0   ;;  %1610 = vrot.lane.b32.xlu1 %v1599_v4, %s11711_s5  ;;  %v10884_v4 = vunpack.i.l.bf16 %v12074_v32 }
 0x242   : > { %v1191_v14 = vpop.permute.xlu0 %1190  ;;  %v1163_v15 = vpop.permute.xlu1 %1162 }
 0x243   : > { %v1173_v20 = vadd.f32 %v1163_v15, %v1145_v16  ;;  %v1043_v15 = vsel %vm1038_vm1, %v11990_v62, 0.0  ;;  %v1009_v16 = vadd.f32 %v10884_v4, %v10879_v8  ;;  %v10854_v62 = vunpack.i.l.bf16 %v12084_v36 }
 0x244   : > { %v10875_v36 = vunpack.i.h.bf16 %v12055_v23  ;;  %v10914_v23 = vunpack.i.l.bf16 %v12119_v49  ;;  %vm1428_vm1 = vcmp.eq.s32.totalorder %v12037_v17, 20 }
 0x245   : > { %v1201_v24 = vadd.f32 %v1191_v14, %v1173_v20  ;;  %v1120_v20 = vpop.permute.xlu2 %1119  ;;  %v1037_v6 = vadd.f32 %v10894_v9, %v1009_v16  ;;  %v10920_v9 = vunpack.i.h.bf16 %v12125_v58 }
 0x24a   : > { %v1288_v26 = vpop.permute.xlu0 %1287  ;;  %v1219_v27 = vpop.permute.xlu1 %1218 }
 0x24b   : > { %v1229_v29 = vadd.f32 %v1219_v27, %v1201_v24  ;;  %v10880_v27 = vunpack.i.h.bf16 %v12096_v40  ;;  %v10905_v40 = vunpack.i.h.bf16 %v12105_v43 }
 0x24d   : > { %v1242_v33 = vadd.f32 %v1238_v30, %v1229_v29  ;;  %v1133_v29 = vadd.f32 %v10889_v11, %v1105_v13  ;;  %v12180_v8 = vpop.permute.xlu2 %10967 }
 0x24f   : > { %v1174_v51 = vadd.f32 %v10880_v27, %v1133_v29 }
 0x252   : > { %v12151_v37 = vpop.permute.xlu0 %1315  ;;  %v1260_v38 = vpop.permute.xlu1 %1259 }
 0x253   : > { %v1270_v52 = vadd.f32 %v1260_v38, %v1242_v33  ;;  %v12191_v38 = vmul.u32 2, %v12058_v25 }
 0x255   : > { %18258 = vst [vmem:[#allocation19_spill] sm:$0xff] %v12191_v38 }
 0x25a   : > { %v1023_v48 = vpop.permute.xlu1 %1022  ;;  %v967_v50 = vpop.permute.xlu0 %966 }
 0x25b   : > { %v978_v0 = vadd.f32 %v967_v50, %v946_v63 }
 0x262   : > { %v1092_v1 = vpop.permute.xlu1 %1091  ;;  %v995_v2 = vpop.permute.xlu0 %994 }
 0x263   : > { %v1006_v10 = vadd.f32 %v995_v2, %v978_v0  ;;  %v10865_v0 = vunpack.i.h.bf16 %v12044_v19  ;;  %v10895_v2 = vunpack.i.h.bf16 %v12094_v39  ;;  %v10870_v19 = vunpack.i.h.bf16 %v12099_v41 }
 0x264   : > { %v10910_v39 = vunpack.i.h.bf16 %v12111_v45 }
 0x265   : > { %v1034_v14 = vadd.f32 %v1023_v48, %v1006_v10  ;;  %v10885_v48 = vunpack.i.h.bf16 %v12074_v32 }
 0x267   : > { %v1047_v24 = vadd.f32 %v1043_v15, %v1034_v14  ;;  %v1202_v4 = vadd.f32 %v10885_v48, %v1174_v51  ;;  %v1718_v14 = vsub.s32 %v12188_v35, %v12191_v38  ;;  %v12200_v15 = vmul.u32 2, %v12037_v17 }
 0x269   : > { %v1075_v30 = vadd.f32 %v1064_v56, %v1047_v24  ;;  %v1078_v56 = vadd.f32 %v10900_v46, %v1037_v6  ;;  %18259 = vst [vmem:[#allocation20_spill] sm:$0xff] %v12200_v15  ;;  %v1230_v53 = vadd.f32 %v10895_v2, %v1202_v4  ;;  %vm1722_vm4 = vcmp.eq.s32.totalorder %v1718_v14, 0 }
 0x26a   : > { %v12169_v57 = vpop.permute.xlu1 %1667  ;;  %v12171_v44 = vpop.permute.xlu0 %10942  ;;  %vm1726_vm5 = vcmp.eq.s32.totalorder %v1718_v14, 1  ;;  %v10919_v24 = vunpack.i.l.bf16 %v12125_v58  ;;  %v17860_v46 = vmov 1.0   ;;  %v10924_v6 = vunpack.i.l.bf16 %v12135_v3 }
 0x26b   : > { %v1103_v50 = vadd.f32 %v1092_v1, %v1075_v30  ;;  %v1298_v1 = vadd.f32 %v1288_v26, %v1270_v52  ;;  %v1106_v11 = vadd.f32 %v10905_v40, %v1078_v56  ;;  %v10890_v26 = vunpack.i.h.bf16 %v12114_v47  ;;  %vm12210_vm6 = vmor %vm1722_vm4, %vm1726_vm5  ;;  %v12237_v56 = vpop.permute.xlu2 %10983 }
 0x26c   : > { %v12207_v47 = vmul.u32 2, %v11979_v55  ;;  %v18261_v30 = vmov 0  ;;  %9320 = vmatpush.msk.msra.mxu2 %vm12210_vm6, %v17860_v46  ;;  %v12220_v55 = vmul.u32 2, %v11976_v54  ;;  %v1271_v58 = vadd.f32 %v10914_v23, %v1230_v53 }
 0x26d   : > { %v1131_v63 = vadd.f32 %v1120_v20, %v1103_v50  ;;  %v1326_v16 = vadd.f32 %v12151_v37, %v1298_v1  ;;  %v1717_v20 = vsub.s32 %v12188_v35, %v12200_v15  ;;  %v1134_v27 = vadd.f32 %v10910_v39, %v1106_v11 }
 0x26e   : > { %18260 = vst [vmem:[#allocation21_spill] sm:$0xff] %v12207_v47  ;;  %v18262_v30 = vsel %vm12210_vm6, 4294967295, %v18261_v30  ;;  %v1716_v37 = vsub.s32 %v12188_v35, %v12207_v47  ;;  %v10899_v50 = vunpack.i.l.bf16 %v12127_v59  ;;  %v10904_v59 = vunpack.i.l.bf16 %v12105_v43 }
 0x26f   : > { %v1172_v61 = vadd.f32 %v10854_v62, %v1131_v63  ;;  %18263 = vst [vmem:[#allocation22_spill] sm:$0xff] %v18262_v30  ;;  %vm1721_vm7 = vcmp.eq.s32.totalorder %v1717_v20, 0  ;;  %vm1725_vm8 = vcmp.eq.s32.totalorder %v1717_v20, 1  ;;  %v18265_v62 = vmov 0 }
 0x270   : > { %18264 = vst [vmem:[#allocation23_spill] sm:$0xff] %v12220_v55  ;;  %vm12224_vm9 = vmor %vm1721_vm7, %vm1725_vm8  ;;  %v1367_v51 = vadd.f32 %v10920_v9, %v1326_v16  ;;  %vm1720_vm10 = vcmp.eq.s32.totalorder %v1716_v37, 0  ;;  %vm1724_vm11 = vcmp.eq.s32.totalorder %v1716_v37, 1  ;;  %v10930_v40 = vunpack.i.h.bf16 %v12141_v7 }
 0x271   : > { %v1200_v32 = vadd.f32 %v10860_v60, %v1172_v61  ;;  %v18266_v62 = vsel %vm12224_vm9, 4294967295, %v18265_v62  ;;  %9321 = vmatpush.msk.msra.mxu2 %vm12224_vm9, %v17860_v46  ;;  %v1715_v60 = vsub.s32 %v12188_v35, %v12220_v55  ;;  %vm12239_vm12 = vmor %vm1720_vm10, %vm1724_vm11  ;;  %v10929_v2 = vunpack.i.l.bf16 %v12141_v7 }
 0x272   : > { %v12183_v10 = vpop.permute.xlu1 %1580  ;;  %v12185_v33 = vpop.permute.xlu0 %10952  ;;  %18267 = vst [vmem:[#allocation24_spill] sm:$0xff] %v18266_v62  ;;  %v1175_v4 = vadd.f32 %v10919_v24, %v1134_v27  ;;  %v10909_v43 = vunpack.i.l.bf16 %v12111_v45  ;;  %v1299_v1 = vadd.f32 %v10924_v6, %v1271_v58  ;;  %v1395_v39 = vadd.f32 %v10930_v40, %v1367_v51 }
 0x273   : > { %v1228_v13 = vadd.f32 %v10865_v0, %v1200_v32  ;;  %v18268_v0 = vmov 0  ;;  %9322 = vmatpush.msk.msra.mxu2 %vm12239_vm12, %v17860_v46  ;;  %vm1719_vm13 = vcmp.eq.s32.totalorder %v1715_v60, 0  ;;  %vm1723_vm14 = vcmp.eq.s32.totalorder %v1715_v60, 1  ;;  %v12266_v58 = vpop.permute.xlu2 %10993 }
 0x274   : > { %v18269_v0 = vsel %vm12239_vm12, 4294967295, %v18268_v0  ;;  %v10934_v32 = vunpack.i.l.bf16 %v12139_v5  ;;  %vm12249_vm15 = vmor %vm1719_vm13, %vm1723_vm14  ;;  %v10915_v7 = vunpack.i.h.bf16 %v12119_v49  ;;  %v10940_v45 = vunpack.i.h.bf16 %v12144_v12 }
 0x275   : > { %v1269_v41 = vadd.f32 %v10870_v19, %v1228_v13  ;;  %18270 = vst [vmem:[#allocation25_spill] sm:$0xff] %v18269_v0  ;;  %v18271_v19 = vmov 0  ;;  %9323 = vmatpush.msk.msra.mxu2 %vm12249_vm15, %v17860_v46  ;;  %v10939_v13 = vunpack.i.l.bf16 %v12144_v12  ;;  %v10925_v23 = vunpack.i.h.bf16 %v12135_v3 }
 0x276   : > { %v18272_v19 = vsel %vm12249_vm15, 4294967295, %v18271_v19  ;;  %v1327_v14 = vadd.f32 %v10934_v32, %v1299_v1  ;;  %v10949_v9 = vunpack.i.l.bf16 %v12147_v21  ;;  %v1423_v16 = vadd.f32 %v10940_v45, %v1395_v39 }
 0x277   : > { %v1297_v29 = vadd.f32 %v10875_v36, %v1269_v41  ;;  %18273 = vst [vmem:[#allocation26_spill] sm:$0xff] %v18272_v19  ;;  %v10945_v41 = vunpack.i.h.bf16 %v12171_v44  ;;  %v1336_v20 = vsel %vm1331_vm0, %v12052_v22, 0.0  ;;  %v10935_v27 = vunpack.i.h.bf16 %v12139_v5 }
 0x278   : > { %v10955_v12 = vunpack.i.h.bf16 %v12185_v33  ;;  %v10944_v3 = vunpack.i.l.bf16 %v12171_v44  ;;  %v1464_v60 = vadd.f32 %v10949_v9, %v1423_v16  ;;  %v10954_v22 = vunpack.i.l.bf16 %v12185_v33 }
 0x279   : > { %v1325_v48 = vadd.f32 %v10890_v26, %v1297_v29  ;;  %v1203_v26 = vadd.f32 %v10929_v2, %v1175_v4  ;;  %v10950_v1 = vunpack.i.h.bf16 %v12147_v21  ;;  %v10969_v32 = vunpack.i.l.bf16 %v12180_v8 }
 0x27a   : > { %v12228_v52 = vpop.permute.xlu0 %10962  ;;  %v1359_v63 = vpop.permute.xlu1 %1358  ;;  %vm1739_vm4 = vcmask 261120   ;;  %vm1526_vm7 = vcmp.eq.s32.totalorder %v12058_v25, 24  ;;  %vm1623_vm10 = vcmp.eq.s32.totalorder %v12058_v25, 28  ;;  %vm17800_vm14 = vcmask 7168  }
 0x27b   : > { %v1366_v61 = vadd.f32 %v10899_v50, %v1325_v48  ;;  %v1231_v37 = vadd.f32 %v10939_v13, %v1203_v26  ;;  %v1340_v50 = vadd.f32 %v1336_v20, %v1327_v14  ;;  %v10959_v48 = vunpack.i.l.bf16 %v12153_v42  ;;  %v1456_v14 = vpop.permute.xlu2 %1455 }
 0x27c   : > { %v10965_v40 = vunpack.i.h.bf16 %v12228_v52  ;;  %v10964_v4 = vunpack.i.l.bf16 %v12228_v52  ;;  %v10960_v52 = vunpack.i.h.bf16 %v12153_v42  ;;  %vm1814_vm0 = vcmask 531456  }
 0x27d   : > { %v1394_v36 = vadd.f32 %v10904_v59, %v1366_v61  ;;  %v1272_v51 = vadd.f32 %v10945_v41, %v1231_v37  ;;  %v1368_v5 = vadd.f32 %v1359_v63, %v1340_v50  ;;  %v1492_v33 = vadd.f32 %v10959_v48, %v1464_v60 }
 0x27e   : > { %v1433_v63 = vsel %vm1428_vm1, %v12039_v18, 0.0 }
 0x27f   : > { %v1422_v11 = vadd.f32 %v10909_v43, %v1394_v36  ;;  %v1300_v61 = vadd.f32 %v10955_v12, %v1272_v51  ;;  %v1520_v21 = vadd.f32 %v10969_v32, %v1492_v33  ;;  %v1531_v33 = vsel %vm1526_vm7, %v12063_v28, 0.0 }
 0x281   : > { %v1463_v53 = vadd.f32 %v10915_v7, %v1422_v11  ;;  %v1328_v7 = vadd.f32 %v10965_v40, %v1300_v61 }
 0x282   : > { %v10973_v49 = vpop.permute.xlu0 %10972  ;;  %v1387_v24 = vpop.permute.xlu1 %1386 }
 0x283   : > { %v1491_v29 = vadd.f32 %v10925_v23, %v1463_v53  ;;  %v10974_v43 = vunpack.i.l.bf16 %v10973_v49  ;;  %v1396_v44 = vadd.f32 %v1387_v24, %v1368_v5  ;;  %v10975_v26 = vunpack.i.h.bf16 %v10973_v49  ;;  %v1609_v48 = vpop.permute.xlu2 %1608 }
 0x284   : > { %v10985_v49 = vunpack.i.l.bf16 %v12237_v56 }
 0x285   : > { %v1519_v6 = vadd.f32 %v10935_v27, %v1491_v29  ;;  %v1369_v17 = vadd.f32 %v10974_v43, %v1328_v7  ;;  %v1561_v16 = vadd.f32 %v10975_v26, %v1520_v21  ;;  %v10970_v29 = vunpack.i.h.bf16 %v12180_v8 }
 0x286   : > { %v10996_v7 = vunpack.i.h.bf16 %v12266_v58 }
 0x287   : > { %v1560_v59 = vadd.f32 %v10944_v3, %v1519_v6  ;;  %v1397_v41 = vadd.f32 %v10960_v52, %v1369_v17 }
 0x289   : > { %v1588_v2 = vadd.f32 %v10954_v22, %v1560_v59  ;;  %v1425_v3 = vadd.f32 %v10970_v29, %v1397_v41  ;;  %v10995_v22 = vunpack.i.l.bf16 %v12266_v58 }
 0x28a   : > { %v10979_v36 = vpop.permute.xlu0 %10978  ;;  %v1415_v39 = vpop.permute.xlu1 %1414 }
 0x28b   : > { %v1616_v11 = vadd.f32 %v10964_v4, %v1588_v2  ;;  %v1424_v45 = vadd.f32 %v1415_v39, %v1396_v44  ;;  %v10980_v9 = vunpack.i.l.bf16 %v10979_v36  ;;  %v10981_v51 = vunpack.i.h.bf16 %v10979_v36 }
 0x28c   : > { %v10986_v44 = vunpack.i.h.bf16 %v12237_v56  ;;  %v1583_v56 = vpop.permute.xlu2 %1582 }
 0x28d   : > { %v1657_v13 = vadd.f32 %v10950_v1, %v1616_v11  ;;  %v1437_v23 = vadd.f32 %v1433_v63, %v1424_v45  ;;  %v1589_v37 = vadd.f32 %v10980_v9, %v1561_v16  ;;  %v1628_v9 = vsel %vm1623_vm10, %v1624_v34, 0.0 }
 0x28f   : > { %v1685_v53 = vadd.f32 %v12169_v57, %v1657_v13  ;;  %v1465_v6 = vadd.f32 %v1456_v14, %v1437_v23  ;;  %v1617_v50 = vadd.f32 %v10985_v49, %v1589_v37 }
 0x291   : > { %v1693_v20 = vmul.f32 1.442695, %v1685_v53  ;;  %vm1689_vm5 = vcmp.gt.f32.partialorder %v1685_v53, 0.0 }
 0x292   : > { %v10989_v24 = vpop.permute.xlu0 %10988  ;;  %v1484_v27 = vpop.permute.xlu1 %1483 }
 0x293   : > { %v10990_v18 = vunpack.i.l.bf16 %v10989_v24  ;;  %11423 = vpow2.f32 %v1693_v20  ;;  %v10991_v12 = vunpack.i.h.bf16 %v10989_v24  ;;  %v1493_v60 = vadd.f32 %v1484_v27, %v1465_v6 }
 0x294   : > { %v1652_v41 = vpop.permute.xlu2 %1651 }
 0x295   : > { %v1466_v42 = vadd.f32 %v10990_v18, %v1425_v3  ;;  %v1658_v59 = vadd.f32 %v10991_v12, %v1617_v50 }
 0x297   : > { %v1494_v61 = vadd.f32 %v10981_v51, %v1466_v42 }
 0x299   : > { %v11424_v57 = vpop.eup %11423  ;;  %v1522_v39 = vadd.f32 %v10986_v44, %v1494_v61 }
 0x29a   : > { %v1673_v40 = vpop.permute.xlu0 %1672  ;;  %v1512_v5 = vpop.permute.xlu1 %1511  ;;  %v9312_v8 = vadd.f32 -1.0, %v11424_v57 }
 0x29b   : > { %v1686_v2 = vadd.f32 %v1673_v40, %v1658_v59  ;;  %v1521_v4 = vadd.f32 %v1512_v5, %v1493_v60  ;;  %v1535_v13 = vadd.f32 %v1531_v33, %v1522_v39  ;;  %v1994_v33 = vld [vmem:[%s17785_s8 + $0x10] sm:$0xff] }
 0x29c   : > { %v12282_v43 = vsel %vm1689_vm5, %v1685_v53, %v9312_v8 }
 0x29d   : > { %v1695_v1 = vmul.f32 1.442695, %v1686_v2  ;;  %v1562_v32 = vadd.f32 %v10995_v22, %v1521_v4  ;;  %9324 = vmatmul.msk.f32.vlgmr.msra.gmra.mxu2 %vm1739_vm4, %v12282_v43  ;;  %vm1690_vm8 = vcmp.gt.f32.partialorder %v1686_v2, 0.0 }
 0x29f   : > { %11425 = vpow2.f32 %v1695_v1  ;;  %v1590_v36 = vadd.f32 %v12183_v10, %v1562_v32 }
 0x2a1   : > { %v1618_v11 = vadd.f32 %v1609_v48, %v1590_v36 }
 0x2a2   : > { %v1555_v45 = vpop.permute.xlu1 %1554  ;;  %v1678_v26 = vpop.permute.xlu0 %1677 }
 0x2a3   : > { %v1659_v63 = vadd.f32 %v10996_v7, %v1618_v11  ;;  %v1563_v52 = vadd.f32 %v1555_v45, %v1535_v13  ;;  %v1992_v45 = vld [vmem:[%s17785_s8] sm:$0xff] }
 0x2a4   : > { %v1819_v13 = vld [vmem:[#allocation4] sm:$0xff] }
 0x2a5   : > { %v11426_v17 = vpop.eup %11425  ;;  %v1687_v23 = vadd.f32 %v1678_v26, %v1659_v63  ;;  %v1591_v58 = vadd.f32 %v1583_v56, %v1563_v52  ;;  %v1995_v63 = vld [vmem:[%s17785_s8 + $0x18] sm:$0x3f]  ;;  %v1820_v56 = vld [vmem:[#allocation4 + $0x8] sm:$0xff]  ;;  %v1821_v26 = vld [vmem:[#allocation4 + $0x10] sm:$0xff] }
 0x2a6   : > { %v9313_v14 = vadd.f32 -1.0, %v11426_v17 }
 0x2a7   : > { %v1697_v53 = vmul.f32 1.442695, %v1687_v23  ;;  %vm1691_vm11 = vcmp.gt.f32.partialorder %v1687_v23, 0.0 }
 0x2a8   : > { %v1706_v10 = vsel %vm1690_vm8, %v1686_v2, %v9313_v14 }
 0x2a9   : > { %11427 = vpow2.f32 %v1697_v53  ;;  %9325 = vmatmul.msk.f32.gmra.mxu2 %vm1739_vm4, %v1706_v10  ;;  %v1822_v53 = vld [vmem:[#allocation4 + $0x18] sm:$0x3f] }
 0x2aa   : > { %v1611_v21 = vpop.permute.xlu1 %1610  ;;  %v1683_v27 = vpop.permute.xlu0 %1682 }
 0x2ab   : > { %v1619_v28 = vadd.f32 %v1611_v21, %v1591_v58  ;;  %v1824_v58 = vld [vmem:[#allocation4 + $0x20] sm:$0xff] }
 0x2ad   : > { %v1632_v16 = vadd.f32 %v1628_v9, %v1619_v28  ;;  %v1993_v9 = vld [vmem:[%s17785_s8 + $0x8] sm:$0xff] }
 0x2af   : > { %v11428_v20 = vpop.eup %11427  ;;  %v1660_v24 = vadd.f32 %v1652_v41, %v1632_v16 }
 0x2b0   : > { %v9314_v29 = vadd.f32 -1.0, %v11428_v20  ;;  %v1825_v20 = vld [vmem:[#allocation4 + $0x28] sm:$0xff] }
 0x2b1   : > { %v1688_v37 = vadd.f32 %v1683_v27, %v1660_v24  ;;  %v1930_v24 = vld [vmem:[#allocation4 + $0x40] sm:$0xff] }
 0x2b2   : > { %v1707_v18 = vsel %vm1691_vm11, %v1687_v23, %v9314_v29  ;;  %v1826_v29 = vld [vmem:[#allocation4 + $0x30] sm:$0xff] }
 0x2b3   : > { %9326 = vmatmul.msk.f32.gmra.mxu2 %vm1739_vm4, %v1707_v18  ;;  %v1699_v25 = vmul.f32 1.442695, %v1688_v37  ;;  %vm1692_vm13 = vcmp.gt.f32.partialorder %v1688_v37, 0.0  ;;  %v11003_v57 = vpack.i.bf16 %v1706_v10, %v1707_v18 }
 0x2b5   : > { %11429 = vpow2.f32 %v1699_v25  ;;  %v1932_v25 = vld [vmem:[#allocation4 + $0x50] sm:$0xff] }
 0x2bb   : > { %v11430_v49 = vpop.eup %11429 }
 0x2bc   : > { %v9315_v12 = vadd.f32 -1.0, %v11430_v49  ;;  %v1933_v49 = vld [vmem:[#allocation4 + $0x58] sm:$0x3f] }
 0x2be   : > { %v1708_v3 = vsel %vm1692_vm13, %v1688_v37, %v9315_v12  ;;  %v1931_v37 = vld [vmem:[#allocation4 + $0x48] sm:$0xff]  ;;  %v2043_v12 = vadd.s32 56, %v11976_v54 }
 0x2bf   : > { %1803 = vrot.lane.b32.xlu2 %v1708_v3, %s11715_s30  ;;  %9327 = vmatmul.msk.f32.gmra.mxu2 %vm1739_vm4, %v1708_v3 }
 0x319   : > { %v1804_v48 = vpop.permute.xlu2 %1803 }
 0x320   : > { %v1769_v31 = vpop.f32.mrf.mxu2 }
 0x321   : > { %1785 = vrot.lane.b32.xlu2 %v1769_v31, %s11716_s1  ;;  %v2042_v31 = vadd.s32 48, %v11976_v54 }
 0x32c   : > { %v1772_v34 = vpop.f32.mrf.mxu2 }
 0x336   : > { %v1775_v42 = vpop.f32.mrf.mxu2 }
 0x337   : > { %v10998_v6 = vpack.i.bf16 %v1772_v34, %v1775_v42  ;;  %v12349_v42 = vmul.u32 2, %v2042_v31 }
 0x339   : > { %10999 = vrot.lane.b32.xlu0 %v10998_v6, %s11716_s1  ;;  %18275 = vst [vmem:[#allocation28_spill] sm:$0xff] %v12349_v42  ;;  %v2041_v6 = vadd.s32 40, %v11976_v54 }
 0x341   : > { %1797 = vrot.lane.b32.xlu0 %v12282_v43, %s11715_s30 }
 0x342   : > { %v1778_v50 = vpop.f32.mrf.mxu2 }
 0x343   : > { %1791 = vrot.lane.b32.xlu1 %v1778_v50, %s11716_s1  ;;  %v2050_v50 = vsub.s32 %v12188_v35, %v12349_v42 }
 0x345   : > { %vm2054_vm7 = vcmp.eq.s32.totalorder %v2050_v50, 0  ;;  %vm2058_vm8 = vcmp.eq.s32.totalorder %v2050_v50, 1 }
 0x346   : > { %vm12366_vm10 = vmor %vm2054_vm7, %vm2058_vm8  ;;  %vm2072_vm8 = vcmask 523264  }
 0x34b   : > { %11004 = vrot.lane.b32.xlu1 %v11003_v57, %s11715_s30  ;;  %v12354_v57 = vmul.u32 2, %v2041_v6  ;;  %s19493_s30 = sld [smem:[#allocation161_spill]] }
 0x34d   : > { %18276 = vst [vmem:[#allocation29_spill] sm:$0xff] %v12354_v57 }
 0x351   : > { %s17743_s26 = scalar_lea.vmem %s19493_s30, %s10750_s23 }
 0x37b   : > { %v1786_v60 = vpop.permute.xlu2 %1785 }
 0x37c   : > { %v1810_v59 = vsel %vm17800_vm14, %v12282_v43, %v1786_v60  ;;  %v2049_v60 = vsub.s32 %v12188_v35, %v12354_v57 }
 0x37e   : > { %vm2053_vm11 = vcmp.eq.s32.totalorder %v2049_v60, 0  ;;  %vm2057_vm13 = vcmp.eq.s32.totalorder %v2049_v60, 1 }
 0x3ab   : > { %v11000_v51 = vpop.permute.xlu0 %10999 }
 0x3ac   : > { %v11002_v2 = vunpack.i.h.bf16 %v11000_v51  ;;  %v11001_v4 = vunpack.i.l.bf16 %v11000_v51  ;;  %v2040_v51 = vadd.s32 32, %v11976_v54 }
 0x3ae   : > { %v1811_v32 = vsel %vm17800_vm14, %v1706_v10, %v11002_v2  ;;  %v1812_v36 = vsel %vm17800_vm14, %v1707_v18, %v11001_v4  ;;  %v1827_v18 = vld [vmem:[#allocation4 + $0x38] sm:$0x3f] }
 0x3b3   : > { %v1798_v22 = vpop.permute.xlu0 %1797 }
 0x3b4   : > { %v1815_v40 = vsel %vm1814_vm0, %v1810_v59, %v1798_v22  ;;  %v18280_v59 = vmov 0  ;;  %v12370_v22 = vmul.u32 2, %v2040_v51 }
 0x3b5   : > { %1832 = vrot.lane.b32.xlu0 %v1815_v40, %s11717_s22  ;;  %v1792_v5 = vpop.permute.xlu1 %1791  ;;  %v18281_v59 = vsel %vm12366_vm10, 4294967295, %v18280_v59 }
 0x3b6   : > { %v1813_v8 = vsel %vm17800_vm14, %v1708_v3, %v1792_v5  ;;  %v12344_v3 = vmul.u32 2, %v2043_v12  ;;  %18282 = vst [vmem:[#allocation31_spill] sm:$0xff] %v18281_v59  ;;  %v2048_v5 = vsub.s32 %v12188_v35, %v12370_v22 }
 0x3b7   : > { %v1818_v61 = vsel %vm1814_vm0, %v1813_v8, %v1804_v48  ;;  %v18277_v48 = vmov 0  ;;  %18283 = vst [vmem:[#allocation32_spill] sm:$0xff] %v12370_v22  ;;  %v18287_v8 = vmov 0 }
 0x3b8   : > { %1838 = vrot.lane.b32.xlu1 %v1818_v61, %s11717_s22  ;;  %9333 = vmatpush.msk.msrb.mxu0 %vm17799_vm2, %v1818_v61  ;;  %18274 = vst [vmem:[#allocation27_spill] sm:$0xff] %v12344_v3  ;;  %v2051_v34 = vsub.s32 %v12188_v35, %v12344_v3 }
 0x3ba   : > { %vm2055_vm1 = vcmp.eq.s32.totalorder %v2051_v34, 0  ;;  %vm2059_vm4 = vcmp.eq.s32.totalorder %v2051_v34, 1 }
 0x3bb   : > { %vm12356_vm5 = vmor %vm2055_vm1, %vm2059_vm4  ;;  %vm2052_vm1 = vcmp.eq.s32.totalorder %v2048_v5, 0  ;;  %vm2056_vm4 = vcmp.eq.s32.totalorder %v2048_v5, 1 }
 0x3bc   : > { %v18278_v48 = vsel %vm12356_vm5, 4294967295, %v18277_v48  ;;  %9351 = vmatpush.msk.msrb.mxu2 %vm12356_vm5, %v17860_v46  ;;  %vm12384_vm7 = vmor %vm2052_vm1, %vm2056_vm4 }
 0x3bd   : > { %1934 = vrot.lane.b32.xlu0 %v1815_v40, %s11718_s18  ;;  %v11005_v43 = vpop.permute.xlu1 %11004  ;;  %18279 = vst [vmem:[#allocation30_spill] sm:$0xff] %v18278_v48  ;;  %v18288_v8 = vsel %vm12384_vm7, 4294967295, %v18287_v8 }
 0x3be   : > { %v11007_v44 = vunpack.i.h.bf16 %v11005_v43  ;;  %v11006_v1 = vunpack.i.l.bf16 %v11005_v43  ;;  %9352 = vmatpush.msk.msrb.mxu2 %vm12366_vm10, %v17860_v46  ;;  %18289 = vst [vmem:[#allocation34_spill] sm:$0xff] %v18288_v8  ;;  %vm18324_vm10 = vcmask 244736  }
 0x3c0   : > { %1940 = vrot.lane.b32.xlu1 %v1818_v61, %s11718_s18  ;;  %v1817_v39 = vsel %vm1814_vm0, %v1812_v36, %v11006_v1  ;;  %v1816_v7 = vsel %vm1814_vm0, %v1811_v32, %v11007_v44  ;;  %vm12375_vm0 = vmor %vm2053_vm11, %vm2057_vm13 }
 0x3c1   : > { %1913 = vmatpush.msrb.mxu0 %v1817_v39  ;;  %v11008_v11 = vpack.i.bf16 %v1816_v7, %v1817_v39  ;;  %9353 = vmatpush.msk.msrb.mxu2 %vm12375_vm0, %v17860_v46 }
 0x3c3   : > { %11009 = vrot.lane.b32.xlu2 %v11008_v11, %s11717_s22  ;;  %1914 = vmatpush.msrb.mxu0 %v1816_v7 }
 0x3c4   : > { %9354 = vmatpush.msk.msrb.mxu2 %vm12384_vm7, %v17860_v46 }
 0x3c5   : > { %2008 = vperm.xlu0 %10997, %v1994_v33   ;;  %1915 = vmatpush.msrb.mxu0 %v1815_v40  ;;  %v18284_v40 = vmov 0 }
 0x3c6   : > { %9334 = vmatmul.msk.f32.vlgmr.msrb.gmra.mxu0 %vm17801_vm3, %v1819_v13  ;;  %v18285_v40 = vsel %vm12375_vm0, 4294967295, %v18284_v40  ;;  %9355 = vmatpush.msk.msrb.mxu2 %vm12210_vm6, %v17860_v46 }
 0x3c7   : > { %18286 = vst [vmem:[#allocation33_spill] sm:$0xff] %v18285_v40 }
 0x3c8   : > { %1998 = vperm.xlu1 %10976, %v1992_v45   ;;  %9356 = vmatpush.msk.msrb.mxu2 %vm12224_vm9, %v17860_v46 }
 0x3ca   : > { %9357 = vmatpush.msk.msrb.mxu2 %vm12239_vm12, %v17860_v46  ;;  %vm18299_vm12 = vcmask 244736  }
 0x3cb   : > { %11014 = vrot.lane.b32.xlu2 %v11008_v11, %s11718_s18 }
 0x3cc   : > { %9358 = vmatpush.msk.msrb.mxu2 %vm12249_vm15, %v17860_v46 }
 0x3ce   : > { %9335 = vmatmul.msk.f32.gmra.mxu0 %vm17801_vm3, %v1820_v56 }
 0x3d0   : > { %2013 = vperm.xlu1 %10976, %v1995_v63  }
 0x3d3   : > { %2003 = vperm.xlu2 %11018, %v1993_v9  }
 0x3d6   : > { %9336 = vmatmul.msk.f32.gmra.mxu0 %vm17801_vm3, %v1821_v26 }
 0x3de   : > { %9337 = vmatmul.msk.f32.gmra.mxu0 %vm17801_vm3, %v1822_v53 }
 0x41d   : > { %v11010_v17 = vpop.permute.xlu2 %11009 }
 0x41e   : > { %v11011_v52 = vunpack.i.l.bf16 %v11010_v17  ;;  %v11012_v14 = vunpack.i.h.bf16 %v11010_v17 }
 0x425   : > { %v11015_v21 = vpop.permute.xlu2 %11014 }
 0x426   : > { %v11016_v16 = vunpack.i.l.bf16 %v11015_v21  ;;  %v11017_v41 = vunpack.i.h.bf16 %v11015_v21 }
 0x427   : > { %v1833_v10 = vpop.permute.xlu0 %1832 }
 0x42a   : > { %v1839_v23 = vpop.permute.xlu1 %1838 }
 0x42b   : > { %9328 = vmatpush.msk.msra.mxu3 %vm17799_vm2, %v1839_v23 }
 0x42d   : > { %1870 = vmatpush.msra.mxu3 %v11011_v52  ;;  %v2004_v45 = vpop.permute.xlu2 %2003 }
 0x42f   : > { %1871 = vmatpush.msra.mxu3 %v11012_v14  ;;  %v1935_v27 = vpop.permute.xlu0 %1934 }
 0x431   : > { %1872 = vmatpush.msra.mxu3 %v1833_v10 }
 0x432   : > { %v1941_v28 = vpop.permute.xlu1 %1940  ;;  %9329 = vmatmul.msk.f32.vlgmr.msra.gmra.mxu3 %vm17801_vm3, %v1824_v58 }
 0x433   : > { %9338 = vmatpush.msk.msrb.mxu1 %vm17799_vm2, %v1941_v28 }
 0x435   : > { %1972 = vmatpush.msrb.mxu1 %v11016_v16 }
 0x437   : > { %1973 = vmatpush.msrb.mxu1 %v11017_v41  ;;  %v2009_v21 = vpop.permute.xlu0 %2008 }
 0x439   : > { %1974 = vmatpush.msrb.mxu1 %v1935_v27 }
 0x43a   : > { %9330 = vmatmul.msk.f32.gmra.mxu3 %vm17801_vm3, %v1825_v20  ;;  %9339 = vmatmul.msk.f32.vlgmr.msrb.gmra.mxu1 %vm17801_vm3, %v1930_v24  ;;  %v1999_v32 = vpop.permute.xlu1 %1998 }
 0x442   : > { %9331 = vmatmul.msk.f32.gmra.mxu3 %vm17801_vm3, %v1826_v29  ;;  %9340 = vmatmul.msk.f32.gmra.mxu1 %vm17801_vm3, %v1931_v37 }
 0x443   : > { %v1917_v61 = vpop.f32.mrf.mxu0 }
 0x44a   : > { %9332 = vmatmul.msk.f32.gmra.mxu3 %vm17801_vm3, %v1827_v18  ;;  %9341 = vmatmul.msk.f32.gmra.mxu1 %vm17801_vm3, %v1932_v25  ;;  %v2014_v25 = vpop.permute.xlu1 %2013 }
 0x44b   : > { %v1920_v44 = vpop.f32.mrf.mxu0 }
 0x452   : > { %9342 = vmatmul.msk.f32.gmra.mxu1 %vm17801_vm3, %v1933_v49 }
 0x453   : > { %v1923_v13 = vpop.f32.mrf.mxu0 }
 0x45b   : > { %v1926_v9 = vpop.f32.mrf.mxu0 }
 0x4b5   : > { %v1874_v2 = vpop.f32.mrf.mxu3 }
 0x4b6   : > { %v1918_v4 = vadd.f32 %v1917_v61, %v1874_v2 }
 0x4b7   : > { %v1976_v43 = vpop.f32.mrf.mxu1 }
 0x4b8   : > { %v1988_v1 = vadd.f32 %v1976_v43, %v1918_v4 }
 0x4ba   : > { %v2016_v36 = vadd.f32 %v1999_v32, %v1988_v1 }
 0x4bc   : > { %v2024_v39 = vmul.f32 1.442695, %v2016_v36  ;;  %vm2020_vm11 = vcmp.gt.f32.partialorder %v2016_v36, 0.0 }
 0x4bd   : > { %v1877_v7 = vpop.f32.mrf.mxu3 }
 0x4be   : > { %11431 = vpow2.f32 %v2024_v39  ;;  %v1921_v11 = vadd.f32 %v1920_v44, %v1877_v7 }
 0x4bf   : > { %v1979_v33 = vpop.f32.mrf.mxu1 }
 0x4c0   : > { %v1989_v63 = vadd.f32 %v1979_v33, %v1921_v11 }
 0x4c2   : > { %v2017_v56 = vadd.f32 %v2004_v45, %v1989_v63 }
 0x4c4   : > { %v11432_v26 = vpop.eup %11431  ;;  %v2026_v17 = vmul.f32 1.442695, %v2017_v56  ;;  %vm2021_vm13 = vcmp.gt.f32.partialorder %v2017_v56, 0.0 }
 0x4c5   : > { %v1880_v23 = vpop.f32.mrf.mxu3  ;;  %v9343_v52 = vadd.f32 -1.0, %v11432_v26 }
 0x4c6   : > { %11433 = vpow2.f32 %v2026_v17  ;;  %v1924_v14 = vadd.f32 %v1923_v13, %v1880_v23 }
 0x4c7   : > { %v1982_v53 = vpop.f32.mrf.mxu1  ;;  %v12403_v10 = vsel %vm2020_vm11, %v2016_v36, %v9343_v52  ;;  %vm17797_vm11 = vcmask 1031168  }
 0x4c8   : > { %v1990_v58 = vadd.f32 %v1982_v53, %v1924_v14  ;;  %9359 = vmatmul.msk.f32.vlgmr.msrb.gmra.mxu2 %vm2072_vm8, %v12403_v10 }
 0x4ca   : > { %v2018_v28 = vadd.f32 %v2009_v21, %v1990_v58 }
 0x4cc   : > { %v11434_v16 = vpop.eup %11433  ;;  %v2028_v41 = vmul.f32 1.442695, %v2018_v28  ;;  %vm2022_vm1 = vcmp.gt.f32.partialorder %v2018_v28, 0.0 }
 0x4cd   : > { %v1883_v20 = vpop.f32.mrf.mxu3  ;;  %v9344_v24 = vadd.f32 -1.0, %v11434_v16  ;;  %v2354_v16 = vld [vmem:[%s17787_s10 + $0x8] sm:$0xff] }
 0x4ce   : > { %v1927_v27 = vadd.f32 %v1926_v9, %v1883_v20  ;;  %11435 = vpow2.f32 %v2028_v41  ;;  %v2356_v41 = vld [vmem:[%s17787_s10 + $0x18] sm:$0x3f]  ;;  %v2355_v20 = vld [vmem:[%s17787_s10 + $0x10] sm:$0xff] }
 0x4cf   : > { %v1985_v29 = vpop.f32.mrf.mxu1  ;;  %v2037_v37 = vsel %vm2021_vm13, %v2017_v56, %v9344_v24 }
 0x4d0   : > { %v1991_v18 = vadd.f32 %v1985_v29, %v1927_v27  ;;  %9360 = vmatmul.msk.f32.gmra.mxu2 %vm2072_vm8, %v2037_v37 }
 0x4d2   : > { %v2019_v49 = vadd.f32 %v2014_v25, %v1991_v18  ;;  %v2150_v18 = vld [vmem:[#allocation6] sm:$0xff]  ;;  %v2151_v25 = vld [vmem:[#allocation6 + $0x8] sm:$0xff] }
 0x4d4   : > { %v11436_v12 = vpop.eup %11435  ;;  %v2030_v31 = vmul.f32 1.442695, %v2019_v49  ;;  %vm2023_vm4 = vcmp.gt.f32.partialorder %v2019_v49, 0.0 }
 0x4d5   : > { %v9345_v34 = vadd.f32 -1.0, %v11436_v12 }
 0x4d6   : > { %11437 = vpow2.f32 %v2030_v31 }
 0x4d7   : > { %v2038_v6 = vsel %vm2022_vm1, %v2018_v28, %v9345_v34 }
 0x4d8   : > { %9361 = vmatmul.msk.f32.gmra.mxu2 %vm2072_vm8, %v2038_v6  ;;  %v11024_v44 = vpack.i.bf16 %v2037_v37, %v2038_v6 }
 0x4dc   : > { %v11438_v50 = vpop.eup %11437 }
 0x4dd   : > { %v9346_v51 = vadd.f32 -1.0, %v11438_v50 }
 0x4df   : > { %v2039_v60 = vsel %vm2023_vm4, %v2019_v49, %v9346_v51  ;;  %v2152_v51 = vld [vmem:[#allocation6 + $0x10] sm:$0xff] }
 0x4e0   : > { %2136 = vrot.lane.b32.xlu0 %v2039_v60, %s11719_s24  ;;  %9362 = vmatmul.msk.f32.gmra.mxu2 %vm2072_vm8, %v2039_v60  ;;  %vm17798_vm8 = vcmask 1039360  }
 0x54b   : > { %v2102_v5 = vpop.f32.mrf.mxu2 }
 0x54c   : > { %2118 = vrot.lane.b32.xlu0 %v2102_v5, %s11716_s1 }
 0x552   : > { %v2137_v1 = vpop.permute.xlu0 %2136 }
 0x553   : > { %v2105_v61 = vpop.f32.mrf.mxu2 }
 0x55b   : > { %v2108_v2 = vpop.f32.mrf.mxu2 }
 0x55c   : > { %v11019_v4 = vpack.i.bf16 %v2105_v61, %v2108_v2 }
 0x55e   : > { %11020 = vrot.lane.b32.xlu1 %v11019_v4, %s11716_s1 }
 0x563   : > { %v2111_v43 = vpop.f32.mrf.mxu2 }
 0x564   : > { %2124 = vrot.lane.b32.xlu2 %v2111_v43, %s11716_s1 }
 0x566   : > { %2130 = vrot.lane.b32.xlu1 %v12403_v10, %s11719_s24 }
 0x56c   : > { %11025 = vrot.lane.b32.xlu2 %v11024_v44, %s11719_s24  ;;  %v2155_v44 = vld [vmem:[#allocation6 + $0x20] sm:$0xff] }
 0x5be   : > { %v2125_v32 = vpop.permute.xlu2 %2124  ;;  %v2119_v52 = vpop.permute.xlu0 %2118 }
 0x5bf   : > { %v2145_v36 = vsel %vm17800_vm14, %v2039_v60, %v2125_v32  ;;  %v2149_v39 = vsel %vm17800_vm14, %v2125_v32, %v2137_v1  ;;  %v2142_v58 = vsel %vm17800_vm14, %v12403_v10, %v2119_v52  ;;  %v2353_v10 = vld [vmem:[%s17787_s10] sm:$0xff] }
 0x5c0   : > { %2181 = vrot.lane.b32.xlu0 %v2149_v39, %s11717_s22  ;;  %9368 = vmatpush.msk.msra.mxu0 %vm17799_vm2, %v2145_v36 }
 0x5c6   : > { %v11026_v7 = vpop.permute.xlu2 %11025 }
 0x5c7   : > { %v11028_v33 = vunpack.i.h.bf16 %v11026_v7  ;;  %v11027_v45 = vunpack.i.l.bf16 %v11026_v7 }
 0x5d0   : > { %v11021_v11 = vpop.permute.xlu1 %11020 }
 0x5d1   : > { %v11023_v63 = vunpack.i.h.bf16 %v11021_v11  ;;  %v11022_v13 = vunpack.i.l.bf16 %v11021_v11  ;;  %v2153_v11 = vld [vmem:[#allocation6 + $0x18] sm:$0x3f] }
 0x5d3   : > { %v2144_v56 = vsel %vm17800_vm14, %v2038_v6, %v11022_v13  ;;  %v2143_v26 = vsel %vm17800_vm14, %v2037_v37, %v11023_v63  ;;  %v2147_v17 = vsel %vm17800_vm14, %v11023_v63, %v11028_v33  ;;  %v2148_v23 = vsel %vm17800_vm14, %v11022_v13, %v11027_v45 }
 0x5d4   : > { %2261 = vmatpush.msra.mxu0 %v2144_v56  ;;  %v11029_v14 = vpack.i.bf16 %v2147_v17, %v2143_v26  ;;  %v11034_v53 = vpack.i.bf16 %v2148_v23, %v2144_v56  ;;  %v2156_v56 = vld [vmem:[#allocation6 + $0x28] sm:$0xff]  ;;  %v12461_v17 = vadd.s32 128, %v12188_v35  ;;  %v2407_v23 = vadd.s32 112, %v11976_v54 }
 0x5d6   : > { %2262 = vmatpush.msra.mxu0 %v2143_v26  ;;  %11030 = vrot.lane.b32.xlu2 %v11029_v14, %s11717_s22  ;;  %v2408_v26 = vadd.s32 120, %v11976_v54  ;;  %18290 = vst [vmem:[#allocation35_spill] sm:$0xff] %v12461_v17 }
 0x5d7   : > { %11035 = vrot.lane.b32.xlu1 %v11034_v53, %s11717_s22 }
 0x5d8   : > { %v2131_v21 = vpop.permute.xlu1 %2130  ;;  %2263 = vmatpush.msra.mxu0 %v2142_v58 }
 0x5d9   : > { %v2146_v28 = vsel %vm17800_vm14, %v2119_v52, %v2131_v21  ;;  %9369 = vmatmul.msk.f32.vlgmr.msra.gmra.mxu0 %vm17801_vm3, %v2150_v18  ;;  %v2406_v52 = vadd.s32 104, %v11976_v54  ;;  %v2404_v21 = vadd.s32 88, %v11976_v54 }
 0x5da   : > { %v11039_v9 = vpack.i.bf16 %v2146_v28, %v2142_v58  ;;  %v2405_v58 = vadd.s32 96, %v11976_v54  ;;  %v2403_v28 = vadd.s32 80, %v11976_v54 }
 0x5dc   : > { %11040 = vrot.lane.b32.xlu0 %v11039_v9, %s11717_s22 }
 0x5de   : > { %2179 = vrot.lane.b32.xlu2 %v2145_v36, %s11717_s22 }
 0x5df   : > { %2294 = vrot.lane.b32.xlu1 %v2145_v36, %s11718_s18 }
 0x5e1   : > { %9370 = vmatmul.msk.f32.gmra.mxu0 %vm17801_vm3, %v2151_v25 }
 0x5e4   : > { %11045 = vrot.lane.b32.xlu0 %v11034_v53, %s11718_s18 }
 0x5e6   : > { %2296 = vrot.lane.b32.xlu2 %v2149_v39, %s11718_s18 }
 0x5e7   : > { %11050 = vrot.lane.b32.xlu1 %v11029_v14, %s11718_s18 }
 0x5e9   : > { %9371 = vmatmul.msk.f32.gmra.mxu0 %vm17801_vm3, %v2152_v51  ;;  %v18297_v51 = vmov 0 }
 0x5ec   : > { %2359 = vperm.xlu0 %10997, %v2353_v10  }
 0x5ee   : > { %11055 = vrot.lane.b32.xlu2 %v11039_v9, %s11718_s18 }
 0x5ef   : > { %2364 = vperm.xlu1 %10976, %v2354_v16   ;;  %v12469_v16 = vmul.u32 2, %v2408_v26  ;;  %v18330_v26 = vmov 0 }
 0x5f1   : > { %9372 = vmatmul.msk.f32.gmra.mxu0 %vm17801_vm3, %v2153_v11  ;;  %18291 = vst [vmem:[#allocation36_spill] sm:$0xff] %v12469_v16  ;;  %v2440_v18 = vsub.s32 %v12188_v35, %v12469_v16  ;;  %v2441_v25 = vsub.s32 %v12461_v17, %v12469_v16  ;;  %v18317_v11 = vmov 0 }
 0x5f3   : > { %vm2464_vm13 = vcmp.eq.s32.totalorder %v2440_v18, 0  ;;  %vm2488_vm1 = vcmp.eq.s32.totalorder %v2440_v18, 1  ;;  %vm2465_vm4 = vcmp.eq.s32.totalorder %v2441_v25, 0 }
 0x5f4   : > { %2374 = vperm.xlu0 %10997, %v2356_v41   ;;  %v12471_v41 = vmul.u32 2, %v2407_v23  ;;  %v2280_v23 = vld [vmem:[#allocation6 + $0x50] sm:$0xff] }
 0x5f6   : > { %2369 = vperm.xlu2 %11018, %v2355_v20   ;;  %18292 = vst [vmem:[#allocation37_spill] sm:$0xff] %v12471_v41  ;;  %v12474_v20 = vmul.u32 2, %v2406_v52  ;;  %v2281_v52 = vld [vmem:[#allocation6 + $0x58] sm:$0x3f] }
 0x5f8   : > { %18293 = vst [vmem:[#allocation38_spill] sm:$0xff] %v12474_v20 }
 0x630   : > { %v11031_v24 = vpop.permute.xlu2 %11030 }
 0x631   : > { %v11033_v31 = vunpack.i.h.bf16 %v11031_v24  ;;  %v11032_v34 = vunpack.i.l.bf16 %v11031_v24  ;;  %v12476_v24 = vmul.u32 2, %v2405_v58  ;;  %v2401_v58 = vadd.s32 64, %v11976_v54 }
 0x632   : > { %v2182_v27 = vpop.permute.xlu0 %2181 }
 0x633   : > { %v2185_v61 = vsel %vm17798_vm8, %v11032_v34, %v11033_v31  ;;  %18294 = vst [vmem:[#allocation39_spill] sm:$0xff] %v12476_v24  ;;  %v2439_v31 = vsub.s32 %v12461_v17, %v12471_v41  ;;  %v2436_v34 = vsub.s32 %v12188_v35, %v12474_v20 }
 0x635   : > { %vm2487_vm15 = vcmp.eq.s32.totalorder %v2439_v31, 1  ;;  %vm2460_vm6 = vcmp.eq.s32.totalorder %v2436_v34, 0 }
 0x638   : > { %v2180_v29 = vpop.permute.xlu2 %2179 }
 0x639   : > { %v2187_v37 = vsel %vm17798_vm8, %v2180_v29, %v2182_v27  ;;  %v12478_v27 = vmul.u32 2, %v2404_v21  ;;  %v12480_v29 = vmul.u32 2, %v2403_v28 }
 0x63a   : > { %9363 = vmatpush.msk.msrb.mxu3 %vm17799_vm2, %v2187_v37 }
 0x63b   : > { %18295 = vst [vmem:[#allocation40_spill] sm:$0xff] %v12478_v27 }
 0x63c   : > { %18296 = vst [vmem:[#allocation41_spill] sm:$0xff] %v12480_v29 }
 0x640   : > { %v2297_v49 = vpop.permute.xlu2 %2296 }
 0x648   : > { %v11056_v43 = vpop.permute.xlu2 %11055 }
 0x649   : > { %v11036_v12 = vpop.permute.xlu1 %11035  ;;  %v11058_v39 = vunpack.i.h.bf16 %v11056_v43  ;;  %v11057_v7 = vunpack.i.l.bf16 %v11056_v43  ;;  %v18306_v43 = vmov 0 }
 0x64a   : > { %v11038_v6 = vunpack.i.h.bf16 %v11036_v12  ;;  %v11037_v50 = vunpack.i.l.bf16 %v11036_v12  ;;  %v2278_v12 = vld [vmem:[#allocation6 + $0x40] sm:$0xff] }
 0x64b   : > { %v2299_v13 = vsel %vm17797_vm11, %v11057_v7, %v11058_v39  ;;  %v18313_v39 = vmov 0  ;;  %v2279_v7 = vld [vmem:[#allocation6 + $0x48] sm:$0xff] }
 0x64c   : > { %v2186_v60 = vsel %vm17798_vm8, %v11037_v50, %v11038_v6  ;;  %v2437_v6 = vsub.s32 %v12461_v17, %v12474_v20  ;;  %v2434_v50 = vsub.s32 %v12188_v35, %v12476_v24 }
 0x64d   : > { %2218 = vmatpush.msrb.mxu3 %v2186_v60  ;;  %v2157_v60 = vld [vmem:[#allocation6 + $0x30] sm:$0xff] }
 0x64e   : > { %v11041_v5 = vpop.permute.xlu0 %11040 }
 0x64f   : > { %v11043_v2 = vunpack.i.h.bf16 %v11041_v5  ;;  %v11042_v4 = vunpack.i.l.bf16 %v11041_v5  ;;  %2219 = vmatpush.msrb.mxu3 %v2185_v61  ;;  %v18300_v5 = vmov 0  ;;  %v18303_v61 = vmov 0 }
 0x651   : > { %v2295_v1 = vpop.permute.xlu1 %2294  ;;  %v2184_v32 = vsel %vm17798_vm8, %v11042_v4, %v11043_v2  ;;  %vm12497_vm8 = vmor %vm2464_vm13, %vm2488_vm1  ;;  %vm2484_vm13 = vcmp.eq.s32.totalorder %v2436_v34, 1  ;;  %v2435_v2 = vsub.s32 %v12461_v17, %v12476_v24  ;;  %v2432_v4 = vsub.s32 %v12188_v35, %v12478_v27 }
 0x652   : > { %v2302_v36 = vsel %vm17797_vm11, %v2295_v1, %v2297_v49  ;;  %2220 = vmatpush.msrb.mxu3 %v2184_v32  ;;  %v2438_v49 = vsub.s32 %v12188_v35, %v12471_v41  ;;  %v18298_v51 = vsel %vm12497_vm8, 4294967295, %v18297_v51  ;;  %9406 = vmatpush.msk.msra.mxu2 %vm12497_vm8, %v17860_v46  ;;  %v2430_v1 = vsub.s32 %v12188_v35, %v12480_v29 }
 0x653   : > { %9373 = vmatpush.msk.msra.mxu1 %vm17799_vm2, %v2302_v36  ;;  %9364 = vmatmul.msk.f32.vlgmr.msrb.gmra.mxu3 %vm17801_vm3, %v2155_v44  ;;  %v2433_v44 = vsub.s32 %v12461_v17, %v12478_v27  ;;  %v18309_v32 = vmov 0  ;;  %v2431_v36 = vsub.s32 %v12461_v17, %v12480_v29  ;;  %v18346_v34 = vmov 0 }
 0x654   : > { %vm2462_vm2 = vcmp.eq.s32.totalorder %v2438_v49, 0  ;;  %vm2486_vm14 = vcmp.eq.s32.totalorder %v2438_v49, 1  ;;  %v2425_v49 = vsub.s32 %v12461_v17, %v12344_v3 }
 0x655   : > { %vm12512_vm1 = vmor %vm2462_vm2, %vm2486_vm14  ;;  %vm2482_vm14 = vcmp.eq.s32.totalorder %v2434_v50, 1  ;;  %vm2457_vm7 = vcmp.eq.s32.totalorder %v2433_v44, 0  ;;  %vm2479_vm0 = vcmp.eq.s32.totalorder %v2431_v36, 1 }
 0x656   : > { %v11046_v33 = vpop.permute.xlu0 %11045  ;;  %v18304_v61 = vsel %vm12512_vm1, 4294967295, %v18303_v61  ;;  %9407 = vmatpush.msk.msra.mxu2 %vm12512_vm1, %v17860_v46  ;;  %vm18316_vm1 = vcmp.eq.s32.totalorder %v2434_v50, 0  ;;  %v2423_v50 = vsub.s32 %v12461_v17, %v12354_v57 }
 0x657   : > { %v11048_v45 = vunpack.i.h.bf16 %v11046_v33  ;;  %v11047_v63 = vunpack.i.l.bf16 %v11046_v33  ;;  %vm12553_vm8 = vmor %vm18316_vm1, %vm2482_vm14  ;;  %v18319_v33 = vmov 0  ;;  %vm2455_vm14 = vcmp.eq.s32.totalorder %v2431_v36, 0 }
 0x658   : > { %v18318_v11 = vsel %vm12553_vm8, 4294967295, %v18317_v11  ;;  %v2420_v36 = vsub.s32 %v12461_v17, %v12200_v15 }
 0x659   : > { %v11051_v14 = vpop.permute.xlu1 %11050  ;;  %v2301_v53 = vsel %vm17797_vm11, %v11047_v63, %v11048_v45  ;;  %v18322_v45 = vmov 0  ;;  %v2158_v63 = vld [vmem:[#allocation6 + $0x38] sm:$0x3f] }
 0x65a   : > { %v11053_v9 = vunpack.i.h.bf16 %v11051_v14  ;;  %v11052_v10 = vunpack.i.l.bf16 %v11051_v14  ;;  %2333 = vmatpush.msra.mxu1 %v2301_v53  ;;  %v2402_v14 = vadd.s32 72, %v11976_v54 }
 0x65b   : > { %9365 = vmatmul.msk.f32.gmra.mxu3 %vm17801_vm3, %v2156_v56  ;;  %vm12534_vm3 = vmor %vm2460_vm6, %vm2484_vm13  ;;  %vm2456_vm6 = vcmp.eq.s32.totalorder %v2432_v4, 0  ;;  %vm2480_vm13 = vcmp.eq.s32.totalorder %v2432_v4, 1  ;;  %v18328_v56 = vmov 0  ;;  %v18356_v4 = vmov 0 }
 0x65c   : > { %v2300_v37 = vsel %vm17797_vm11, %v11052_v10, %v11053_v9  ;;  %vm2489_vm11 = vcmp.eq.s32.totalorder %v2441_v25, 1  ;;  %v18310_v32 = vsel %vm12534_vm3, 4294967295, %v18309_v32  ;;  %9408 = vmatpush.msk.msra.mxu2 %vm12534_vm3, %v17860_v46  ;;  %vm2478_vm3 = vcmp.eq.s32.totalorder %v2430_v1, 1  ;;  %vm12567_vm1 = vmor %vm2456_vm6, %vm2480_vm13 }
 0x65d   : > { %2334 = vmatpush.msra.mxu1 %v2300_v37  ;;  %vm12505_vm9 = vmor %vm2465_vm4, %vm2489_vm11  ;;  %vm18305_vm11 = vcmp.eq.s32.totalorder %v2439_v31, 0  ;;  %v18323_v45 = vsel %vm12567_vm1, 4294967295, %v18322_v45  ;;  %v12603_v53 = vmul.u32 2, %v2402_v14  ;;  %v12610_v9 = vmul.u32 2, %v2401_v58 }
 0x65e   : > { %v18301_v5 = vsel %vm12505_vm9, 4294967295, %v18300_v5  ;;  %9422 = vmatpush.msk.msra.mxu3 %vm12505_vm9, %v17860_v46  ;;  %vm12524_vm4 = vmor %vm18305_vm11, %vm2487_vm15  ;;  %vm2459_vm9 = vcmp.eq.s32.totalorder %v2435_v2, 0  ;;  %vm2483_vm15 = vcmp.eq.s32.totalorder %v2435_v2, 1  ;;  %vm18311_vm11 = vcmp.eq.s32.totalorder %v2437_v6, 1  ;;  %9409 = vmatpush.msk.msra.mxu2 %vm12553_vm8, %v17860_v46 }
 0x65f   : > { %2335 = vmatpush.msra.mxu1 %v2299_v13  ;;  %18302 = vst [vmem:[#allocation42_spill] sm:$0xff] %v18301_v5  ;;  %v18307_v43 = vsel %vm12524_vm4, 4294967295, %v18306_v43  ;;  %v18325_v13 = vmov 0  ;;  %v2428_v21 = vsub.s32 %v12188_v35, %v12603_v53  ;;  %v2429_v28 = vsub.s32 %v12461_v17, %v12603_v53 }
 0x660   : > { %9374 = vmatmul.msk.f32.vlgmr.msra.gmra.mxu1 %vm18299_vm12, %v2278_v12  ;;  %18308 = vst [vmem:[#allocation43_spill] sm:$0xff] %v18307_v43  ;;  %9423 = vmatpush.msk.msra.mxu3 %vm12524_vm4, %v17860_v46  ;;  %vm2481_vm4 = vcmp.eq.s32.totalorder %v2433_v44, 1  ;;  %v18338_v10 = vmov 0  ;;  %v2426_v37 = vsub.s32 %v12188_v35, %v12610_v9  ;;  %v2427_v18 = vsub.s32 %v12461_v17, %v12610_v9 }
 0x661   : > { %9410 = vmatpush.msk.msra.mxu2 %vm12567_vm1, %v17860_v46  ;;  %18336 = vst [vmem:[#allocation48_spill] sm:$0xff] %v12603_v53  ;;  %vm2453_vm6 = vcmp.eq.s32.totalorder %v2429_v28, 0  ;;  %vm2477_vm13 = vcmp.eq.s32.totalorder %v2429_v28, 1  ;;  %v18340_v25 = vmov 0  ;;  %v18343_v12 = vmov 0 }
 0x662   : > { %18337 = vst [vmem:[#allocation49_spill] sm:$0xff] %v12610_v9  ;;  %v2424_v31 = vsub.s32 %v12461_v17, %v12349_v42  ;;  %v2422_v2 = vsub.s32 %v12461_v17, %v12370_v22  ;;  %v2421_v44 = vsub.s32 %v12461_v17, %v12191_v38  ;;  %v18372_v14 = vmov 0  ;;  %v2365_v38 = vpop.permute.xlu1 %2364 }
 0x663   : > { %9366 = vmatmul.msk.f32.gmra.mxu3 %vm18299_vm12, %v2157_v60  ;;  %vm18312_vm12 = vcmp.eq.s32.totalorder %v2437_v6, 0  ;;  %v18349_v6 = vmov 0  ;;  %v18352_v60 = vmov 0  ;;  %v18376_v58 = vmov 0 }
 0x664   : > { %vm12548_vm2 = vmor %vm18312_vm12, %vm18311_vm11  ;;  %vm2454_vm12 = vcmp.eq.s32.totalorder %v2430_v1, 0  ;;  %v18360_v1 = vmov 0 }
 0x665   : > { %v18314_v39 = vsel %vm12548_vm2, 4294967295, %v18313_v39  ;;  %9424 = vmatpush.msk.msra.mxu3 %vm12548_vm2, %v17860_v46  ;;  %vm12563_vm11 = vmor %vm2459_vm9, %vm2483_vm15  ;;  %vm2476_vm15 = vcmp.eq.s32.totalorder %v2428_v21, 1 }
 0x666   : > { %18315 = vst [vmem:[#allocation44_spill] sm:$0xff] %v18314_v39  ;;  %v18320_v33 = vsel %vm12563_vm11, 4294967295, %v18319_v33  ;;  %vm12575_vm2 = vmor %vm2457_vm7, %vm2481_vm4  ;;  %vm18333_vm7 = vcmask 244736  }
 0x667   : > { %18321 = vst [vmem:[#allocation45_spill] sm:$0xff] %v18320_v33  ;;  %9425 = vmatpush.msk.msra.mxu3 %vm12563_vm11, %v17860_v46  ;;  %v18326_v13 = vsel %vm12575_vm2, 4294967295, %v18325_v13  ;;  %vm12582_vm9 = vmor %vm2454_vm12, %vm2478_vm3 }
 0x668   : > { %9375 = vmatmul.msk.f32.gmra.mxu1 %vm18324_vm10, %v2279_v7  ;;  %18327 = vst [vmem:[#allocation46_spill] sm:$0xff] %v18326_v13  ;;  %v18329_v56 = vsel %vm12582_vm9, 4294967295, %v18328_v56  ;;  %vm12589_vm10 = vmor %vm2455_vm14, %vm2479_vm0  ;;  %9411 = vmatpush.msk.msra.mxu2 %vm12582_vm9, %v17860_v46  ;;  %vm2452_vm0 = vcmp.eq.s32.totalorder %v2428_v21, 0  ;;  %v18364_v7 = vmov 0  ;;  %v2265_v21 = vpop.f32.mrf.mxu0 }
 0x669   : > { %9426 = vmatpush.msk.msra.mxu3 %vm12575_vm2, %v17860_v46  ;;  %v18331_v26 = vsel %vm12589_vm10, 4294967295, %v18330_v26  ;;  %vm18334_vm3 = vmmov %vm18333_vm7 }
 0x66a   : > { %18332 = vst [vmem:[#allocation47_spill] sm:$0xff] %v18331_v26  ;;  %vm18335_vm4 = vmmov %vm18334_vm3 }
 0x66b   : > { %9367 = vmatmul.msk.f32.gmra.mxu3 %vm18333_vm7, %v2158_v63  ;;  %vm12612_vm12 = vmor %vm2452_vm0, %vm2476_vm15  ;;  %vm2450_vm7 = vcmp.eq.s32.totalorder %v2426_v37, 0  ;;  %vm2475_vm0 = vcmp.eq.s32.totalorder %v2427_v18, 1  ;;  %v2419_v63 = vsub.s32 %v12461_v17, %v12207_v47 }
 0x66c   : > { %9427 = vmatpush.msk.msra.mxu3 %vm12589_vm10, %v17860_v46  ;;  %v18339_v10 = vsel %vm12612_vm12, 4294967295, %v18338_v10  ;;  %9412 = vmatpush.msk.msra.mxu2 %vm12612_vm12, %v17860_v46  ;;  %vm12623_vm14 = vmor %vm2453_vm6, %vm2477_vm13  ;;  %vm2449_vm10 = vcmp.eq.s32.totalorder %v2425_v49, 0  ;;  %vm2473_vm6 = vcmp.eq.s32.totalorder %v2425_v49, 1 }
 0x66d   : > { %v18341_v25 = vsel %vm12623_vm14, 4294967295, %v18340_v25 }
 0x66e   : > { %18342 = vst [vmem:[#allocation50_spill] sm:$0xff] %v18341_v25  ;;  %9428 = vmatpush.msk.msra.mxu3 %vm12623_vm14, %v17860_v46  ;;  %vm2472_vm14 = vcmp.eq.s32.totalorder %v2424_v31, 1 }
 0x670   : > { %9376 = vmatmul.msk.f32.gmra.mxu1 %vm18334_vm3, %v2280_v23  ;;  %vm2474_vm3 = vcmp.eq.s32.totalorder %v2426_v37, 1  ;;  %v18368_v23 = vmov 0 }
 0x671   : > { %vm12632_vm15 = vmor %vm2450_vm7, %vm2474_vm3  ;;  %vm2448_vm3 = vcmp.eq.s32.totalorder %v2424_v31, 0 }
 0x672   : > { %v18344_v12 = vsel %vm12632_vm15, 4294967295, %v18343_v12  ;;  %9413 = vmatpush.msk.msra.mxu2 %vm12632_vm15, %v17860_v46  ;;  %vm12648_vm7 = vmor %vm2449_vm10, %vm2473_vm6  ;;  %vm2447_vm10 = vcmp.eq.s32.totalorder %v2423_v50, 0  ;;  %vm18355_vm6 = vnez %v18281_v59 }
 0x673   : > { %18345 = vst [vmem:[#allocation51_spill] sm:$0xff] %v18344_v12  ;;  %v18350_v6 = vsel %vm12648_vm7, 4294967295, %v18349_v6  ;;  %v13235_v12 = vadd.s32 384, %v12188_v35 }
 0x674   : > { %18351 = vst [vmem:[#allocation53_spill] sm:$0xff] %v18350_v6  ;;  %9414 = vmatpush.msk.msra.mxu2 %vm12356_vm5, %v17860_v46 }
 0x675   : > { %18533 = vst [vmem:[#allocation94_spill] sm:$0xff] %v13235_v12 }
 0x676   : > { %9415 = vmatpush.msk.msra.mxu2 %vm18355_vm6, %v17860_v46 }
 0x678   : > { %9377 = vmatmul.msk.f32.gmra.mxu1 %vm18335_vm4, %v2281_v52  ;;  %vm2451_vm4 = vcmp.eq.s32.totalorder %v2427_v18, 0  ;;  %v2418_v52 = vsub.s32 %v12461_v17, %v12220_v55  ;;  %v2268_v18 = vpop.f32.mrf.mxu0 }
 0x679   : > { %vm12641_vm13 = vmor %vm2451_vm4, %vm2475_vm0  ;;  %vm2471_vm0 = vcmp.eq.s32.totalorder %v2423_v50, 1 }
 0x67a   : > { %v18347_v34 = vsel %vm12641_vm13, 4294967295, %v18346_v34  ;;  %9429 = vmatpush.msk.msra.mxu3 %vm12641_vm13, %v17860_v46  ;;  %vm12657_vm4 = vmor %vm2448_vm3, %vm2472_vm14  ;;  %vm2446_vm14 = vcmp.eq.s32.totalorder %v2422_v2, 0  ;;  %vm2470_vm3 = vcmp.eq.s32.totalorder %v2422_v2, 1  ;;  %v2360_v2 = vpop.permute.xlu0 %2359 }
 0x67b   : > { %18348 = vst [vmem:[#allocation52_spill] sm:$0xff] %v18347_v34  ;;  %v18353_v60 = vsel %vm12657_vm4, 4294967295, %v18352_v60  ;;  %vm12669_vm13 = vmor %vm2447_vm10, %vm2471_vm0  ;;  %vm2445_vm10 = vcmp.eq.s32.totalorder %v2421_v44, 0  ;;  %vm2469_vm0 = vcmp.eq.s32.totalorder %v2421_v44, 1 }
 0x67c   : > { %18354 = vst [vmem:[#allocation54_spill] sm:$0xff] %v18353_v60  ;;  %9430 = vmatpush.msk.msra.mxu3 %vm12648_vm7, %v17860_v46  ;;  %v18357_v4 = vsel %vm12669_vm13, 4294967295, %v18356_v4  ;;  %vm18359_vm7 = vnez %v18285_v40  ;;  %vm12681_vm2 = vmor %vm2446_vm14, %vm2470_vm3  ;;  %vm2444_vm14 = vcmp.eq.s32.totalorder %v2420_v36, 0  ;;  %vm2468_vm3 = vcmp.eq.s32.totalorder %v2420_v36, 1 }
 0x67d   : > { %18358 = vst [vmem:[#allocation55_spill] sm:$0xff] %v18357_v4  ;;  %9416 = vmatpush.msk.msra.mxu2 %vm18359_vm7, %v17860_v46  ;;  %v18361_v1 = vsel %vm12681_vm2, 4294967295, %v18360_v1  ;;  %vm12693_vm11 = vmor %vm2445_vm10, %vm2469_vm0  ;;  %vm2443_vm10 = vcmp.eq.s32.totalorder %v2419_v63, 0  ;;  %vm2467_vm0 = vcmp.eq.s32.totalorder %v2419_v63, 1 }
 0x67e   : > { %9431 = vmatpush.msk.msra.mxu3 %vm12657_vm4, %v17860_v46  ;;  %18362 = vst [vmem:[#allocation56_spill] sm:$0xff] %v18361_v1  ;;  %vm18363_vm4 = vnez %v18288_v8  ;;  %v18365_v7 = vsel %vm12693_vm11, 4294967295, %v18364_v7  ;;  %vm12705_vm7 = vmor %vm2444_vm14, %vm2468_vm3  ;;  %vm2442_vm14 = vcmp.eq.s32.totalorder %v2418_v52, 0  ;;  %vm2466_vm3 = vcmp.eq.s32.totalorder %v2418_v52, 1 }
 0x67f   : > { %9417 = vmatpush.msk.msra.mxu2 %vm18363_vm4, %v17860_v46  ;;  %18366 = vst [vmem:[#allocation57_spill] sm:$0xff] %v18365_v7  ;;  %v18369_v23 = vsel %vm12705_vm7, 4294967295, %v18368_v23  ;;  %vm12717_vm4 = vmor %vm2443_vm10, %vm2467_vm0  ;;  %vm18379_vm10 = vnez %v18272_v19 }
 0x680   : > { %9432 = vmatpush.msk.msra.mxu3 %vm12669_vm13, %v17860_v46  ;;  %vm18367_vm13 = vnez %v18262_v30  ;;  %18370 = vst [vmem:[#allocation58_spill] sm:$0xff] %v18369_v23  ;;  %v18373_v14 = vsel %vm12717_vm4, 4294967295, %v18372_v14  ;;  %v2271_v55 = vpop.f32.mrf.mxu0 }
 0x681   : > { %9418 = vmatpush.msk.msra.mxu2 %vm18367_vm13, %v17860_v46  ;;  %18374 = vst [vmem:[#allocation59_spill] sm:$0xff] %v18373_v14  ;;  %vm12727_vm13 = vmor %vm2442_vm14, %vm2466_vm3 }
 0x682   : > { %9433 = vmatpush.msk.msra.mxu3 %vm12681_vm2, %v17860_v46  ;;  %vm18371_vm2 = vnez %v18266_v62  ;;  %v18377_v58 = vsel %vm12727_vm13, 4294967295, %v18376_v58 }
 0x683   : > { %9419 = vmatpush.msk.msra.mxu2 %vm18371_vm2, %v17860_v46  ;;  %18378 = vst [vmem:[#allocation60_spill] sm:$0xff] %v18377_v58 }
 0x684   : > { %9434 = vmatpush.msk.msra.mxu3 %vm12693_vm11, %v17860_v46  ;;  %vm18375_vm11 = vnez %v18269_v0 }
 0x685   : > { %9420 = vmatpush.msk.msra.mxu2 %vm18375_vm11, %v17860_v46 }
 0x686   : > { %9435 = vmatpush.msk.msra.mxu3 %vm12705_vm7, %v17860_v46 }
 0x687   : > { %9421 = vmatpush.msk.msra.mxu2 %vm18379_vm10, %v17860_v46 }
 0x688   : > { %9436 = vmatpush.msk.msra.mxu3 %vm12717_vm4, %v17860_v46 }
 0x68a   : > { %9437 = vmatpush.msk.msra.mxu3 %vm12727_vm13, %v17860_v46 }
 0x6d6   : > { %v2222_v28 = vpop.f32.mrf.mxu3 }
 0x6d7   : > { %v2266_v37 = vadd.f32 %v2265_v21, %v2222_v28 }
 0x6dd   : > { %v2337_v49 = vpop.f32.mrf.mxu1 }
 0x6de   : > { %v2349_v31 = vadd.f32 %v2337_v49, %v2266_v37  ;;  %v2225_v50 = vpop.f32.mrf.mxu3  ;;  %v2370_v37 = vpop.permute.xlu2 %2369 }
 0x6df   : > { %v2269_v63 = vadd.f32 %v2268_v18, %v2225_v50 }
 0x6e0   : > { %v2377_v44 = vadd.f32 %v2360_v2, %v2349_v31  ;;  %v2274_v31 = vpop.f32.mrf.mxu0 }
 0x6e2   : > { %v2385_v36 = vmul.f32 1.442695, %v2377_v44  ;;  %vm2381_vm0 = vcmp.gt.f32.partialorder %v2377_v44, 0.0 }
 0x6e4   : > { %11439 = vpow2.f32 %v2385_v36 }
 0x6e5   : > { %v2340_v52 = vpop.f32.mrf.mxu1 }
 0x6e6   : > { %v2350_v47 = vadd.f32 %v2340_v52, %v2269_v63  ;;  %v2228_v15 = vpop.f32.mrf.mxu3 }
 0x6e7   : > { %v2272_v42 = vadd.f32 %v2271_v55, %v2228_v15 }
 0x6e8   : > { %v2378_v22 = vadd.f32 %v2365_v38, %v2350_v47 }
 0x6ea   : > { %v11440_v57 = vpop.eup %11439  ;;  %v2387_v46 = vmul.f32 1.442695, %v2378_v22  ;;  %vm2382_vm14 = vcmp.gt.f32.partialorder %v2378_v22, 0.0 }
 0x6eb   : > { %v9378_v3 = vadd.f32 -1.0, %v11440_v57 }
 0x6ec   : > { %11441 = vpow2.f32 %v2387_v46 }
 0x6ed   : > { %v2343_v21 = vpop.f32.mrf.mxu1  ;;  %v12740_v28 = vsel %vm2381_vm0, %v2377_v44, %v9378_v3  ;;  %v2375_v3 = vpop.permute.xlu0 %2374 }
 0x6ee   : > { %v2351_v49 = vadd.f32 %v2343_v21, %v2272_v42  ;;  %2578 = vmatmul.f32.vlgmr.msra.gmra.mxu2 %v12740_v28  ;;  %2607 = vmatmul.f32.vlgmr.msra.gmra.mxu3 %v12740_v28  ;;  %v2231_v18 = vpop.f32.mrf.mxu3 }
 0x6ef   : > { %v2275_v47 = vadd.f32 %v2274_v31, %v2231_v18 }
 0x6f0   : > { %v2379_v50 = vadd.f32 %v2370_v37, %v2351_v49 }
 0x6f2   : > { %v11442_v2 = vpop.eup %11441  ;;  %v2389_v38 = vmul.f32 1.442695, %v2379_v50  ;;  %vm2383_vm3 = vcmp.gt.f32.partialorder %v2379_v50, 0.0 }
 0x6f3   : > { %v9379_v36 = vadd.f32 -1.0, %v11442_v2 }
 0x6f4   : > { %11443 = vpow2.f32 %v2389_v38 }
 0x6f5   : > { %v2346_v15 = vpop.f32.mrf.mxu1  ;;  %v2398_v46 = vsel %vm2382_vm14, %v2378_v22, %v9379_v36  ;;  %vm18380_vm14 = vcmask 7168  }
 0x6f6   : > { %v2352_v55 = vadd.f32 %v2346_v15, %v2275_v47  ;;  %2581 = vmatmul.f32.gmra.mxu2 %v2398_v46  ;;  %2610 = vmatmul.f32.gmra.mxu3 %v2398_v46 }
 0x6f8   : > { %v2380_v42 = vadd.f32 %v2375_v3, %v2352_v55 }
 0x6fa   : > { %v11444_v57 = vpop.eup %11443  ;;  %v2391_v44 = vmul.f32 1.442695, %v2380_v42  ;;  %vm2384_vm0 = vcmp.gt.f32.partialorder %v2380_v42, 0.0 }
 0x6fb   : > { %v9380_v63 = vadd.f32 -1.0, %v11444_v57 }
 0x6fc   : > { %11445 = vpow2.f32 %v2391_v44 }
 0x6fd   : > { %v2399_v52 = vsel %vm2383_vm3, %v2379_v50, %v9380_v63  ;;  %vm18381_vm3 = vmmov %vm18380_vm14 }
 0x6fe   : > { %2584 = vmatmul.f32.gmra.mxu2 %v2399_v52  ;;  %2613 = vmatmul.f32.gmra.mxu3 %v2399_v52  ;;  %v11059_v21 = vpack.i.bf16 %v2398_v46, %v2399_v52 }
 0x700   : > { %11060 = vrot.lane.b32.xlu2 %v11059_v21, %s11720_s19 }
 0x702   : > { %v11446_v37 = vpop.eup %11445 }
 0x703   : > { %v9381_v49 = vadd.f32 -1.0, %v11446_v37 }
 0x705   : > { %v2400_v22 = vsel %vm2384_vm0, %v2380_v42, %v9381_v49  ;;  %vm18382_vm0 = vmmov %vm18381_vm3 }
 0x706   : > { %2669 = vrot.lane.b32.xlu0 %v2400_v22, %s11720_s19  ;;  %2587 = vmatmul.f32.gmra.mxu2 %v2400_v22  ;;  %vm18383_vm13 = vmmov %vm18382_vm0 }
 0x707   : > { %2616 = vmatmul.f32.gmra.mxu3 %v2400_v22  ;;  %vm18385_vm4 = vmmov %vm18382_vm0 }
 0x708   : > { %vm18386_vm7 = vmmov %vm18382_vm0 }
 0x75a   : > { %v11061_v57 = vpop.permute.xlu2 %11060 }
 0x75b   : > { %v11063_v49 = vunpack.i.h.bf16 %v11061_v57 }
 0x771   : > { %v2579_v18 = vpop.f32.mrf.mxu2  ;;  %v2608_v31 = vpop.f32.mrf.mxu3 }
 0x772   : > { %v11074_v42 = vpack.i.bf16 %v2608_v31, %v2579_v18 }
 0x778   : > { %v2670_v44 = vpop.permute.xlu0 %2669 }
 0x779   : > { %v2582_v2 = vpop.f32.mrf.mxu2  ;;  %v2611_v38 = vpop.f32.mrf.mxu3 }
 0x77a   : > { %v11064_v47 = vpack.i.bf16 %v2611_v38, %v2582_v2 }
 0x77c   : > { %11065 = vrot.lane.b32.xlu0 %v11064_v47, %s11716_s1 }
 0x781   : > { %v2585_v50 = vpop.f32.mrf.mxu2  ;;  %v2614_v36 = vpop.f32.mrf.mxu3 }
 0x782   : > { %v11069_v15 = vpack.i.bf16 %v2614_v36, %v2585_v50  ;;  %v11062_v36 = vunpack.i.l.bf16 %v11061_v57 }
 0x784   : > { %11070 = vrot.lane.b32.xlu1 %v11069_v15, %s11716_s1 }
 0x789   : > { %v2588_v3 = vpop.f32.mrf.mxu2 }
 0x78a   : > { %v2617_v55 = vpop.f32.mrf.mxu3 }
 0x78b   : > { %2642 = vrot.lane.b32.xlu2 %v2617_v55, %s11716_s1 }
 0x78c   : > { %2640 = vrot.lane.b32.xlu1 %v2588_v3, %s11716_s1 }
 0x793   : > { %2663 = vrot.lane.b32.xlu2 %v12740_v28, %s11720_s19 }
 0x794   : > { %11075 = vrot.lane.b32.xlu1 %v11074_v42, %s11716_s1 }
 0x7e5   : > { %v2643_v63 = vpop.permute.xlu2 %2642 }
 0x7e6   : > { %v2682_v21 = vsel %vm18380_vm14, %v2643_v63, %v2670_v44  ;;  %vm18384_vm14 = vmmov %vm18382_vm0 }
 0x7e7   : > { %2722 = vrot.lane.b32.xlu2 %v2682_v21, %s11717_s22 }
 0x7ee   : > { %v11066_v37 = vpop.permute.xlu0 %11065 }
 0x7ef   : > { %v11068_v2 = vunpack.i.h.bf16 %v11066_v37  ;;  %v11067_v38 = vunpack.i.l.bf16 %v11066_v37 }
 0x7f1   : > { %v2645_v47 = vsel %vm18381_vm3, %v11067_v38, %v11068_v2  ;;  %v2680_v18 = vsel %vm18382_vm0, %v11068_v2, %v11063_v49  ;;  %v2676_v44 = vsel %vm18385_vm4, %v2398_v46, %v11067_v38  ;;  %vm18387_vm3 = vmmov %vm18382_vm0 }
 0x7f2   : > { %v11089_v31 = vpack.i.bf16 %v2680_v18, %v2645_v47  ;;  %vm18391_vm4 = vmmov %vm18382_vm0  ;;  %v2664_v18 = vpop.permute.xlu2 %2663 }
 0x7f4   : > { %11090 = vrot.lane.b32.xlu2 %v11089_v31, %s11717_s22 }
 0x7f6   : > { %v11071_v50 = vpop.permute.xlu1 %11070 }
 0x7f7   : > { %v11073_v15 = vunpack.i.h.bf16 %v11071_v50  ;;  %v11072_v55 = vunpack.i.l.bf16 %v11071_v50  ;;  %v18392_v50 = vmov 1.0  }
 0x7f9   : > { %v2646_v3 = vsel %vm18383_vm13, %v11072_v55, %v11073_v15  ;;  %v2677_v42 = vsel %vm18384_vm14, %v2399_v52, %v11072_v55  ;;  %v2681_v9 = vsel %vm18386_vm7, %v11073_v15, %v11062_v36  ;;  %vm18388_vm13 = vcmask 1045504   ;;  %vm18390_vm7 = vmmov %vm18382_vm0  ;;  %v2684_v15 = vld [vmem:[#allocation7 + $0x8] sm:$0xff] }
 0x7fa   : > { %v11079_v37 = vpack.i.bf16 %v2646_v3, %v2677_v42  ;;  %v11084_v53 = vpack.i.bf16 %v2676_v44, %v2681_v9  ;;  %vm18389_vm14 = vmmov %vm18388_vm13 }
 0x7fc   : > { %11080 = vrot.lane.b32.xlu0 %v11079_v37, %s11717_s22  ;;  %11100 = vrot.lane.b32.xlu2 %v11079_v37, %s11718_s18 }
 0x7fd   : > { %11085 = vrot.lane.b32.xlu1 %v11084_v53, %s11717_s22 }
 0x7fe   : > { %v2641_v49 = vpop.permute.xlu1 %2640 }
 0x7ff   : > { %v2647_v57 = vsel %vm18387_vm3, %v2641_v49, %v2643_v63  ;;  %v2678_v2 = vsel %vm18382_vm0, %v2400_v22, %v2641_v49  ;;  %vm18393_vm3 = vnez %v18298_v51 }
 0x800   : > { %9448 = vmatpush.msk.msrb.mxu2 %vm18388_vm13, %v2678_v2  ;;  %9453 = vmatpush.msk.msrb.mxu3 %vm18389_vm14, %v2647_v57  ;;  %vm18394_vm13 = vnez %v18304_v61  ;;  %vm18395_vm14 = vnez %v18310_v32 }
 0x802   : > { %2841 = vmatpush.msrb.mxu2 %v2677_v42  ;;  %2870 = vmatpush.msrb.mxu3 %v2646_v3  ;;  %v2685_v42 = vld [vmem:[#allocation7 + $0x10] sm:$0xff] }
 0x804   : > { %2909 = vrot.lane.b32.xlu2 %v2678_v2, %s11718_s18  ;;  %2718 = vrot.lane.b32.xlu0 %v2678_v2, %s11717_s22 }
 0x805   : > { %2842 = vmatpush.msrb.mxu2 %v2676_v44  ;;  %2720 = vrot.lane.b32.xlu1 %v2647_v57, %s11717_s22 }
 0x806   : > { %2871 = vmatpush.msrb.mxu3 %v2645_v47  ;;  %v11076_v9 = vpop.permute.xlu1 %11075  ;;  %v3014_v47 = vld [vmem:[%s17789_s12 + $0x18] sm:$0x3f] }
 0x807   : > { %v11078_v46 = vunpack.i.h.bf16 %v11076_v9  ;;  %v11077_v52 = vunpack.i.l.bf16 %v11076_v9 }
 0x809   : > { %v2675_v22 = vsel %vm18390_vm7, %v12740_v28, %v11077_v52  ;;  %v2644_v63 = vsel %vm18391_vm4, %v11077_v52, %v11078_v46  ;;  %v2679_v36 = vsel %vm18382_vm0, %v11078_v46, %v2664_v18  ;;  %v3012_v28 = vld [vmem:[%s17789_s12 + $0x8] sm:$0xff]  ;;  %vm18396_vm7 = vnez %v18285_v40  ;;  %v2686_v46 = vld [vmem:[#allocation7 + $0x18] sm:$0x3f] }
 0x80a   : > { %2843 = vmatpush.msrb.mxu2 %v2675_v22  ;;  %2872 = vmatpush.msrb.mxu3 %v2644_v63  ;;  %v11114_v38 = vpack.i.bf16 %v2644_v63, %v2675_v22  ;;  %vm18397_vm4 = vnez %v18288_v8  ;;  %vm18398_vm0 = vnez %v18262_v30  ;;  %v18520_v8 = vmov 0 }
 0x80c   : > { %9572 = vmatpush.msk.msra.mxu2 %vm18393_vm3, %v18392_v50  ;;  %11115 = vrot.lane.b32.xlu2 %v11114_v38, %s11718_s18 }
 0x80d   : > { %11095 = vrot.lane.b32.xlu0 %v11114_v38, %s11717_s22  ;;  %2704 = vrot.lane.b32.xlu1 %v2679_v36, %s11717_s22 }
 0x80e   : > { %9573 = vmatpush.msk.msra.mxu2 %vm18394_vm13, %v18392_v50 }
 0x810   : > { %9574 = vmatpush.msk.msra.mxu2 %vm18395_vm14, %v18392_v50 }
 0x812   : > { %9575 = vmatpush.msk.msra.mxu2 %vm12553_vm8, %v18392_v50 }
 0x814   : > { %9576 = vmatpush.msk.msra.mxu2 %vm12567_vm1, %v18392_v50  ;;  %3022 = vperm.xlu2 %11018, %v3012_v28  }
 0x815   : > { %11105 = vrot.lane.b32.xlu0 %v11084_v53, %s11718_s18  ;;  %2913 = vrot.lane.b32.xlu1 %v2682_v21, %s11718_s18  ;;  %v3011_v53 = vld [vmem:[%s17789_s12] sm:$0xff]  ;;  %v3013_v21 = vld [vmem:[%s17789_s12 + $0x10] sm:$0xff] }
 0x816   : > { %9577 = vmatpush.msk.msra.mxu2 %vm12582_vm9, %v18392_v50 }
 0x818   : > { %9578 = vmatpush.msk.msra.mxu2 %vm12612_vm12, %v18392_v50 }
 0x81a   : > { %9579 = vmatpush.msk.msra.mxu2 %vm12632_vm15, %v18392_v50 }
 0x81c   : > { %9580 = vmatpush.msk.msra.mxu2 %vm12356_vm5, %v18392_v50 }
 0x81d   : > { %2911 = vrot.lane.b32.xlu0 %v2647_v57, %s11718_s18  ;;  %11110 = vrot.lane.b32.xlu1 %v11089_v31, %s11718_s18  ;;  %v2683_v31 = vld [vmem:[#allocation7] sm:$0xff] }
 0x81e   : > { %9581 = vmatpush.msk.msra.mxu2 %vm18355_vm6, %v18392_v50 }
 0x820   : > { %9582 = vmatpush.msk.msra.mxu2 %vm18396_vm7, %v18392_v50 }
 0x822   : > { %9583 = vmatpush.msk.msra.mxu2 %vm18397_vm4, %v18392_v50 }
 0x824   : > { %9584 = vmatpush.msk.msra.mxu2 %vm18398_vm0, %v18392_v50 }
 0x825   : > { %2895 = vrot.lane.b32.xlu0 %v2679_v36, %s11718_s18  ;;  %3017 = vperm.xlu1 %10976, %v3011_v53  }
 0x826   : > { %9585 = vmatpush.msk.msra.mxu2 %vm18371_vm2, %v18392_v50  ;;  %vm18399_vm2 = vcmask 244736  }
 0x827   : > { %9449 = vmatmul.msk.f32.vlgmr.msrb.gmra.mxu2 %vm18399_vm2, %v2683_v31  ;;  %vm18400_vm0 = vmmov %vm18399_vm2 }
 0x828   : > { %9586 = vmatpush.msk.msra.mxu2 %vm18375_vm11, %v18392_v50  ;;  %9454 = vmatmul.msk.f32.vlgmr.msrb.gmra.mxu3 %vm18400_vm0, %v2683_v31  ;;  %vm18401_vm11 = vmmov %vm18400_vm0 }
 0x829   : > { %vm18402_vm4 = vmmov %vm18400_vm0 }
 0x82a   : > { %9587 = vmatpush.msk.msra.mxu2 %vm18379_vm10, %v18392_v50  ;;  %vm18403_vm10 = vmmov %vm18400_vm0 }
 0x82b   : > { %vm18404_vm7 = vmmov %vm18400_vm0 }
 0x82c   : > { %vm18405_vm2 = vmmov %vm18400_vm0 }
 0x82d   : > { %3027 = vperm.xlu0 %10997, %v3013_v21   ;;  %3032 = vperm.xlu1 %10976, %v3014_v47  }
 0x82f   : > { %9450 = vmatmul.msk.f32.gmra.mxu2 %vm18401_vm11, %v2684_v15  ;;  %vm18406_vm11 = vmmov %vm18400_vm0 }
 0x830   : > { %9455 = vmatmul.msk.f32.gmra.mxu3 %vm18402_vm4, %v2684_v15  ;;  %vm18407_vm4 = vcmask 1039360  }
 0x831   : > { %vm18408_vm0 = vmmov %vm18407_vm4 }
 0x832   : > { %vm18411_vm6 = vmmov %vm18408_vm0 }
 0x833   : > { %vm18412_vm5 = vmmov %vm18408_vm0 }
 0x837   : > { %9451 = vmatmul.msk.f32.gmra.mxu2 %vm18403_vm10, %v2685_v42  ;;  %vm18409_vm10 = vcmask 1045504  }
 0x838   : > { %9456 = vmatmul.msk.f32.gmra.mxu3 %vm18404_vm7, %v2685_v42  ;;  %vm18410_vm7 = vmmov %vm18409_vm10 }
 0x83f   : > { %9452 = vmatmul.msk.f32.gmra.mxu2 %vm18405_vm2, %v2686_v46  ;;  %vm18413_vm2 = vmmov %vm18408_vm0 }
 0x840   : > { %9457 = vmatmul.msk.f32.gmra.mxu3 %vm18406_vm11, %v2686_v46  ;;  %vm18414_vm11 = vmmov %vm18408_vm0  ;;  %v2689_v46 = vld [vmem:[#allocation7 + $0x28] sm:$0xff] }
 0x841   : > { %v2723_v55 = vpop.permute.xlu2 %2722 }
 0x84e   : > { %v11091_v37 = vpop.permute.xlu2 %11090 }
 0x84f   : > { %v11093_v52 = vunpack.i.h.bf16 %v11091_v37  ;;  %v11092_v63 = vunpack.i.l.bf16 %v11091_v37 }
 0x851   : > { %v2727_v31 = vsel %vm18414_vm11, %v11092_v63, %v11093_v52 }
 0x856   : > { %v11101_v28 = vpop.permute.xlu2 %11100 }
 0x857   : > { %v11103_v52 = vunpack.i.h.bf16 %v11101_v28 }
 0x86e   : > { %v11081_v3 = vpop.permute.xlu0 %11080 }
 0x86f   : > { %v11086_v44 = vpop.permute.xlu1 %11085  ;;  %v11083_v49 = vunpack.i.h.bf16 %v11081_v3  ;;  %v11082_v57 = vunpack.i.l.bf16 %v11081_v3 }
 0x870   : > { %v11087_v2 = vunpack.i.l.bf16 %v11086_v44  ;;  %v11088_v38 = vunpack.i.h.bf16 %v11086_v44  ;;  %v2688_v44 = vld [vmem:[#allocation7 + $0x20] sm:$0xff] }
 0x871   : > { %v2728_v53 = vsel %vm18411_vm6, %v11082_v57, %v11083_v49 }
 0x872   : > { %v2729_v21 = vsel %vm18412_vm5, %v11083_v49, %v11087_v2  ;;  %v2726_v47 = vsel %vm18413_vm2, %v11088_v38, %v11092_v63  ;;  %vm18416_vm5 = vcmask 244736   ;;  %v2910_v49 = vpop.permute.xlu2 %2909  ;;  %vm18420_vm2 = vcmask 1031168  }
 0x873   : > { %vm18417_vm6 = vmmov %vm18416_vm5 }
 0x874   : > { %vm18421_vm11 = vmmov %vm18420_vm2 }
 0x876   : > { %v2719_v9 = vpop.permute.xlu0 %2718 }
 0x877   : > { %v2721_v22 = vpop.permute.xlu1 %2720 }
 0x878   : > { %v2730_v18 = vsel %vm18407_vm4, %v2719_v9, %v2721_v22  ;;  %v2731_v36 = vsel %vm18408_vm0, %v2721_v22, %v2723_v55  ;;  %vm18415_vm4 = vmmov %vm18408_vm0  ;;  %v11102_v22 = vunpack.i.l.bf16 %v11101_v28 }
 0x879   : > { %9438 = vmatpush.msk.msrb.mxu0 %vm18409_vm10, %v2730_v18  ;;  %9443 = vmatpush.msk.msrb.mxu1 %vm18410_vm7, %v2731_v36  ;;  %vm18418_vm10 = vmmov %vm18416_vm5 }
 0x87a   : > { %vm18419_vm7 = vmmov %vm18416_vm5  ;;  %v11116_v38 = vpop.permute.xlu2 %11115 }
 0x87b   : > { %2767 = vmatpush.msrb.mxu0 %v2728_v53  ;;  %2796 = vmatpush.msrb.mxu1 %v2729_v21 }
 0x87d   : > { %2768 = vmatpush.msrb.mxu0 %v2726_v47  ;;  %2797 = vmatpush.msrb.mxu1 %v2727_v31 }
 0x87f   : > { %v11096_v15 = vpop.permute.xlu0 %11095  ;;  %v2705_v3 = vpop.permute.xlu1 %2704 }
 0x880   : > { %v11098_v55 = vunpack.i.h.bf16 %v11096_v15  ;;  %v11097_v42 = vunpack.i.l.bf16 %v11096_v15 }
 0x882   : > { %v2724_v37 = vsel %vm18415_vm4, %v11097_v42, %v11098_v55  ;;  %v2725_v9 = vsel %vm18408_vm0, %v11098_v55, %v2705_v3  ;;  %vm18422_vm4 = vcmask 1045504   ;;  %v2690_v3 = vld [vmem:[#allocation7 + $0x30] sm:$0xff]  ;;  %v11118_v55 = vunpack.i.h.bf16 %v11116_v38 }
 0x883   : > { %2769 = vmatpush.msrb.mxu0 %v2724_v37  ;;  %2798 = vmatpush.msrb.mxu1 %v2725_v9  ;;  %vm18423_vm0 = vmmov %vm18422_vm4  ;;  %v11117_v42 = vunpack.i.l.bf16 %v11116_v38  ;;  %v2890_v38 = vld [vmem:[#allocation7 + $0x58] sm:$0x3f] }
 0x884   : > { %9439 = vmatmul.msk.f32.vlgmr.msrb.gmra.mxu0 %vm18416_vm5, %v2688_v44  ;;  %9444 = vmatmul.msk.f32.vlgmr.msrb.gmra.mxu1 %vm18417_vm6, %v2688_v44  ;;  %vm18424_vm5 = vmmov %vm18420_vm2 }
 0x885   : > { %v2919_v15 = vsel %vm18424_vm5, %v11102_v22, %v11103_v52  ;;  %vm18425_vm6 = vmmov %vm18420_vm2  ;;  %vm18430_vm5 = vnez %v18301_v5  ;;  %v2888_v22 = vld [vmem:[#allocation7 + $0x48] sm:$0xff] }
 0x887   : > { %v11106_v57 = vpop.permute.xlu0 %11105  ;;  %v2914_v2 = vpop.permute.xlu1 %2913 }
 0x888   : > { %v11107_v63 = vunpack.i.l.bf16 %v11106_v57  ;;  %v11108_v28 = vunpack.i.h.bf16 %v11106_v57 }
 0x88a   : > { %v2920_v44 = vsel %vm18425_vm6, %v11103_v52, %v11107_v63  ;;  %vm18431_vm6 = vnez %v18307_v43  ;;  %v2887_v52 = vld [vmem:[#allocation7 + $0x40] sm:$0xff]  ;;  %v2889_v63 = vld [vmem:[#allocation7 + $0x50] sm:$0xff]  ;;  %v3086_v43 = vadd.s32 152, %v11976_v54 }
 0x88c   : > { %9440 = vmatmul.msk.f32.gmra.mxu0 %vm18418_vm10, %v2689_v46  ;;  %9445 = vmatmul.msk.f32.gmra.mxu1 %vm18419_vm7, %v2689_v46  ;;  %vm18426_vm10 = vmmov %vm18419_vm7  ;;  %v2691_v46 = vld [vmem:[#allocation7 + $0x38] sm:$0x3f]  ;;  %v13154_v19 = vmul.u32 2, %v3086_v43 }
 0x88e   : > { %18511 = vst [vmem:[#allocation84_spill] sm:$0xff] %v13154_v19 }
 0x88f   : > { %v2912_v18 = vpop.permute.xlu0 %2911  ;;  %v11111_v36 = vpop.permute.xlu1 %11110 }
 0x890   : > { %v2921_v53 = vsel %vm18420_vm2, %v2910_v49, %v2912_v18  ;;  %v2922_v21 = vsel %vm18421_vm11, %v2912_v18, %v2914_v2  ;;  %v11113_v47 = vunpack.i.h.bf16 %v11111_v36  ;;  %v11112_v31 = vunpack.i.l.bf16 %v11111_v36  ;;  %vm18427_vm11 = vmmov %vm18420_vm2 }
 0x891   : > { %9458 = vmatpush.msk.msra.mxu0 %vm18422_vm4, %v2921_v53  ;;  %9463 = vmatpush.msk.msra.mxu1 %vm18423_vm0, %v2922_v21  ;;  %vm18428_vm4 = vmmov %vm18420_vm2  ;;  %v3098_v18 = vadd.s32 248, %v11976_v54  ;;  %v3097_v53 = vadd.s32 240, %v11976_v54 }
 0x892   : > { %v2917_v37 = vsel %vm18420_vm2, %v11108_v28, %v11112_v31  ;;  %v2918_v9 = vsel %vm18427_vm11, %v11112_v31, %v11113_v47  ;;  %v2915_v49 = vsel %vm18428_vm4, %v11117_v42, %v11118_v55  ;;  %vm18429_vm0 = vmmov %vm18420_vm2  ;;  %vm18433_vm2 = vnez %v18314_v39 }
 0x893   : > { %2958 = vmatpush.msra.mxu0 %v2919_v15  ;;  %2987 = vmatpush.msra.mxu1 %v2920_v44  ;;  %vm18434_vm11 = vnez %v18320_v33  ;;  %vm18435_vm4 = vnez %v18326_v13  ;;  %v12937_v36 = vmul.u32 2, %v3098_v18  ;;  %v12944_v31 = vmul.u32 2, %v3097_v53 }
 0x894   : > { %9441 = vmatmul.msk.f32.gmra.mxu0 %vm18426_vm10, %v2690_v3  ;;  %9446 = vmatmul.msk.f32.gmra.mxu1 %vm18419_vm7, %v2690_v3  ;;  %vm18432_vm10 = vmmov %vm18419_vm7  ;;  %v3096_v15 = vadd.s32 232, %v11976_v54  ;;  %v3095_v44 = vadd.s32 224, %v11976_v54  ;;  %v3088_v39 = vadd.s32 168, %v11976_v54 }
 0x895   : > { %2959 = vmatpush.msra.mxu0 %v2917_v37  ;;  %2988 = vmatpush.msra.mxu1 %v2918_v9  ;;  %18452 = vst [vmem:[#allocation61_spill] sm:$0xff] %v12937_v36  ;;  %v3209_v21 = vsub.s32 %v12188_v35, %v12937_v36  ;;  %v3210_v47 = vsub.s32 %v12461_v17, %v12937_v36  ;;  %v18457_v37 = vmov 0  ;;  %v3094_v9 = vadd.s32 216, %v11976_v54 }
 0x896   : > { %18453 = vst [vmem:[#allocation62_spill] sm:$0xff] %v12944_v31  ;;  %v3206_v42 = vsub.s32 %v12461_v17, %v12944_v31  ;;  %v12955_v28 = vmul.u32 2, %v3096_v15  ;;  %v18469_v15 = vmov 0 }
 0x897   : > { %v2896_v2 = vpop.permute.xlu0 %2895  ;;  %2960 = vmatpush.msra.mxu0 %v2915_v49  ;;  %v18460_v49 = vmov 0 }
 0x898   : > { %v2916_v57 = vsel %vm18429_vm0, %v11118_v55, %v2896_v2  ;;  %vm18436_vm0 = vnez %v18331_v26  ;;  %v3205_v55 = vsub.s32 %v12188_v35, %v12944_v31  ;;  %18456 = vst [vmem:[#allocation63_spill] sm:$0xff] %v12955_v28  ;;  %v3201_v2 = vsub.s32 %v12188_v35, %v12955_v28 }
 0x899   : > { %9604 = vmatpush.msk.msrb.mxu0 %vm18430_vm5, %v18392_v50  ;;  %2989 = vmatpush.msra.mxu1 %v2916_v57  ;;  %vm3398_vm5 = vcmp.eq.s32.totalorder %v3206_v42, 1  ;;  %v3202_v57 = vsub.s32 %v12461_v17, %v12955_v28  ;;  %v18492_v26 = vmov 0 }
 0x89b   : > { %9605 = vmatpush.msk.msrb.mxu0 %vm18431_vm6, %v18392_v50  ;;  %vm18450_vm6 = vmmov %vm18419_vm7 }
 0x89c   : > { %9442 = vmatmul.msk.f32.gmra.mxu0 %vm18432_vm10, %v2691_v46  ;;  %9447 = vmatmul.msk.f32.gmra.mxu1 %vm18419_vm7, %v2691_v46  ;;  %vm18437_vm10 = vmmov %vm18419_vm7  ;;  %v12977_v46 = vmul.u32 2, %v3095_v44  ;;  %v3091_v44 = vadd.s32 192, %v11976_v54 }
 0x89d   : > { %9606 = vmatpush.msk.msrb.mxu0 %vm18433_vm2, %v18392_v50  ;;  %vm18438_vm2 = vnez %v18341_v25 }
 0x89e   : > { %18462 = vst [vmem:[#allocation65_spill] sm:$0xff] %v12977_v46  ;;  %v3197_v18 = vsub.s32 %v12188_v35, %v12977_v46  ;;  %v3198_v53 = vsub.s32 %v12461_v17, %v12977_v46 }
 0x89f   : > { %9607 = vmatpush.msk.msrb.mxu0 %vm18434_vm11, %v18392_v50  ;;  %vm18439_vm11 = vnez %v18347_v34 }
 0x8a1   : > { %9608 = vmatpush.msk.msrb.mxu0 %vm18435_vm4, %v18392_v50  ;;  %vm18440_vm4 = vnez %v18350_v6  ;;  %v18487_v6 = vmov 0 }
 0x8a3   : > { %9609 = vmatpush.msk.msrb.mxu0 %vm18436_vm0, %v18392_v50  ;;  %vm18441_vm0 = vnez %v18353_v60 }
 0x8a4   : > { %9459 = vmatmul.msk.f32.vlgmr.msra.gmra.mxu0 %vm18437_vm10, %v2887_v52  ;;  %9464 = vmatmul.msk.f32.vlgmr.msra.gmra.mxu1 %vm18419_vm7, %v2887_v52  ;;  %vm18442_vm10 = vmmov %vm18419_vm7  ;;  %v12979_v52 = vmul.u32 2, %v3094_v9 }
 0x8a5   : > { %9610 = vmatpush.msk.msrb.mxu0 %vm18438_vm2, %v18392_v50  ;;  %vm18443_vm2 = vnez %v18357_v4 }
 0x8a6   : > { %18463 = vst [vmem:[#allocation66_spill] sm:$0xff] %v12979_v52 }
 0x8a7   : > { %9611 = vmatpush.msk.msrb.mxu0 %vm18439_vm11, %v18392_v50  ;;  %vm18444_vm11 = vnez %v18361_v1  ;;  %v18485_v1 = vmov 0 }
 0x8a9   : > { %9612 = vmatpush.msk.msrb.mxu0 %vm18440_vm4, %v18392_v50  ;;  %vm18445_vm4 = vnez %v18365_v7 }
 0x8aa   : > { %v13015_v9 = vpop.f32.mrf.mxu2 }
 0x8ab   : > { %9613 = vmatpush.msk.msrb.mxu0 %vm18441_vm0, %v18392_v50  ;;  %vm18446_vm0 = vnez %v18369_v23  ;;  %v3089_v23 = vadd.s32 176, %v11976_v54 }
 0x8ac   : > { %9460 = vmatmul.msk.f32.gmra.mxu0 %vm18442_vm10, %v2888_v22  ;;  %9465 = vmatmul.msk.f32.gmra.mxu1 %vm18419_vm7, %v2888_v22  ;;  %vm18447_vm10 = vmmov %vm18419_vm7  ;;  %v18464_v22 = vmov 0 }
 0x8ad   : > { %9614 = vmatpush.msk.msrb.mxu0 %vm18443_vm2, %v18392_v50  ;;  %vm18448_vm2 = vnez %v18373_v14  ;;  %v13039_v14 = vmul.u32 2, %v3091_v44  ;;  %v13085_v25 = vmul.u32 2, %v3089_v23  ;;  %v18494_v23 = vmov 0 }
 0x8af   : > { %9615 = vmatpush.msk.msrb.mxu0 %vm18444_vm11, %v18392_v50  ;;  %vm18449_vm11 = vnez %v18377_v58  ;;  %18479 = vst [vmem:[#allocation72_spill] sm:$0xff] %v13039_v14  ;;  %v3182_v60 = vsub.s32 %v12461_v17, %v13039_v14 }
 0x8b0   : > { %18491 = vst [vmem:[#allocation76_spill] sm:$0xff] %v13085_v25 }
 0x8b1   : > { %9616 = vmatpush.msk.msrb.mxu0 %vm18445_vm4, %v18392_v50  ;;  %vm18451_vm4 = vmmov %vm18450_vm6 }
 0x8b2   : > { %v13109_v13 = vpop.f32.mrf.mxu2 }
 0x8b3   : > { %9617 = vmatpush.msk.msrb.mxu0 %vm18446_vm0, %v18392_v50  ;;  %vm3302_vm0 = vcmp.eq.s32.totalorder %v3206_v42, 0  ;;  %v3092_v42 = vadd.s32 200, %v11976_v54 }
 0x8b4   : > { %9461 = vmatmul.msk.f32.gmra.mxu0 %vm18447_vm10, %v2889_v63  ;;  %9466 = vmatmul.msk.f32.gmra.mxu1 %vm18419_vm7, %v2889_v63  ;;  %vm3305_vm10 = vcmp.eq.s32.totalorder %v3209_v21, 0  ;;  %vm3306_vm7 = vcmp.eq.s32.totalorder %v3210_v47, 0  ;;  %v3093_v63 = vadd.s32 208, %v11976_v54 }
 0x8b5   : > { %9618 = vmatpush.msk.msrb.mxu0 %vm18448_vm2, %v18392_v50  ;;  %v13037_v58 = vmul.u32 2, %v3092_v42  ;;  %v18482_v42 = vmov 0 }
 0x8b7   : > { %9619 = vmatpush.msk.msrb.mxu0 %vm18449_vm11, %v18392_v50  ;;  %18478 = vst [vmem:[#allocation71_spill] sm:$0xff] %v13037_v58  ;;  %v3185_v4 = vsub.s32 %v12188_v35, %v13037_v58 }
 0x8bc   : > { %9462 = vmatmul.msk.f32.gmra.mxu0 %vm18450_vm6, %v2890_v38  ;;  %9467 = vmatmul.msk.f32.gmra.mxu1 %vm18451_vm4, %v2890_v38  ;;  %vm3401_vm6 = vcmp.eq.s32.totalorder %v3209_v21, 1  ;;  %vm3402_vm4 = vcmp.eq.s32.totalorder %v3210_v47, 1  ;;  %v18467_v38 = vmov 0  ;;  %v3193_v21 = vsub.s32 %v12188_v35, %v12979_v52 }
 0x8bd   : > { %vm12947_vm11 = vmor %vm3305_vm10, %vm3401_vm6  ;;  %vm3301_vm10 = vcmp.eq.s32.totalorder %v3205_v55, 0  ;;  %vm3397_vm6 = vcmp.eq.s32.totalorder %v3205_v55, 1  ;;  %v3194_v47 = vsub.s32 %v12461_v17, %v12979_v52  ;;  %v13011_v55 = vmul.u32 2, %v3093_v63 }
 0x8be   : > { %9588 = vmatpush.msk.msra.mxu3 %vm12947_vm11, %v18392_v50  ;;  %vm12961_vm2 = vmor %vm3306_vm7, %vm3402_vm4  ;;  %vm3297_vm4 = vcmp.eq.s32.totalorder %v3201_v2, 0  ;;  %vm3385_vm9 = vcmp.eq.s32.totalorder %v3193_v21, 1  ;;  %v18475_v63 = vmov 0 }
 0x8bf   : > { %v18458_v37 = vsel %vm12961_vm2, 4294967295, %v18457_v37  ;;  %9620 = vmatpush.msk.msrb.mxu1 %vm12961_vm2, %v18392_v50  ;;  %vm12969_vm15 = vmor %vm3301_vm10, %vm3397_vm6  ;;  %vm3393_vm10 = vcmp.eq.s32.totalorder %v3201_v2, 1  ;;  %vm3298_vm6 = vcmp.eq.s32.totalorder %v3202_v57, 0  ;;  %vm3394_vm2 = vcmp.eq.s32.totalorder %v3202_v57, 1  ;;  %18472 = vst [vmem:[#allocation69_spill] sm:$0xff] %v13011_v55  ;;  %v13017_v2 = vpop.f32.mrf.mxu3 }
 0x8c0   : > { %18459 = vst [vmem:[#allocation64_spill] sm:$0xff] %v18458_v37  ;;  %v18461_v49 = vsel %vm12969_vm15, 4294967295, %v18460_v49  ;;  %9589 = vmatpush.msk.msra.mxu3 %vm12969_vm15, %v18392_v50  ;;  %vm12984_vm7 = vmor %vm3302_vm0, %vm3398_vm5  ;;  %vm3293_vm0 = vcmp.eq.s32.totalorder %v3197_v18, 0  ;;  %v18473_v57 = vmov 0  ;;  %vm3290_vm1 = vcmp.eq.s32.totalorder %v3194_v47, 0 }
 0x8c1   : > { %v18465_v22 = vsel %vm12984_vm7, 4294967295, %v18464_v22  ;;  %9621 = vmatpush.msk.msrb.mxu1 %vm12984_vm7, %v18392_v50  ;;  %vm12992_vm12 = vmor %vm3297_vm4, %vm3393_vm10  ;;  %vm3389_vm4 = vcmp.eq.s32.totalorder %v3197_v18, 1  ;;  %vm3390_vm10 = vcmp.eq.s32.totalorder %v3198_v53, 1  ;;  %vm3289_vm7 = vcmp.eq.s32.totalorder %v3193_v21, 0 }
 0x8c2   : > { %18466 = vst [vmem:[#allocation67_spill] sm:$0xff] %v18465_v22  ;;  %v18468_v38 = vsel %vm12992_vm12, 4294967295, %v18467_v38  ;;  %9590 = vmatpush.msk.msra.mxu3 %vm12992_vm12, %v18392_v50  ;;  %vm13007_vm5 = vmor %vm3298_vm6, %vm3394_vm2  ;;  %vm3294_vm2 = vcmp.eq.s32.totalorder %v3198_v53, 0  ;;  %vm3386_vm8 = vcmp.eq.s32.totalorder %v3194_v47, 1  ;;  %v3189_v18 = vsub.s32 %v12188_v35, %v13011_v55 }
 0x8c3   : > { %v18470_v15 = vsel %vm13007_vm5, 4294967295, %v18469_v15  ;;  %9622 = vmatpush.msk.msrb.mxu1 %vm13007_vm5, %v18392_v50  ;;  %vm13022_vm6 = vmor %vm3293_vm0, %vm3389_vm4  ;;  %v3190_v53 = vsub.s32 %v12461_v17, %v13011_v55  ;;  %v18480_v21 = vmov 0  ;;  %v3090_v47 = vadd.s32 184, %v11976_v54 }
 0x8c4   : > { %18471 = vst [vmem:[#allocation68_spill] sm:$0xff] %v18470_v15  ;;  %v18474_v57 = vsel %vm13022_vm6, 4294967295, %v18473_v57  ;;  %9591 = vmatpush.msk.msra.mxu3 %vm13022_vm6, %v18392_v50  ;;  %vm13029_vm12 = vmor %vm3294_vm2, %vm3390_vm10  ;;  %vm3285_vm2 = vcmp.eq.s32.totalorder %v3189_v18, 0  ;;  %vm3381_vm10 = vcmp.eq.s32.totalorder %v3189_v18, 1  ;;  %v3186_v18 = vsub.s32 %v12461_v17, %v13037_v58 }
 0x8c5   : > { %v18476_v63 = vsel %vm13029_vm12, 4294967295, %v18475_v63  ;;  %9623 = vmatpush.msk.msrb.mxu1 %vm13029_vm12, %v18392_v50  ;;  %vm13044_vm0 = vmor %vm3289_vm7, %vm3385_vm9  ;;  %vm3286_vm5 = vcmp.eq.s32.totalorder %v3190_v53, 0  ;;  %vm3382_vm12 = vcmp.eq.s32.totalorder %v3190_v53, 1  ;;  %v3181_v53 = vsub.s32 %v12188_v35, %v13039_v14 }
 0x8c6   : > { %18477 = vst [vmem:[#allocation70_spill] sm:$0xff] %v18476_v63  ;;  %v18481_v21 = vsel %vm13044_vm0, 4294967295, %v18480_v21  ;;  %9592 = vmatpush.msk.msra.mxu3 %vm13044_vm0, %v18392_v50  ;;  %vm13053_vm4 = vmor %vm3290_vm1, %vm3386_vm8  ;;  %v13083_v34 = vmul.u32 2, %v3090_v47  ;;  %vm3281_vm1 = vcmp.eq.s32.totalorder %v3185_v4, 0  ;;  %vm3377_vm7 = vcmp.eq.s32.totalorder %v3185_v4, 1 }
 0x8c7   : > { %v18483_v42 = vsel %vm13053_vm4, 4294967295, %v18482_v42  ;;  %9624 = vmatpush.msk.msrb.mxu1 %vm13053_vm4, %v18392_v50  ;;  %vm13064_vm9 = vmor %vm3285_vm2, %vm3381_vm10  ;;  %vm3282_vm2 = vcmp.eq.s32.totalorder %v3186_v18, 0  ;;  %vm3378_vm10 = vcmp.eq.s32.totalorder %v3186_v18, 1  ;;  %vm3374_vm0 = vcmp.eq.s32.totalorder %v3182_v60, 1  ;;  %v13111_v33 = vpop.f32.mrf.mxu3 }
 0x8c8   : > { %18484 = vst [vmem:[#allocation73_spill] sm:$0xff] %v18483_v42  ;;  %v18486_v1 = vsel %vm13064_vm9, 4294967295, %v18485_v1  ;;  %9593 = vmatpush.msk.msra.mxu3 %vm13064_vm9, %v18392_v50  ;;  %vm13079_vm8 = vmor %vm3286_vm5, %vm3382_vm12  ;;  %vm3277_vm12 = vcmp.eq.s32.totalorder %v3181_v53, 0  ;;  %vm3373_vm5 = vcmp.eq.s32.totalorder %v3181_v53, 1  ;;  %vm3278_vm9 = vcmp.eq.s32.totalorder %v3182_v60, 0 }
 0x8c9   : > { %v18488_v6 = vsel %vm13079_vm8, 4294967295, %v18487_v6  ;;  %18490 = vst [vmem:[#allocation75_spill] sm:$0xff] %v13083_v34  ;;  %9625 = vmatpush.msk.msrb.mxu1 %vm13079_vm8, %v18392_v50  ;;  %vm13090_vm4 = vmor %vm3281_vm1, %vm3377_vm7  ;;  %v3177_v4 = vsub.s32 %v12188_v35, %v13083_v34  ;;  %v3178_v47 = vsub.s32 %v12461_v17, %v13083_v34  ;;  %v3173_v18 = vsub.s32 %v12188_v35, %v13085_v25 }
 0x8ca   : > { %18489 = vst [vmem:[#allocation74_spill] sm:$0xff] %v18488_v6  ;;  %v18493_v26 = vsel %vm13090_vm4, 4294967295, %v18492_v26  ;;  %9594 = vmatpush.msk.msra.mxu3 %vm13090_vm4, %v18392_v50  ;;  %vm13097_vm6 = vmor %vm3282_vm2, %vm3378_vm10  ;;  %v3174_v53 = vsub.s32 %v12461_v17, %v13085_v25  ;;  %v18497_v6 = vmov 0  ;;  %v3087_v42 = vadd.s32 160, %v11976_v54 }
 0x8cb   : > { %v18495_v23 = vsel %vm13097_vm6, 4294967295, %v18494_v23  ;;  %9626 = vmatpush.msk.msrb.mxu1 %vm13097_vm6, %v18392_v50  ;;  %vm13116_vm1 = vmor %vm3277_vm12, %vm3373_vm5  ;;  %v18500_v63 = vmov 0  ;;  %vm3273_vm2 = vcmp.eq.s32.totalorder %v3177_v4, 0  ;;  %vm3369_vm10 = vcmp.eq.s32.totalorder %v3177_v4, 1 }
 0x8cc   : > { %18496 = vst [vmem:[#allocation77_spill] sm:$0xff] %v18495_v23  ;;  %v18498_v6 = vsel %vm13116_vm1, 4294967295, %v18497_v6  ;;  %9595 = vmatpush.msk.msra.mxu3 %vm13116_vm1, %v18392_v50  ;;  %vm13128_vm7 = vmor %vm3278_vm9, %vm3374_vm0  ;;  %vm3274_vm12 = vcmp.eq.s32.totalorder %v3178_v47, 0  ;;  %vm3370_vm5 = vcmp.eq.s32.totalorder %v3178_v47, 1  ;;  %v18503_v23 = vmov 0 }
 0x8cd   : > { %18499 = vst [vmem:[#allocation78_spill] sm:$0xff] %v18498_v6  ;;  %v18501_v63 = vsel %vm13128_vm7, 4294967295, %v18500_v63  ;;  %9627 = vmatpush.msk.msrb.mxu1 %vm13128_vm7, %v18392_v50  ;;  %vm13135_vm6 = vmor %vm3273_vm2, %vm3369_vm10  ;;  %vm3269_vm8 = vcmp.eq.s32.totalorder %v3173_v18, 0  ;;  %vm3365_vm1 = vcmp.eq.s32.totalorder %v3173_v18, 1  ;;  %vm3270_vm4 = vcmp.eq.s32.totalorder %v3174_v53, 0 }
 0x8ce   : > { %18502 = vst [vmem:[#allocation79_spill] sm:$0xff] %v18501_v63  ;;  %v18504_v23 = vsel %vm13135_vm6, 4294967295, %v18503_v23  ;;  %vm3366_vm14 = vcmp.eq.s32.totalorder %v3174_v53, 1  ;;  %9596 = vmatpush.msk.msra.mxu3 %vm13135_vm6, %v18392_v50  ;;  %vm13146_vm0 = vmor %vm3274_vm12, %vm3370_vm5  ;;  %v18506_v4 = vmov 0  ;;  %v13150_v47 = vmul.u32 2, %v3088_v39 }
 0x8cf   : > { %18505 = vst [vmem:[#allocation80_spill] sm:$0xff] %v18504_v23  ;;  %v18507_v4 = vsel %vm13146_vm0, 4294967295, %v18506_v4  ;;  %v13152_v63 = vmul.u32 2, %v3087_v42  ;;  %v3085_v18 = vadd.s32 144, %v11976_v54  ;;  %9628 = vmatpush.msk.msrb.mxu1 %vm13146_vm0, %v18392_v50  ;;  %vm13160_vm9 = vmor %vm3269_vm8, %vm3365_vm1  ;;  %v18512_v53 = vmov 0 }
 0x8d0   : > { %18508 = vst [vmem:[#allocation81_spill] sm:$0xff] %v18507_v4  ;;  %v18513_v53 = vsel %vm13160_vm9, 4294967295, %v18512_v53  ;;  %v3084_v15 = vadd.s32 136, %v11976_v54  ;;  %9597 = vmatpush.msk.msra.mxu3 %vm13160_vm9, %v18392_v50  ;;  %vm13168_vm2 = vmor %vm3270_vm4, %vm3366_vm14  ;;  %v18515_v39 = vmov 0  ;;  %v3169_v43 = vsub.s32 %v12188_v35, %v13150_v47 }
 0x8d1   : > { %18509 = vst [vmem:[#allocation82_spill] sm:$0xff] %v13150_v47  ;;  %v18516_v39 = vsel %vm13168_vm2, 4294967295, %v18515_v39  ;;  %v3170_v42 = vsub.s32 %v12461_v17, %v13150_v47  ;;  %v3165_v4 = vsub.s32 %v12188_v35, %v13152_v63  ;;  %v3166_v0 = vsub.s32 %v12461_v17, %v13152_v63  ;;  %9629 = vmatpush.msk.msrb.mxu1 %vm13168_vm2, %v18392_v50 }
 0x8d2   : > { %18510 = vst [vmem:[#allocation83_spill] sm:$0xff] %v13152_v63  ;;  %v3161_v22 = vsub.s32 %v12188_v35, %v13154_v19  ;;  %v3162_v37 = vsub.s32 %v12461_v17, %v13154_v19  ;;  %v13187_v62 = vmul.u32 2, %v3085_v18  ;;  %v13189_v30 = vmul.u32 2, %v3084_v15  ;;  %v2851_v15 = vpop.f32.mrf.mxu2 }
 0x8d3   : > { %18514 = vst [vmem:[#allocation85_spill] sm:$0xff] %v18513_v53  ;;  %vm3265_vm14 = vcmp.eq.s32.totalorder %v3169_v43, 0  ;;  %vm3361_vm4 = vcmp.eq.s32.totalorder %v3169_v43, 1  ;;  %vm3266_vm8 = vcmp.eq.s32.totalorder %v3170_v42, 0  ;;  %vm3362_vm1 = vcmp.eq.s32.totalorder %v3170_v42, 1  ;;  %v13202_v43 = vpop.f32.mrf.mxu3 }
 0x8d4   : > { %18517 = vst [vmem:[#allocation86_spill] sm:$0xff] %v18516_v39  ;;  %vm13191_vm10 = vmor %vm3265_vm14, %vm3361_vm4  ;;  %vm3261_vm12 = vcmp.eq.s32.totalorder %v3165_v4, 0  ;;  %vm3357_vm5 = vcmp.eq.s32.totalorder %v3165_v4, 1  ;;  %vm3262_vm2 = vcmp.eq.s32.totalorder %v3166_v0, 0  ;;  %vm3358_vm0 = vcmp.eq.s32.totalorder %v3166_v0, 1 }
 0x8d5   : > { %18518 = vst [vmem:[#allocation87_spill] sm:$0xff] %v13187_v62  ;;  %v18521_v8 = vsel %vm13191_vm10, 4294967295, %v18520_v8  ;;  %9598 = vmatpush.msk.msra.mxu3 %vm13191_vm10, %v18392_v50  ;;  %vm13198_vm7 = vmor %vm3266_vm8, %vm3362_vm1  ;;  %v18523_v18 = vmov 0  ;;  %vm3257_vm9 = vcmp.eq.s32.totalorder %v3161_v22, 0  ;;  %vm3353_vm6 = vcmp.eq.s32.totalorder %v3161_v22, 1 }
 0x8d6   : > { %18519 = vst [vmem:[#allocation88_spill] sm:$0xff] %v13189_v30  ;;  %v18524_v18 = vsel %vm13198_vm7, 4294967295, %v18523_v18  ;;  %vm3258_vm15 = vcmp.eq.s32.totalorder %v3162_v37, 0  ;;  %vm3354_vm13 = vcmp.eq.s32.totalorder %v3162_v37, 1  ;;  %9630 = vmatpush.msk.msrb.mxu1 %vm13198_vm7, %v18392_v50  ;;  %vm13207_vm14 = vmor %vm3261_vm12, %vm3357_vm5  ;;  %v18526_v4 = vmov 0 }
 0x8d7   : > { %18522 = vst [vmem:[#allocation89_spill] sm:$0xff] %v18521_v8  ;;  %v18527_v4 = vsel %vm13207_vm14, 4294967295, %v18526_v4  ;;  %v3157_v42 = vsub.s32 %v12188_v35, %v13187_v62  ;;  %v3158_v39 = vsub.s32 %v12461_v17, %v13187_v62  ;;  %v3153_v40 = vsub.s32 %v12188_v35, %v13189_v30  ;;  %9599 = vmatpush.msk.msra.mxu3 %vm13207_vm14, %v18392_v50  ;;  %vm13226_vm4 = vmor %vm3262_vm2, %vm3358_vm0 }
 0x8d8   : > { %18525 = vst [vmem:[#allocation90_spill] sm:$0xff] %v18524_v18  ;;  %v3154_v59 = vsub.s32 %v12461_v17, %v13189_v30  ;;  %v18529_v18 = vmov 0  ;;  %v3083_v53 = vadd.s32 128, %v11976_v54  ;;  %v13232_v23 = vadd.s32 256, %v12188_v35  ;;  %9631 = vmatpush.msk.msrb.mxu1 %vm13226_vm4, %v18392_v50  ;;  %vm13250_vm0 = vmor %vm3257_vm9, %vm3353_vm6 }
 0x8d9   : > { %18528 = vst [vmem:[#allocation91_spill] sm:$0xff] %v18527_v4  ;;  %v18530_v18 = vsel %vm13226_vm4, 4294967295, %v18529_v18  ;;  %v18534_v0 = vmov 0  ;;  %vm3253_vm2 = vcmp.eq.s32.totalorder %v3157_v42, 0  ;;  %vm3349_vm8 = vcmp.eq.s32.totalorder %v3157_v42, 1  ;;  %9600 = vmatpush.msk.msra.mxu3 %vm13250_vm0, %v18392_v50  ;;  %vm13259_vm1 = vmor %vm3258_vm15, %vm3354_vm13 }
 0x8da   : > { %18531 = vst [vmem:[#allocation92_spill] sm:$0xff] %v18530_v18  ;;  %v18535_v0 = vsel %vm13250_vm0, 4294967295, %v18534_v0  ;;  %vm3254_vm12 = vcmp.eq.s32.totalorder %v3158_v39, 0  ;;  %vm3350_vm5 = vcmp.eq.s32.totalorder %v3158_v39, 1  ;;  %vm3249_vm4 = vcmp.eq.s32.totalorder %v3153_v40, 0  ;;  %9632 = vmatpush.msk.msrb.mxu1 %vm13259_vm1, %v18392_v50  ;;  %vm13266_vm6 = vmor %vm3253_vm2, %vm3349_vm8 }
 0x8db   : > { %18532 = vst [vmem:[#allocation93_spill] sm:$0xff] %v13232_v23  ;;  %vm3345_vm7 = vcmp.eq.s32.totalorder %v3153_v40, 1  ;;  %v18539_v22 = vmov 0  ;;  %vm3250_vm9 = vcmp.eq.s32.totalorder %v3154_v59, 0  ;;  %vm3346_vm0 = vcmp.eq.s32.totalorder %v3154_v59, 1  ;;  %9601 = vmatpush.msk.msra.mxu3 %vm13266_vm6, %v18392_v50  ;;  %vm13277_vm15 = vmor %vm3254_vm12, %vm3350_vm5 }
 0x8dc   : > { %v18540_v22 = vsel %vm13266_vm6, 4294967295, %v18539_v22  ;;  %v3147_v37 = vsub.s32 %v13232_v23, %v12469_v16  ;;  %v3148_v39 = vsub.s32 %v13235_v12, %v12469_v16  ;;  %v3145_v42 = vsub.s32 %v13232_v23, %v12471_v41  ;;  %9633 = vmatpush.msk.msrb.mxu1 %vm13277_vm15, %v18392_v50  ;;  %vm13293_vm13 = vmor %vm3249_vm4, %vm3345_vm7 }
 0x8dd   : > { %v18545_v54 = vmov 0  ;;  %9602 = vmatpush.msk.msra.mxu3 %vm13293_vm13, %v18392_v50  ;;  %vm13314_vm7 = vmor %vm3250_vm9, %vm3346_vm0  ;;  %v18547_v40 = vmov 0 }
 0x8de   : > { %v18546_v54 = vsel %vm13293_vm13, 4294967295, %v18545_v54  ;;  %vm3243_vm2 = vcmp.eq.s32.totalorder %v3147_v37, 0  ;;  %vm3339_vm8 = vcmp.eq.s32.totalorder %v3147_v37, 1  ;;  %v18548_v40 = vsel %vm13314_vm7, 4294967295, %v18547_v40  ;;  %9634 = vmatpush.msk.msrb.mxu1 %vm13314_vm7, %v18392_v50 }
 0x8df   : > { %18549 = vst [vmem:[#allocation98_spill] sm:$0xff] %v18548_v40  ;;  %vm13321_vm14 = vmor %vm3243_vm2, %vm3339_vm8  ;;  %vm3340_vm4 = vcmp.eq.s32.totalorder %v3148_v39, 1  ;;  %v3146_v37 = vsub.s32 %v13235_v12, %v12471_v41  ;;  %v3203_v41 = vsub.s32 %v13232_v23, %v12955_v28  ;;  %vm18571_vm8 = vcmp.eq.s32.totalorder %v3145_v42, 0 }
 0x8e0   : > { %9636 = vmatpush.msk.msrb.mxu2 %vm13321_vm14, %v18392_v50 }
 0x901   : > { %v13057_v44 = vpop.f32.mrf.mxu0  ;;  %v13059_v7 = vpop.f32.mrf.mxu1 }
 0x902   : > { %v13239_v6 = vadd.f32 %v13015_v9, %v13057_v44  ;;  %v13243_v4 = vadd.f32 %v13017_v2, %v13059_v7  ;;  %v18536_v7 = vmov 0  ;;  %v13270_v9 = vmul.u32 2, %v3083_v53 }
 0x903   : > { %v18537_v7 = vsel %vm13259_vm1, 4294967295, %v18536_v7  ;;  %v18542_v2 = vmov 0  ;;  %v3211_v44 = vsub.s32 %v13232_v23, %v12937_v36  ;;  %v3212_v53 = vsub.s32 %v13235_v12, %v12937_v36 }
 0x904   : > { %18538 = vst [vmem:[#allocation95_spill] sm:$0xff] %v18537_v7  ;;  %v18543_v2 = vsel %vm13277_vm15, 4294967295, %v18542_v2  ;;  %v3149_v7 = vsub.s32 %v12188_v35, %v13270_v9  ;;  %v3150_v16 = vsub.s32 %v12461_v17, %v13270_v9  ;;  %v18560_v17 = vmov 0 }
 0x905   : > { %18541 = vst [vmem:[#allocation96_spill] sm:$0xff] %v13270_v9  ;;  %vm18559_vm12 = vcmp.eq.s32.totalorder %v3211_v44, 0  ;;  %v3143_v35 = vsub.s32 %v13232_v23, %v12474_v20 }
 0x906   : > { %18544 = vst [vmem:[#allocation97_spill] sm:$0xff] %v18543_v2  ;;  %vm3245_vm5 = vcmp.eq.s32.totalorder %v3149_v7, 0  ;;  %vm3341_vm15 = vcmp.eq.s32.totalorder %v3149_v7, 1  ;;  %vm3246_vm1 = vcmp.eq.s32.totalorder %v3150_v16, 0  ;;  %vm3342_vm6 = vcmp.eq.s32.totalorder %v3150_v16, 1  ;;  %v2854_v16 = vpop.f32.mrf.mxu2  ;;  %v2883_v7 = vpop.f32.mrf.mxu3 }
 0x907   : > { %vm13327_vm0 = vmor %vm3245_vm5, %vm3341_vm15  ;;  %vm3404_vm15 = vcmp.eq.s32.totalorder %v3212_v53, 1  ;;  %vm18558_vm5 = vcmp.eq.s32.totalorder %v3211_v44, 1  ;;  %v18563_v44 = vmov 0 }
 0x908   : > { %9603 = vmatpush.msk.msra.mxu3 %vm13327_vm0, %v18392_v50  ;;  %vm13337_vm2 = vmor %vm3246_vm1, %vm3342_vm6  ;;  %vm18562_vm6 = vcmp.eq.s32.totalorder %v3148_v39, 0  ;;  %vm18566_vm1 = vcmp.eq.s32.totalorder %v3212_v53, 0  ;;  %v18576_v39 = vmov 0  ;;  %v3204_v53 = vsub.s32 %v13235_v12, %v12955_v28 }
 0x909   : > { %v13139_v60 = vpop.f32.mrf.mxu0  ;;  %v13141_v5 = vpop.f32.mrf.mxu1  ;;  %9635 = vmatpush.msk.msrb.mxu1 %vm13337_vm2, %v18392_v50  ;;  %vm13350_vm9 = vmor %vm18559_vm12, %vm18558_vm5  ;;  %vm18570_vm5 = vcmp.eq.s32.totalorder %v3145_v42, 1  ;;  %v3141_v42 = vsub.s32 %v13232_v23, %v12476_v24  ;;  %v3200_v28 = vsub.s32 %v13235_v12, %v12977_v46 }
 0x90a   : > { %v13303_v36 = vadd.f32 %v13109_v13, %v13139_v60  ;;  %v13307_v2 = vadd.f32 %v13111_v33, %v13141_v5  ;;  %v18550_v5 = vmov 0  ;;  %v18553_v60 = vmov 0  ;;  %9652 = vmatpush.msk.msrb.mxu3 %vm13350_vm9, %v18392_v50  ;;  %vm13369_vm12 = vmor %vm18562_vm6, %vm3340_vm4 }
 0x90b   : > { %v18551_v5 = vsel %vm13321_vm14, 4294967295, %v18550_v5  ;;  %v18554_v60 = vsel %vm13327_vm0, 4294967295, %v18553_v60  ;;  %v18561_v17 = vsel %vm13350_vm9, 4294967295, %v18560_v17  ;;  %v18564_v44 = vsel %vm13369_vm12, 4294967295, %v18563_v44  ;;  %9668 = vmatpush.msk.msra.mxu0 %vm13369_vm12, %v18392_v50  ;;  %vm13384_vm9 = vmor %vm18566_vm1, %vm3404_vm15 }
 0x90c   : > { %18552 = vst [vmem:[#allocation99_spill] sm:$0xff] %v18551_v5  ;;  %v3208_v5 = vsub.s32 %v13235_v12, %v12944_v31  ;;  %vm3338_vm6 = vcmp.eq.s32.totalorder %v3146_v37, 1  ;;  %9684 = vmatpush.msk.msra.mxu1 %vm13384_vm9, %v18392_v50  ;;  %vm13393_vm14 = vmor %vm18571_vm8, %vm18570_vm5  ;;  %vm3335_vm0 = vcmp.eq.s32.totalorder %v3143_v35, 1  ;;  %vm18578_vm8 = vcmp.eq.s32.totalorder %v3146_v37, 0 }
 0x90d   : > { %18565 = vst [vmem:[#allocation101_spill] sm:$0xff] %v18564_v44  ;;  %9637 = vmatpush.msk.msrb.mxu2 %vm13393_vm14, %v18392_v50  ;;  %vm13416_vm5 = vmor %vm18578_vm8, %vm3338_vm6  ;;  %v18582_v37 = vmov 0  ;;  %v3018_v44 = vpop.permute.xlu1 %3017 }
 0x90e   : > { %vm3400_vm12 = vcmp.eq.s32.totalorder %v3208_v5, 1  ;;  %9669 = vmatpush.msk.msra.mxu0 %vm13416_vm5, %v18392_v50 }
 0x911   : > { %v2777_v8 = vpop.f32.mrf.mxu0  ;;  %v13219_v48 = vpop.f32.mrf.mxu1 }
 0x912   : > { %v13325_v33 = vadd.f32 %v2851_v15, %v2777_v8  ;;  %v18555_v8 = vmov 0  ;;  %v3207_v15 = vsub.s32 %v13232_v23, %v12944_v31  ;;  %v3144_v31 = vsub.s32 %v13235_v12, %v12474_v20 }
 0x913   : > { %v18556_v8 = vsel %vm13337_vm2, 4294967295, %v18555_v8  ;;  %vm3304_vm2 = vcmp.eq.s32.totalorder %v3208_v5, 0  ;;  %v3139_v20 = vsub.s32 %v13232_v23, %v12478_v27 }
 0x914   : > { %18557 = vst [vmem:[#allocation100_spill] sm:$0xff] %v18556_v8  ;;  %v13362_v8 = vadd.f32 %v13202_v43, %v13219_v48  ;;  %v18567_v48 = vmov 0  ;;  %v18572_v43 = vmov 0  ;;  %vm18574_vm15 = vcmp.eq.s32.totalorder %v3207_v15, 1  ;;  %vm13427_vm7 = vmor %vm3304_vm2, %vm3400_vm12 }
 0x915   : > { %v18568_v48 = vsel %vm13384_vm9, 4294967295, %v18567_v48  ;;  %v18573_v43 = vsel %vm13393_vm14, 4294967295, %v18572_v43  ;;  %vm18575_vm1 = vcmp.eq.s32.totalorder %v3207_v15, 0  ;;  %v18583_v37 = vsel %vm13427_vm7, 4294967295, %v18582_v37  ;;  %9685 = vmatpush.msk.msra.mxu1 %vm13427_vm7, %v18392_v50 }
 0x916   : > { %18569 = vst [vmem:[#allocation102_spill] sm:$0xff] %v18568_v48  ;;  %vm13402_vm4 = vmor %vm18575_vm1, %vm18574_vm15  ;;  %vm3395_vm15 = vcmp.eq.s32.totalorder %v3203_v41, 1  ;;  %v13439_v48 = vsub.s32 %v13235_v12, %v12478_v27  ;;  %vm18585_vm2 = vcmp.eq.s32.totalorder %v3143_v35, 0  ;;  %vm18588_vm1 = vcmp.eq.s32.totalorder %v3203_v41, 0 }
 0x917   : > { %v18577_v39 = vsel %vm13402_vm4, 4294967295, %v18576_v39  ;;  %9653 = vmatpush.msk.msrb.mxu3 %vm13402_vm4, %v18392_v50  ;;  %18584 = vst [vmem:[#allocation104_spill] sm:$0xff] %v18583_v37  ;;  %vm13448_vm12 = vmor %vm18585_vm2, %vm3335_vm0  ;;  %vm18591_vm2 = vcmp.eq.s32.totalorder %v3144_v31, 1  ;;  %vm18592_vm6 = vcmp.eq.s32.totalorder %v3144_v31, 0  ;;  %v18593_v41 = vmov 0  ;;  %v18618_v37 = vld [vmem:[#allocation48_spill] sm:$0xff] }
 0x918   : > { %9638 = vmatpush.msk.msrb.mxu2 %vm13448_vm12, %v18392_v50  ;;  %vm13457_vm9 = vmor %vm18588_vm1, %vm3395_vm15  ;;  %vm18596_vm4 = vcmp.eq.s32.totalorder %v3204_v53, 1  ;;  %vm18597_vm0 = vcmp.eq.s32.totalorder %v3204_v53, 0  ;;  %v18603_v53 = vmov 0 }
 0x919   : > { %v2780_v59 = vpop.f32.mrf.mxu0  ;;  %v2809_v13 = vpop.f32.mrf.mxu1  ;;  %9654 = vmatpush.msk.msrb.mxu3 %vm13457_vm9, %v18392_v50  ;;  %vm13470_vm8 = vmor %vm18592_vm6, %vm18591_vm2  ;;  %vm18601_vm6 = vcmp.eq.s32.totalorder %v3141_v42, 1  ;;  %vm18602_vm2 = vcmp.eq.s32.totalorder %v3141_v42, 0  ;;  %v3196_v42 = vsub.s32 %v13235_v12, %v12979_v52 }
 0x91a   : > { %v13375_v40 = vadd.f32 %v2854_v16, %v2780_v59  ;;  %v13377_v18 = vadd.f32 %v2883_v7, %v2809_v13  ;;  %v3199_v59 = vsub.s32 %v13232_v23, %v12977_v46  ;;  %v18579_v13 = vmov 0  ;;  %9670 = vmatpush.msk.msra.mxu0 %vm13470_vm8, %v18392_v50  ;;  %vm13479_vm7 = vmor %vm18597_vm0, %vm18596_vm4 }
 0x91b   : > { %v18580_v13 = vsel %vm13416_vm5, 4294967295, %v18579_v13  ;;  %v3142_v16 = vsub.s32 %v13235_v12, %v12476_v24  ;;  %v3195_v24 = vsub.s32 %v13232_v23, %v12979_v52  ;;  %v18586_v46 = vmov 0  ;;  %9686 = vmatpush.msk.msra.mxu1 %vm13479_vm7, %v18392_v50  ;;  %vm13490_vm15 = vmor %vm18602_vm2, %vm18601_vm6 }
 0x91c   : > { %18581 = vst [vmem:[#allocation103_spill] sm:$0xff] %v18580_v13  ;;  %v18587_v46 = vsel %vm13448_vm12, 4294967295, %v18586_v46  ;;  %v18594_v41 = vsel %vm13470_vm8, 4294967295, %v18593_v41  ;;  %v18604_v53 = vsel %vm13490_vm15, 4294967295, %v18603_v53  ;;  %9639 = vmatpush.msk.msrb.mxu2 %vm13490_vm15, %v18392_v50  ;;  %vm18605_vm12 = vcmp.eq.s32.totalorder %v3199_v59, 1 }
 0x91d   : > { %18595 = vst [vmem:[#allocation105_spill] sm:$0xff] %v18594_v41  ;;  %vm3334_vm1 = vcmp.eq.s32.totalorder %v3142_v16, 1  ;;  %vm3387_vm0 = vcmp.eq.s32.totalorder %v3195_v24, 1  ;;  %vm18606_vm14 = vcmp.eq.s32.totalorder %v3199_v59, 0  ;;  %v18610_v59 = vmov 0 }
 0x91e   : > { %vm13499_vm5 = vmor %vm18606_vm14, %vm18605_vm12  ;;  %vm18609_vm14 = vcmp.eq.s32.totalorder %v3142_v16, 0  ;;  %v3138_v52 = vsub.s32 %v13235_v12, %v12480_v29  ;;  %vm18614_vm4 = vcmp.eq.s32.totalorder %v3200_v28, 0  ;;  %v18615_v16 = vmov 0 }
 0x91f   : > { %9655 = vmatpush.msk.msrb.mxu3 %vm13499_vm5, %v18392_v50  ;;  %vm13516_vm12 = vmor %vm18609_vm14, %vm3334_vm1  ;;  %vm3388_vm2 = vcmp.eq.s32.totalorder %v3196_v42, 1  ;;  %vm18628_vm6 = vcmp.eq.s32.totalorder %v13439_v48, 0 }
 0x920   : > { %v18611_v59 = vsel %vm13516_vm12, 4294967295, %v18610_v59  ;;  %9671 = vmatpush.msk.msra.mxu0 %vm13516_vm12, %v18392_v50 }
 0x921   : > { %v2962_v7 = vpop.f32.mrf.mxu0  ;;  %v2991_v15 = vpop.f32.mrf.mxu1  ;;  %18612 = vst [vmem:[#allocation107_spill] sm:$0xff] %v18611_v59 }
 0x922   : > { %v3003_v13 = vadd.f32 %v2962_v7, %v13239_v6  ;;  %v3004_v5 = vadd.f32 %v2991_v15, %v13243_v4  ;;  %v18589_v6 = vmov 0  ;;  %v18607_v7 = vmov 0 }
 0x923   : > { %v18590_v6 = vsel %vm13457_vm9, 4294967295, %v18589_v6  ;;  %v18608_v7 = vsel %vm13499_vm5, 4294967295, %v18607_v7  ;;  %v3137_v15 = vsub.s32 %v13232_v23, %v12480_v29  ;;  %vm18613_vm9 = vcmp.eq.s32.totalorder %v3200_v28, 1 }
 0x924   : > { %v13461_v35 = vadd.f32 %v3018_v44, %v3003_v13  ;;  %v13463_v4 = vadd.f32 %v3018_v44, %v3004_v5  ;;  %v18598_v44 = vmov 0  ;;  %v3191_v5 = vsub.s32 %v13232_v23, %v13011_v55  ;;  %vm13529_vm1 = vmor %vm18614_vm4, %vm18613_vm9 }
 0x925   : > { %v18599_v44 = vsel %vm13479_vm7, 4294967295, %v18598_v44  ;;  %v18616_v16 = vsel %vm13529_vm1, 4294967295, %v18615_v16  ;;  %v13539_v29 = vsub.s32 %v13232_v23, %v13037_v58  ;;  %9687 = vmatpush.msk.msra.mxu1 %vm13529_vm1, %v18392_v50  ;;  %vm18619_vm9 = vcmp.eq.s32.totalorder %v3139_v20, 1 }
 0x926   : > { %18600 = vst [vmem:[#allocation106_spill] sm:$0xff] %v18599_v44  ;;  %v3051_v31 = vmul.f32 1.442695, %v13461_v35  ;;  %v3053_v13 = vmul.f32 1.442695, %v13463_v4  ;;  %v3192_v44 = vsub.s32 %v13235_v12, %v13011_v55  ;;  %vm18620_vm4 = vcmp.eq.s32.totalorder %v3139_v20, 0  ;;  %v3023_v55 = vpop.permute.xlu2 %3022 }
 0x927   : > { %18617 = vst [vmem:[#allocation108_spill] sm:$0xff] %v18616_v16  ;;  %vm13548_vm14 = vmor %vm18620_vm4, %vm18619_vm9  ;;  %v18621_v28 = vmov 0  ;;  %vm18623_vm7 = vcmp.eq.s32.totalorder %v3195_v24, 0  ;;  %vm18627_vm4 = vcmp.eq.s32.totalorder %v13439_v48, 1  ;;  %v18629_v24 = vmov 0 }
 0x928   : > { %11447 = vpow2.f32 %v3051_v31  ;;  %v18622_v28 = vsel %vm13548_vm14, 4294967295, %v18621_v28  ;;  %9640 = vmatpush.msk.msrb.mxu2 %vm13548_vm14, %v18392_v50  ;;  %vm13557_vm12 = vmor %vm18623_vm7, %vm3387_vm0  ;;  %vm3330_vm1 = vcmp.eq.s32.totalorder %v3138_v52, 1  ;;  %vm18632_vm5 = vcmp.eq.s32.totalorder %v3196_v42, 0 }
 0x929   : > { %11449 = vpow2.f32 %v3053_v13  ;;  %v2965_v27 = vpop.f32.mrf.mxu0  ;;  %v2994_v31 = vpop.f32.mrf.mxu1  ;;  %v3135_v13 = vsub.s32 %v13232_v23, %v18618_v37  ;;  %9656 = vmatpush.msk.msrb.mxu3 %vm13557_vm12, %v18392_v50  ;;  %vm13572_vm7 = vmor %vm18628_vm6, %vm18627_vm4  ;;  %vm18636_vm6 = vcmp.eq.s32.totalorder %v3137_v15, 1  ;;  %v18638_v42 = vmov 0 }
 0x92a   : > { %v3005_v41 = vadd.f32 %v2965_v27, %v13303_v36  ;;  %v3006_v59 = vadd.f32 %v2994_v31, %v13307_v2  ;;  %v18624_v27 = vmov 0  ;;  %v18630_v24 = vsel %vm13572_vm7, 4294967295, %v18629_v24  ;;  %9672 = vmatpush.msk.msra.mxu0 %vm13572_vm7, %v18392_v50  ;;  %vm13581_vm9 = vmor %vm18632_vm5, %vm3388_vm2 }
 0x92b   : > { %v18625_v27 = vsel %vm13557_vm12, 4294967295, %v18624_v27  ;;  %18631 = vst [vmem:[#allocation110_spill] sm:$0xff] %v18630_v24  ;;  %v3136_v2 = vsub.s32 %v13235_v12, %v18618_v37  ;;  %9688 = vmatpush.msk.msra.mxu1 %vm13581_vm9, %v18392_v50  ;;  %vm18637_vm5 = vcmp.eq.s32.totalorder %v3137_v15, 0  ;;  %vm18640_vm8 = vcmp.eq.s32.totalorder %v3191_v5, 1 }
 0x92c   : > { %18626 = vst [vmem:[#allocation109_spill] sm:$0xff] %v18625_v27  ;;  %v13561_v20 = vadd.f32 %v3023_v55, %v3005_v41  ;;  %v13563_v36 = vadd.f32 %v3023_v55, %v3006_v59  ;;  %v18633_v55 = vmov 0  ;;  %vm13594_vm2 = vmor %vm18637_vm5, %vm18636_vm6  ;;  %vm18641_vm12 = vcmp.eq.s32.totalorder %v3191_v5, 0 }
 0x92d   : > { %v18634_v55 = vsel %vm13581_vm9, 4294967295, %v18633_v55  ;;  %v18639_v42 = vsel %vm13594_vm2, 4294967295, %v18638_v42  ;;  %9641 = vmatpush.msk.msrb.mxu2 %vm13594_vm2, %v18392_v50  ;;  %vm13604_vm0 = vmor %vm18641_vm12, %vm18640_vm8  ;;  %v3188_v15 = vsub.s32 %v13235_v12, %v13037_v58  ;;  %vm18645_vm14 = vcmp.eq.s32.totalorder %v3138_v52, 0 }
 0x92e   : > { %18635 = vst [vmem:[#allocation111_spill] sm:$0xff] %v18634_v55  ;;  %v11448_v48 = vpop.eup %11447  ;;  %v3055_v41 = vmul.f32 1.442695, %v13561_v20  ;;  %v3057_v59 = vmul.f32 1.442695, %v13563_v36  ;;  %v18642_v55 = vmov 0  ;;  %9657 = vmatpush.msk.msrb.mxu3 %vm13604_vm0, %v18392_v50  ;;  %vm13616_vm4 = vmor %vm18645_vm14, %vm3330_vm1  ;;  %v3183_v27 = vsub.s32 %v13232_v23, %v13039_v14 }
 0x92f   : > { %v11450_v31 = vpop.eup %11449  ;;  %v9468_v37 = vadd.f32 -1.0, %v11448_v48  ;;  %v18643_v55 = vsel %vm13604_vm0, 4294967295, %v18642_v55  ;;  %v18646_v5 = vmov 0  ;;  %v18649_v48 = vld [vmem:[#allocation49_spill] sm:$0xff]  ;;  %vm18650_vm8 = vcmp.gt.f32.partialorder %v13461_v35, 0.0  ;;  %9673 = vmatpush.msk.msra.mxu0 %vm13616_vm4, %v18392_v50 }
 0x930   : > { %18644 = vst [vmem:[#allocation112_spill] sm:$0xff] %v18643_v55  ;;  %11451 = vpow2.f32 %v3055_v41  ;;  %v9469_v16 = vadd.f32 -1.0, %v11450_v31  ;;  %v18647_v5 = vsel %vm13616_vm4, 4294967295, %v18646_v5  ;;  %v3133_v24 = vsub.s32 %v13232_v23, %v18649_v48 }
 0x931   : > { %18648 = vst [vmem:[#allocation113_spill] sm:$0xff] %v18647_v5  ;;  %11453 = vpow2.f32 %v3057_v59  ;;  %v2968_v58 = vpop.f32.mrf.mxu0  ;;  %v2997_v41 = vpop.f32.mrf.mxu1  ;;  %v13627_v31 = vsel %vm18650_vm8, %v13461_v35, %v9468_v37  ;;  %vm18651_vm12 = vcmp.eq.s32.totalorder %v3192_v44, 1  ;;  %vm18652_vm1 = vcmp.eq.s32.totalorder %v3192_v44, 0 }
 0x932   : > { %vm13634_vm14 = vmor %vm18652_vm1, %vm18651_vm12  ;;  %v18653_v52 = vmov 0  ;;  %v3007_v59 = vadd.f32 %v2968_v58, %v13325_v33  ;;  %v3008_v55 = vadd.f32 %v2997_v41, %v13362_v8  ;;  %3709 = vmatmul.f32.vlgmr.msra.gmra.mxu2 %v13627_v31  ;;  %vm18656_vm8 = vcmp.gt.f32.partialorder %v13463_v4, 0.0  ;;  %3767 = vmatmul.f32.vlgmr.msrb.gmra.mxu0 %v13627_v31  ;;  %v3028_v44 = vpop.permute.xlu0 %3027 }
 0x933   : > { %v18654_v52 = vsel %vm13634_vm14, 4294967295, %v18653_v52  ;;  %v13644_v37 = vsel %vm18656_vm8, %v13463_v4, %v9469_v16  ;;  %vm18657_vm9 = vcmp.eq.s32.totalorder %v3135_v13, 1  ;;  %vm18658_vm12 = vcmp.eq.s32.totalorder %v3135_v13, 0  ;;  %9689 = vmatpush.msk.msra.mxu1 %vm13634_vm14, %v18392_v50 }
 0x934   : > { %18655 = vst [vmem:[#allocation114_spill] sm:$0xff] %v18654_v52  ;;  %vm13649_vm1 = vmor %vm18658_vm12, %vm18657_vm9  ;;  %v18659_v35 = vmov 0  ;;  %vm3380_vm6 = vcmp.eq.s32.totalorder %v3188_v15, 1  ;;  %3738 = vmatmul.f32.vlgmr.msra.gmra.mxu3 %v13644_v37  ;;  %3796 = vmatmul.f32.vlgmr.msrb.gmra.mxu1 %v13644_v37  ;;  %vm18662_vm5 = vcmp.eq.s32.totalorder %v13539_v29, 1  ;;  %vm18663_vm4 = vcmp.eq.s32.totalorder %v13539_v29, 0 }
 0x935   : > { %v18660_v35 = vsel %vm13649_vm1, 4294967295, %v18659_v35  ;;  %vm13659_vm8 = vmor %vm18663_vm4, %vm18662_vm5  ;;  %v18664_v58 = vmov 0  ;;  %v3134_v33 = vsub.s32 %v13235_v12, %v18649_v48  ;;  %v13665_v8 = vadd.f32 %v3028_v44, %v3007_v59  ;;  %9642 = vmatpush.msk.msrb.mxu2 %vm13649_vm1, %v18392_v50 }
 0x936   : > { %18661 = vst [vmem:[#allocation115_spill] sm:$0xff] %v18660_v35  ;;  %v18665_v58 = vsel %vm13659_vm8, 4294967295, %v18664_v58  ;;  %v13667_v4 = vadd.f32 %v3028_v44, %v3008_v55  ;;  %vm18667_vm4 = vcmp.eq.s32.totalorder %v3136_v2, 1  ;;  %vm18668_vm5 = vcmp.eq.s32.totalorder %v3136_v2, 0  ;;  %9658 = vmatpush.msk.msrb.mxu3 %vm13659_vm8, %v18392_v50  ;;  %v18676_v55 = vld [vmem:[#allocation27_spill] sm:$0xff]  ;;  %v11452_v59 = vpop.eup %11451 }
 0x937   : > { %18666 = vst [vmem:[#allocation116_spill] sm:$0xff] %v18665_v58  ;;  %vm13677_vm12 = vmor %vm18668_vm5, %vm18667_vm4  ;;  %v18669_v29 = vmov 0  ;;  %v3184_v16 = vsub.s32 %v13235_v12, %v13039_v14  ;;  %vm18672_vm7 = vcmp.eq.s32.totalorder %v3188_v15, 0  ;;  %v18673_v13 = vmov 0  ;;  %v11454_v48 = vpop.eup %11453 }
 0x938   : > { %v18670_v29 = vsel %vm13677_vm12, 4294967295, %v18669_v29  ;;  %9674 = vmatpush.msk.msra.mxu0 %vm13677_vm12, %v18392_v50  ;;  %vm13691_vm0 = vmor %vm18672_vm7, %vm3380_vm6  ;;  %v3131_v2 = vsub.s32 %v13232_v23, %v18676_v55  ;;  %v3179_v41 = vsub.s32 %v13232_v23, %v13083_v34  ;;  %v3059_v44 = vmul.f32 1.442695, %v13665_v8 }
 0x939   : > { %18671 = vst [vmem:[#allocation117_spill] sm:$0xff] %v18670_v29  ;;  %v18674_v13 = vsel %vm13691_vm0, 4294967295, %v18673_v13  ;;  %v3061_v14 = vmul.f32 1.442695, %v13667_v4  ;;  %9690 = vmatpush.msk.msra.mxu1 %vm13691_vm0, %v18392_v50  ;;  %vm18677_vm7 = vcmp.eq.s32.totalorder %v3133_v24, 1  ;;  %vm18678_vm6 = vcmp.eq.s32.totalorder %v3133_v24, 0  ;;  %v3000_v29 = vpop.f32.mrf.mxu1 }
 0x93a   : > { %18675 = vst [vmem:[#allocation118_spill] sm:$0xff] %v18674_v13  ;;  %vm13706_vm9 = vmor %vm18678_vm6, %vm18677_vm7  ;;  %v18679_v15 = vmov 0  ;;  %vm3045_vm14 = vcmp.gt.f32.partialorder %v13561_v20, 0.0  ;;  %v9470_v52 = vadd.f32 -1.0, %v11452_v59  ;;  %vm18682_vm8 = vcmp.eq.s32.totalorder %v3183_v27, 1 }
 0x93b   : > { %v18680_v15 = vsel %vm13706_vm9, 4294967295, %v18679_v15  ;;  %9643 = vmatpush.msk.msrb.mxu2 %vm13706_vm9, %v18392_v50  ;;  %vm18683_vm0 = vcmp.eq.s32.totalorder %v3183_v27, 0  ;;  %v18684_v24 = vmov 0  ;;  %11455 = vpow2.f32 %v3059_v44  ;;  %v2971_v27 = vpop.f32.mrf.mxu0 }
 0x93c   : > { %18681 = vst [vmem:[#allocation119_spill] sm:$0xff] %v18680_v15  ;;  %vm13717_vm1 = vmor %vm18683_vm0, %vm18682_vm8  ;;  %v9471_v13 = vadd.f32 -1.0, %v11454_v48  ;;  %vm18687_vm6 = vcmp.eq.s32.totalorder %v3134_v33, 1  ;;  %vm18688_vm4 = vcmp.eq.s32.totalorder %v3134_v33, 0  ;;  %v18689_v59 = vmov 0 }
 0x93d   : > { %v18685_v24 = vsel %vm13717_vm1, 4294967295, %v18684_v24  ;;  %9659 = vmatpush.msk.msrb.mxu3 %vm13717_vm1, %v18392_v50  ;;  %vm13726_vm12 = vmor %vm18688_vm4, %vm18687_vm6  ;;  %vm3323_vm5 = vcmp.eq.s32.totalorder %v3131_v2, 1  ;;  %vm3275_vm9 = vcmp.eq.s32.totalorder %v3179_v41, 0  ;;  %11457 = vpow2.f32 %v3061_v14 }
 0x93e   : > { %18686 = vst [vmem:[#allocation120_spill] sm:$0xff] %v18685_v24  ;;  %v18690_v59 = vsel %vm13726_vm12, 4294967295, %v18689_v59  ;;  %v13731_v5 = vsel %vm3045_vm14, %v13561_v20, %v9470_v52  ;;  %9675 = vmatpush.msk.msra.mxu0 %vm13726_vm12, %v18392_v50  ;;  %vm18692_vm0 = vcmp.eq.s32.totalorder %v3184_v16, 1  ;;  %vm18693_vm8 = vcmp.eq.s32.totalorder %v3184_v16, 0 }
 0x93f   : > { %18691 = vst [vmem:[#allocation121_spill] sm:$0xff] %v18690_v59  ;;  %vm13738_vm7 = vmor %vm18693_vm8, %vm18692_vm0  ;;  %v18694_v48 = vmov 0  ;;  %vm3371_vm4 = vcmp.eq.s32.totalorder %v3179_v41, 1  ;;  %v3132_v33 = vsub.s32 %v13235_v12, %v18676_v55  ;;  %v3009_v14 = vadd.f32 %v2971_v27, %v13375_v40  ;;  %3712 = vmatmul.f32.gmra.mxu2 %v13731_v5  ;;  %3770 = vmatmul.f32.gmra.mxu0 %v13731_v5  ;;  %v3033_v40 = vpop.permute.xlu1 %3032 }
 0x940   : > { %v18695_v48 = vsel %vm13738_vm7, 4294967295, %v18694_v48  ;;  %v3010_v44 = vadd.f32 %v3000_v29, %v13377_v18  ;;  %vm18697_vm14 = vcmp.gt.f32.partialorder %v13563_v36, 0.0  ;;  %vm18698_vm0 = vcmp.eq.s32.totalorder %v3131_v2, 0  ;;  %vm13763_vm12 = vmor %vm3275_vm9, %vm3371_vm4  ;;  %v18705_v29 = vld [vmem:[#allocation28_spill] sm:$0xff]  ;;  %9691 = vmatpush.msk.msra.mxu1 %vm13738_vm7, %v18392_v50 }
 0x941   : > { %18696 = vst [vmem:[#allocation122_spill] sm:$0xff] %v18695_v48  ;;  %v13750_v20 = vsel %vm18697_vm14, %v13563_v36, %v9471_v13  ;;  %vm13756_vm8 = vmor %vm18698_vm0, %vm3323_vm5  ;;  %v18699_v52 = vmov 0  ;;  %v18702_v18 = vmov 0  ;;  %vm3228_vm14 = vcmp.eq.s32.totalorder %v3132_v33, 0  ;;  %9660 = vmatpush.msk.msrb.mxu3 %vm13763_vm12, %v18392_v50 }
 0x942   : > { %v18700_v52 = vsel %vm13756_vm8, 4294967295, %v18699_v52  ;;  %3741 = vmatmul.f32.gmra.mxu3 %v13750_v20  ;;  %3799 = vmatmul.f32.gmra.mxu1 %v13750_v20  ;;  %v18703_v18 = vsel %vm13763_vm12, 4294967295, %v18702_v18  ;;  %vm3324_vm1 = vcmp.eq.s32.totalorder %v3132_v33, 1  ;;  %v3180_v36 = vsub.s32 %v13235_v12, %v13083_v34  ;;  %v11456_v33 = vpop.eup %11455 }
 0x943   : > { %18701 = vst [vmem:[#allocation123_spill] sm:$0xff] %v18700_v52  ;;  %v3129_v16 = vsub.s32 %v13232_v23, %v18705_v29  ;;  %v13771_v13 = vadd.f32 %v3033_v40, %v3009_v14  ;;  %v13773_v2 = vadd.f32 %v3033_v40, %v3010_v44  ;;  %9644 = vmatpush.msk.msrb.mxu2 %vm13756_vm8, %v18392_v50  ;;  %vm13782_vm5 = vmor %vm3228_vm14, %vm3324_vm1  ;;  %v18706_v41 = vmov 0  ;;  %v11458_v34 = vpop.eup %11457 }
 0x944   : > { %18704 = vst [vmem:[#allocation124_spill] sm:$0xff] %v18703_v18  ;;  %v18707_v41 = vsel %vm13782_vm5, 4294967295, %v18706_v41  ;;  %v3175_v27 = vsub.s32 %v13232_v23, %v13085_v25  ;;  %9676 = vmatpush.msk.msra.mxu0 %vm13782_vm5, %v18392_v50  ;;  %vm3276_vm4 = vcmp.eq.s32.totalorder %v3180_v36, 0  ;;  %vm3372_vm0 = vcmp.eq.s32.totalorder %v3180_v36, 1 }
 0x945   : > { %18708 = vst [vmem:[#allocation125_spill] sm:$0xff] %v18707_v41  ;;  %vm3225_vm9 = vcmp.eq.s32.totalorder %v3129_v16, 0  ;;  %vm3321_vm6 = vcmp.eq.s32.totalorder %v3129_v16, 1  ;;  %v3063_v14 = vmul.f32 1.442695, %v13771_v13  ;;  %vm13796_vm1 = vmor %vm3276_vm4, %vm3372_vm0  ;;  %v18709_v40 = vmov 0 }
 0x946   : > { %v3065_v44 = vmul.f32 1.442695, %v13773_v2  ;;  %v18710_v40 = vsel %vm13796_vm1, 4294967295, %v18709_v40  ;;  %vm3271_vm14 = vcmp.eq.s32.totalorder %v3175_v27, 0  ;;  %vm3367_vm7 = vcmp.eq.s32.totalorder %v3175_v27, 1  ;;  %9692 = vmatpush.msk.msra.mxu1 %vm13796_vm1, %v18392_v50  ;;  %vm13803_vm5 = vmor %vm3225_vm9, %vm3321_vm6  ;;  %v18715_v41 = vld [vmem:[#allocation29_spill] sm:$0xff] }
 0x947   : > { %18711 = vst [vmem:[#allocation126_spill] sm:$0xff] %v18710_v40  ;;  %v9472_v55 = vadd.f32 -1.0, %v11456_v33  ;;  %v18712_v36 = vmov 0  ;;  %v3130_v16 = vsub.s32 %v13235_v12, %v18705_v29  ;;  %v3176_v48 = vsub.s32 %v13235_v12, %v13085_v25  ;;  %9645 = vmatpush.msk.msrb.mxu2 %vm13803_vm5, %v18392_v50  ;;  %vm13816_vm4 = vmor %vm3271_vm14, %vm3367_vm7 }
 0x948   : > { %v18713_v36 = vsel %vm13803_vm5, 4294967295, %v18712_v36  ;;  %v3127_v59 = vsub.s32 %v13232_v23, %v18715_v41  ;;  %11459 = vpow2.f32 %v3063_v14  ;;  %v9473_v27 = vadd.f32 -1.0, %v11458_v34  ;;  %9661 = vmatpush.msk.msrb.mxu3 %vm13816_vm4, %v18392_v50 }
 0x949   : > { %18714 = vst [vmem:[#allocation127_spill] sm:$0xff] %v18713_v36  ;;  %v18716_v33 = vmov 0  ;;  %v3171_v40 = vsub.s32 %v13232_v23, %v13150_v47  ;;  %v3128_v29 = vsub.s32 %v13235_v12, %v18715_v41  ;;  %11461 = vpow2.f32 %v3065_v44 }
 0x94a   : > { %v18717_v33 = vsel %vm13816_vm4, 4294967295, %v18716_v33  ;;  %vm18719_vm6 = vcmp.gt.f32.partialorder %v13665_v8, 0.0  ;;  %vm3226_vm7 = vcmp.eq.s32.totalorder %v3130_v16, 0  ;;  %vm3322_vm9 = vcmp.eq.s32.totalorder %v3130_v16, 1 }
 0x94b   : > { %18718 = vst [vmem:[#allocation128_spill] sm:$0xff] %v18717_v33  ;;  %v13827_v14 = vsel %vm18719_vm6, %v13665_v8, %v9472_v55  ;;  %vm18720_vm0 = vcmp.gt.f32.partialorder %v13667_v4, 0.0  ;;  %vm13839_vm14 = vmor %vm3226_vm7, %vm3322_vm9  ;;  %v18721_v44 = vmov 0  ;;  %vm3272_vm6 = vcmp.eq.s32.totalorder %v3176_v48, 0 }
 0x94c   : > { %3715 = vmatmul.f32.gmra.mxu2 %v13827_v14  ;;  %v13836_v34 = vsel %vm18720_vm0, %v13667_v4, %v9473_v27  ;;  %3773 = vmatmul.f32.gmra.mxu0 %v13827_v14  ;;  %v18722_v44 = vsel %vm13839_vm14, 4294967295, %v18721_v44  ;;  %vm3368_vm1 = vcmp.eq.s32.totalorder %v3176_v48, 1  ;;  %vm3223_vm12 = vcmp.eq.s32.totalorder %v3127_v59, 0 }
 0x94d   : > { %18723 = vst [vmem:[#allocation129_spill] sm:$0xff] %v18722_v44  ;;  %3744 = vmatmul.f32.gmra.mxu3 %v13836_v34  ;;  %3802 = vmatmul.f32.gmra.mxu1 %v13836_v34  ;;  %vm13845_vm4 = vmor %vm3272_vm6, %vm3368_vm1  ;;  %v18724_v8 = vmov 0  ;;  %vm3319_vm5 = vcmp.eq.s32.totalorder %v3127_v59, 1  ;;  %vm3267_vm0 = vcmp.eq.s32.totalorder %v3171_v40, 0  ;;  %vm3363_vm8 = vcmp.eq.s32.totalorder %v3171_v40, 1  ;;  %v18730_v59 = vld [vmem:[#allocation32_spill] sm:$0xff] }
 0x94e   : > { %v18725_v8 = vsel %vm13845_vm4, 4294967295, %v18724_v8  ;;  %vm3224_vm2 = vcmp.eq.s32.totalorder %v3128_v29, 0  ;;  %9677 = vmatpush.msk.msra.mxu0 %vm13839_vm14, %v18392_v50  ;;  %9693 = vmatpush.msk.msra.mxu1 %vm13845_vm4, %v18392_v50  ;;  %vm13855_vm7 = vmor %vm3223_vm12, %vm3319_vm5  ;;  %v18727_v4 = vmov 0  ;;  %vm3320_vm1 = vcmp.eq.s32.totalorder %v3128_v29, 1  ;;  %v11460_v25 = vpop.eup %11459 }
 0x94f   : > { %18726 = vst [vmem:[#allocation130_spill] sm:$0xff] %v18725_v8  ;;  %v18728_v4 = vsel %vm13855_vm7, 4294967295, %v18727_v4  ;;  %v3172_v55 = vsub.s32 %v13235_v12, %v13150_v47  ;;  %v3125_v48 = vsub.s32 %v13232_v23, %v18730_v59  ;;  %v3167_v40 = vsub.s32 %v13232_v23, %v13152_v63  ;;  %9646 = vmatpush.msk.msrb.mxu2 %vm13855_vm7, %v18392_v50  ;;  %vm13868_vm9 = vmor %vm3267_vm0, %vm3363_vm8  ;;  %v18746_v8 = vld [vmem:[#allocation19_spill] sm:$0xff] }
 0x950   : > { %18729 = vst [vmem:[#allocation131_spill] sm:$0xff] %v18728_v4  ;;  %v18731_v16 = vmov 0  ;;  %v3126_v27 = vsub.s32 %v13235_v12, %v18730_v59  ;;  %v3168_v47 = vsub.s32 %v13235_v12, %v13152_v63  ;;  %9662 = vmatpush.msk.msrb.mxu3 %vm13868_vm9, %v18392_v50  ;;  %vm13882_vm8 = vmor %vm3224_vm2, %vm3320_vm1  ;;  %v18734_v41 = vmov 0  ;;  %v11462_v59 = vpop.eup %11461 }
 0x951   : > { %v18732_v16 = vsel %vm13868_vm9, 4294967295, %v18731_v16  ;;  %v18735_v41 = vsel %vm13882_vm8, 4294967295, %v18734_v41  ;;  %vm3268_vm6 = vcmp.eq.s32.totalorder %v3172_v55, 0  ;;  %vm3364_vm0 = vcmp.eq.s32.totalorder %v3172_v55, 1  ;;  %9678 = vmatpush.msk.msra.mxu0 %vm13882_vm8, %v18392_v50 }
 0x952   : > { %18733 = vst [vmem:[#allocation132_spill] sm:$0xff] %v18732_v16  ;;  %vm3221_vm4 = vcmp.eq.s32.totalorder %v3125_v48, 0  ;;  %vm3317_vm14 = vcmp.eq.s32.totalorder %v3125_v48, 1  ;;  %vm13889_vm5 = vmor %vm3268_vm6, %vm3364_vm0  ;;  %v18737_v63 = vmov 0  ;;  %vm3263_vm12 = vcmp.eq.s32.totalorder %v3167_v40, 0 }
 0x953   : > { %18736 = vst [vmem:[#allocation133_spill] sm:$0xff] %v18735_v41  ;;  %v18738_v63 = vsel %vm13889_vm5, 4294967295, %v18737_v63  ;;  %vm3359_vm9 = vcmp.eq.s32.totalorder %v3167_v40, 1  ;;  %vm3222_vm7 = vcmp.eq.s32.totalorder %v3126_v27, 0  ;;  %vm3318_vm2 = vcmp.eq.s32.totalorder %v3126_v27, 1  ;;  %9694 = vmatpush.msk.msra.mxu1 %vm13889_vm5, %v18392_v50  ;;  %vm13896_vm1 = vmor %vm3221_vm4, %vm3317_vm14 }
 0x954   : > { %18739 = vst [vmem:[#allocation134_spill] sm:$0xff] %v18738_v63  ;;  %v18740_v29 = vmov 0  ;;  %vm3264_vm15 = vcmp.eq.s32.totalorder %v3168_v47, 0  ;;  %vm3360_vm13 = vcmp.eq.s32.totalorder %v3168_v47, 1  ;;  %v9474_v55 = vadd.f32 -1.0, %v11460_v25  ;;  %9647 = vmatpush.msk.msrb.mxu2 %vm13896_vm1, %v18392_v50  ;;  %vm13903_vm6 = vmor %vm3263_vm12, %vm3359_vm9 }
 0x955   : > { %v18741_v29 = vsel %vm13896_vm1, 4294967295, %v18740_v29  ;;  %v9475_v48 = vadd.f32 -1.0, %v11462_v59  ;;  %v18743_v40 = vmov 0  ;;  %v3123_v63 = vsub.s32 %v13232_v23, %v18746_v8  ;;  %9663 = vmatpush.msk.msrb.mxu3 %vm13903_vm6, %v18392_v50  ;;  %vm13919_vm4 = vmor %vm3222_vm7, %vm3318_vm2 }
 0x956   : > { %18742 = vst [vmem:[#allocation135_spill] sm:$0xff] %v18741_v29  ;;  %v18744_v40 = vsel %vm13903_vm6, 4294967295, %v18743_v40  ;;  %v3163_v41 = vsub.s32 %v13232_v23, %v13154_v19  ;;  %v3124_v44 = vsub.s32 %v13235_v12, %v18746_v8  ;;  %v3164_v25 = vsub.s32 %v13235_v12, %v13154_v19  ;;  %v18752_v19 = vld [vmem:[#allocation20_spill] sm:$0xff]  ;;  %9679 = vmatpush.msk.msra.mxu0 %vm13919_vm4, %v18392_v50  ;;  %vm13942_vm7 = vmor %vm3264_vm15, %vm3360_vm13 }
 0x957   : > { %18745 = vst [vmem:[#allocation136_spill] sm:$0xff] %v18744_v40  ;;  %v18747_v59 = vmov 0  ;;  %vm18750_vm14 = vcmp.gt.f32.partialorder %v13771_v13, 0.0  ;;  %vm18751_vm9 = vcmp.gt.f32.partialorder %v13773_v2, 0.0  ;;  %v3121_v33 = vsub.s32 %v13232_v23, %v18752_v19  ;;  %9695 = vmatpush.msk.msra.mxu1 %vm13942_vm7, %v18392_v50 }
 0x958   : > { %v18748_v59 = vsel %vm13919_vm4, 4294967295, %v18747_v59  ;;  %v13926_v16 = vsel %vm18750_vm14, %v13771_v13, %v9474_v55  ;;  %v13931_v8 = vsel %vm18751_vm9, %v13773_v2, %v9475_v48  ;;  %v3159_v27 = vsub.s32 %v13232_v23, %v13187_v62  ;;  %v18765_v55 = vld [vmem:[#allocation21_spill] sm:$0xff] }
 0x959   : > { %18749 = vst [vmem:[#allocation137_spill] sm:$0xff] %v18748_v59  ;;  %v18753_v13 = vmov 0  ;;  %3718 = vmatmul.f32.gmra.mxu2 %v13926_v16  ;;  %vm3219_vm12 = vcmp.eq.s32.totalorder %v3123_v63, 0  ;;  %vm3315_vm0 = vcmp.eq.s32.totalorder %v3123_v63, 1  ;;  %vm3259_vm2 = vcmp.eq.s32.totalorder %v3163_v41, 0  ;;  %3747 = vmatmul.f32.gmra.mxu3 %v13931_v8 }
 0x95a   : > { %v18754_v13 = vsel %vm13942_vm7, 4294967295, %v18753_v13  ;;  %vm3355_vm14 = vcmp.eq.s32.totalorder %v3163_v41, 1  ;;  %vm13951_vm9 = vmor %vm3219_vm12, %vm3315_vm0  ;;  %v18756_v2 = vmov 0  ;;  %vm3220_vm13 = vcmp.eq.s32.totalorder %v3124_v44, 0  ;;  %3776 = vmatmul.f32.gmra.mxu0 %v13926_v16  ;;  %3805 = vmatmul.f32.gmra.mxu1 %v13931_v8 }
 0x95b   : > { %18755 = vst [vmem:[#allocation138_spill] sm:$0xff] %v18754_v13  ;;  %v18757_v2 = vsel %vm13951_vm9, 4294967295, %v18756_v2  ;;  %vm3316_vm15 = vcmp.eq.s32.totalorder %v3124_v44, 1  ;;  %vm3260_vm5 = vcmp.eq.s32.totalorder %v3164_v25, 0  ;;  %vm3356_vm4 = vcmp.eq.s32.totalorder %v3164_v25, 1  ;;  %vm13957_vm8 = vmor %vm3259_vm2, %vm3355_vm14  ;;  %9648 = vmatpush.msk.msrb.mxu2 %vm13951_vm9, %v18392_v50 }
 0x95c   : > { %18758 = vst [vmem:[#allocation139_spill] sm:$0xff] %v18757_v2  ;;  %v18759_v63 = vmov 0  ;;  %vm3217_vm6 = vcmp.eq.s32.totalorder %v3121_v33, 0  ;;  %vm3313_vm7 = vcmp.eq.s32.totalorder %v3121_v33, 1  ;;  %vm3255_vm1 = vcmp.eq.s32.totalorder %v3159_v27, 0  ;;  %9664 = vmatpush.msk.msrb.mxu3 %vm13957_vm8, %v18392_v50  ;;  %vm13967_vm12 = vmor %vm3220_vm13, %vm3316_vm15  ;;  %v18775_v33 = vld [vmem:[#allocation23_spill] sm:$0xff] }
 0x95d   : > { %v18760_v63 = vsel %vm13957_vm8, 4294967295, %v18759_v63  ;;  %v18762_v47 = vmov 0  ;;  %vm3351_vm0 = vcmp.eq.s32.totalorder %v3159_v27, 1  ;;  %v3122_v41 = vsub.s32 %v13235_v12, %v18752_v19  ;;  %9680 = vmatpush.msk.msra.mxu0 %vm13967_vm12, %v18392_v50  ;;  %vm13982_vm2 = vmor %vm3260_vm5, %vm3356_vm4 }
 0x95e   : > { %18761 = vst [vmem:[#allocation140_spill] sm:$0xff] %v18760_v63  ;;  %v18763_v47 = vsel %vm13967_vm12, 4294967295, %v18762_v47  ;;  %v3160_v44 = vsub.s32 %v13235_v12, %v13187_v62  ;;  %v3119_v48 = vsub.s32 %v13232_v23, %v18765_v55  ;;  %v18766_v13 = vmov 0  ;;  %9696 = vmatpush.msk.msra.mxu1 %vm13982_vm2, %v18392_v50  ;;  %vm13997_vm14 = vmor %vm3217_vm6, %vm3313_vm7 }
 0x95f   : > { %18764 = vst [vmem:[#allocation141_spill] sm:$0xff] %v18763_v47  ;;  %v18767_v13 = vsel %vm13982_vm2, 4294967295, %v18766_v13  ;;  %v3155_v59 = vsub.s32 %v13232_v23, %v13189_v30  ;;  %v3120_v19 = vsub.s32 %v13235_v12, %v18765_v55  ;;  %v3156_v62 = vsub.s32 %v13235_v12, %v13189_v30  ;;  %9649 = vmatpush.msk.msrb.mxu2 %vm13997_vm14, %v18392_v50  ;;  %vm14006_vm12 = vmor %vm3255_vm1, %vm3351_vm0 }
 0x960   : > { %18768 = vst [vmem:[#allocation142_spill] sm:$0xff] %v18767_v13  ;;  %v18769_v25 = vmov 0  ;;  %vm3218_vm5 = vcmp.eq.s32.totalorder %v3122_v41, 0  ;;  %vm3314_vm4 = vcmp.eq.s32.totalorder %v3122_v41, 1  ;;  %vm3256_vm13 = vcmp.eq.s32.totalorder %v3160_v44, 0  ;;  %9665 = vmatpush.msk.msrb.mxu3 %vm14006_vm12, %v18392_v50 }
 0x961   : > { %v18770_v25 = vsel %vm13997_vm14, 4294967295, %v18769_v25  ;;  %vm3352_vm15 = vcmp.eq.s32.totalorder %v3160_v44, 1  ;;  %v18772_v30 = vmov 0  ;;  %vm3215_vm2 = vcmp.eq.s32.totalorder %v3119_v48, 0  ;;  %vm14015_vm6 = vmor %vm3218_vm5, %vm3314_vm4 }
 0x962   : > { %18771 = vst [vmem:[#allocation143_spill] sm:$0xff] %v18770_v25  ;;  %v18773_v30 = vsel %vm14006_vm12, 4294967295, %v18772_v30  ;;  %vm3311_vm8 = vcmp.eq.s32.totalorder %v3119_v48, 1  ;;  %v3117_v55 = vsub.s32 %v13232_v23, %v18775_v33  ;;  %v18776_v41 = vmov 0  ;;  %9681 = vmatpush.msk.msra.mxu0 %vm14015_vm6, %v18392_v50  ;;  %vm14022_vm1 = vmor %vm3256_vm13, %vm3352_vm15 }
 0x963   : > { %18774 = vst [vmem:[#allocation144_spill] sm:$0xff] %v18773_v30  ;;  %v18777_v41 = vsel %vm14015_vm6, 4294967295, %v18776_v41  ;;  %vm3251_vm7 = vcmp.eq.s32.totalorder %v3155_v59, 0  ;;  %vm3347_vm14 = vcmp.eq.s32.totalorder %v3155_v59, 1  ;;  %v18779_v27 = vmov 0  ;;  %9697 = vmatpush.msk.msra.mxu1 %vm14022_vm1, %v18392_v50  ;;  %vm14033_vm5 = vmor %vm3215_vm2, %vm3311_vm8 }
 0x964   : > { %18778 = vst [vmem:[#allocation145_spill] sm:$0xff] %v18777_v41  ;;  %v18780_v27 = vsel %vm14022_vm1, 4294967295, %v18779_v27  ;;  %vm3216_vm0 = vcmp.eq.s32.totalorder %v3120_v19, 0  ;;  %vm3312_vm9 = vcmp.eq.s32.totalorder %v3120_v19, 1  ;;  %v3151_v44 = vsub.s32 %v13232_v23, %v13270_v9  ;;  %9650 = vmatpush.msk.msrb.mxu2 %vm14033_vm5, %v18392_v50  ;;  %vm14045_vm15 = vmor %vm3251_vm7, %vm3347_vm14 }
 0x965   : > { %18781 = vst [vmem:[#allocation146_spill] sm:$0xff] %v18780_v27  ;;  %v3118_v48 = vsub.s32 %v13235_v12, %v18775_v33  ;;  %v18782_v13 = vmov 0  ;;  %vm3252_vm4 = vcmp.eq.s32.totalorder %v3156_v62, 0  ;;  %vm3348_vm13 = vcmp.eq.s32.totalorder %v3156_v62, 1  ;;  %9666 = vmatpush.msk.msrb.mxu3 %vm14045_vm15, %v18392_v50  ;;  %vm14053_vm1 = vmor %vm3216_vm0, %vm3312_vm9 }
 0x966   : > { %v18783_v13 = vsel %vm14033_vm5, 4294967295, %v18782_v13  ;;  %v3152_v41 = vsub.s32 %v13235_v12, %v13270_v9  ;;  %v18785_v33 = vmov 0  ;;  %vm3213_vm8 = vcmp.eq.s32.totalorder %v3117_v55, 0  ;;  %9682 = vmatpush.msk.msra.mxu0 %vm14053_vm1, %v18392_v50  ;;  %vm14060_vm14 = vmor %vm3252_vm4, %vm3348_vm13 }
 0x967   : > { %18784 = vst [vmem:[#allocation147_spill] sm:$0xff] %v18783_v13  ;;  %v18786_v33 = vsel %vm14045_vm15, 4294967295, %v18785_v33  ;;  %vm3309_vm2 = vcmp.eq.s32.totalorder %v3117_v55, 1  ;;  %v18788_v62 = vmov 0  ;;  %vm3247_vm6 = vcmp.eq.s32.totalorder %v3151_v44, 0  ;;  %9698 = vmatpush.msk.msra.mxu1 %vm14060_vm14, %v18392_v50 }
 0x968   : > { %18787 = vst [vmem:[#allocation148_spill] sm:$0xff] %v18786_v33  ;;  %v18789_v62 = vsel %vm14053_vm1, 4294967295, %v18788_v62  ;;  %vm3343_vm12 = vcmp.eq.s32.totalorder %v3151_v44, 1  ;;  %v18791_v59 = vmov 0  ;;  %vm3214_vm7 = vcmp.eq.s32.totalorder %v3118_v48, 0  ;;  %vm14067_vm9 = vmor %vm3213_vm8, %vm3309_vm2 }
 0x969   : > { %18790 = vst [vmem:[#allocation149_spill] sm:$0xff] %v18789_v62  ;;  %v18792_v59 = vsel %vm14060_vm14, 4294967295, %v18791_v59  ;;  %vm3310_vm5 = vcmp.eq.s32.totalorder %v3118_v48, 1  ;;  %v18794_v19 = vmov 0  ;;  %vm3248_vm0 = vcmp.eq.s32.totalorder %v3152_v41, 0  ;;  %9651 = vmatpush.msk.msrb.mxu2 %vm14067_vm9, %v18392_v50  ;;  %vm14074_vm4 = vmor %vm3247_vm6, %vm3343_vm12 }
 0x96a   : > { %18793 = vst [vmem:[#allocation150_spill] sm:$0xff] %v18792_v59  ;;  %v18795_v19 = vsel %vm14067_vm9, 4294967295, %v18794_v19  ;;  %vm3344_vm15 = vcmp.eq.s32.totalorder %v3152_v41, 1  ;;  %v18797_v55 = vmov 0  ;;  %9667 = vmatpush.msk.msrb.mxu3 %vm14074_vm4, %v18392_v50  ;;  %vm14081_vm13 = vmor %vm3214_vm7, %vm3310_vm5  ;;  %v18800_v44 = vmov 0  ;;  %3825 = vmatmul.f32.vlgmr.msrb.gmra.mxu2 %v13627_v31 }
 0x96b   : > { %18796 = vst [vmem:[#allocation151_spill] sm:$0xff] %v18795_v19  ;;  %v18798_v55 = vsel %vm14074_vm4, 4294967295, %v18797_v55  ;;  %v18801_v44 = vsel %vm14081_vm13, 4294967295, %v18800_v44  ;;  %9683 = vmatpush.msk.msra.mxu0 %vm14081_vm13, %v18392_v50  ;;  %vm14089_vm8 = vmor %vm3248_vm0, %vm3344_vm15  ;;  %v18803_v41 = vmov 0  ;;  %3854 = vmatmul.f32.vlgmr.msrb.gmra.mxu3 %v13644_v37  ;;  %vm18807_vm12 = vcmask 7168  }
 0x96c   : > { %18799 = vst [vmem:[#allocation152_spill] sm:$0xff] %v18798_v55  ;;  %v18804_v41 = vsel %vm14089_vm8, 4294967295, %v18803_v41  ;;  %9699 = vmatpush.msk.msra.mxu1 %vm14089_vm8, %v18392_v50  ;;  %3883 = vmatmul.f32.vlgmr.msra.gmra.mxu0 %v13627_v31  ;;  %vm18808_vm6 = vmmov %vm18807_vm12 }
 0x96d   : > { %18802 = vst [vmem:[#allocation153_spill] sm:$0xff] %v18801_v44  ;;  %3912 = vmatmul.f32.vlgmr.msra.gmra.mxu1 %v13644_v37  ;;  %vm18809_vm5 = vmmov %vm18808_vm6 }
 0x96e   : > { %18805 = vst [vmem:[#allocation154_spill] sm:$0xff] %v18804_v41  ;;  %vm18810_vm15 = vmmov %vm18809_vm5 }
 0x96f   : > { %vm18811_vm2 = vmmov %vm18809_vm5 }
 0x970   : > { %vm18812_vm7 = vmmov %vm18811_vm2 }
 0x971   : > { %vm18813_vm0 = vmmov %vm18811_vm2 }
 0x972   : > { %3828 = vmatmul.f32.gmra.mxu2 %v13731_v5 }
 0x973   : > { %3857 = vmatmul.f32.gmra.mxu3 %v13750_v20 }
 0x974   : > { %3886 = vmatmul.f32.gmra.mxu0 %v13731_v5 }
 0x975   : > { %3915 = vmatmul.f32.gmra.mxu1 %v13750_v20 }
 0x97a   : > { %3831 = vmatmul.f32.gmra.mxu2 %v13827_v14 }
 0x97b   : > { %3860 = vmatmul.f32.gmra.mxu3 %v13836_v34 }
 0x97c   : > { %3889 = vmatmul.f32.gmra.mxu0 %v13827_v14 }
 0x97d   : > { %3918 = vmatmul.f32.gmra.mxu1 %v13836_v34 }
 0x982   : > { %3834 = vmatmul.f32.gmra.mxu2 %v13926_v16 }
 0x983   : > { %3863 = vmatmul.f32.gmra.mxu3 %v13931_v8 }
 0x984   : > { %3892 = vmatmul.f32.gmra.mxu0 %v13926_v16 }
 0x985   : > { %3921 = vmatmul.f32.gmra.mxu1 %v13931_v8 }
 0x9af   : > { %v3768_v48 = vpop.f32.mrf.mxu0 }
 0x9b1   : > { %v3797_v47 = vpop.f32.mrf.mxu1 }
 0x9b2   : > { %v3798_v24 = vadd.f32 %v3797_v47, %v3768_v48 }
 0x9b5   : > { %v3710_v9 = vpop.f32.mrf.mxu2 }
 0x9b7   : > { %v3739_v41 = vpop.f32.mrf.mxu3 }
 0x9b8   : > { %v3740_v4 = vadd.f32 %v3739_v41, %v3710_v9 }
 0x9ba   : > { %v11134_v36 = vpack.i.bf16 %v3798_v24, %v3740_v4 }
 0x9bc   : > { %v3771_v59 = vpop.f32.mrf.mxu0 }
 0x9bf   : > { %v3800_v27 = vpop.f32.mrf.mxu1 }
 0x9c2   : > { %v3713_v44 = vpop.f32.mrf.mxu2 }
 0x9c5   : > { %v3742_v62 = vpop.f32.mrf.mxu3 }
 0x9c9   : > { %v3774_v12 = vpop.f32.mrf.mxu0 }
 0x9ca   : > { %v3803_v23 = vpop.f32.mrf.mxu1 }
 0x9cb   : > { %v3804_v30 = vadd.f32 %v3803_v23, %v3774_v12 }
 0x9cf   : > { %v3716_v55 = vpop.f32.mrf.mxu2 }
 0x9d0   : > { %v3745_v33 = vpop.f32.mrf.mxu3 }
 0x9d1   : > { %v3746_v63 = vadd.f32 %v3745_v33, %v3716_v55 }
 0x9d3   : > { %v11119_v19 = vpack.i.bf16 %v3804_v30, %v3746_v63 }
 0x9d5   : > { %11120 = vrot.lane.b32.xlu2 %v11119_v19, %s11716_s1 }
 0x9d7   : > { %v3777_v40 = vpop.f32.mrf.mxu0  ;;  %v3806_v13 = vpop.f32.mrf.mxu1 }
 0x9d8   : > { %v3807_v25 = vadd.f32 %v3806_v13, %v3777_v40 }
 0x9da   : > { %3967 = vrot.lane.b32.xlu0 %v3807_v25, %s11716_s1 }
 0x9dc   : > { %v3719_v2 = vpop.f32.mrf.mxu2  ;;  %v3748_v29 = vpop.f32.mrf.mxu3 }
 0x9dd   : > { %v3749_v18 = vadd.f32 %v3748_v29, %v3719_v2  ;;  %v3743_v29 = vadd.f32 %v3742_v62, %v3713_v44 }
 0x9df   : > { %3965 = vrot.lane.b32.xlu2 %v3749_v18, %s11716_s1 }
 0x9e7   : > { %11135 = vrot.lane.b32.xlu2 %v11134_v36, %s11716_s1 }
 0x9e9   : > { %v3884_v12 = vpop.f32.mrf.mxu0 }
 0x9ea   : > { %v3913_v30 = vpop.f32.mrf.mxu1 }
 0x9eb   : > { %v3914_v62 = vadd.f32 %v3913_v30, %v3884_v12 }
 0x9ed   : > { %v3826_v23 = vpop.f32.mrf.mxu2 }
 0x9ee   : > { %v3855_v63 = vpop.f32.mrf.mxu3 }
 0x9ef   : > { %4012 = vrot.lane.b32.xlu2 %v13931_v8, %s11720_s19  ;;  %v3856_v8 = vadd.f32 %v3855_v63, %v3826_v23  ;;  %v18806_v23 = vpack.i.bf16 %v13750_v20, %v13836_v34 }
 0x9f1   : > { %v3887_v25 = vpop.f32.mrf.mxu0 }
 0x9f2   : > { %v3916_v33 = vpop.f32.mrf.mxu1 }
 0x9f3   : > { %v3917_v52 = vadd.f32 %v3916_v33, %v3887_v25 }
 0x9f5   : > { %v3829_v40 = vpop.f32.mrf.mxu2 }
 0x9f6   : > { %v3858_v13 = vpop.f32.mrf.mxu3 }
 0x9f7   : > { %4006 = vrot.lane.b32.xlu2 %v13644_v37, %s11720_s19  ;;  %v3859_v58 = vadd.f32 %v3858_v13, %v3829_v40  ;;  %v3801_v37 = vadd.f32 %v3800_v27, %v3771_v59 }
 0x9f9   : > { %v3890_v36 = vpop.f32.mrf.mxu0  ;;  %v11129_v44 = vpack.i.bf16 %v3859_v58, %v3801_v37 }
 0x9fa   : > { %v3919_v2 = vpop.f32.mrf.mxu1 }
 0x9fb   : > { %v3920_v47 = vadd.f32 %v3919_v2, %v3890_v36 }
 0x9fd   : > { %v3832_v18 = vpop.f32.mrf.mxu2  ;;  %v11139_v48 = vpack.i.bf16 %v3920_v47, %v3856_v8 }
 0x9fe   : > { %v3861_v9 = vpop.f32.mrf.mxu3 }
 0x9ff   : > { %v3862_v24 = vadd.f32 %v3861_v9, %v3832_v18  ;;  %v11144_v18 = vpack.i.bf16 %v3914_v62, %v3917_v52 }
 0xa01   : > { %v11124_v4 = vpack.i.bf16 %v3743_v29, %v3862_v24  ;;  %v3893_v9 = vpop.f32.mrf.mxu0 }
 0xa02   : > { %v3922_v29 = vpop.f32.mrf.mxu1 }
 0xa03   : > { %11125 = vrot.lane.b32.xlu0 %v11124_v4, %s11716_s1  ;;  %v3923_v24 = vadd.f32 %v3922_v29, %v3893_v9 }
 0xa05   : > { %v3835_v19 = vpop.f32.mrf.mxu2 }
 0xa06   : > { %v3864_v55 = vpop.f32.mrf.mxu3 }
 0xa07   : > { %v3865_v41 = vadd.f32 %v3864_v55, %v3835_v19 }
 0xa09   : > { %3969 = vrot.lane.b32.xlu1 %v3865_v41, %s11716_s1 }
 0xa0b   : > { %11140 = vrot.lane.b32.xlu0 %v11139_v48, %s11716_s1 }
 0xa11   : > { %11130 = vrot.lane.b32.xlu1 %v11129_v44, %s11716_s1 }
 0xa13   : > { %11145 = vrot.lane.b32.xlu0 %v11144_v18, %s11716_s1 }
 0xa19   : > { %3971 = vrot.lane.b32.xlu1 %v3923_v24, %s11716_s1 }
 0xa21   : > { %11150 = vrot.lane.b32.xlu1 %v18806_v23, %s11720_s19 }
 0xa2f   : > { %v11121_v63 = vpop.permute.xlu2 %11120 }
 0xa30   : > { %v11123_v27 = vunpack.i.h.bf16 %v11121_v63  ;;  %v11122_v59 = vunpack.i.l.bf16 %v11121_v63 }
 0xa32   : > { %v14130_v58 = vsel %vm18807_vm12, %v11122_v59, %v11123_v27  ;;  %v14134_v52 = vsel %vm18808_vm6, %v13827_v14, %v11122_v59  ;;  %vm18814_vm12 = vmmov %vm18813_vm0 }
 0xa33   : > { %v14138_v12 = vpack.i.bf16 %v14130_v58, %v14134_v52  ;;  %vm18815_vm6 = vmmov %vm18813_vm0 }
 0xa35   : > { %11155 = vrot.lane.b32.xlu0 %v14138_v12, %s11717_s22 }
 0xa39   : > { %v3966_v30 = vpop.permute.xlu2 %3965 }
 0xa3a   : > { %v14144_v20 = vsel %vm18809_vm5, %v13926_v16, %v3966_v30  ;;  %vm18816_vm5 = vmmov %vm18813_vm0 }
 0xa3d   : > { %4073 = vrot.lane.b32.xlu0 %v14144_v20, %s11717_s22 }
 0xa41   : > { %v11136_v34 = vpop.permute.xlu2 %11135 }
 0xa42   : > { %v11138_v40 = vunpack.i.h.bf16 %v11136_v34  ;;  %v11137_v13 = vunpack.i.l.bf16 %v11136_v34 }
 0xa44   : > { %v14149_v14 = vsel %vm18810_vm15, %v11137_v13, %v11138_v40  ;;  %v14153_v25 = vsel %vm18811_vm2, %v13627_v31, %v11137_v13  ;;  %vm18817_vm15 = vmmov %vm18813_vm0 }
 0xa45   : > { %v11169_v33 = vpack.i.bf16 %v14149_v14, %v14153_v25  ;;  %vm18818_vm2 = vmmov %vm18813_vm0 }
 0xa47   : > { %11170 = vrot.lane.b32.xlu0 %v11169_v33, %s11717_s22 }
 0xa49   : > { %v4013_v59 = vpop.permute.xlu2 %4012 }
 0xa4c   : > { %v3968_v16 = vpop.permute.xlu0 %3967 }
 0xa4d   : > { %v14159_v4 = vsel %vm18812_vm7, %v3966_v30, %v3968_v16  ;;  %vm18819_vm7 = vmmov %vm18813_vm0 }
 0xa4e   : > { %4075 = vrot.lane.b32.xlu1 %v14159_v4, %s11717_s22 }
 0xa75   : > { %v11126_v36 = vpop.permute.xlu0 %11125 }
 0xa76   : > { %v11128_v2 = vunpack.i.h.bf16 %v11126_v36  ;;  %v11127_v47 = vunpack.i.l.bf16 %v11126_v36 }
 0xa78   : > { %v14164_v19 = vsel %vm18813_vm0, %v11123_v27, %v11127_v47  ;;  %v14168_v31 = vsel %vm18814_vm12, %v13731_v5, %v11128_v2  ;;  %vm18820_vm12 = vmmov %vm18813_vm0 }
 0xa79   : > { %v11159_v55 = vpack.i.bf16 %v14168_v31, %v14164_v19 }
 0xa7b   : > { %v3970_v8 = vpop.permute.xlu1 %3969  ;;  %11160 = vrot.lane.b32.xlu1 %v11159_v55, %s11717_s22 }
 0xa7c   : > { %v14174_v41 = vsel %vm18815_vm6, %v3968_v16, %v3970_v8  ;;  %vm18821_vm6 = vmmov %vm18813_vm0 }
 0xa7d   : > { %v11141_v48 = vpop.permute.xlu0 %11140  ;;  %4077 = vrot.lane.b32.xlu2 %v14174_v41, %s11717_s22 }
 0xa7e   : > { %v11143_v37 = vunpack.i.h.bf16 %v11141_v48  ;;  %v11142_v62 = vunpack.i.l.bf16 %v11141_v48 }
 0xa80   : > { %v14179_v44 = vsel %vm18816_vm5, %v11138_v40, %v11142_v62  ;;  %v14182_v5 = vsel %vm18817_vm15, %v11127_v47, %v11143_v37  ;;  %vm18822_vm5 = vmmov %vm18813_vm0 }
 0xa81   : > { %v11174_v18 = vpack.i.bf16 %v14182_v5, %v14179_v44  ;;  %vm18823_vm15 = vmmov %vm18813_vm0 }
 0xa83   : > { %v11131_v9 = vpop.permute.xlu1 %11130  ;;  %11175 = vrot.lane.b32.xlu1 %v11174_v18, %s11717_s22 }
 0xa84   : > { %v11133_v29 = vunpack.i.h.bf16 %v11131_v9  ;;  %v11132_v24 = vunpack.i.l.bf16 %v11131_v9 }
 0xa85   : > { %v11146_v40 = vpop.permute.xlu0 %11145 }
 0xa86   : > { %v14188_v23 = vsel %vm18818_vm2, %v11128_v2, %v11132_v24  ;;  %v14191_v63 = vsel %vm18819_vm7, %v11132_v24, %v11133_v29  ;;  %v11148_v13 = vunpack.i.h.bf16 %v11146_v40  ;;  %v11147_v36 = vunpack.i.l.bf16 %v11146_v40  ;;  %v4007_v2 = vpop.permute.xlu2 %4006  ;;  %vm18824_vm2 = vmmov %vm18813_vm0 }
 0xa87   : > { %v11164_v27 = vpack.i.bf16 %v14191_v63, %v14188_v23  ;;  %vm18825_vm7 = vmmov %vm18813_vm0 }
 0xa88   : > { %v4022_v24 = vsel %vm18821_vm6, %v11148_v13, %v4007_v2  ;;  %v14209_v15 = vsel %vm18823_vm15, %v11133_v29, %v11147_v36 }
 0xa89   : > { %11165 = vrot.lane.b32.xlu2 %v11164_v27, %s11717_s22 }
 0xa8b   : > { %v3972_v30 = vpop.permute.xlu1 %3971 }
 0xa8c   : > { %v4025_v34 = vsel %vm18813_vm0, %v3972_v30, %v4013_v59  ;;  %v14199_v16 = vsel %vm18820_vm12, %v3970_v8, %v3972_v30  ;;  %v14206_v59 = vsel %vm18822_vm5, %v11142_v62, %v11148_v13  ;;  %vm18826_vm0 = vcmask 1039360  }
 0xa8d   : > { %4081 = vrot.lane.b32.xlu0 %v4025_v34, %s11717_s22  ;;  %vm18827_vm12 = vcmask 1045504   ;;  %vm18828_vm6 = vmmov %vm18826_vm0 }
 0xa8e   : > { %vm18829_vm5 = vmmov %vm18826_vm0 }
 0xa8f   : > { %vm18830_vm15 = vmmov %vm18827_vm12 }
 0xa91   : > { %4079 = vrot.lane.b32.xlu2 %v14199_v16, %s11717_s22 }
 0xa93   : > { %v11151_v47 = vpop.permute.xlu1 %11150 }
 0xa94   : > { %v11153_v48 = vunpack.i.h.bf16 %v11151_v47  ;;  %v11152_v9 = vunpack.i.l.bf16 %v11151_v47 }
 0xa95   : > { %4051 = vrot.lane.b32.xlu0 %v4022_v24, %s11717_s22 }
 0xa96   : > { %v4023_v8 = vsel %vm18824_vm2, %v11147_v36, %v11153_v48  ;;  %v4024_v30 = vsel %vm18825_vm7, %v11143_v37, %v11152_v9  ;;  %vm18831_vm2 = vmmov %vm18826_vm0 }
 0xa97   : > { %v11179_v40 = vpack.i.bf16 %v4024_v30, %v14209_v15  ;;  %v11184_v35 = vpack.i.bf16 %v4023_v8, %v14206_v59  ;;  %vm18832_vm7 = vmmov %vm18827_vm12 }
 0xa99   : > { %11185 = vrot.lane.b32.xlu2 %v11184_v35, %s11717_s22  ;;  %11180 = vrot.lane.b32.xlu1 %v11179_v40, %s11717_s22 }
 0xa9d   : > { %4422 = vrot.lane.b32.xlu0 %v14174_v41, %s11718_s18 }
 0xaa1   : > { %4420 = vrot.lane.b32.xlu2 %v14159_v4, %s11718_s18  ;;  %4418 = vrot.lane.b32.xlu1 %v14144_v20, %s11718_s18 }
 0xaa5   : > { %11200 = vrot.lane.b32.xlu0 %v11164_v27, %s11718_s18  ;;  %v4611_v27 = vld [vmem:[%s17791_s14 + $0x18] sm:$0x3f] }
 0xaa7   : > { %v11156_v37 = vpop.permute.xlu0 %11155 }
 0xaa8   : > { %v11157_v62 = vunpack.i.l.bf16 %v11156_v37 }
 0xaa9   : > { %11195 = vrot.lane.b32.xlu2 %v11159_v55, %s11718_s18  ;;  %11190 = vrot.lane.b32.xlu1 %v14138_v12, %s11718_s18  ;;  %v4609_v55 = vld [vmem:[%s17791_s14 + $0x8] sm:$0xff]  ;;  %v4608_v12 = vld [vmem:[%s17791_s14] sm:$0xff] }
 0xaad   : > { %4424 = vrot.lane.b32.xlu0 %v14199_v16, %s11718_s18 }
 0xab1   : > { %11210 = vrot.lane.b32.xlu2 %v11174_v18, %s11718_s18  ;;  %11205 = vrot.lane.b32.xlu1 %v11169_v33, %s11718_s18  ;;  %v11158_v33 = vunpack.i.h.bf16 %v11156_v37 }
 0xab3   : > { %v4091_v13 = vsel %vm18828_vm6, %v11157_v62, %v11158_v33  ;;  %vm18834_vm6 = vmmov %vm18826_vm0 }
 0xab5   : > { %11220 = vrot.lane.b32.xlu0 %v11184_v35, %s11718_s18  ;;  %v4074_v35 = vpop.permute.xlu0 %4073 }
 0xab9   : > { %11215 = vrot.lane.b32.xlu2 %v11179_v40, %s11718_s18  ;;  %4426 = vrot.lane.b32.xlu1 %v4025_v34, %s11718_s18  ;;  %v4610_v34 = vld [vmem:[%s17791_s14 + $0x10] sm:$0xff] }
 0xabd   : > { %4619 = vperm.xlu0 %10997, %v4609_v55   ;;  %v11171_v48 = vpop.permute.xlu0 %11170 }
 0xabe   : > { %v11173_v8 = vunpack.i.h.bf16 %v11171_v48  ;;  %v11172_v30 = vunpack.i.l.bf16 %v11171_v48 }
 0xac0   : > { %v4076_v18 = vpop.permute.xlu1 %4075 }
 0xac1   : > { %4614 = vperm.xlu2 %11018, %v4608_v12   ;;  %4396 = vrot.lane.b32.xlu1 %v4022_v24, %s11718_s18  ;;  %v4095_v29 = vsel %vm18826_vm0, %v4074_v35, %v4076_v18 }
 0xac2   : > { %9700 = vmatpush.msk.msra.mxu2 %vm18827_vm12, %v4095_v29  ;;  %vm18833_vm12 = vmmov %vm18826_vm0  ;;  %v4031_v29 = vld [vmem:[#allocation9 + $0x20] sm:$0xff] }
 0xac4   : > { %4144 = vmatpush.msra.mxu2 %v4091_v13 }
 0xac9   : > { %4629 = vperm.xlu2 %11018, %v4611_v27   ;;  %4624 = vperm.xlu1 %10976, %v4610_v34   ;;  %v4083_v27 = vsel %vm18834_vm6, %v11172_v30, %v11173_v8 }
 0xad7   : > { %v4078_v36 = vpop.permute.xlu2 %4077 }
 0xad8   : > { %v4096_v2 = vsel %vm18829_vm5, %v4076_v18, %v4078_v36  ;;  %vm18835_vm5 = vmmov %vm18826_vm0 }
 0xad9   : > { %9705 = vmatpush.msk.msra.mxu3 %vm18830_vm15, %v4096_v2  ;;  %vm18836_vm15 = vcmask 244736  }
 0xae3   : > { %v11166_v47 = vpop.permute.xlu2 %11165 }
 0xae4   : > { %v11168_v37 = vunpack.i.h.bf16 %v11166_v47  ;;  %v11167_v55 = vunpack.i.l.bf16 %v11166_v47 }
 0xae6   : > { %v4088_v34 = vsel %vm18835_vm5, %v11167_v55, %v11168_v37 }
 0xaeb   : > { %v4080_v9 = vpop.permute.xlu2 %4079 }
 0xaec   : > { %v4097_v24 = vsel %vm18831_vm2, %v4078_v36, %v4080_v9  ;;  %vm18837_vm2 = vmmov %vm18832_vm7 }
 0xaed   : > { %v11161_v40 = vpop.permute.xlu1 %11160  ;;  %9710 = vmatpush.msk.msrb.mxu0 %vm18832_vm7, %v4097_v24  ;;  %vm18838_vm7 = vmmov %vm18826_vm0  ;;  %v14265_v24 = vld [vmem:[#allocation9 + $0x28] sm:$0xff] }
 0xaee   : > { %v11163_v12 = vunpack.i.h.bf16 %v11161_v40  ;;  %v11162_v62 = vunpack.i.l.bf16 %v11161_v40  ;;  %vm18840_vm6 = vmmov %vm18837_vm2 }
 0xaf0   : > { %v4087_v35 = vsel %vm18826_vm0, %v11163_v12, %v11167_v55  ;;  %v4092_v18 = vsel %vm18833_vm12, %v11158_v33, %v11162_v62  ;;  %vm18839_vm12 = vmmov %vm18836_vm15 }
 0xaf1   : > { %4145 = vmatpush.msra.mxu2 %v4087_v35  ;;  %4173 = vmatpush.msra.mxu3 %v4092_v18  ;;  %vm18841_vm5 = vmmov %vm18839_vm12 }
 0xaf3   : > { %4146 = vmatpush.msra.mxu2 %v4083_v27  ;;  %4174 = vmatpush.msra.mxu3 %v4088_v34  ;;  %v11186_v33 = vpop.permute.xlu2 %11185  ;;  %v14297_v34 = vld [vmem:[#allocation9] sm:$0xff] }
 0xaf4   : > { %9701 = vmatmul.msk.f32.vlgmr.msra.gmra.mxu2 %vm18836_vm15, %v4031_v29  ;;  %vm18842_vm15 = vmmov %vm18826_vm0  ;;  %v11188_v30 = vunpack.i.h.bf16 %v11186_v33  ;;  %v11187_v40 = vunpack.i.l.bf16 %v11186_v33  ;;  %v14319_v33 = vld [vmem:[#allocation9 + $0x8] sm:$0xff] }
 0xaf5   : > { %9720 = vmatpush.msk.msrb.mxu2 %vm18837_vm2, %v14144_v20  ;;  %v11176_v13 = vpop.permute.xlu1 %11175 }
 0xaf6   : > { %v11178_v36 = vunpack.i.h.bf16 %v11176_v13  ;;  %v11177_v2 = vunpack.i.l.bf16 %v11176_v13 }
 0xaf7   : > { %4280 = vmatpush.msrb.mxu2 %v14134_v52 }
 0xaf8   : > { %v4084_v47 = vsel %vm18838_vm7, %v11173_v8, %v11177_v2  ;;  %v4093_v48 = vsel %vm18826_vm0, %v11162_v62, %v11178_v36  ;;  %vm18843_vm7 = vmmov %vm18841_vm5 }
 0xaf9   : > { %4281 = vmatpush.msrb.mxu2 %v14168_v31  ;;  %4175 = vmatpush.msra.mxu3 %v4084_v47  ;;  %v14278_v31 = vld [vmem:[#allocation9 + $0x30] sm:$0xff]  ;;  %vm18844_vm0 = vmmov %vm18841_vm5 }
 0xafa   : > { %4202 = vmatpush.msrb.mxu0 %v4093_v48  ;;  %9706 = vmatmul.msk.f32.vlgmr.msra.gmra.mxu3 %vm18839_vm12, %v4031_v29  ;;  %vm18845_vm12 = vmmov %vm18844_vm0 }
 0xafb   : > { %4282 = vmatpush.msrb.mxu2 %v14153_v25  ;;  %9725 = vmatpush.msk.msrb.mxu3 %vm18840_vm6, %v14159_v4  ;;  %v4421_v25 = vpop.permute.xlu2 %4420  ;;  %vm18846_vm6 = vmmov %vm18844_vm0 }
 0xafc   : > { %9702 = vmatmul.msk.f32.gmra.mxu2 %vm18841_vm5, %v14265_v24  ;;  %vm18847_vm5 = vmmov %vm18842_vm15 }
 0xafd   : > { %4309 = vmatpush.msrb.mxu3 %v14130_v58  ;;  %v14284_v58 = vld [vmem:[#allocation9 + $0x38] sm:$0x3f] }
 0xaff   : > { %4310 = vmatpush.msrb.mxu3 %v14188_v23  ;;  %v4082_v52 = vpop.permute.xlu0 %4081 }
 0xb00   : > { %v4098_v20 = vsel %vm18842_vm15, %v4080_v9, %v4082_v52  ;;  %vm18848_vm15 = vmmov %vm18847_vm5 }
 0xb01   : > { %4311 = vmatpush.msrb.mxu3 %v14149_v14  ;;  %9715 = vmatpush.msk.msrb.mxu1 %vm18837_vm2, %v4098_v20  ;;  %vm18849_vm2 = vcmask 1031168  }
 0xb02   : > { %9707 = vmatmul.msk.f32.gmra.mxu3 %vm18843_vm7, %v14265_v24  ;;  %vm18850_vm7 = vmmov %vm18847_vm5 }
 0xb03   : > { %v14288_v9 = vpop.permute.xlu2 %11195  ;;  %v4085_v18 = vsel %vm18850_vm7, %v11177_v2, %v11187_v40  ;;  %vm18856_vm7 = vcmask 1031168  }
 0xb04   : > { %9703 = vmatmul.msk.f32.gmra.mxu2 %vm18844_vm0, %v14278_v31  ;;  %vm18851_vm0 = vmmov %vm18847_vm5 }
 0xb07   : > { %v4052_v4 = vpop.permute.xlu0 %4051 }
 0xb0a   : > { %9708 = vmatmul.msk.f32.gmra.mxu3 %vm18845_vm12, %v14278_v31  ;;  %vm18852_vm12 = vcmask 1045504  }
 0xb0b   : > { %v11181_v23 = vpop.permute.xlu1 %11180  ;;  %v14311_v2 = vpop.permute.xlu2 %11210 }
 0xb0c   : > { %v11183_v14 = vunpack.i.h.bf16 %v11181_v23  ;;  %v11182_v8 = vunpack.i.l.bf16 %v11181_v23  ;;  %9704 = vmatmul.msk.f32.gmra.mxu2 %vm18846_vm6, %v14284_v58  ;;  %v11213_v52 = vunpack.i.h.bf16 %v14311_v2 }
 0xb0e   : > { %v4089_v55 = vsel %vm18847_vm5, %v11168_v37, %v11182_v8  ;;  %v4094_v12 = vsel %vm18848_vm15, %v11178_v36, %v11183_v14  ;;  %v4090_v27 = vsel %vm18851_vm0, %v11182_v8, %v11188_v30  ;;  %vm18853_vm5 = vmmov %vm18846_vm6  ;;  %v11212_v30 = vunpack.i.l.bf16 %v14311_v2  ;;  %v4386_v2 = vld [vmem:[#allocation9 + $0x50] sm:$0xff] }
 0xb0f   : > { %4203 = vmatpush.msrb.mxu0 %v4089_v55  ;;  %4231 = vmatpush.msrb.mxu1 %v4094_v12  ;;  %v4423_v62 = vpop.permute.xlu0 %4422  ;;  %vm18854_vm15 = vmmov %vm18852_vm12 }
 0xb10   : > { %v4441_v35 = vsel %vm18849_vm2, %v4421_v25, %v4423_v62  ;;  %vm18855_vm2 = vmmov %vm18851_vm0 }
 0xb11   : > { %4204 = vmatpush.msrb.mxu0 %v4085_v18  ;;  %4232 = vmatpush.msrb.mxu1 %v4090_v27  ;;  %v4086_v13 = vsel %vm18855_vm2, %v11187_v40, %v4052_v4  ;;  %vm18857_vm0 = vmmov %vm18853_vm5 }
 0xb12   : > { %9745 = vmatpush.msk.msra.mxu3 %vm18852_vm12, %v4441_v35  ;;  %9711 = vmatmul.msk.f32.vlgmr.msrb.gmra.mxu0 %vm18846_vm6, %v4031_v29  ;;  %vm18858_vm8 = vmmov %vm18857_vm0 }
 0xb13   : > { %9709 = vmatmul.msk.f32.gmra.mxu3 %vm18853_vm5, %v14284_v58  ;;  %9730 = vmatpush.msk.msra.mxu0 %vm18854_vm15, %v14174_v41  ;;  %v4419_v37 = vpop.permute.xlu1 %4418  ;;  %vm18859_vm6 = vmmov %vm18852_vm12 }
 0xb14   : > { %v4440_v36 = vsel %vm18856_vm7, %v4419_v37, %v4421_v25  ;;  %4233 = vmatpush.msrb.mxu1 %v4086_v13  ;;  %9721 = vmatmul.msk.f32.vlgmr.msrb.gmra.mxu2 %vm18857_vm0, %v14297_v34  ;;  %vm18861_vm5 = vmmov %vm18857_vm0 }
 0xb15   : > { %9716 = vmatmul.msk.f32.vlgmr.msrb.gmra.mxu1 %vm18858_vm8, %v4031_v29  ;;  %4338 = vmatpush.msra.mxu0 %v14164_v19  ;;  %vm18860_vm8 = vmmov %vm18857_vm0  ;;  %v11197_v19 = vunpack.i.l.bf16 %v14288_v9 }
 0xb16   : > { %9735 = vmatpush.msk.msra.mxu1 %vm18852_vm12, %v14199_v16  ;;  %9740 = vmatpush.msk.msra.mxu2 %vm18859_vm6, %v4440_v36  ;;  %vm18862_vm15 = vmmov %vm18857_vm0  ;;  %v18915_v36 = vld [vmem:[#allocation91_spill] sm:$0xff] }
 0xb17   : > { %4339 = vmatpush.msra.mxu0 %v14191_v63  ;;  %v11201_v41 = vpop.permute.xlu0 %11200  ;;  %vm18863_vm2 = vmmov %vm18857_vm0 }
 0xb18   : > { %4367 = vmatpush.msra.mxu1 %v14182_v5  ;;  %v11203_v29 = vunpack.i.h.bf16 %v11201_v41  ;;  %v11202_v63 = vunpack.i.l.bf16 %v11201_v41  ;;  %vm18864_vm0 = vmmov %vm18856_vm7  ;;  %v18917_v41 = vld [vmem:[#allocation33_spill] sm:$0xff] }
 0xb19   : > { %4340 = vmatpush.msra.mxu0 %v14179_v44  ;;  %vm18865_vm12 = vmmov %vm18864_vm0 }
 0xb1a   : > { %4368 = vmatpush.msra.mxu1 %v14209_v15  ;;  %9712 = vmatmul.msk.f32.gmra.mxu0 %vm18860_vm8, %v14265_v24  ;;  %v11198_v15 = vunpack.i.h.bf16 %v14288_v9  ;;  %vm18866_vm6 = vmmov %vm18864_vm0 }
 0xb1b   : > { %9726 = vmatmul.msk.f32.vlgmr.msrb.gmra.mxu3 %vm18861_vm5, %v14297_v34  ;;  %v11191_v16 = vpop.permute.xlu1 %11190  ;;  %vm18867_vm8 = vmmov %vm18864_vm0  ;;  %vm18868_vm5 = vcmask 1045504  }
 0xb1c   : > { %4369 = vmatpush.msra.mxu1 %v14206_v59  ;;  %v11193_v5 = vunpack.i.h.bf16 %v11191_v16  ;;  %v11192_v47 = vunpack.i.l.bf16 %v11191_v16  ;;  %9722 = vmatmul.msk.f32.gmra.mxu2 %vm18862_vm15, %v14319_v33  ;;  %v11216_v59 = vpop.permute.xlu2 %11215  ;;  %v4432_v4 = vsel %vm18866_vm6, %v11198_v15, %v11202_v63  ;;  %v4433_v23 = vsel %vm18867_vm8, %v11202_v63, %v11203_v29  ;;  %vm18869_vm15 = vmmov %vm18863_vm2  ;;  %v18933_v16 = vld [vmem:[#allocation64_spill] sm:$0xff]  ;;  %v18944_v63 = vld [vmem:[#allocation26_spill] sm:$0xff] }
 0xb1d   : > { %9717 = vmatmul.msk.f32.gmra.mxu1 %vm18863_vm2, %v14265_v24  ;;  %v14339_v24 = vld [vmem:[#allocation9 + $0x10] sm:$0xff]  ;;  %v11217_v9 = vunpack.i.l.bf16 %v11216_v59  ;;  %vm18873_vm8 = vmmov %vm18866_vm6  ;;  %v11218_v13 = vunpack.i.h.bf16 %v11216_v59  ;;  %v18963_v59 = vld [vmem:[#allocation77_spill] sm:$0xff] }
 0xb1e   : > { %v4436_v44 = vsel %vm18856_vm7, %v11192_v47, %v11193_v5  ;;  %v4437_v48 = vsel %vm18864_vm0, %v11193_v5, %v11197_v19  ;;  %vm18870_vm7 = vmmov %vm18864_vm0  ;;  %v18946_v5 = vld [vmem:[#allocation42_spill] sm:$0xff]  ;;  %v18950_v15 = vld [vmem:[#allocation43_spill] sm:$0xff] }
 0xb1f   : > { %v4425_v20 = vpop.permute.xlu0 %4424  ;;  %4489 = vmatpush.msra.mxu2 %v4436_v44  ;;  %4518 = vmatpush.msra.mxu3 %v4437_v48  ;;  %v4438_v8 = vsel %vm18870_vm7, %v11197_v19, %v11213_v52  ;;  %vm18871_vm0 = vmmov %vm18863_vm2  ;;  %v4434_v12 = vsel %vm18866_vm6, %v11203_v29, %v11217_v9  ;;  %vm18877_vm7 = vnez %v18461_v49  ;;  %v18931_v19 = vld [vmem:[#allocation24_spill] sm:$0xff]  ;;  %v18948_v47 = vld [vmem:[#allocation70_spill] sm:$0xff] }
 0xb20   : > { %v4442_v25 = vsel %vm18865_vm12, %v4423_v62, %v4425_v20  ;;  %vm18872_vm12 = vmmov %vm18871_vm0  ;;  %v18942_v29 = vld [vmem:[#allocation68_spill] sm:$0xff]  ;;  %v18952_v44 = vld [vmem:[#allocation73_spill] sm:$0xff] }
 0xb21   : > { %4490 = vmatpush.msra.mxu2 %v4432_v4  ;;  %4519 = vmatpush.msra.mxu3 %v4433_v23  ;;  %v18956_v48 = vld [vmem:[#allocation44_spill] sm:$0xff]  ;;  %v18967_v4 = vld [vmem:[#allocation79_spill] sm:$0xff] }
 0xb22   : > { %9750 = vmatpush.msk.msrb.mxu0 %vm18868_vm5, %v4442_v25  ;;  %vm18874_vm5 = vmmov %vm18866_vm6  ;;  %v18965_v25 = vld [vmem:[#allocation46_spill] sm:$0xff]  ;;  %v18969_v23 = vld [vmem:[#allocation47_spill] sm:$0xff] }
 0xb23   : > { %9713 = vmatmul.msk.f32.gmra.mxu0 %vm18869_vm15, %v14278_v31  ;;  %9727 = vmatmul.msk.f32.gmra.mxu3 %vm18863_vm2, %v14319_v33  ;;  %v11206_v14 = vpop.permute.xlu1 %11205  ;;  %vm18875_vm15 = vmmov %vm18874_vm5  ;;  %vm18876_vm2 = vnez %v18304_v61 }
 0xb24   : > { %v11208_v40 = vunpack.i.h.bf16 %v11206_v14  ;;  %v11207_v55 = vunpack.i.l.bf16 %v11206_v14  ;;  %4547 = vmatpush.msrb.mxu0 %v4438_v8  ;;  %9723 = vmatmul.msk.f32.gmra.mxu2 %vm18871_vm0, %v14339_v24  ;;  %vm18881_vm6 = vmmov %vm18871_vm0  ;;  %v18976_v14 = vld [vmem:[#allocation86_spill] sm:$0xff]  ;;  %v18979_v8 = vld [vmem:[#allocation52_spill] sm:$0xff] }
 0xb25   : > { %9718 = vmatmul.msk.f32.gmra.mxu1 %vm18872_vm12, %v14278_v31  ;;  %v14361_v31 = vld [vmem:[#allocation9 + $0x18] sm:$0x3f]  ;;  %vm18880_vm12 = vmmov %vm18871_vm0 }
 0xb26   : > { %4548 = vmatpush.msrb.mxu0 %v4434_v12  ;;  %v4428_v62 = vsel %vm18873_vm8, %v11207_v55, %v11208_v40  ;;  %v4429_v35 = vsel %vm18874_vm5, %v11208_v40, %v11212_v30  ;;  %vm18882_vm8 = vnez %v18310_v32  ;;  %v18983_v40 = vld [vmem:[#allocation53_spill] sm:$0xff]  ;;  %v18985_v55 = vld [vmem:[#allocation92_spill] sm:$0xff]  ;;  %v18987_v12 = vld [vmem:[#allocation54_spill] sm:$0xff] }
 0xb27   : > { %v11221_v18 = vpop.permute.xlu0 %11220  ;;  %4491 = vmatpush.msra.mxu2 %v4428_v62  ;;  %4520 = vmatpush.msra.mxu3 %v4429_v35  ;;  %v18989_v62 = vld [vmem:[#allocation95_spill] sm:$0xff] }
 0xb28   : > { %v11222_v27 = vunpack.i.l.bf16 %v11221_v18  ;;  %v11223_v61 = vunpack.i.h.bf16 %v11221_v18  ;;  %v18992_v35 = vld [vmem:[#allocation55_spill] sm:$0xff]  ;;  %v18994_v18 = vld [vmem:[#allocation97_spill] sm:$0xff] }
 0xb29   : > { %10160 = vmatpush.msk.msrb.mxu2 %vm18393_vm3, %v18392_v50  ;;  %10176 = vmatpush.msk.msrb.mxu3 %vm12947_vm11, %v18392_v50  ;;  %vm18878_vm3 = vmmov %vm18871_vm0 }
 0xb2a   : > { %v4430_v37 = vsel %vm18875_vm15, %v11212_v30, %v11222_v27  ;;  %vm18879_vm11 = vmmov %vm18874_vm5  ;;  %vm18883_vm5 = vcmask 1045504   ;;  %vm18884_vm15 = vnez %v18468_v38  ;;  %v18981_v30 = vld [vmem:[#allocation90_spill] sm:$0xff] }
 0xb2b   : > { %10161 = vmatpush.msk.msrb.mxu2 %vm18876_vm2, %v18392_v50  ;;  %10177 = vmatpush.msk.msrb.mxu3 %vm18877_vm7, %v18392_v50  ;;  %v4427_v51 = vpop.permute.xlu1 %4426  ;;  %vm18885_vm2 = vmmov %vm18879_vm11  ;;  %vm18886_vm7 = vnez %v18318_v11 }
 0xb2c   : > { %9714 = vmatmul.msk.f32.gmra.mxu0 %vm18871_vm0, %v14284_v58  ;;  %9728 = vmatmul.msk.f32.gmra.mxu3 %vm18878_vm3, %v14339_v24  ;;  %v4443_v3 = vsel %vm18879_vm11, %v4425_v20, %v4427_v51  ;;  %v4439_v49 = vsel %vm18885_vm2, %v11213_v52, %v11218_v13  ;;  %vm18887_vm0 = vnez %v18474_v57  ;;  %vm18888_vm3 = vmmov %vm18885_vm2  ;;  %vm18889_vm11 = vnez %v18323_v45  ;;  %v18899_v45 = vld [vmem:[#allocation78_spill] sm:$0xff]  ;;  %v18901_v57 = vld [vmem:[#allocation51_spill] sm:$0xff] }
 0xb2d   : > { %4549 = vmatpush.msrb.mxu0 %v4430_v37  ;;  %9724 = vmatmul.msk.f32.gmra.mxu2 %vm18880_vm12, %v14361_v31  ;;  %v4435_v32 = vsel %vm18888_vm3, %v11217_v9, %v11223_v61  ;;  %vm18890_vm12 = vnez %v18481_v21  ;;  %vm18897_vm3 = vnez %v18493_v26  ;;  %v18907_v26 = vld [vmem:[#allocation85_spill] sm:$0xff]  ;;  %v18958_v52 = vld [vmem:[#allocation74_spill] sm:$0xff]  ;;  %v19003_v13 = vld [vmem:[#allocation100_spill] sm:$0xff] }
 0xb2e   : > { %9719 = vmatmul.msk.f32.gmra.mxu1 %vm18881_vm6, %v14284_v58  ;;  %10162 = vmatpush.msk.msrb.mxu2 %vm18882_vm8, %v18392_v50  ;;  %v4384_v58 = vld [vmem:[#allocation9 + $0x40] sm:$0xff]  ;;  %vm18891_vm8 = vmmov %vm18881_vm6  ;;  %v18974_v9 = vld [vmem:[#allocation50_spill] sm:$0xff] }
 0xb2f   : > { %9755 = vmatpush.msk.msrb.mxu1 %vm18883_vm5, %v4443_v3  ;;  %10178 = vmatpush.msk.msrb.mxu3 %vm18884_vm15, %v18392_v50  ;;  %vm18892_vm5 = vmmov %vm18881_vm6  ;;  %v18961_v20 = vld [vmem:[#allocation45_spill] sm:$0xff]  ;;  %v19005_v51 = vld [vmem:[#allocation58_spill] sm:$0xff] }
 0xb30   : > { %10163 = vmatpush.msk.msrb.mxu2 %vm18886_vm7, %v18392_v50  ;;  %vm18893_vm15 = vmmov %vm18885_vm2  ;;  %vm18894_vm2 = vnez %v18486_v1  ;;  %v4385_v1 = vld [vmem:[#allocation9 + $0x48] sm:$0xff]  ;;  %v19001_v37 = vld [vmem:[#allocation57_spill] sm:$0xff] }
 0xb31   : > { %4576 = vmatpush.msrb.mxu1 %v4439_v49  ;;  %10179 = vmatpush.msk.msrb.mxu3 %vm18887_vm0, %v18392_v50  ;;  %vm18895_vm7 = vmmov %vm18892_vm5  ;;  %vm18896_vm0 = vnez %v18329_v56  ;;  %v18903_v56 = vld [vmem:[#allocation80_spill] sm:$0xff]  ;;  %v19008_v3 = vld [vmem:[#allocation59_spill] sm:$0xff] }
 0xb32   : > { %10164 = vmatpush.msk.msrb.mxu2 %vm18889_vm11, %v18392_v50  ;;  %vm18898_vm11 = vnez %v18339_v10  ;;  %v18910_v10 = vld [vmem:[#allocation30_spill] sm:$0xff]  ;;  %v19011_v61 = vld [vmem:[#allocation60_spill] sm:$0xff] }
 0xb33   : > { %4577 = vmatpush.msrb.mxu1 %v4435_v32  ;;  %10180 = vmatpush.msk.msrb.mxu3 %vm18890_vm12, %v18392_v50  ;;  %v4397_v11 = vpop.permute.xlu1 %4396  ;;  %vm18900_vm12 = vnez %v18899_v45 }
 0xb34   : > { %9729 = vmatmul.msk.f32.gmra.mxu3 %vm18881_vm6, %v14361_v31  ;;  %9731 = vmatmul.msk.f32.vlgmr.msra.gmra.mxu0 %vm18891_vm8, %v14297_v34  ;;  %v4431_v38 = vsel %vm18893_vm15, %v11222_v27, %v4397_v11  ;;  %vm18902_vm6 = vnez %v18901_v57  ;;  %vm18904_vm8 = vnez %v18903_v56  ;;  %vm18905_vm15 = vmmov %vm18892_vm5  ;;  %v18997_v27 = vld [vmem:[#allocation56_spill] sm:$0xff] }
 0xb35   : > { %9741 = vmatmul.msk.f32.vlgmr.msra.gmra.mxu2 %vm18892_vm5, %v4384_v58  ;;  %10181 = vmatpush.msk.msrb.mxu3 %vm18894_vm2, %v18392_v50  ;;  %vm18906_vm2 = vmmov %vm18892_vm5 }
 0xb36   : > { %9736 = vmatmul.msk.f32.vlgmr.msra.gmra.mxu1 %vm18895_vm7, %v14297_v34  ;;  %10165 = vmatpush.msk.msrb.mxu2 %vm18896_vm0, %v18392_v50  ;;  %vm18908_vm7 = vnez %v18907_v26  ;;  %vm18909_vm0 = vmmov %vm18906_vm2  ;;  %v18913_v34 = vld [vmem:[#allocation31_spill] sm:$0xff] }
 0xb37   : > { %4578 = vmatpush.msrb.mxu1 %v4431_v38  ;;  %10182 = vmatpush.msk.msrb.mxu3 %vm18897_vm3, %v18392_v50  ;;  %vm18911_vm3 = vnez %v18910_v10 }
 0xb38   : > { %10166 = vmatpush.msk.msrb.mxu2 %vm18898_vm11, %v18392_v50  ;;  %vm18914_vm11 = vnez %v18913_v34 }
 0xb39   : > { %10183 = vmatpush.msk.msrb.mxu3 %vm18900_vm12, %v18392_v50  ;;  %vm18916_vm12 = vnez %v18915_v36 }
 0xb3a   : > { %10167 = vmatpush.msk.msrb.mxu2 %vm18902_vm6, %v18392_v50  ;;  %vm18918_vm6 = vnez %v18917_v41 }
 0xb3b   : > { %10184 = vmatpush.msk.msrb.mxu3 %vm18904_vm8, %v18392_v50  ;;  %vm18919_vm8 = vnez %v18535_v0  ;;  %v18928_v0 = vld [vmem:[#allocation22_spill] sm:$0xff] }
 0xb3c   : > { %9732 = vmatmul.msk.f32.gmra.mxu0 %vm18892_vm5, %v14319_v33  ;;  %9746 = vmatmul.msk.f32.vlgmr.msra.gmra.mxu3 %vm18905_vm15, %v4384_v58  ;;  %vm18920_vm5 = vmmov %vm18909_vm0 }
 0xb3d   : > { %9742 = vmatmul.msk.f32.gmra.mxu2 %vm18906_vm2, %v4385_v1  ;;  %10185 = vmatpush.msk.msrb.mxu3 %vm18908_vm7, %v18392_v50  ;;  %vm18922_vm15 = vmmov %vm18909_vm0  ;;  %vm18923_vm2 = vnez %v18540_v22  ;;  %v4387_v22 = vld [vmem:[#allocation9 + $0x58] sm:$0x3f] }
 0xb3e   : > { %9737 = vmatmul.msk.f32.gmra.mxu1 %vm18909_vm0, %v14319_v33  ;;  %10168 = vmatpush.msk.msrb.mxu2 %vm18911_vm3, %v18392_v50  ;;  %vm18924_vm7 = vmmov %vm18909_vm0  ;;  %v18925_v33 = vld [vmem:[#allocation34_spill] sm:$0xff]  ;;  %vm18927_vm3 = vnez %v18546_v54  ;;  %v18937_v54 = vld [vmem:[#allocation67_spill] sm:$0xff] }
 0xb3f   : > { %10186 = vmatpush.msk.msrb.mxu3 %vm13191_vm10, %v18392_v50  ;;  %vm18921_vm10 = vmmov %vm18909_vm0  ;;  %vm18926_vm0 = vnez %v18925_v33 }
 0xb40   : > { %10169 = vmatpush.msk.msrb.mxu2 %vm18914_vm11, %v18392_v50  ;;  %vm18929_vm11 = vnez %v18928_v0  ;;  %v19013_v0 = vld [vmem:[#allocation17_spill] sm:$0xff] }
 0xb41   : > { %10187 = vmatpush.msk.msrb.mxu3 %vm18916_vm12, %v18392_v50  ;;  %vm18930_vm12 = vnez %v18554_v60  ;;  %v18940_v60 = vld [vmem:[#allocation25_spill] sm:$0xff] }
 0xb42   : > { %10170 = vmatpush.msk.msrb.mxu2 %vm18918_vm6, %v18392_v50  ;;  %vm18932_vm6 = vnez %v18931_v19 }
 0xb43   : > { %10188 = vmatpush.msk.msrb.mxu3 %vm18919_vm8, %v18392_v50  ;;  %vm18934_vm8 = vnez %v18933_v16  ;;  %v4742_v16 = vadd.s32 368, %v19013_v0 }
 0xb44   : > { %9733 = vmatmul.msk.f32.gmra.mxu0 %vm18920_vm5, %v14339_v24  ;;  %9747 = vmatmul.msk.f32.gmra.mxu3 %vm18921_vm10, %v4385_v1  ;;  %vm18935_vm10 = vmmov %vm18920_vm5 }
 0xb45   : > { %9743 = vmatmul.msk.f32.gmra.mxu2 %vm18922_vm15, %v4386_v2  ;;  %10189 = vmatpush.msk.msrb.mxu3 %vm18923_vm2, %v18392_v50  ;;  %vm18936_vm15 = vmmov %vm18920_vm5  ;;  %vm18938_vm2 = vnez %v18937_v54  ;;  %v4759_v54 = vadd.s32 504, %v19013_v0 }
 0xb46   : > { %9738 = vmatmul.msk.f32.gmra.mxu1 %vm18924_vm7, %v14339_v24  ;;  %10171 = vmatpush.msk.msrb.mxu2 %vm18926_vm0, %v18392_v50  ;;  %vm18939_vm7 = vmmov %vm18920_vm5  ;;  %vm18941_vm0 = vnez %v18940_v60  ;;  %v18971_v24 = vld [vmem:[#allocation81_spill] sm:$0xff] }
 0xb47   : > { %10190 = vmatpush.msk.msrb.mxu3 %vm18927_vm3, %v18392_v50  ;;  %vm18943_vm3 = vnez %v18942_v29  ;;  %v19015_v29 = vld [vmem:[#allocation18_spill] sm:$0xff] }
 0xb48   : > { %10172 = vmatpush.msk.msrb.mxu2 %vm18929_vm11, %v18392_v50  ;;  %vm18945_vm11 = vnez %v18944_v63 }
 0xb49   : > { %10191 = vmatpush.msk.msrb.mxu3 %vm18930_vm12, %v18392_v50  ;;  %vm18947_vm12 = vnez %v18946_v5  ;;  %v14628_v5 = vmul.u32 2, %v4742_v16 }
 0xb4a   : > { %10173 = vmatpush.msk.msrb.mxu2 %vm18932_vm6, %v18392_v50  ;;  %vm18949_vm6 = vnez %v18948_v47  ;;  %v14630_v47 = vmul.u32 2, %v4759_v54 }
 0xb4b   : > { %10240 = vmatpush.msk.msra.mxu3 %vm18934_vm8, %v18392_v50  ;;  %vm18951_vm8 = vnez %v18950_v15  ;;  %19016 = vst [vmem:[#allocation51_spill] sm:$0xff] %v14628_v5  ;;  %v4741_v15 = vadd.s32 360, %v19013_v0 }
 0xb4c   : > { %9734 = vmatmul.msk.f32.gmra.mxu0 %vm18920_vm5, %v14361_v31  ;;  %9748 = vmatmul.msk.f32.gmra.mxu3 %vm18935_vm10, %v4386_v2  ;;  %vm18953_vm5 = vnez %v18952_v44  ;;  %vm18954_vm10 = vmmov %vm18939_vm7  ;;  %19017 = vst [vmem:[#allocation80_spill] sm:$0xff] %v14630_v47 }
 0xb4d   : > { %9744 = vmatmul.msk.f32.gmra.mxu2 %vm18936_vm15, %v4387_v22  ;;  %10241 = vmatpush.msk.msra.mxu3 %vm18938_vm2, %v18392_v50  ;;  %vm18955_vm15 = vmmov %vm18939_vm7  ;;  %vm18957_vm2 = vnez %v18956_v48 }
 0xb4e   : > { %9739 = vmatmul.msk.f32.gmra.mxu1 %vm18939_vm7, %v14361_v31  ;;  %10174 = vmatpush.msk.msrb.mxu2 %vm18941_vm0, %v18392_v50  ;;  %vm18959_vm7 = vnez %v18958_v52  ;;  %vm18960_vm0 = vmmov %vm18954_vm10  ;;  %v18999_v31 = vld [vmem:[#allocation98_spill] sm:$0xff]  ;;  %v4758_v52 = vadd.s32 496, %v19013_v0 }
 0xb4f   : > { %10242 = vmatpush.msk.msra.mxu3 %vm18943_vm3, %v18392_v50  ;;  %vm18962_vm3 = vnez %v18961_v20 }
 0xb50   : > { %10175 = vmatpush.msk.msrb.mxu2 %vm18945_vm11, %v18392_v50  ;;  %vm18964_vm11 = vnez %v18963_v59 }
 0xb51   : > { %10243 = vmatpush.msk.msra.mxu3 %vm18949_vm6, %v18392_v50  ;;  %vm18968_vm6 = vnez %v18967_v4  ;;  %v5172_v4 = vsub.s32 %v19015_v29, %v14630_v47 }
 0xb52   : > { %10224 = vmatpush.msk.msra.mxu2 %vm18947_vm12, %v18392_v50  ;;  %vm18966_vm12 = vnez %v18965_v25  ;;  %v5036_v25 = vsub.s32 %v19015_v29, %v14628_v5 }
 0xb53   : > { %10244 = vmatpush.msk.msra.mxu3 %vm18953_vm5, %v18392_v50  ;;  %vm18972_vm5 = vnez %v18971_v24  ;;  %v14646_v24 = vmul.u32 2, %v4758_v52 }
 0xb54   : > { %10225 = vmatpush.msk.msra.mxu2 %vm18951_vm8, %v18392_v50  ;;  %9749 = vmatmul.msk.f32.gmra.mxu3 %vm18954_vm10, %v4387_v22  ;;  %vm18970_vm8 = vnez %v18969_v23  ;;  %vm18973_vm10 = vmmov %vm18960_vm0  ;;  %v14644_v23 = vmul.u32 2, %v4741_v15  ;;  %v4736_v15 = vadd.s32 320, %v19013_v0 }
 0xb55   : > { %9751 = vmatmul.msk.f32.vlgmr.msrb.gmra.mxu0 %vm18955_vm15, %v4384_v58  ;;  %10245 = vmatpush.msk.msra.mxu3 %vm18959_vm7, %v18392_v50  ;;  %vm18975_vm15 = vnez %v18974_v9  ;;  %vm18978_vm7 = vmmov %vm18960_vm0  ;;  %19019 = vst [vmem:[#allocation30_spill] sm:$0xff] %v14646_v24  ;;  %v4740_v9 = vadd.s32 352, %v19013_v0 }
 0xb56   : > { %10226 = vmatpush.msk.msra.mxu2 %vm18957_vm2, %v18392_v50  ;;  %9756 = vmatmul.msk.f32.vlgmr.msrb.gmra.mxu1 %vm18960_vm0, %v4384_v58  ;;  %vm18977_vm2 = vnez %v18976_v14  ;;  %vm18980_vm0 = vnez %v18979_v8  ;;  %19018 = vst [vmem:[#allocation85_spill] sm:$0xff] %v14644_v23  ;;  %v4757_v8 = vadd.s32 488, %v19013_v0 }
 0xb57   : > { %10246 = vmatpush.msk.msra.mxu3 %vm18964_vm11, %v18392_v50  ;;  %vm18984_vm11 = vnez %v18983_v40  ;;  %v5028_v40 = vsub.s32 %v19015_v29, %v14644_v23 }
 0xb58   : > { %10227 = vmatpush.msk.msra.mxu2 %vm18962_vm3, %v18392_v50  ;;  %vm18982_vm3 = vnez %v18981_v30  ;;  %v4739_v30 = vadd.s32 344, %v19013_v0 }
 0xb59   : > { %10247 = vmatpush.msk.msra.mxu3 %vm18968_vm6, %v18392_v50  ;;  %vm18988_vm6 = vnez %v18987_v12  ;;  %v14659_v12 = vmul.u32 2, %v4740_v9  ;;  %v14714_v9 = vmul.u32 2, %v4736_v15 }
 0xb5a   : > { %10228 = vmatpush.msk.msra.mxu2 %vm18966_vm12, %v18392_v50  ;;  %vm18986_vm12 = vnez %v18985_v55  ;;  %v5164_v55 = vsub.s32 %v19015_v29, %v14646_v24 }
 0xb5b   : > { %10248 = vmatpush.msk.msra.mxu3 %vm18972_vm5, %v18392_v50  ;;  %vm18991_vm5 = vmmov %vm18978_vm7  ;;  %19020 = vst [vmem:[#allocation89_spill] sm:$0xff] %v14659_v12 }
 0xb5c   : > { %10229 = vmatpush.msk.msra.mxu2 %vm18970_vm8, %v18392_v50  ;;  %vm18990_vm8 = vnez %v18989_v62  ;;  %v14661_v62 = vmul.u32 2, %v4757_v8  ;;  %19023 = vst [vmem:[#allocation33_spill] sm:$0xff] %v14714_v9 }
 0xb5d   : > { %9752 = vmatmul.msk.f32.gmra.mxu0 %vm18973_vm10, %v4385_v1  ;;  %10249 = vmatpush.msk.msra.mxu3 %vm18977_vm2, %v18392_v50  ;;  %vm18993_vm10 = vnez %v18992_v35  ;;  %vm18996_vm2 = vmmov %vm18991_vm5  ;;  %v14663_v35 = vmul.u32 2, %v4739_v30 }
 0xb5e   : > { %10230 = vmatpush.msk.msra.mxu2 %vm18975_vm15, %v18392_v50  ;;  %9757 = vmatmul.msk.f32.gmra.mxu1 %vm18978_vm7, %v4385_v1  ;;  %vm18995_vm15 = vnez %v18994_v18  ;;  %vm18998_vm7 = vnez %v18997_v27  ;;  %v4756_v18 = vadd.s32 480, %v19013_v0 }
 0xb5f   : > { %10250 = vmatpush.msk.msra.mxu3 %vm18982_vm3, %v18392_v50  ;;  %vm19002_vm3 = vnez %v19001_v37  ;;  %v5156_v37 = vsub.s32 %v19015_v29, %v14661_v62 }
 0xb60   : > { %10231 = vmatpush.msk.msra.mxu2 %vm18980_vm0, %v18392_v50  ;;  %vm19000_vm0 = vnez %v18999_v31  ;;  %v5020_v31 = vsub.s32 %v19015_v29, %v14659_v12 }
 0xb61   : > { %10251 = vmatpush.msk.msra.mxu3 %vm18986_vm12, %v18392_v50  ;;  %vm19006_vm12 = vnez %v19005_v51  ;;  %v14673_v51 = vmul.u32 2, %v4756_v18 }
 0xb62   : > { %10232 = vmatpush.msk.msra.mxu2 %vm18984_vm11, %v18392_v50  ;;  %vm19004_vm11 = vnez %v19003_v13  ;;  %v5012_v13 = vsub.s32 %v19015_v29, %v14663_v35 }
 0xb63   : > { %10252 = vmatpush.msk.msra.mxu3 %vm18990_vm8, %v18392_v50  ;;  %vm19009_vm8 = vnez %v19008_v3  ;;  %19021 = vst [vmem:[#allocation31_spill] sm:$0xff] %v14673_v51 }
 0xb64   : > { %10233 = vmatpush.msk.msra.mxu2 %vm18988_vm6, %v18392_v50  ;;  %vm19007_vm6 = vmmov %vm18996_vm2 }
 0xb65   : > { %9753 = vmatmul.msk.f32.gmra.mxu0 %vm18991_vm5, %v4386_v2  ;;  %10253 = vmatpush.msk.msra.mxu3 %vm18995_vm15, %v18392_v50  ;;  %vm19010_vm5 = vmmov %vm18996_vm2 }
 0xb66   : > { %10234 = vmatpush.msk.msra.mxu2 %vm18993_vm10, %v18392_v50  ;;  %9758 = vmatmul.msk.f32.gmra.mxu1 %vm18996_vm2, %v4386_v2  ;;  %vm19012_vm10 = vnez %v19011_v61 }
 0xb67   : > { %10254 = vmatpush.msk.msra.mxu3 %vm19000_vm0, %v18392_v50  ;;  %vm5420_vm0 = vcmp.eq.s32.totalorder %v5036_v25, 0 }
 0xb68   : > { %10235 = vmatpush.msk.msra.mxu2 %vm18998_vm7, %v18392_v50 }
 0xb69   : > { %10255 = vmatpush.msk.msra.mxu3 %vm19004_vm11, %v18392_v50 }
 0xb6a   : > { %10236 = vmatpush.msk.msra.mxu2 %vm19002_vm3, %v18392_v50  ;;  %vm5804_vm3 = vcmp.eq.s32.totalorder %v5036_v25, 1 }
 0xb6b   : > { %vm6188_vm11 = vmor %vm5420_vm0, %vm5804_vm3  ;;  %vm5404_vm3 = vcmp.eq.s32.totalorder %v5020_v31, 0 }
 0xb6c   : > { %10237 = vmatpush.msk.msra.mxu2 %vm19006_vm12, %v18392_v50  ;;  %vm5556_vm12 = vcmp.eq.s32.totalorder %v5172_v4, 0 }
 0xb6d   : > { %9754 = vmatmul.msk.f32.gmra.mxu0 %vm19007_vm6, %v4387_v22  ;;  %vm5940_vm6 = vcmp.eq.s32.totalorder %v5172_v4, 1 }
 0xb6e   : > { %10238 = vmatpush.msk.msra.mxu2 %vm19009_vm8, %v18392_v50  ;;  %9759 = vmatmul.msk.f32.gmra.mxu1 %vm19010_vm5, %v4387_v22  ;;  %v4743_v22 = vadd.s32 376, %v19013_v0  ;;  %vm6324_vm8 = vmor %vm5556_vm12, %vm5940_vm6  ;;  %vm5412_vm5 = vcmp.eq.s32.totalorder %v5028_v40, 0  ;;  %vm5540_vm12 = vcmp.eq.s32.totalorder %v5156_v37, 0 }
 0xb6f   : > { %10208 = vmatpush.msk.msra.mxu1 %vm6324_vm8, %v18392_v50  ;;  %vm5924_vm8 = vcmp.eq.s32.totalorder %v5156_v37, 1  ;;  %v4988_v37 = vsub.s32 %v19015_v29, %v14714_v9 }
 0xb70   : > { %10239 = vmatpush.msk.msra.mxu2 %vm19012_vm10, %v18392_v50  ;;  %v14622_v19 = vmul.u32 2, %v4743_v22  ;;  %vm5796_vm10 = vcmp.eq.s32.totalorder %v5028_v40, 1 }
 0xb72   : > { %19014 = vst [vmem:[#allocation78_spill] sm:$0xff] %v14622_v19  ;;  %v5044_v63 = vsub.s32 %v19015_v29, %v14622_v19 }
 0xb74   : > { %vm5428_vm15 = vcmp.eq.s32.totalorder %v5044_v63, 0  ;;  %vm5812_vm2 = vcmp.eq.s32.totalorder %v5044_v63, 1  ;;  %v4754_v63 = vadd.s32 464, %v19013_v0 }
 0xb75   : > { %vm6196_vm7 = vmor %vm5428_vm15, %vm5812_vm2  ;;  %vm5548_vm15 = vcmp.eq.s32.totalorder %v5164_v55, 0  ;;  %vm5932_vm2 = vcmp.eq.s32.totalorder %v5164_v55, 1 }
 0xb76   : > { %10192 = vmatpush.msk.msra.mxu0 %vm6196_vm7, %v18392_v50  ;;  %vm6180_vm7 = vmor %vm5412_vm5, %vm5796_vm10  ;;  %vm5396_vm5 = vcmp.eq.s32.totalorder %v5012_v13, 0  ;;  %vm5780_vm10 = vcmp.eq.s32.totalorder %v5012_v13, 1  ;;  %v14712_v4 = vmul.u32 2, %v4754_v63  ;;  %v4735_v13 = vadd.s32 312, %v19013_v0 }
 0xb77   : > { %v4148_v49 = vpop.f32.mrf.mxu2  ;;  %vm6316_vm0 = vmor %vm5548_vm15, %vm5932_vm2 }
 0xb78   : > { %10193 = vmatpush.msk.msra.mxu0 %vm6188_vm11, %v18392_v50  ;;  %10209 = vmatpush.msk.msra.mxu1 %vm6316_vm0, %v18392_v50  ;;  %vm5788_vm11 = vcmp.eq.s32.totalorder %v5020_v31, 1  ;;  %vm6308_vm15 = vmor %vm5540_vm12, %vm5924_vm8  ;;  %v5132_v18 = vsub.s32 %v19015_v29, %v14712_v4 }
 0xb79   : > { %vm6172_vm6 = vmor %vm5404_vm3, %vm5788_vm11 }
 0xb7a   : > { %10194 = vmatpush.msk.msra.mxu0 %vm6180_vm7, %v18392_v50  ;;  %10210 = vmatpush.msk.msra.mxu1 %vm6308_vm15, %v18392_v50  ;;  %vm6164_vm2 = vmor %vm5396_vm5, %vm5780_vm10 }
 0xb7c   : > { %10195 = vmatpush.msk.msra.mxu0 %vm6172_vm6, %v18392_v50 }
 0xb7d   : > { %v4177_v32 = vpop.f32.mrf.mxu3 }
 0xb7e   : > { %10196 = vmatpush.msk.msra.mxu0 %vm6164_vm2, %v18392_v50 }
 0xb7f   : > { %v14597_v58 = vpop.f32.mrf.mxu2 }
 0xb85   : > { %v14599_v11 = vpop.f32.mrf.mxu3 }
 0xb87   : > { %v14601_v38 = vpop.f32.mrf.mxu2 }
 0xb8d   : > { %v14603_v45 = vpop.f32.mrf.mxu3 }
 0xb8f   : > { %v14605_v1 = vpop.f32.mrf.mxu2  ;;  %v14607_v57 = vpop.f32.mrf.mxu0 }
 0xb92   : > { %v14609_v56 = vpop.f32.mrf.mxu1 }
 0xb96   : > { %v14611_v26 = vpop.f32.mrf.mxu3 }
 0xb97   : > { %v14613_v10 = vpop.f32.mrf.mxu0  ;;  %v4284_v21 = vpop.f32.mrf.mxu2 }
 0xb98   : > { %v14633_v44 = vadd.f32 %v4284_v21, %v4148_v49  ;;  %v4738_v49 = vadd.s32 336, %v19013_v0  ;;  %v4737_v21 = vadd.s32 328, %v19013_v0 }
 0xb9a   : > { %v14615_v34 = vpop.f32.mrf.mxu1  ;;  %v14692_v16 = vmul.u32 2, %v4738_v49 }
 0xb9c   : > { %v5004_v52 = vsub.s32 %v19015_v29, %v14692_v16 }
 0xb9e   : > { %v4313_v36 = vpop.f32.mrf.mxu3  ;;  %vm5388_vm11 = vcmp.eq.s32.totalorder %v5004_v52, 0  ;;  %vm5772_vm12 = vcmp.eq.s32.totalorder %v5004_v52, 1 }
 0xb9f   : > { %v4287_v2 = vpop.f32.mrf.mxu2  ;;  %v14636_v20 = vadd.f32 %v4313_v36, %v4177_v32  ;;  %v4755_v32 = vadd.s32 472, %v19013_v0  ;;  %vm6156_vm5 = vmor %vm5388_vm11, %vm5772_vm12  ;;  %vm5372_vm12 = vcmp.eq.s32.totalorder %v4988_v37, 0 }
 0xba0   : > { %v14617_v41 = vpop.f32.mrf.mxu0  ;;  %v14676_v3 = vadd.f32 %v4287_v2, %v14597_v58  ;;  %10197 = vmatpush.msk.msra.mxu0 %vm6156_vm5, %v18392_v50 }
 0xba1   : > { %v14694_v54 = vmul.u32 2, %v4755_v32 }
 0xba2   : > { %v14619_v33 = vpop.f32.mrf.mxu1 }
 0xba3   : > { %19022 = vst [vmem:[#allocation91_spill] sm:$0xff] %v14694_v54 }
 0xba6   : > { %v4316_v60 = vpop.f32.mrf.mxu3 }
 0xba7   : > { %v4290_v48 = vpop.f32.mrf.mxu2  ;;  %v14683_v36 = vadd.f32 %v4316_v60, %v14599_v11  ;;  %v5148_v11 = vsub.s32 %v19015_v29, %v14673_v51  ;;  %v14696_v60 = vmul.u32 2, %v4737_v21 }
 0xba8   : > { %v14687_v58 = vadd.f32 %v4290_v48, %v14601_v38  ;;  %v4753_v48 = vadd.s32 456, %v19013_v0 }
 0xba9   : > { %v14638_v59 = vpop.f32.mrf.mxu0  ;;  %vm5532_vm7 = vcmp.eq.s32.totalorder %v5148_v11, 0  ;;  %vm5916_vm0 = vcmp.eq.s32.totalorder %v5148_v11, 1  ;;  %v4996_v25 = vsub.s32 %v19015_v29, %v14696_v60 }
 0xbaa   : > { %vm6300_vm3 = vmor %vm5532_vm7, %vm5916_vm0  ;;  %v14716_v8 = vmul.u32 2, %v4753_v48  ;;  %vm5516_vm0 = vcmp.eq.s32.totalorder %v5132_v18, 0  ;;  %v4734_v48 = vadd.s32 304, %v19013_v0 }
 0xbab   : > { %v14649_v14 = vpop.f32.mrf.mxu1  ;;  %10211 = vmatpush.msk.msra.mxu1 %vm6300_vm3, %v18392_v50  ;;  %vm5380_vm10 = vcmp.eq.s32.totalorder %v4996_v25, 0  ;;  %vm5764_vm15 = vcmp.eq.s32.totalorder %v4996_v25, 1  ;;  %vm5900_vm3 = vcmp.eq.s32.totalorder %v5132_v18, 1 }
 0xbac   : > { %19024 = vst [vmem:[#allocation34_spill] sm:$0xff] %v14716_v8  ;;  %vm6148_vm7 = vmor %vm5380_vm10, %vm5764_vm15 }
 0xbad   : > { %10198 = vmatpush.msk.msra.mxu0 %vm6148_vm7, %v18392_v50  ;;  %vm6284_vm11 = vmor %vm5516_vm0, %vm5900_vm3 }
 0xbaf   : > { %v4319_v27 = vpop.f32.mrf.mxu3 }
 0xbb0   : > { %v4293_v61 = vpop.f32.mrf.mxu2  ;;  %v14699_v38 = vadd.f32 %v4319_v27, %v14603_v45  ;;  %v5140_v45 = vsub.s32 %v19015_v29, %v14694_v54 }
 0xbb1   : > { %v4342_v22 = vpop.f32.mrf.mxu0  ;;  %v14720_v40 = vadd.f32 %v4293_v61, %v14605_v1  ;;  %v5124_v1 = vsub.s32 %v19015_v29, %v14716_v8  ;;  %v14731_v61 = vpop.permute.xlu2 %4614 }
 0xbb2   : > { %vm5524_vm6 = vcmp.eq.s32.totalorder %v5140_v45, 0  ;;  %vm5908_vm8 = vcmp.eq.s32.totalorder %v5140_v45, 1  ;;  %v14734_v49 = vadd.f32 %v4342_v22, %v14607_v57  ;;  %v14746_v22 = vmul.u32 2, %v4735_v13 }
 0xbb3   : > { %v4371_v2 = vpop.f32.mrf.mxu1  ;;  %vm6292_vm2 = vmor %vm5524_vm6, %vm5908_vm8  ;;  %vm5756_vm6 = vcmp.eq.s32.totalorder %v4988_v37, 1  ;;  %vm5508_vm8 = vcmp.eq.s32.totalorder %v5124_v1, 0  ;;  %vm5892_vm10 = vcmp.eq.s32.totalorder %v5124_v1, 1  ;;  %v4750_v45 = vadd.s32 432, %v19013_v0 }
 0xbb4   : > { %10212 = vmatpush.msk.msra.mxu1 %vm6292_vm2, %v18392_v50  ;;  %v14743_v57 = vadd.f32 %v4371_v2, %v14609_v56  ;;  %vm6140_vm5 = vmor %vm5372_vm12, %vm5756_vm6  ;;  %v4751_v56 = vadd.s32 440, %v19013_v0  ;;  %v4980_v2 = vsub.s32 %v19015_v29, %v14746_v22 }
 0xbb5   : > { %10199 = vmatpush.msk.msra.mxu0 %vm6140_vm5, %v18392_v50  ;;  %vm6276_vm15 = vmor %vm5508_vm8, %vm5892_vm10 }
 0xbb6   : > { %10213 = vmatpush.msk.msra.mxu1 %vm6284_vm11, %v18392_v50  ;;  %v14769_v18 = vmul.u32 2, %v4751_v56  ;;  %vm5364_vm2 = vcmp.eq.s32.totalorder %v4980_v2, 0  ;;  %vm5748_vm7 = vcmp.eq.s32.totalorder %v4980_v2, 1 }
 0xbb7   : > { %v4322_v30 = vpop.f32.mrf.mxu3  ;;  %vm6132_vm3 = vmor %vm5364_vm2, %vm5748_vm7 }
 0xbb8   : > { %v4493_v55 = vpop.f32.mrf.mxu2  ;;  %v14751_v63 = vadd.f32 %v4322_v30, %v14611_v26  ;;  %10214 = vmatpush.msk.msra.mxu1 %vm6276_vm15, %v18392_v50  ;;  %v4733_v26 = vadd.s32 296, %v19013_v0  ;;  %19026 = vst [vmem:[#allocation24_spill] sm:$0xff] %v14769_v18  ;;  %10200 = vmatpush.msk.msra.mxu0 %vm6132_vm3, %v18392_v50 }
 0xbb9   : > { %v4345_v27 = vpop.f32.mrf.mxu0  ;;  %v4592_v31 = vadd.f32 %v4493_v55, %v14633_v44  ;;  %v4752_v44 = vadd.s32 448, %v19013_v0  ;;  %v14767_v55 = vmul.u32 2, %v4734_v48  ;;  %v14785_v48 = vmul.u32 2, %v4750_v45 }
 0xbba   : > { %v14765_v25 = vadd.f32 %v4345_v27, %v14613_v10  ;;  %v5108_v27 = vsub.s32 %v19015_v29, %v14769_v18 }
 0xbbb   : > { %v14739_v32 = vadd.f32 %v14731_v61, %v4592_v31  ;;  %v4374_v21 = vpop.f32.mrf.mxu1  ;;  %v14748_v11 = vmul.u32 2, %v4752_v44  ;;  %v4972_v10 = vsub.s32 %v19015_v29, %v14767_v55  ;;  %v14777_v44 = vpop.permute.xlu0 %4619  ;;  %19028 = vst [vmem:[#allocation67_spill] sm:$0xff] %v14785_v48 }
 0xbbc   : > { %vm5492_vm5 = vcmp.eq.s32.totalorder %v5108_v27, 0  ;;  %vm5876_vm2 = vcmp.eq.s32.totalorder %v5108_v27, 1 }
 0xbbd   : > { %19025 = vst [vmem:[#allocation22_spill] sm:$0xff] %v14748_v11  ;;  %v4664_v15 = vmul.f32 1.442695, %v14739_v32  ;;  %v5116_v52 = vsub.s32 %v19015_v29, %v14748_v11  ;;  %vm5356_vm6 = vcmp.eq.s32.totalorder %v4972_v10, 0  ;;  %vm5740_vm8 = vcmp.eq.s32.totalorder %v4972_v10, 1  ;;  %vm6260_vm7 = vmor %vm5492_vm5, %vm5876_vm2 }
 0xbbe   : > { %vm4648_vm10 = vcmp.gt.f32.partialorder %v14739_v32, 0.0  ;;  %vm6124_vm15 = vmor %vm5356_vm6, %vm5740_vm8 }
 0xbbf   : > { %11463 = vpow2.f32 %v4664_v15  ;;  %v4522_v30 = vpop.f32.mrf.mxu3  ;;  %vm5500_vm0 = vcmp.eq.s32.totalorder %v5116_v52, 0  ;;  %vm5884_vm11 = vcmp.eq.s32.totalorder %v5116_v52, 1  ;;  %v14794_v52 = vadd.f32 %v4374_v21, %v14615_v34  ;;  %10201 = vmatpush.msk.msra.mxu0 %vm6124_vm15, %v18392_v50 }
 0xbc0   : > { %v4593_v31 = vadd.f32 %v4522_v30, %v14636_v20  ;;  %v4496_v37 = vpop.f32.mrf.mxu2  ;;  %vm6268_vm12 = vmor %vm5500_vm0, %vm5884_vm11  ;;  %v14783_v20 = vmul.u32 2, %v4733_v26  ;;  %v5100_v34 = vsub.s32 %v19015_v29, %v14785_v48 }
 0xbc1   : > { %v4348_v1 = vpop.f32.mrf.mxu0  ;;  %v4596_v13 = vadd.f32 %v4496_v37, %v14676_v3  ;;  %v4732_v3 = vadd.s32 288, %v19013_v0  ;;  %10215 = vmatpush.msk.msra.mxu1 %vm6268_vm12, %v18392_v50 }
 0xbc2   : > { %v14780_v15 = vadd.f32 %v14731_v61, %v4593_v31  ;;  %19027 = vst [vmem:[#allocation64_spill] sm:$0xff] %v14783_v20  ;;  %v14798_v30 = vadd.f32 %v4348_v1, %v14617_v41  ;;  %v4964_v37 = vsub.s32 %v19015_v29, %v14783_v20  ;;  %v4749_v41 = vadd.s32 424, %v19013_v0 }
 0xbc3   : > { %v14789_v56 = vadd.f32 %v14777_v44, %v4596_v13  ;;  %v4377_v2 = vpop.f32.mrf.mxu1  ;;  %10216 = vmatpush.msk.msra.mxu1 %vm6260_vm7, %v18392_v50  ;;  %v14807_v13 = vmul.u32 2, %v4732_v3  ;;  %vm5484_vm11 = vcmp.eq.s32.totalorder %v5100_v34, 0  ;;  %vm5868_vm6 = vcmp.eq.s32.totalorder %v5100_v34, 1 }
 0xbc4   : > { %v4666_v26 = vmul.f32 1.442695, %v14780_v15  ;;  %vm5348_vm0 = vcmp.eq.s32.totalorder %v4964_v37, 0  ;;  %vm5732_vm3 = vcmp.eq.s32.totalorder %v4964_v37, 1  ;;  %vm6252_vm8 = vmor %vm5484_vm11, %vm5868_vm6  ;;  %v14821_v37 = vmul.u32 2, %v4749_v41 }
 0xbc5   : > { %v11464_v45 = vpop.eup %11463  ;;  %v4672_v31 = vmul.f32 1.442695, %v14789_v56  ;;  %19029 = vst [vmem:[#allocation25_spill] sm:$0xff] %v14807_v13  ;;  %vm6116_vm12 = vmor %vm5348_vm0, %vm5732_vm3  ;;  %v4956_v3 = vsub.s32 %v19015_v29, %v14807_v13  ;;  %vm4649_vm5 = vcmp.gt.f32.partialorder %v14780_v15, 0.0  ;;  %10217 = vmatpush.msk.msra.mxu1 %vm6252_vm8, %v18392_v50  ;;  %vm4652_vm0 = vcmp.gt.f32.partialorder %v14789_v56, 0.0 }
 0xbc6   : > { %v9760_v21 = vadd.f32 -1.0, %v11464_v45  ;;  %11465 = vpow2.f32 %v4666_v26  ;;  %10202 = vmatpush.msk.msra.mxu0 %vm6116_vm12, %v18392_v50  ;;  %19031 = vst [vmem:[#allocation26_spill] sm:$0xff] %v14821_v37  ;;  %vm19035_vm3 = vnez %v18573_v43  ;;  %vm19036_vm6 = vnez %v18587_v46 }
 0xbc7   : > { %11467 = vpow2.f32 %v4672_v31  ;;  %v4525_v1 = vpop.f32.mrf.mxu3  ;;  %vm5724_vm15 = vcmp.eq.s32.totalorder %v4956_v3, 1 }
 0xbc8   : > { %v14813_v10 = vsel %vm4648_vm10, %v14739_v32, %v9760_v21  ;;  %v4597_v27 = vadd.f32 %v4525_v1, %v14683_v36  ;;  %v4499_v45 = vpop.f32.mrf.mxu2  ;;  %v4731_v32 = vadd.s32 280, %v19013_v0  ;;  %v4748_v36 = vadd.s32 416, %v19013_v0  ;;  %v14825_v21 = vpop.permute.xlu1 %4624 }
 0xbc9   : > { %19030 = vst [vmem:[#allocation68_spill] sm:$0xff] %v14813_v10  ;;  %v4351_v26 = vpop.f32.mrf.mxu0  ;;  %v4600_v31 = vadd.f32 %v4499_v45, %v14687_v58  ;;  %7116 = vmatmul.f32.vlgmr.msrb.gmra.mxu2 %v14813_v10  ;;  %vm5340_vm10 = vcmp.eq.s32.totalorder %v4956_v3, 0  ;;  %v19032_v58 = vld [vmem:[#allocation99_spill] sm:$0xff]  ;;  %v5092_v45 = vsub.s32 %v19015_v29, %v14821_v37  ;;  %v14846_v3 = vadd.f32 %v4377_v2, %v14619_v33 }
 0xbca   : > { %v14829_v34 = vadd.f32 %v14777_v44, %v4597_v27  ;;  %vm19033_vm2 = vnez %v19032_v58  ;;  %vm6108_vm7 = vmor %vm5340_vm10, %vm5724_vm15  ;;  %v14840_v13 = vmul.u32 2, %v4731_v32  ;;  %v14842_v27 = vmul.u32 2, %v4748_v36 }
 0xbcb   : > { %10288 = vmatpush.msk.msrb.mxu2 %vm19033_vm2, %v18392_v50  ;;  %v14836_v41 = vadd.f32 %v14825_v21, %v4600_v31  ;;  %v4380_v1 = vpop.f32.mrf.mxu1  ;;  %10203 = vmatpush.msk.msra.mxu0 %vm6108_vm7, %v18392_v50  ;;  %v4730_v31 = vadd.s32 272, %v19013_v0  ;;  %v14855_v36 = vadd.f32 %v4351_v26, %v14638_v59  ;;  %vm5476_vm11 = vcmp.eq.s32.totalorder %v5092_v45, 0 }
 0xbcc   : > { %19034 = vst [vmem:[#allocation42_spill] sm:$0xff] %v14842_v27  ;;  %v11466_v48 = vpop.eup %11465  ;;  %v4674_v58 = vmul.f32 1.442695, %v14829_v34  ;;  %vm5860_vm12 = vcmp.eq.s32.totalorder %v5092_v45, 1  ;;  %v4948_v2 = vsub.s32 %v19015_v29, %v14840_v13 }
 0xbcd   : > { %10289 = vmatpush.msk.msrb.mxu2 %vm19035_vm3, %v18392_v50  ;;  %v11468_v32 = vpop.eup %11467  ;;  %v9761_v37 = vadd.f32 -1.0, %v11466_v48  ;;  %v4680_v20 = vmul.f32 1.442695, %v14836_v41  ;;  %vm6244_vm8 = vmor %vm5476_vm11, %vm5860_vm12  ;;  %v5084_v48 = vsub.s32 %v19015_v29, %v14842_v27  ;;  %v14870_v26 = vmul.u32 2, %v4730_v31 }
 0xbce   : > { %v9764_v33 = vadd.f32 -1.0, %v11468_v32  ;;  %11469 = vpow2.f32 %v4674_v58  ;;  %10218 = vmatpush.msk.msra.mxu1 %vm6244_vm8, %v18392_v50  ;;  %vm5716_vm10 = vcmp.eq.s32.totalorder %v4948_v2, 1  ;;  %vm4653_vm3 = vcmp.gt.f32.partialorder %v14829_v34, 0.0 }
 0xbcf   : > { %10290 = vmatpush.msk.msrb.mxu2 %vm19036_vm6, %v18392_v50  ;;  %v14866_v43 = vsel %vm4649_vm5, %v14780_v15, %v9761_v37  ;;  %11471 = vpow2.f32 %v4680_v20  ;;  %v4528_v59 = vpop.f32.mrf.mxu3  ;;  %19038 = vst [vmem:[#allocation43_spill] sm:$0xff] %v14870_v26  ;;  %vm5332_vm5 = vcmp.eq.s32.totalorder %v4948_v2, 0  ;;  %vm5468_vm2 = vcmp.eq.s32.totalorder %v5084_v48, 0 }
 0xbd0   : > { %19037 = vst [vmem:[#allocation70_spill] sm:$0xff] %v14866_v43  ;;  %v14875_v45 = vsel %vm4652_vm0, %v14789_v56, %v9764_v33  ;;  %v4601_v46 = vadd.f32 %v4528_v59, %v14699_v38  ;;  %7145 = vmatmul.f32.vlgmr.msrb.gmra.mxu3 %v14866_v43  ;;  %v4502_v58 = vpop.f32.mrf.mxu2  ;;  %vm6100_vm15 = vmor %vm5332_vm5, %vm5716_vm10  ;;  %vm5852_vm7 = vcmp.eq.s32.totalorder %v5084_v48, 1  ;;  %v4940_v56 = vsub.s32 %v19015_v29, %v14870_v26  ;;  %v14887_v38 = vpop.permute.xlu2 %4629 }
 0xbd1   : > { %19039 = vst [vmem:[#allocation73_spill] sm:$0xff] %v14875_v45  ;;  %v4604_v15 = vadd.f32 %v4502_v58, %v14720_v40  ;;  %7119 = vmatmul.f32.gmra.mxu2 %v14875_v45  ;;  %vm19040_vm0 = vnez %v18561_v17  ;;  %10204 = vmatpush.msk.msra.mxu0 %vm6100_vm15, %v18392_v50  ;;  %vm6236_vm11 = vmor %vm5468_vm2, %vm5852_vm7  ;;  %v4747_v31 = vadd.s32 408, %v19013_v0  ;;  %vm19041_vm12 = vnez %v18604_v53 }
 0xbd2   : > { %v4551_v20 = vpop.f32.mrf.mxu0  ;;  %10304 = vmatpush.msk.msrb.mxu3 %vm19040_vm0, %v18392_v50  ;;  %v14891_v37 = vadd.f32 %v14825_v21, %v4601_v46  ;;  %10291 = vmatpush.msk.msrb.mxu2 %vm19041_vm12, %v18392_v50  ;;  %v14900_v17 = vadd.f32 %v4380_v1, %v14649_v14  ;;  %vm5324_vm6 = vcmp.eq.s32.totalorder %v4940_v56, 0  ;;  %vm5708_vm8 = vcmp.eq.s32.totalorder %v4940_v56, 1 }
 0xbd3   : > { %v4594_v40 = vadd.f32 %v4551_v20, %v14734_v49  ;;  %v14903_v32 = vadd.f32 %v14887_v38, %v4604_v15  ;;  %v4580_v33 = vpop.f32.mrf.mxu1  ;;  %10219 = vmatpush.msk.msra.mxu1 %vm6236_vm11, %v18392_v50  ;;  %vm19042_vm5 = vnez %v18577_v39  ;;  %vm6092_vm10 = vmor %vm5324_vm6, %vm5708_vm8  ;;  %v4729_v1 = vadd.s32 264, %v19013_v0 }
 0xbd4   : > { %10305 = vmatpush.msk.msrb.mxu3 %vm19042_vm5, %v18392_v50  ;;  %v11470_v49 = vpop.eup %11469  ;;  %v4682_v2 = vmul.f32 1.442695, %v14891_v37  ;;  %v4595_v14 = vadd.f32 %v4580_v33, %v14743_v57  ;;  %vm19043_vm15 = vnez %v18622_v28  ;;  %vm4656_vm2 = vcmp.gt.f32.partialorder %v14836_v41, 0.0  ;;  %10205 = vmatpush.msk.msra.mxu0 %vm6092_vm10, %v18392_v50 }
 0xbd5   : > { %v14911_v53 = vadd.f32 %v14731_v61, %v4594_v40  ;;  %10292 = vmatpush.msk.msrb.mxu2 %vm19043_vm15, %v18392_v50  ;;  %v11472_v59 = vpop.eup %11471  ;;  %v9765_v48 = vadd.f32 -1.0, %v11470_v49  ;;  %v4688_v39 = vmul.f32 1.442695, %v14903_v32  ;;  %v14921_v46 = vmul.u32 2, %v4747_v31  ;;  %v19051_v40 = vld [vmem:[#allocation115_spill] sm:$0xff] }
 0xbd6   : > { %vm19045_vm7 = vnez %v18590_v6  ;;  %v9768_v57 = vadd.f32 -1.0, %v11472_v59  ;;  %11473 = vpow2.f32 %v4682_v2  ;;  %v4746_v28 = vadd.s32 400, %v19013_v0  ;;  %v19058_v59 = vld [vmem:[#allocation112_spill] sm:$0xff] }
 0xbd7   : > { %19044 = vst [vmem:[#allocation44_spill] sm:$0xff] %v14921_v46  ;;  %10306 = vmatpush.msk.msrb.mxu3 %vm19045_vm7, %v18392_v50  ;;  %v4668_v58 = vmul.f32 1.442695, %v14911_v53  ;;  %vm19046_vm0 = vnez %v18639_v42  ;;  %v14934_v15 = vsel %vm4653_vm3, %v14829_v34, %v9765_v48  ;;  %11475 = vpow2.f32 %v4688_v39  ;;  %v4531_v6 = vpop.f32.mrf.mxu3 }
 0xbd8   : > { %10293 = vmatpush.msk.msrb.mxu2 %vm19046_vm0, %v18392_v50  ;;  %19047 = vst [vmem:[#allocation74_spill] sm:$0xff] %v14934_v15  ;;  %v14937_v20 = vadd.f32 %v14731_v61, %v4595_v14  ;;  %v5076_v56 = vsub.s32 %v19015_v29, %v14921_v46  ;;  %vm19048_vm11 = vnez %v18608_v7  ;;  %v14947_v42 = vsel %vm4656_vm2, %v14836_v41, %v9768_v57  ;;  %v19053_v41 = vld [vmem:[#allocation109_spill] sm:$0xff]  ;;  %v19056_v14 = vld [vmem:[#allocation119_spill] sm:$0xff] }
 0xbd9   : > { %10307 = vmatpush.msk.msrb.mxu3 %vm19048_vm11, %v18392_v50  ;;  %19049 = vst [vmem:[#allocation45_spill] sm:$0xff] %v14947_v42  ;;  %11477 = vpow2.f32 %v4668_v58  ;;  %v4605_v34 = vadd.f32 %v4531_v6, %v14751_v63  ;;  %v14951_v61 = vmul.u32 2, %v4729_v1  ;;  %vm19052_vm3 = vnez %v19051_v40  ;;  %7122 = vmatmul.f32.gmra.mxu2 %v14947_v42  ;;  %v19060_v6 = vld [vmem:[#allocation123_spill] sm:$0xff] }
 0xbda   : > { %7148 = vmatmul.f32.gmra.mxu3 %v14934_v15  ;;  %10294 = vmatpush.msk.msrb.mxu2 %vm19052_vm3, %v18392_v50  ;;  %vm4657_vm12 = vcmp.gt.f32.partialorder %v14891_v37, 0.0  ;;  %v4670_v7 = vmul.f32 1.442695, %v14937_v20  ;;  %v4554_v31 = vpop.f32.mrf.mxu0  ;;  %vm5460_vm6 = vcmp.eq.s32.totalorder %v5076_v56, 0  ;;  %vm5844_vm8 = vcmp.eq.s32.totalorder %v5076_v56, 1 }
 0xbdb   : > { %19050 = vst [vmem:[#allocation77_spill] sm:$0xff] %v14951_v61  ;;  %vm19054_vm5 = vnez %v19053_v41  ;;  %v14963_v63 = vadd.f32 %v14887_v38, %v4605_v34  ;;  %v4598_v33 = vadd.f32 %v4554_v31, %v14765_v25  ;;  %vm6228_vm10 = vmor %vm5460_vm6, %vm5844_vm8  ;;  %v4932_v49 = vsub.s32 %v19015_v29, %v14951_v61  ;;  %v4583_v1 = vpop.f32.mrf.mxu1 }
 0xbdc   : > { %10308 = vmatpush.msk.msrb.mxu3 %vm19054_vm5, %v18392_v50  ;;  %v14968_v2 = vmul.u32 2, %v4746_v28  ;;  %vm19057_vm15 = vnez %v19056_v14  ;;  %vm4660_vm2 = vcmp.gt.f32.partialorder %v14903_v32, 0.0  ;;  %vm4650_vm7 = vcmp.gt.f32.partialorder %v14911_v53, 0.0  ;;  %10220 = vmatpush.msk.msra.mxu1 %vm6228_vm10, %v18392_v50  ;;  %v11474_v48 = vpop.eup %11473  ;;  %v19064_v14 = vld [vmem:[#allocation127_spill] sm:$0xff] }
 0xbdd   : > { %10295 = vmatpush.msk.msrb.mxu2 %vm19057_vm15, %v18392_v50  ;;  %11479 = vpow2.f32 %v4670_v7  ;;  %v4728_v25 = vadd.s32 256, %v19013_v0  ;;  %vm19059_vm0 = vnez %v19058_v59  ;;  %v4690_v39 = vmul.f32 1.442695, %v14963_v63  ;;  %v11476_v56 = vpop.eup %11475  ;;  %v19062_v7 = vld [vmem:[#allocation116_spill] sm:$0xff] }
 0xbde   : > { %19055 = vst [vmem:[#allocation46_spill] sm:$0xff] %v14968_v2  ;;  %10309 = vmatpush.msk.msrb.mxu3 %vm19059_vm0, %v18392_v50  ;;  %v14982_v57 = vadd.f32 %v14777_v44, %v4598_v33  ;;  %v4599_v58 = vadd.f32 %v4583_v1, %v14794_v52  ;;  %v4745_v28 = vadd.s32 392, %v19013_v0  ;;  %vm19061_vm11 = vnez %v19060_v6 }
 0xbdf   : > { %10296 = vmatpush.msk.msrb.mxu2 %vm19061_vm11, %v18392_v50  ;;  %v9769_v34 = vadd.f32 -1.0, %v11474_v48  ;;  %vm5316_vm3 = vcmp.eq.s32.totalorder %v4932_v49, 0  ;;  %vm5700_vm6 = vcmp.eq.s32.totalorder %v4932_v49, 1  ;;  %v5068_v40 = vsub.s32 %v19015_v29, %v14968_v2  ;;  %v11478_v31 = vpop.eup %11477  ;;  %v19067_v48 = vld [vmem:[#allocation120_spill] sm:$0xff] }
 0xbe0   : > { %vm19063_vm8 = vnez %v19062_v7  ;;  %v9772_v41 = vadd.f32 -1.0, %v11476_v56  ;;  %11481 = vpow2.f32 %v4690_v39  ;;  %v4676_v52 = vmul.f32 1.442695, %v14982_v57  ;;  %vm6084_vm5 = vmor %vm5316_vm3, %vm5700_vm6 }
 0xbe1   : > { %10310 = vmatpush.msk.msrb.mxu3 %vm19063_vm8, %v18392_v50  ;;  %v4744_v33 = vadd.s32 384, %v19013_v0  ;;  %vm19065_vm10 = vnez %v19064_v14  ;;  %v15002_v49 = vsel %vm4657_vm12, %v14891_v37, %v9769_v34  ;;  %v9762_v1 = vadd.f32 -1.0, %v11478_v31  ;;  %10206 = vmatpush.msk.msra.mxu0 %vm6084_vm5, %v18392_v50  ;;  %v19078_v31 = vld [vmem:[#allocation135_spill] sm:$0xff] }
 0xbe2   : > { %10297 = vmatpush.msk.msrb.mxu2 %vm19065_vm10, %v18392_v50  ;;  %19066 = vst [vmem:[#allocation79_spill] sm:$0xff] %v15002_v49  ;;  %v15005_v59 = vadd.f32 %v14777_v44, %v4599_v58  ;;  %vm5452_vm15 = vcmp.eq.s32.totalorder %v5068_v40, 0  ;;  %vm19068_vm0 = vnez %v19067_v48  ;;  %v15014_v0 = vsel %vm4660_vm2, %v14903_v32, %v9772_v41  ;;  %7151 = vmatmul.f32.gmra.mxu3 %v15002_v49  ;;  %v19071_v44 = vld [vmem:[#allocation131_spill] sm:$0xff]  ;;  %v4557_v6 = vpop.f32.mrf.mxu0 }
 0xbe3   : > { %10311 = vmatpush.msk.msrb.mxu3 %vm19068_vm0, %v18392_v50  ;;  %19069 = vst [vmem:[#allocation47_spill] sm:$0xff] %v15014_v0  ;;  %11483 = vpow2.f32 %v4676_v52  ;;  %vm5836_vm11 = vcmp.eq.s32.totalorder %v5068_v40, 1  ;;  %v15017_v37 = vmul.u32 2, %v4728_v25  ;;  %vm19072_vm12 = vnez %v19071_v44  ;;  %v11480_v39 = vpop.eup %11479  ;;  %7125 = vmatmul.f32.gmra.mxu2 %v15014_v0  ;;  %v19075_v25 = vld [vmem:[#allocation124_spill] sm:$0xff]  ;;  %v4586_v41 = vpop.f32.mrf.mxu1  ;;  %v19080_v52 = vld [vmem:[#allocation35_spill] sm:$0xff] }
 0xbe4   : > { %10298 = vmatpush.msk.msrb.mxu2 %vm19072_vm12, %v18392_v50  ;;  %v15025_v58 = vsel %vm4650_vm7, %v14911_v53, %v9762_v1  ;;  %vm4651_vm3 = vcmp.gt.f32.partialorder %v14937_v20, 0.0  ;;  %v4678_v32 = vmul.f32 1.442695, %v15005_v59  ;;  %vm6220_vm2 = vmor %vm5452_vm15, %vm5836_vm11  ;;  %v15029_v56 = vmul.u32 2, %v4745_v28  ;;  %v19081_v1 = vld [vmem:[#allocation128_spill] sm:$0xff] }
 0xbe5   : > { %19070 = vst [vmem:[#allocation81_spill] sm:$0xff] %v15017_v37  ;;  %vm19076_vm6 = vnez %v19075_v25  ;;  %v9763_v34 = vadd.f32 -1.0, %v11480_v39  ;;  %10221 = vmatpush.msk.msra.mxu1 %vm6220_vm2, %v18392_v50  ;;  %v4602_v53 = vadd.f32 %v4557_v6, %v14798_v30  ;;  %v4924_v40 = vsub.s32 %v19015_v29, %v15017_v37  ;;  %v19084_v39 = vld [vmem:[#allocation139_spill] sm:$0xff] }
 0xbe6   : > { %19073 = vst [vmem:[#allocation50_spill] sm:$0xff] %v15025_v58  ;;  %10312 = vmatpush.msk.msrb.mxu3 %vm19076_vm6, %v18392_v50  ;;  %v15039_v7 = vmul.u32 2, %v4744_v33  ;;  %vm19079_vm7 = vnez %v19078_v31  ;;  %11485 = vpow2.f32 %v4678_v32  ;;  %v5060_v28 = vsub.s32 %v19015_v29, %v15029_v56  ;;  %v11482_v33 = vpop.eup %11481 }
 0xbe7   : > { %19074 = vst [vmem:[#allocation86_spill] sm:$0xff] %v15029_v56  ;;  %10299 = vmatpush.msk.msrb.mxu2 %vm19079_vm7, %v18392_v50  ;;  %v5045_v14 = vsub.s32 %v19080_v52, %v14622_v19  ;;  %v5037_v30 = vsub.s32 %v19080_v52, %v14628_v5  ;;  %vm19082_vm8 = vnez %v19081_v1  ;;  %v15056_v48 = vsel %vm4651_vm3, %v14937_v20, %v9763_v34  ;;  %v19086_v20 = vld [vmem:[#allocation132_spill] sm:$0xff] }
 0xbe8   : > { %19077 = vst [vmem:[#allocation52_spill] sm:$0xff] %v15039_v7  ;;  %10313 = vmatpush.msk.msrb.mxu3 %vm19082_vm8, %v18392_v50  ;;  %v15059_v44 = vadd.f32 %v14825_v21, %v4602_v53  ;;  %vm5308_vm5 = vcmp.eq.s32.totalorder %v4924_v40, 0  ;;  %vm5692_vm10 = vcmp.eq.s32.totalorder %v4924_v40, 1  ;;  %vm19085_vm15 = vnez %v19084_v39  ;;  %8185 = vrot.lane.b32.xlu1 %v15056_v48, %s11720_s19 }
 0xbe9   : > { %19083 = vst [vmem:[#allocation90_spill] sm:$0xff] %v15056_v48  ;;  %10300 = vmatpush.msk.msrb.mxu2 %vm19085_vm15, %v18392_v50  ;;  %v9773_v32 = vadd.f32 -1.0, %v11482_v33  ;;  %vm6076_vm0 = vmor %vm5308_vm5, %vm5692_vm10  ;;  %vm5444_vm11 = vcmp.eq.s32.totalorder %v5060_v28, 0  ;;  %vm5828_vm12 = vcmp.eq.s32.totalorder %v5060_v28, 1  ;;  %v4603_v6 = vadd.f32 %v4586_v41, %v14846_v3  ;;  %v11484_v25 = vpop.eup %11483  ;;  %v19088_v3 = vld [vmem:[#allocation143_spill] sm:$0xff] }
 0xbea   : > { %vm19087_vm3 = vnez %v19086_v20  ;;  %vm4661_vm2 = vcmp.gt.f32.partialorder %v14963_v63, 0.0  ;;  %v4684_v34 = vmul.f32 1.442695, %v15059_v44  ;;  %10207 = vmatpush.msk.msra.mxu0 %vm6076_vm0, %v18392_v50  ;;  %vm6212_vm6 = vmor %vm5444_vm11, %vm5828_vm12  ;;  %v5052_v53 = vsub.s32 %v19015_v29, %v15039_v7  ;;  %v19091_v41 = vld [vmem:[#allocation147_spill] sm:$0xff] }
 0xbeb   : > { %10314 = vmatpush.msk.msrb.mxu3 %vm19087_vm3, %v18392_v50  ;;  %vm5429_vm7 = vcmp.eq.s32.totalorder %v5045_v14, 0  ;;  %vm19089_vm8 = vnez %v19088_v3  ;;  %v15079_v40 = vsel %vm4661_vm2, %v14963_v63, %v9773_v32  ;;  %v9766_v31 = vadd.f32 -1.0, %v11484_v25  ;;  %10222 = vmatpush.msk.msra.mxu1 %vm6212_vm6, %v18392_v50  ;;  %v19107_v3 = vld [vmem:[#allocation148_spill] sm:$0xff] }
 0xbec   : > { %10301 = vmatpush.msk.msrb.mxu2 %vm19089_vm8, %v18392_v50  ;;  %19090 = vst [vmem:[#allocation53_spill] sm:$0xff] %v15079_v40  ;;  %7174 = vmatmul.f32.vlgmr.msra.gmra.mxu0 %v15025_v58  ;;  %v15084_v28 = vadd.f32 %v14825_v21, %v4603_v6  ;;  %vm5813_vm5 = vcmp.eq.s32.totalorder %v5045_v14, 1  ;;  %11487 = vpow2.f32 %v4684_v34  ;;  %vm5436_vm10 = vcmp.eq.s32.totalorder %v5052_v53, 0  ;;  %v11486_v63 = vpop.eup %11485  ;;  %v4560_v14 = vpop.f32.mrf.mxu0  ;;  %v19093_v6 = vld [vmem:[#allocation136_spill] sm:$0xff] }
 0xbed   : > { %vm5820_vm15 = vcmp.eq.s32.totalorder %v5052_v53, 1  ;;  %vm6197_vm0 = vmor %vm5429_vm7, %vm5813_vm5  ;;  %vm5421_vm11 = vcmp.eq.s32.totalorder %v5037_v30, 0  ;;  %7154 = vmatmul.f32.gmra.mxu3 %v15079_v40  ;;  %vm19092_vm12 = vnez %v19091_v41  ;;  %vm4654_vm3 = vcmp.gt.f32.partialorder %v14982_v57, 0.0  ;;  %7232 = vmatmul.f32.vlgmr.msra.gmra.mxu2 %v14813_v10  ;;  %v4589_v53 = vpop.f32.mrf.mxu1 }
 0xbee   : > { %10302 = vmatpush.msk.msrb.mxu2 %vm19092_vm12, %v18392_v50  ;;  %v4686_v21 = vmul.f32 1.442695, %v15084_v28  ;;  %vm6204_vm6 = vmor %vm5436_vm10, %vm5820_vm15  ;;  %10256 = vmatpush.msk.msrb.mxu0 %vm6197_vm0, %v18392_v50  ;;  %vm5805_vm8 = vcmp.eq.s32.totalorder %v5037_v30, 1  ;;  %v9767_v1 = vadd.f32 -1.0, %v11486_v63  ;;  %v5173_v33 = vsub.s32 %v19080_v52, %v14630_v47  ;;  %v19101_v63 = vld [vmem:[#allocation144_spill] sm:$0xff] }
 0xbef   : > { %10223 = vmatpush.msk.msra.mxu1 %vm6204_vm6, %v18392_v50  ;;  %vm6189_vm5 = vmor %vm5421_vm11, %vm5805_vm8  ;;  %v5029_v39 = vsub.s32 %v19080_v52, %v14644_v23  ;;  %v5165_v32 = vsub.s32 %v19080_v52, %v14646_v24  ;;  %vm19094_vm10 = vnez %v19093_v6  ;;  %v4606_v30 = vadd.f32 %v4560_v14, %v14855_v36  ;;  %v19097_v36 = vld [vmem:[#allocation140_spill] sm:$0xff]  ;;  %v19104_v6 = vld [vmem:[#allocation103_spill] sm:$0xff] }
 0xbf0   : > { %10315 = vmatpush.msk.msrb.mxu3 %vm19094_vm10, %v18392_v50  ;;  %11489 = vpow2.f32 %v4686_v21  ;;  %7203 = vmatmul.f32.vlgmr.msra.gmra.mxu1 %v15056_v48  ;;  %v5021_v20 = vsub.s32 %v19080_v52, %v14659_v12  ;;  %v5157_v25 = vsub.s32 %v19080_v52, %v14661_v62  ;;  %v15117_v34 = vsel %vm4654_vm3, %v14982_v57, %v9766_v31  ;;  %v19099_v57 = vld [vmem:[#allocation101_spill] sm:$0xff] }
 0xbf1   : > { %10257 = vmatpush.msk.msrb.mxu0 %vm6189_vm5, %v18392_v50  ;;  %19095 = vst [vmem:[#allocation92_spill] sm:$0xff] %v15117_v34  ;;  %vm5557_vm15 = vcmp.eq.s32.totalorder %v5173_v33, 0  ;;  %vm5941_vm0 = vcmp.eq.s32.totalorder %v5173_v33, 1  ;;  %vm5413_vm11 = vcmp.eq.s32.totalorder %v5029_v39, 0  ;;  %10303 = vmatpush.msk.msrb.mxu2 %vm14067_vm9, %v18392_v50  ;;  %vm19098_vm12 = vnez %v19097_v36 }
 0xbf2   : > { %10316 = vmatpush.msk.msrb.mxu3 %vm19098_vm12, %v18392_v50  ;;  %vm6325_vm6 = vmor %vm5557_vm15, %vm5941_vm0  ;;  %vm5797_vm8 = vcmp.eq.s32.totalorder %v5029_v39, 1  ;;  %vm5549_vm5 = vcmp.eq.s32.totalorder %v5165_v32, 0  ;;  %vm5933_vm10 = vcmp.eq.s32.totalorder %v5165_v32, 1  ;;  %v15126_v41 = vadd.f32 %v14887_v38, %v4606_v30  ;;  %v11488_v31 = vpop.eup %11487 }
 0xbf3   : > { %vm19100_vm3 = vnez %v19099_v57  ;;  %10272 = vmatpush.msk.msrb.mxu1 %vm6325_vm6, %v18392_v50  ;;  %vm6181_vm7 = vmor %vm5413_vm11, %vm5797_vm8  ;;  %vm5405_vm9 = vcmp.eq.s32.totalorder %v5021_v20, 0  ;;  %vm5789_vm2 = vcmp.eq.s32.totalorder %v5021_v20, 1  ;;  %vm5541_vm14 = vcmp.eq.s32.totalorder %v5157_v25, 0 }
 0xbf4   : > { %10352 = vmatpush.msk.msra.mxu2 %vm19100_vm3, %v18392_v50  ;;  %vm5925_vm13 = vcmp.eq.s32.totalorder %v5157_v25, 1  ;;  %vm19102_vm15 = vnez %v19101_v63  ;;  %vm19103_vm0 = vcmp.gt.f32.partialorder %v15005_v59, 0.0  ;;  %v9770_v14 = vadd.f32 -1.0, %v11488_v31  ;;  %10258 = vmatpush.msk.msrb.mxu0 %vm6181_vm7, %v18392_v50  ;;  %vm6317_vm12 = vmor %vm5549_vm5, %vm5933_vm10  ;;  %v19121_v63 = vld [vmem:[#allocation25_spill] sm:$0xff] }
 0xbf5   : > { %10317 = vmatpush.msk.msrb.mxu3 %vm19102_vm15, %v18392_v50  ;;  %v15138_v21 = vsel %vm19103_vm0, %v15005_v59, %v9767_v1  ;;  %v4692_v33 = vmul.f32 1.442695, %v15126_v41  ;;  %v4607_v39 = vadd.f32 %v4589_v53, %v14900_v17  ;;  %vm19105_vm11 = vnez %v19104_v6  ;;  %10273 = vmatpush.msk.msrb.mxu1 %vm6317_vm12, %v18392_v50  ;;  %vm6173_vm8 = vmor %vm5405_vm9, %vm5789_vm2 }
 0xbf6   : > { %10353 = vmatpush.msk.msra.mxu2 %vm19105_vm11, %v18392_v50  ;;  %vm4659_vm6 = vcmp.gt.f32.partialorder %v15084_v28, 0.0  ;;  %7177 = vmatmul.f32.gmra.mxu0 %v15117_v34  ;;  %v5013_v59 = vsub.s32 %v19080_v52, %v14663_v35  ;;  %v5149_v1 = vsub.s32 %v19080_v52, %v14673_v51  ;;  %v5005_v17 = vsub.s32 %v19080_v52, %v14692_v16  ;;  %v11490_v32 = vpop.eup %11489  ;;  %vm6309_vm2 = vmor %vm5541_vm14, %vm5925_vm13 }
 0xbf7   : > { %11491 = vpow2.f32 %v4692_v33  ;;  %10259 = vmatpush.msk.msrb.mxu0 %vm6173_vm8, %v18392_v50  ;;  %v15161_v30 = vadd.f32 %v14887_v38, %v4607_v39  ;;  %v5141_v20 = vsub.s32 %v19080_v52, %v14694_v54  ;;  %7261 = vmatmul.f32.vlgmr.msra.gmra.mxu3 %v14866_v43  ;;  %v9771_v53 = vadd.f32 -1.0, %v11490_v32  ;;  %v19114_v32 = vld [vmem:[#allocation102_spill] sm:$0xff] }
 0xbf8   : > { %10274 = vmatpush.msk.msrb.mxu1 %vm6309_vm2, %v18392_v50  ;;  %vm5397_vm5 = vcmp.eq.s32.totalorder %v5013_v59, 0  ;;  %vm5781_vm10 = vcmp.eq.s32.totalorder %v5013_v59, 1  ;;  %vm5533_vm3 = vcmp.eq.s32.totalorder %v5149_v1, 0  ;;  %7235 = vmatmul.f32.gmra.mxu2 %v14875_v45  ;;  %vm19106_vm9 = vcmp.gt.f32.partialorder %v15059_v44, 0.0 }
 0xbf9   : > { %v15171_v25 = vsel %vm19106_vm9, %v15059_v44, %v9770_v14  ;;  %v4694_v38 = vmul.f32 1.442695, %v15161_v30  ;;  %vm6165_vm14 = vmor %vm5397_vm5, %vm5781_vm10  ;;  %vm5917_vm13 = vcmp.eq.s32.totalorder %v5149_v1, 1  ;;  %7206 = vmatmul.f32.gmra.mxu1 %v15138_v21  ;;  %vm5389_vm15 = vcmp.eq.s32.totalorder %v5005_v17, 0  ;;  %v19109_v44 = vld [vmem:[#allocation105_spill] sm:$0xff]  ;;  %v19112_v1 = vld [vmem:[#allocation107_spill] sm:$0xff] }
 0xbfa   : > { %vm19108_vm0 = vnez %v19107_v3  ;;  %v15181_v36 = vsel %vm4659_vm6, %v15084_v28, %v9771_v53  ;;  %10260 = vmatpush.msk.msrb.mxu0 %vm6165_vm14, %v18392_v50  ;;  %vm6301_vm12 = vmor %vm5533_vm3, %vm5917_vm13  ;;  %vm5773_vm11 = vcmp.eq.s32.totalorder %v5005_v17, 1  ;;  %vm5525_vm8 = vcmp.eq.s32.totalorder %v5141_v20, 0  ;;  %v19119_v3 = vld [vmem:[#allocation64_spill] sm:$0xff] }
 0xbfb   : > { %10318 = vmatpush.msk.msrb.mxu3 %vm19108_vm0, %v18392_v50  ;;  %vm5909_vm2 = vcmp.eq.s32.totalorder %v5141_v20, 1  ;;  %vm19110_vm5 = vnez %v19109_v44  ;;  %11493 = vpow2.f32 %v4694_v38  ;;  %10275 = vmatpush.msk.msrb.mxu1 %vm6301_vm12, %v18392_v50  ;;  %vm6157_vm10 = vmor %vm5389_vm15, %vm5773_vm11  ;;  %v4997_v57 = vsub.s32 %v19080_v52, %v14696_v60 }
 0xbfc   : > { %10354 = vmatpush.msk.msra.mxu2 %vm19110_vm5, %v18392_v50  ;;  %v5133_v28 = vsub.s32 %v19080_v52, %v14712_v4  ;;  %v4989_v31 = vsub.s32 %v19080_v52, %v14714_v9  ;;  %10261 = vmatpush.msk.msrb.mxu0 %vm6157_vm10, %v18392_v50  ;;  %vm6293_vm6 = vmor %vm5525_vm8, %vm5909_vm2  ;;  %v5125_v14 = vsub.s32 %v19080_v52, %v14716_v8  ;;  %vm4663_vm2 = vcmp.gt.f32.partialorder %v15161_v30, 0.0 }
 0xbfd   : > { %10319 = vmatpush.msk.msrb.mxu3 %vm14074_vm4, %v18392_v50  ;;  %v4981_v33 = vsub.s32 %v19080_v52, %v14746_v22  ;;  %v5117_v39 = vsub.s32 %v19080_v52, %v14748_v11  ;;  %v4973_v6 = vsub.s32 %v19080_v52, %v14767_v55  ;;  %v11492_v59 = vpop.eup %11491  ;;  %10276 = vmatpush.msk.msrb.mxu1 %vm6293_vm6, %v18392_v50  ;;  %vm5381_vm3 = vcmp.eq.s32.totalorder %v4997_v57, 0 }
 0xbfe   : > { %vm5765_vm4 = vcmp.eq.s32.totalorder %v4997_v57, 1  ;;  %vm5517_vm9 = vcmp.eq.s32.totalorder %v5133_v28, 0  ;;  %vm5901_vm14 = vcmp.eq.s32.totalorder %v5133_v28, 1  ;;  %vm19113_vm13 = vnez %v19112_v1  ;;  %7180 = vmatmul.f32.gmra.mxu0 %v15171_v25  ;;  %v19120_v28 = vld [vmem:[#allocation67_spill] sm:$0xff] }
 0xbff   : > { %10355 = vmatpush.msk.msra.mxu2 %vm19113_vm13, %v18392_v50  ;;  %v9774_v17 = vadd.f32 -1.0, %v11492_v59  ;;  %vm6149_vm15 = vmor %vm5381_vm3, %vm5765_vm4  ;;  %vm5373_vm0 = vcmp.eq.s32.totalorder %v4989_v31, 0  ;;  %vm5757_vm12 = vcmp.eq.s32.totalorder %v4989_v31, 1  ;;  %vm19115_vm8 = vnez %v19114_v32  ;;  %7264 = vmatmul.f32.gmra.mxu3 %v14934_v15  ;;  %v19122_v59 = vld [vmem:[#allocation26_spill] sm:$0xff] }
 0xc00   : > { %10368 = vmatpush.msk.msra.mxu3 %vm19115_vm8, %v18392_v50  ;;  %10262 = vmatpush.msk.msrb.mxu0 %vm6149_vm15, %v18392_v50  ;;  %vm6285_vm5 = vmor %vm5517_vm9, %vm5901_vm14  ;;  %vm5893_vm10 = vcmp.eq.s32.totalorder %v5125_v14, 1  ;;  %vm5365_vm6 = vcmp.eq.s32.totalorder %v4981_v33, 0  ;;  %vm5749_vm7 = vcmp.eq.s32.totalorder %v4981_v33, 1  ;;  %vm19116_vm3 = vcmp.gt.f32.partialorder %v15126_v41, 0.0 }
 0xc01   : > { %v15220_v20 = vsel %vm19116_vm3, %v15126_v41, %v9774_v17  ;;  %10277 = vmatpush.msk.msrb.mxu1 %vm6285_vm5, %v18392_v50  ;;  %vm6141_vm4 = vmor %vm5373_vm0, %vm5757_vm12  ;;  %vm5501_vm13 = vcmp.eq.s32.totalorder %v5117_v39, 0  ;;  %vm5885_vm8 = vcmp.eq.s32.totalorder %v5117_v39, 1  ;;  %vm5357_vm11 = vcmp.eq.s32.totalorder %v4973_v6, 0  ;;  %7238 = vmatmul.f32.gmra.mxu2 %v14947_v42  ;;  %v11494_v53 = vpop.eup %11493  ;;  %v19123_v17 = vld [vmem:[#allocation110_spill] sm:$0xff]  ;;  %v19126_v39 = vld [vmem:[#allocation104_spill] sm:$0xff] }
 0xc02   : > { %19117 = vst [vmem:[#allocation54_spill] sm:$0xff] %v15220_v20  ;;  %10263 = vmatpush.msk.msrb.mxu0 %vm6141_vm4, %v18392_v50  ;;  %vm19118_vm9 = vcmp.eq.s32.totalorder %v5125_v14, 0  ;;  %7209 = vmatmul.f32.gmra.mxu1 %v15181_v36  ;;  %vm5741_vm15 = vcmp.eq.s32.totalorder %v4973_v6, 1  ;;  %v5109_v41 = vsub.s32 %v19080_v52, %v14769_v18  ;;  %v11224_v38 = vpack.i.bf16 %v15138_v21, %v15181_v36  ;;  %vm6133_vm0 = vmor %vm5365_vm6, %vm5749_vm7 }
 0xc03   : > { %vm6277_vm14 = vmor %vm19118_vm9, %vm5893_vm10  ;;  %v4965_v44 = vsub.s32 %v19080_v52, %v19119_v3  ;;  %v9775_v57 = vadd.f32 -1.0, %v11494_v53  ;;  %v5101_v31 = vsub.s32 %v19080_v52, %v19120_v28  ;;  %v4957_v14 = vsub.s32 %v19080_v52, %v19121_v63 }
 0xc04   : > { %10278 = vmatpush.msk.msrb.mxu1 %vm6277_vm14, %v18392_v50  ;;  %v5093_v1 = vsub.s32 %v19080_v52, %v19122_v59  ;;  %vm19124_vm12 = vnez %v19123_v17  ;;  %10264 = vmatpush.msk.msrb.mxu0 %vm6133_vm0, %v18392_v50  ;;  %vm6269_vm5 = vmor %vm5501_vm13, %vm5885_vm8  ;;  %vm5493_vm10 = vcmp.eq.s32.totalorder %v5109_v41, 0  ;;  %vm5877_vm7 = vcmp.eq.s32.totalorder %v5109_v41, 1 }
 0xc05   : > { %10356 = vmatpush.msk.msra.mxu2 %vm19124_vm12, %v18392_v50  ;;  %11225 = vrot.lane.b32.xlu2 %v11224_v38, %s11720_s19  ;;  %vm5733_vm3 = vcmp.eq.s32.totalorder %v4965_v44, 1  ;;  %v15252_v33 = vsel %vm4663_vm2, %v15161_v30, %v9775_v57  ;;  %vm6125_vm4 = vmor %vm5357_vm11, %vm5741_vm15  ;;  %vm5485_vm9 = vcmp.eq.s32.totalorder %v5101_v31, 0  ;;  %vm5869_vm14 = vcmp.eq.s32.totalorder %v5101_v31, 1  ;;  %v19129_v31 = vld [vmem:[#allocation113_spill] sm:$0xff] }
 0xc06   : > { %19125 = vst [vmem:[#allocation95_spill] sm:$0xff] %v15252_v33  ;;  %10279 = vmatpush.msk.msrb.mxu1 %vm6269_vm5, %v18392_v50  ;;  %vm19127_vm13 = vnez %v19126_v39  ;;  %10265 = vmatpush.msk.msrb.mxu0 %vm6125_vm4, %v18392_v50  ;;  %vm6261_vm8 = vmor %vm5493_vm10, %vm5877_vm7  ;;  %vm5341_vm0 = vcmp.eq.s32.totalorder %v4957_v14, 0  ;;  %vm5725_vm12 = vcmp.eq.s32.totalorder %v4957_v14, 1  ;;  %vm5477_vm6 = vcmp.eq.s32.totalorder %v5093_v1, 0  ;;  %v19132_v39 = vld [vmem:[#allocation106_spill] sm:$0xff] }
 0xc07   : > { %10369 = vmatpush.msk.msra.mxu3 %vm19127_vm13, %v18392_v50  ;;  %v4949_v30 = vsub.s32 %v19080_v52, %v14840_v13  ;;  %8191 = vrot.lane.b32.xlu1 %v15252_v33, %s11720_s19  ;;  %vm19128_vm11 = vcmp.eq.s32.totalorder %v4965_v44, 0  ;;  %vm5861_vm15 = vcmp.eq.s32.totalorder %v5093_v1, 1  ;;  %v5085_v6 = vsub.s32 %v19080_v52, %v14842_v27  ;;  %vm6253_vm5 = vmor %vm5485_vm9, %vm5869_vm14  ;;  %v19131_v1 = vld [vmem:[#allocation93_spill] sm:$0xff]  ;;  %s19389_s19 = sld [smem:[#allocation160_spill]] }
 0xc08   : > { %10280 = vmatpush.msk.msrb.mxu1 %vm6261_vm8, %v18392_v50  ;;  %vm6117_vm2 = vmor %vm19128_vm11, %vm5733_vm3  ;;  %7183 = vmatmul.f32.gmra.mxu0 %v15220_v20  ;;  %v4941_v32 = vsub.s32 %v19080_v52, %v14870_v26  ;;  %v5077_v53 = vsub.s32 %v19080_v52, %v14921_v46  ;;  %v4933_v41 = vsub.s32 %v19080_v52, %v14951_v61 }
 0xc09   : > { %10266 = vmatpush.msk.msrb.mxu0 %vm6117_vm2, %v18392_v50  ;;  %vm5333_vm10 = vcmp.eq.s32.totalorder %v4949_v30, 0  ;;  %vm5717_vm7 = vcmp.eq.s32.totalorder %v4949_v30, 1  ;;  %7267 = vmatmul.f32.gmra.mxu3 %v15002_v49  ;;  %vm6109_vm3 = vmor %vm5341_vm0, %vm5725_vm12  ;;  %vm5469_vm4 = vcmp.eq.s32.totalorder %v5085_v6, 0  ;;  %vm5853_vm13 = vcmp.eq.s32.totalorder %v5085_v6, 1  ;;  %v19134_v30 = vld [vmem:[#allocation117_spill] sm:$0xff] }
 0xc0a   : > { %10281 = vmatpush.msk.msrb.mxu1 %vm6253_vm5, %v18392_v50  ;;  %v5069_v38 = vsub.s32 %v19080_v52, %v14968_v2  ;;  %7241 = vmatmul.f32.gmra.mxu2 %v15014_v0  ;;  %vm6245_vm9 = vmor %vm5477_vm6, %vm5861_vm15  ;;  %vm5325_vm14 = vcmp.eq.s32.totalorder %v4941_v32, 0  ;;  %vm5709_vm8 = vcmp.eq.s32.totalorder %v4941_v32, 1  ;;  %vm5461_vm12 = vcmp.eq.s32.totalorder %v5077_v53, 0  ;;  %v19136_v32 = vld [vmem:[#allocation108_spill] sm:$0xff] }
 0xc0b   : > { %10267 = vmatpush.msk.msrb.mxu0 %vm6109_vm3, %v18392_v50  ;;  %7212 = vmatmul.f32.gmra.mxu1 %v15252_v33  ;;  %vm6101_vm0 = vmor %vm5333_vm10, %vm5717_vm7  ;;  %vm5845_vm11 = vcmp.eq.s32.totalorder %v5077_v53, 1  ;;  %v4925_v44 = vsub.s32 %v19080_v52, %v15017_v37  ;;  %v5061_v57 = vsub.s32 %v19080_v52, %v15029_v56  ;;  %vm19130_vm6 = vnez %v19129_v31 }
 0xc0c   : > { %10282 = vmatpush.msk.msrb.mxu1 %vm6245_vm9, %v18392_v50  ;;  %10357 = vmatpush.msk.msra.mxu2 %vm19130_vm6, %v18392_v50  ;;  %vm6237_vm2 = vmor %vm5469_vm4, %vm5853_vm13  ;;  %vm5317_vm15 = vcmp.eq.s32.totalorder %v4933_v41, 0  ;;  %vm5701_vm5 = vcmp.eq.s32.totalorder %v4933_v41, 1  ;;  %v5053_v14 = vsub.s32 %v19080_v52, %v15039_v7  ;;  %vm5453_vm7 = vcmp.eq.s32.totalorder %v5069_v38, 0 }
 0xc0d   : > { %10268 = vmatpush.msk.msrb.mxu0 %vm6101_vm0, %v18392_v50  ;;  %vm6093_vm10 = vmor %vm5325_vm14, %vm5709_vm8  ;;  %vm5837_vm3 = vcmp.eq.s32.totalorder %v5069_v38, 1  ;;  %v5046_v17 = vsub.s32 %v19131_v1, %v14622_v19  ;;  %vm19133_vm9 = vnez %v19132_v39  ;;  %vm5309_vm13 = vcmp.eq.s32.totalorder %v4925_v44, 0  ;;  %v19140_v39 = vld [vmem:[#allocation111_spill] sm:$0xff] }
 0xc0e   : > { %10283 = vmatpush.msk.msrb.mxu1 %vm6237_vm2, %v18392_v50  ;;  %10370 = vmatpush.msk.msra.mxu3 %vm19133_vm9, %v18392_v50  ;;  %vm6229_vm4 = vmor %vm5461_vm12, %vm5845_vm11  ;;  %vm5693_vm0 = vcmp.eq.s32.totalorder %v4925_v44, 1  ;;  %v5038_v52 = vsub.s32 %v19131_v1, %v14628_v5  ;;  %vm19135_vm14 = vnez %v19134_v30  ;;  %vm5445_vm6 = vcmp.eq.s32.totalorder %v5061_v57, 0  ;;  %v19138_v44 = vld [vmem:[#allocation121_spill] sm:$0xff] }
 0xc0f   : > { %10269 = vmatpush.msk.msrb.mxu0 %vm6093_vm10, %v18392_v50  ;;  %10358 = vmatpush.msk.msra.mxu2 %vm19135_vm14, %v18392_v50  ;;  %vm6085_vm8 = vmor %vm5317_vm15, %vm5701_vm5  ;;  %vm5829_vm2 = vcmp.eq.s32.totalorder %v5061_v57, 1  ;;  %v5174_v6 = vsub.s32 %v19131_v1, %v14630_v47  ;;  %vm19137_vm12 = vnez %v19136_v32  ;;  %vm5437_vm10 = vcmp.eq.s32.totalorder %v5053_v14, 0  ;;  %v19144_v32 = vld [vmem:[#allocation129_spill] sm:$0xff] }
 0xc10   : > { %10284 = vmatpush.msk.msrb.mxu1 %vm6229_vm4, %v18392_v50  ;;  %10371 = vmatpush.msk.msra.mxu3 %vm19137_vm12, %v18392_v50  ;;  %vm6221_vm11 = vmor %vm5453_vm7, %vm5837_vm3  ;;  %vm5821_vm9 = vcmp.eq.s32.totalorder %v5053_v14, 1  ;;  %v5030_v53 = vsub.s32 %v19131_v1, %v14644_v23  ;;  %vm5430_vm5 = vcmp.eq.s32.totalorder %v5046_v17, 0  ;;  %vm5814_vm4 = vcmp.eq.s32.totalorder %v5046_v17, 1  ;;  %v19142_v14 = vld [vmem:[#allocation125_spill] sm:$0xff] }
 0xc11   : > { %10270 = vmatpush.msk.msrb.mxu0 %vm6085_vm8, %v18392_v50  ;;  %7270 = vmatmul.f32.gmra.mxu3 %v15079_v40  ;;  %vm6077_vm15 = vmor %vm5309_vm13, %vm5693_vm0  ;;  %v5166_v41 = vsub.s32 %v19131_v1, %v14646_v24  ;;  %vm5422_vm3 = vcmp.eq.s32.totalorder %v5038_v52, 0  ;;  %vm5806_vm14 = vcmp.eq.s32.totalorder %v5038_v52, 1  ;;  %v5022_v38 = vsub.s32 %v19131_v1, %v14659_v12 }
 0xc12   : > { %10285 = vmatpush.msk.msrb.mxu1 %vm6221_vm11, %v18392_v50  ;;  %7348 = vmatmul.f32.vlgmr.msrb.gmra.mxu2 %v14813_v10  ;;  %vm6213_vm7 = vmor %vm5445_vm6, %vm5829_vm2  ;;  %vm19139_vm13 = vnez %v19138_v44  ;;  %vm5558_vm8 = vcmp.eq.s32.totalorder %v5174_v6, 0  ;;  %vm5942_vm12 = vcmp.eq.s32.totalorder %v5174_v6, 1  ;;  %v5158_v57 = vsub.s32 %v19131_v1, %v14661_v62  ;;  %v19146_v44 = vld [vmem:[#allocation114_spill] sm:$0xff] }
 0xc13   : > { %10271 = vmatpush.msk.msrb.mxu0 %vm6077_vm15, %v18392_v50  ;;  %10359 = vmatpush.msk.msra.mxu2 %vm19139_vm13, %v18392_v50  ;;  %vm6205_vm0 = vmor %vm5437_vm10, %vm5821_vm9  ;;  %vm5414_vm2 = vcmp.eq.s32.totalorder %v5030_v53, 0  ;;  %vm5798_vm11 = vcmp.eq.s32.totalorder %v5030_v53, 1  ;;  %v5014_v31 = vsub.s32 %v19131_v1, %v14663_v35  ;;  %vm19141_vm15 = vnez %v19140_v39  ;;  %v19148_v39 = vld [vmem:[#allocation118_spill] sm:$0xff] }
 0xc14   : > { %10286 = vmatpush.msk.msrb.mxu1 %vm6213_vm7, %v18392_v50  ;;  %7290 = vmatmul.f32.vlgmr.msrb.gmra.mxu0 %v15025_v58  ;;  %vm6198_vm6 = vmor %vm5430_vm5, %vm5814_vm4  ;;  %vm19143_vm10 = vnez %v19142_v14  ;;  %vm5550_vm5 = vcmp.eq.s32.totalorder %v5166_v41, 0  ;;  %vm5934_vm4 = vcmp.eq.s32.totalorder %v5166_v41, 1  ;;  %v5150_v17 = vsub.s32 %v19131_v1, %v14673_v51 }
 0xc15   : > { %10372 = vmatpush.msk.msra.mxu3 %vm19141_vm15, %v18392_v50  ;;  %10360 = vmatpush.msk.msra.mxu2 %vm19143_vm10, %v18392_v50  ;;  %vm6190_vm9 = vmor %vm5422_vm3, %vm5806_vm14  ;;  %vm5406_vm13 = vcmp.eq.s32.totalorder %v5022_v38, 0  ;;  %vm5790_vm15 = vcmp.eq.s32.totalorder %v5022_v38, 1  ;;  %v5006_v30 = vsub.s32 %v19131_v1, %v14692_v16  ;;  %vm5542_vm14 = vcmp.eq.s32.totalorder %v5158_v57, 0 }
 0xc16   : > { %10287 = vmatpush.msk.msrb.mxu1 %vm6205_vm0, %v18392_v50  ;;  %10320 = vmatpush.msk.msra.mxu0 %vm6198_vm6, %v18392_v50  ;;  %vm6326_vm7 = vmor %vm5558_vm8, %vm5942_vm12  ;;  %vm5926_vm0 = vcmp.eq.s32.totalorder %v5158_v57, 1  ;;  %v5142_v52 = vsub.s32 %v19131_v1, %v14694_v54  ;;  %vm5398_vm10 = vcmp.eq.s32.totalorder %v5014_v31, 0  ;;  %vm5782_vm8 = vcmp.eq.s32.totalorder %v5014_v31, 1 }
 0xc17   : > { %7319 = vmatmul.f32.vlgmr.msrb.gmra.mxu1 %v15056_v48  ;;  %vm6182_vm3 = vmor %vm5414_vm2, %vm5798_vm11  ;;  %v4998_v6 = vsub.s32 %v19131_v1, %v14696_v60  ;;  %vm19145_vm12 = vnez %v19144_v32  ;;  %vm5534_vm11 = vcmp.eq.s32.totalorder %v5150_v17, 0  ;;  %v5134_v53 = vsub.s32 %v19131_v1, %v14712_v4  ;;  %v19152_v32 = vld [vmem:[#allocation137_spill] sm:$0xff] }
 0xc18   : > { %10321 = vmatpush.msk.msra.mxu0 %vm6190_vm9, %v18392_v50  ;;  %10336 = vmatpush.msk.msra.mxu1 %vm6326_vm7, %v18392_v50  ;;  %vm6318_vm6 = vmor %vm5550_vm5, %vm5934_vm4  ;;  %vm5918_vm9 = vcmp.eq.s32.totalorder %v5150_v17, 1  ;;  %vm5390_vm4 = vcmp.eq.s32.totalorder %v5006_v30, 0  ;;  %vm5774_vm7 = vcmp.eq.s32.totalorder %v5006_v30, 1  ;;  %v4990_v41 = vsub.s32 %v19131_v1, %v14714_v9  ;;  %v19150_v17 = vld [vmem:[#allocation133_spill] sm:$0xff] }
 0xc19   : > { %7377 = vmatmul.f32.vlgmr.msrb.gmra.mxu3 %v14866_v43  ;;  %10361 = vmatpush.msk.msra.mxu2 %vm19145_vm12, %v18392_v50  ;;  %vm6174_vm2 = vmor %vm5406_vm13, %vm5790_vm15  ;;  %vm5526_vm15 = vcmp.eq.s32.totalorder %v5142_v52, 0  ;;  %v5126_v38 = vsub.s32 %v19131_v1, %v14716_v8  ;;  %vm5766_vm12 = vcmp.eq.s32.totalorder %v4998_v6, 1  ;;  %v4982_v57 = vsub.s32 %v19131_v1, %v14746_v22 }
 0xc1a   : > { %10322 = vmatpush.msk.msra.mxu0 %vm6182_vm3, %v18392_v50  ;;  %10337 = vmatpush.msk.msra.mxu1 %vm6318_vm6, %v18392_v50  ;;  %vm6310_vm5 = vmor %vm5542_vm14, %vm5926_vm0  ;;  %vm19147_vm3 = vnez %v19146_v44  ;;  %vm5910_vm14 = vcmp.eq.s32.totalorder %v5142_v52, 1  ;;  %vm5382_vm6 = vcmp.eq.s32.totalorder %v4998_v6, 0  ;;  %v5118_v31 = vsub.s32 %v19131_v1, %v14748_v11  ;;  %v19154_v44 = vld [vmem:[#allocation122_spill] sm:$0xff] }
 0xc1b   : > { %7351 = vmatmul.f32.gmra.mxu2 %v14875_v45  ;;  %10373 = vmatpush.msk.msra.mxu3 %vm19147_vm3, %v18392_v50  ;;  %vm6166_vm13 = vmor %vm5398_vm10, %vm5782_vm8  ;;  %vm5518_vm8 = vcmp.eq.s32.totalorder %v5134_v53, 0  ;;  %vm5758_vm3 = vcmp.eq.s32.totalorder %v4990_v41, 1  ;;  %v4974_v14 = vsub.s32 %v19131_v1, %v14767_v55  ;;  %v5110_v30 = vsub.s32 %v19131_v1, %v14769_v18 }
 0xc1c   : > { %10323 = vmatpush.msk.msra.mxu0 %vm6174_vm2, %v18392_v50  ;;  %10338 = vmatpush.msk.msra.mxu1 %vm6310_vm5, %v18392_v50  ;;  %vm6302_vm0 = vmor %vm5534_vm11, %vm5918_vm9  ;;  %vm19149_vm2 = vnez %v19148_v39  ;;  %vm5902_vm5 = vcmp.eq.s32.totalorder %v5134_v53, 1  ;;  %vm5374_vm9 = vcmp.eq.s32.totalorder %v4990_v41, 0  ;;  %v4966_v52 = vsub.s32 %v19131_v1, %v19119_v3  ;;  %v19156_v39 = vld [vmem:[#allocation126_spill] sm:$0xff] }
 0xc1d   : > { %7293 = vmatmul.f32.gmra.mxu0 %v15117_v34  ;;  %10374 = vmatpush.msk.msra.mxu3 %vm19149_vm2, %v18392_v50  ;;  %vm6158_vm10 = vmor %vm5390_vm4, %vm5774_vm7  ;;  %vm5510_vm7 = vcmp.eq.s32.totalorder %v5126_v38, 0  ;;  %vm5750_vm2 = vcmp.eq.s32.totalorder %v4982_v57, 1  ;;  %v5102_v6 = vsub.s32 %v19131_v1, %v19120_v28  ;;  %v4958_v53 = vsub.s32 %v19131_v1, %v19121_v63 }
 0xc1e   : > { %10324 = vmatpush.msk.msra.mxu0 %vm6166_vm13, %v18392_v50  ;;  %10339 = vmatpush.msk.msra.mxu1 %vm6302_vm0, %v18392_v50  ;;  %vm6294_vm11 = vmor %vm5526_vm15, %vm5910_vm14  ;;  %vm19151_vm13 = vnez %v19150_v17  ;;  %vm5894_vm0 = vcmp.eq.s32.totalorder %v5126_v38, 1  ;;  %vm5366_vm14 = vcmp.eq.s32.totalorder %v4982_v57, 0  ;;  %v5094_v41 = vsub.s32 %v19131_v1, %v19122_v59  ;;  %v19158_v17 = vld [vmem:[#allocation141_spill] sm:$0xff] }
 0xc1f   : > { %7322 = vmatmul.f32.gmra.mxu1 %v15138_v21  ;;  %10362 = vmatpush.msk.msra.mxu2 %vm19151_vm13, %v18392_v50  ;;  %vm6150_vm4 = vmor %vm5382_vm6, %vm5766_vm12  ;;  %vm5502_vm12 = vcmp.eq.s32.totalorder %v5118_v31, 0  ;;  %vm5742_vm13 = vcmp.eq.s32.totalorder %v4974_v14, 1  ;;  %v4950_v38 = vsub.s32 %v19131_v1, %v14840_v13  ;;  %v5086_v57 = vsub.s32 %v19131_v1, %v14842_v27 }
 0xc20   : > { %10325 = vmatpush.msk.msra.mxu0 %vm6158_vm10, %v18392_v50  ;;  %10340 = vmatpush.msk.msra.mxu1 %vm6294_vm11, %v18392_v50  ;;  %vm6286_vm15 = vmor %vm5518_vm8, %vm5902_vm5  ;;  %vm19153_vm10 = vnez %v19152_v32  ;;  %vm5886_vm8 = vcmp.eq.s32.totalorder %v5118_v31, 1  ;;  %vm5358_vm11 = vcmp.eq.s32.totalorder %v4974_v14, 0  ;;  %v4942_v31 = vsub.s32 %v19131_v1, %v14870_v26  ;;  %v19160_v32 = vld [vmem:[#allocation145_spill] sm:$0xff] }
 0xc21   : > { %7380 = vmatmul.f32.gmra.mxu3 %v14934_v15  ;;  %10363 = vmatpush.msk.msra.mxu2 %vm19153_vm10, %v18392_v50  ;;  %vm6142_vm6 = vmor %vm5374_vm9, %vm5758_vm3  ;;  %vm5494_vm3 = vcmp.eq.s32.totalorder %v5110_v30, 0  ;;  %vm5734_vm10 = vcmp.eq.s32.totalorder %v4966_v52, 1  ;;  %v5078_v14 = vsub.s32 %v19131_v1, %v14921_v46 }
 0xc22   : > { %10326 = vmatpush.msk.msra.mxu0 %vm6150_vm4, %v18392_v50  ;;  %10341 = vmatpush.msk.msra.mxu1 %vm6286_vm15, %v18392_v50  ;;  %vm6278_vm5 = vmor %vm5510_vm7, %vm5894_vm0  ;;  %vm19155_vm4 = vnez %v19154_v44  ;;  %vm5878_vm7 = vcmp.eq.s32.totalorder %v5110_v30, 1  ;;  %vm5350_vm15 = vcmp.eq.s32.totalorder %v4966_v52, 0  ;;  %v4934_v30 = vsub.s32 %v19131_v1, %v14951_v61  ;;  %v19162_v44 = vld [vmem:[#allocation130_spill] sm:$0xff] }
 0xc23   : > { %7354 = vmatmul.f32.gmra.mxu2 %v14947_v42  ;;  %10375 = vmatpush.msk.msra.mxu3 %vm19155_vm4, %v18392_v50  ;;  %vm6134_vm9 = vmor %vm5366_vm14, %vm5750_vm2  ;;  %vm5486_vm2 = vcmp.eq.s32.totalorder %v5102_v6, 0  ;;  %vm5726_vm4 = vcmp.eq.s32.totalorder %v4958_v53, 1  ;;  %v5070_v52 = vsub.s32 %v19131_v1, %v14968_v2 }
 0xc24   : > { %10327 = vmatpush.msk.msra.mxu0 %vm6142_vm6, %v18392_v50  ;;  %10342 = vmatpush.msk.msra.mxu1 %vm6278_vm5, %v18392_v50  ;;  %vm6270_vm0 = vmor %vm5502_vm12, %vm5886_vm8  ;;  %vm19157_vm6 = vnez %v19156_v39  ;;  %vm5870_vm5 = vcmp.eq.s32.totalorder %v5102_v6, 1  ;;  %vm5342_vm8 = vcmp.eq.s32.totalorder %v4958_v53, 0  ;;  %v4926_v6 = vsub.s32 %v19131_v1, %v15017_v37  ;;  %v19164_v39 = vld [vmem:[#allocation134_spill] sm:$0xff] }
 0xc25   : > { %7296 = vmatmul.f32.gmra.mxu0 %v15171_v25  ;;  %10376 = vmatpush.msk.msra.mxu3 %vm19157_vm6, %v18392_v50  ;;  %vm6126_vm14 = vmor %vm5358_vm11, %vm5742_vm13  ;;  %vm5478_vm13 = vcmp.eq.s32.totalorder %v5094_v41, 0  ;;  %vm5718_vm6 = vcmp.eq.s32.totalorder %v4950_v38, 1  ;;  %v5062_v53 = vsub.s32 %v19131_v1, %v15029_v56 }
 0xc26   : > { %10328 = vmatpush.msk.msra.mxu0 %vm6134_vm9, %v18392_v50  ;;  %10343 = vmatpush.msk.msra.mxu1 %vm6270_vm0, %v18392_v50  ;;  %vm6262_vm12 = vmor %vm5494_vm3, %vm5878_vm7  ;;  %vm19159_vm9 = vnez %v19158_v17  ;;  %vm5862_vm0 = vcmp.eq.s32.totalorder %v5094_v41, 1  ;;  %vm5334_vm7 = vcmp.eq.s32.totalorder %v4950_v38, 0  ;;  %v5054_v41 = vsub.s32 %v19131_v1, %v15039_v7  ;;  %v19166_v38 = vld [vmem:[#allocation94_spill] sm:$0xff] }
 0xc27   : > { %7325 = vmatmul.f32.gmra.mxu1 %v15181_v36  ;;  %10364 = vmatpush.msk.msra.mxu2 %vm19159_vm9, %v18392_v50  ;;  %vm6118_vm11 = vmor %vm5350_vm15, %vm5734_vm10  ;;  %vm5470_vm10 = vcmp.eq.s32.totalorder %v5086_v57, 0  ;;  %vm5710_vm9 = vcmp.eq.s32.totalorder %v4942_v31, 1  ;;  %v5039_v1 = vsub.s32 %v19166_v38, %v14628_v5  ;;  %v19174_v17 = vld [vmem:[#allocation146_spill] sm:$0xff] }
 0xc28   : > { %10329 = vmatpush.msk.msra.mxu0 %vm6126_vm14, %v18392_v50  ;;  %10344 = vmatpush.msk.msra.mxu1 %vm6262_vm12, %v18392_v50  ;;  %vm6254_vm3 = vmor %vm5486_vm2, %vm5870_vm5  ;;  %vm19161_vm14 = vnez %v19160_v32  ;;  %vm5854_vm2 = vcmp.eq.s32.totalorder %v5086_v57, 1  ;;  %vm5326_vm12 = vcmp.eq.s32.totalorder %v4942_v31, 0  ;;  %v5047_v57 = vsub.s32 %v19166_v38, %v14622_v19 }
 0xc29   : > { %7383 = vmatmul.f32.gmra.mxu3 %v15002_v49  ;;  %10365 = vmatpush.msk.msra.mxu2 %vm19161_vm14, %v18392_v50  ;;  %vm6110_vm15 = vmor %vm5342_vm8, %vm5726_vm4  ;;  %vm5462_vm4 = vcmp.eq.s32.totalorder %v5078_v14, 0  ;;  %vm5702_vm14 = vcmp.eq.s32.totalorder %v4934_v30, 1  ;;  %v5175_v31 = vsub.s32 %v19166_v38, %v14630_v47  ;;  %v5031_v32 = vsub.s32 %v19166_v38, %v14644_v23 }
 0xc2a   : > { %10330 = vmatpush.msk.msra.mxu0 %vm6118_vm11, %v18392_v50  ;;  %10345 = vmatpush.msk.msra.mxu1 %vm6254_vm3, %v18392_v50  ;;  %vm6246_vm5 = vmor %vm5478_vm13, %vm5862_vm0  ;;  %vm19163_vm11 = vnez %v19162_v44  ;;  %vm5846_vm13 = vcmp.eq.s32.totalorder %v5078_v14, 1  ;;  %vm5318_vm3 = vcmp.eq.s32.totalorder %v4934_v30, 0  ;;  %v19168_v14 = vld [vmem:[#allocation138_spill] sm:$0xff]  ;;  %v19170_v44 = vld [vmem:[#allocation153_spill] sm:$0xff]  ;;  %v5167_v30 = vsub.s32 %v19166_v38, %v14646_v24 }
 0xc2b   : > { %7357 = vmatmul.f32.gmra.mxu2 %v15014_v0  ;;  %10377 = vmatpush.msk.msra.mxu3 %vm19163_vm11, %v18392_v50  ;;  %vm6102_vm8 = vmor %vm5334_vm7, %vm5718_vm6  ;;  %vm5454_vm6 = vcmp.eq.s32.totalorder %v5070_v52, 0  ;;  %vm5694_vm11 = vcmp.eq.s32.totalorder %v4926_v6, 1 }
 0xc2c   : > { %10331 = vmatpush.msk.msra.mxu0 %vm6110_vm15, %v18392_v50  ;;  %10346 = vmatpush.msk.msra.mxu1 %vm6246_vm5, %v18392_v50  ;;  %vm6238_vm0 = vmor %vm5470_vm10, %vm5854_vm2  ;;  %vm19165_vm15 = vnez %v19164_v39  ;;  %vm5838_vm5 = vcmp.eq.s32.totalorder %v5070_v52, 1  ;;  %vm5310_vm2 = vcmp.eq.s32.totalorder %v4926_v6, 0  ;;  %v5023_v52 = vsub.s32 %v19166_v38, %v14659_v12 }
 0xc2d   : > { %7299 = vmatmul.f32.gmra.mxu0 %v15220_v20  ;;  %10378 = vmatpush.msk.msra.mxu3 %vm19165_vm15, %v18392_v50  ;;  %vm6094_vm7 = vmor %vm5326_vm12, %vm5710_vm9  ;;  %vm5446_vm9 = vcmp.eq.s32.totalorder %v5062_v53, 0  ;;  %vm19169_vm15 = vnez %v19168_v14  ;;  %v15564_v39 = vadd.s32 512, %v19015_v29  ;;  %v5159_v6 = vsub.s32 %v19166_v38, %v14661_v62  ;;  %v19176_v14 = vld [vmem:[#allocation36_spill] sm:$0xff] }
 0xc2e   : > { %10332 = vmatpush.msk.msra.mxu0 %vm6102_vm8, %v18392_v50  ;;  %10347 = vmatpush.msk.msra.mxu1 %vm6238_vm0, %v18392_v50  ;;  %vm6230_vm10 = vmor %vm5462_vm4, %vm5846_vm13  ;;  %vm5830_vm8 = vcmp.eq.s32.totalorder %v5062_v53, 1  ;;  %vm5438_vm13 = vcmp.eq.s32.totalorder %v5054_v41, 0  ;;  %vm5822_vm0 = vcmp.eq.s32.totalorder %v5054_v41, 1  ;;  %v19172_v53 = vld [vmem:[#allocation142_spill] sm:$0xff]  ;;  %v5015_v41 = vsub.s32 %v19166_v38, %v14663_v35 }
 0xc2f   : > { %7328 = vmatmul.f32.gmra.mxu1 %v15252_v33  ;;  %10366 = vmatpush.msk.msra.mxu2 %vm14053_vm1, %v18392_v50  ;;  %vm6086_vm12 = vmor %vm5318_vm3, %vm5702_vm14  ;;  %vm19171_vm1 = vnez %v19170_v44  ;;  %vm5431_vm14 = vcmp.eq.s32.totalorder %v5047_v57, 0  ;;  %v19177_v44 = vld [vmem:[#allocation150_spill] sm:$0xff] }
 0xc30   : > { %10333 = vmatpush.msk.msra.mxu0 %vm6094_vm7, %v18392_v50  ;;  %10348 = vmatpush.msk.msra.mxu1 %vm6230_vm10, %v18392_v50  ;;  %vm6222_vm4 = vmor %vm5454_vm6, %vm5838_vm5  ;;  %vm5815_vm7 = vcmp.eq.s32.totalorder %v5047_v57, 1  ;;  %vm5423_vm5 = vcmp.eq.s32.totalorder %v5039_v1, 0  ;;  %vm5807_vm10 = vcmp.eq.s32.totalorder %v5039_v1, 1  ;;  %v5151_v57 = vsub.s32 %v19166_v38, %v14673_v51 }
 0xc31   : > { %10379 = vmatpush.msk.msra.mxu3 %vm19169_vm15, %v18392_v50  ;;  %10367 = vmatpush.msk.msra.mxu2 %vm19171_vm1, %v18392_v50  ;;  %vm6078_vm3 = vmor %vm5310_vm2, %vm5694_vm11  ;;  %vm5559_vm11 = vcmp.eq.s32.totalorder %v5175_v31, 0  ;;  %vm19173_vm15 = vnez %v19172_v53  ;;  %vm5935_vm1 = vcmp.eq.s32.totalorder %v5167_v30, 1  ;;  %v4856_v1 = vsub.s32 %v15564_v39, %v19176_v14 }
 0xc32   : > { %10334 = vmatpush.msk.msra.mxu0 %vm6086_vm12, %v18392_v50  ;;  %10349 = vmatpush.msk.msra.mxu1 %vm6222_vm4, %v18392_v50  ;;  %vm6214_vm6 = vmor %vm5446_vm9, %vm5830_vm8  ;;  %vm5943_vm12 = vcmp.eq.s32.totalorder %v5175_v31, 1  ;;  %vm5415_vm8 = vcmp.eq.s32.totalorder %v5031_v32, 0  ;;  %vm5799_vm4 = vcmp.eq.s32.totalorder %v5031_v32, 1  ;;  %v5007_v31 = vsub.s32 %v19166_v38, %v14692_v16  ;;  %v19179_v32 = vld [vmem:[#allocation37_spill] sm:$0xff] }
 0xc33   : > { %7386 = vmatmul.f32.gmra.mxu3 %v15079_v40  ;;  %7464 = vmatmul.f32.vlgmr.msra.gmra.mxu2 %v14813_v10  ;;  %vm6206_vm2 = vmor %vm5438_vm13, %vm5822_vm0  ;;  %vm5551_vm0 = vcmp.eq.s32.totalorder %v5167_v30, 0  ;;  %v5143_v53 = vsub.s32 %v19166_v38, %v14694_v54  ;;  %v4852_v30 = vsub.s32 %v15564_v39, %v19179_v32 }
 0xc34   : > { %10335 = vmatpush.msk.msra.mxu0 %vm6078_vm3, %v18392_v50  ;;  %10350 = vmatpush.msk.msra.mxu1 %vm6214_vm6, %v18392_v50  ;;  %vm6199_vm9 = vmor %vm5431_vm14, %vm5815_vm7  ;;  %vm5407_vm14 = vcmp.eq.s32.totalorder %v5023_v52, 0  ;;  %vm5791_vm7 = vcmp.eq.s32.totalorder %v5023_v52, 1  ;;  %vm19175_vm6 = vnez %v19174_v17  ;;  %v4999_v17 = vsub.s32 %v19166_v38, %v14696_v60 }
 0xc35   : > { %7406 = vmatmul.f32.vlgmr.msra.gmra.mxu0 %v15025_v58  ;;  %10380 = vmatpush.msk.msra.mxu3 %vm19173_vm15, %v18392_v50  ;;  %vm6191_vm13 = vmor %vm5423_vm5, %vm5807_vm10  ;;  %vm5543_vm10 = vcmp.eq.s32.totalorder %v5159_v6, 0  ;;  %vm19178_vm15 = vnez %v19177_v44  ;;  %v5135_v52 = vsub.s32 %v19166_v38, %v14712_v4  ;;  %v19182_v44 = vld [vmem:[#allocation38_spill] sm:$0xff] }
 0xc36   : > { %10351 = vmatpush.msk.msra.mxu1 %vm6206_vm2, %v18392_v50  ;;  %10384 = vmatpush.msk.msrb.mxu0 %vm6199_vm9, %v18392_v50  ;;  %vm6327_vm3 = vmor %vm5559_vm11, %vm5943_vm12  ;;  %vm5927_vm2 = vcmp.eq.s32.totalorder %v5159_v6, 1  ;;  %vm5399_vm12 = vcmp.eq.s32.totalorder %v5015_v41, 0  ;;  %vm5783_vm9 = vcmp.eq.s32.totalorder %v5015_v41, 1  ;;  %v19180_v6 = vld [vmem:[#allocation154_spill] sm:$0xff]  ;;  %v4991_v41 = vsub.s32 %v19166_v38, %v14714_v9 }
 0xc37   : > { %7435 = vmatmul.f32.vlgmr.msra.gmra.mxu1 %v15056_v48  ;;  %10381 = vmatpush.msk.msra.mxu3 %vm19175_vm6, %v18392_v50  ;;  %vm6183_vm5 = vmor %vm5415_vm8, %vm5799_vm4  ;;  %vm5535_vm4 = vcmp.eq.s32.totalorder %v5151_v57, 0  ;;  %vm19181_vm6 = vnez %v19180_v6  ;;  %v4848_v6 = vsub.s32 %v15564_v39, %v19182_v44 }
 0xc38   : > { %10385 = vmatpush.msk.msrb.mxu0 %vm6191_vm13, %v18392_v50  ;;  %10400 = vmatpush.msk.msrb.mxu1 %vm6327_vm3, %v18392_v50  ;;  %vm6319_vm11 = vmor %vm5551_vm0, %vm5935_vm1  ;;  %vm5919_vm13 = vcmp.eq.s32.totalorder %v5151_v57, 1  ;;  %vm5240_vm1 = vcmp.eq.s32.totalorder %v4856_v1, 0  ;;  %vm5624_vm3 = vcmp.eq.s32.totalorder %v4856_v1, 1  ;;  %v5127_v57 = vsub.s32 %v19166_v38, %v14716_v8  ;;  %v19183_v1 = vld [vmem:[#allocation39_spill] sm:$0xff] }
 0xc39   : > { %10382 = vmatpush.msk.msra.mxu3 %vm19178_vm15, %v18392_v50  ;;  %vm6175_vm8 = vmor %vm5407_vm14, %vm5791_vm7  ;;  %vm5391_vm7 = vcmp.eq.s32.totalorder %v5007_v31, 0  ;;  %vm5620_vm15 = vcmp.eq.s32.totalorder %v4852_v30, 1 }
 0xc3a   : > { %10386 = vmatpush.msk.msrb.mxu0 %vm6183_vm5, %v18392_v50  ;;  %10401 = vmatpush.msk.msrb.mxu1 %vm6319_vm11, %v18392_v50  ;;  %vm6311_vm0 = vmor %vm5543_vm10, %vm5927_vm2  ;;  %vm5775_vm5 = vcmp.eq.s32.totalorder %v5007_v31, 1  ;;  %vm5527_vm2 = vcmp.eq.s32.totalorder %v5143_v53, 0  ;;  %vm5911_vm11 = vcmp.eq.s32.totalorder %v5143_v53, 1  ;;  %v19184_v31 = vld [vmem:[#allocation61_spill] sm:$0xff]  ;;  %v4983_v53 = vsub.s32 %v19166_v38, %v14746_v22 }
 0xc3b   : > { %10383 = vmatpush.msk.msra.mxu3 %vm19181_vm6, %v18392_v50  ;;  %7467 = vmatmul.f32.gmra.mxu2 %v14875_v45  ;;  %vm6167_vm14 = vmor %vm5399_vm12, %vm5783_vm9  ;;  %vm5236_vm9 = vcmp.eq.s32.totalorder %v4852_v30, 0  ;;  %v5119_v30 = vsub.s32 %v19166_v38, %v14748_v11  ;;  %v19186_v11 = vld [vmem:[#allocation62_spill] sm:$0xff] }
 0xc3c   : > { %10387 = vmatpush.msk.msrb.mxu0 %vm6175_vm8, %v18392_v50  ;;  %10402 = vmatpush.msk.msrb.mxu1 %vm6311_vm0, %v18392_v50  ;;  %vm6303_vm10 = vmor %vm5535_vm4, %vm5919_vm13  ;;  %vm5383_vm4 = vcmp.eq.s32.totalorder %v4999_v17, 0  ;;  %vm5767_vm13 = vcmp.eq.s32.totalorder %v4999_v17, 1  ;;  %v4920_v17 = vsub.s32 %v15564_v39, %v19184_v31 }
 0xc3d   : > { %7409 = vmatmul.f32.gmra.mxu0 %v15117_v34  ;;  %7493 = vmatmul.f32.vlgmr.msra.gmra.mxu3 %v14866_v43  ;;  %vm6008_vm12 = vmor %vm5240_vm1, %vm5624_vm3  ;;  %vm5519_vm1 = vcmp.eq.s32.totalorder %v5135_v52, 0  ;;  %vm5903_vm3 = vcmp.eq.s32.totalorder %v5135_v52, 1  ;;  %v4844_v43 = vsub.s32 %v15564_v39, %v19183_v1  ;;  %v19185_v52 = vld [vmem:[#allocation40_spill] sm:$0xff] }
 0xc3e   : > { %10388 = vmatpush.msk.msrb.mxu0 %vm6167_vm14, %v18392_v50  ;;  %10403 = vmatpush.msk.msrb.mxu1 %vm6303_vm10, %v18392_v50  ;;  %vm6159_vm8 = vmor %vm5391_vm7, %vm5775_vm5  ;;  %vm5232_vm14 = vcmp.eq.s32.totalorder %v4848_v6, 0  ;;  %vm5616_vm7 = vcmp.eq.s32.totalorder %v4848_v6, 1  ;;  %vm5375_vm10 = vcmp.eq.s32.totalorder %v4991_v41, 0  ;;  %v4840_v31 = vsub.s32 %v15564_v39, %v19185_v52 }
 0xc3f   : > { %10416 = vmatpush.msk.msrb.mxu2 %vm6008_vm12, %v18392_v50  ;;  %7438 = vmatmul.f32.gmra.mxu1 %v15138_v21  ;;  %vm6295_vm0 = vmor %vm5527_vm2, %vm5911_vm11  ;;  %vm5759_vm12 = vcmp.eq.s32.totalorder %v4991_v41, 1  ;;  %vm5511_vm11 = vcmp.eq.s32.totalorder %v5127_v57, 0  ;;  %v4975_v6 = vsub.s32 %v19166_v38, %v14767_v55  ;;  %v5111_v41 = vsub.s32 %v19166_v38, %v14769_v18 }
 0xc40   : > { %10389 = vmatpush.msk.msrb.mxu0 %vm6159_vm8, %v18392_v50  ;;  %10404 = vmatpush.msk.msrb.mxu1 %vm6295_vm0, %v18392_v50  ;;  %vm6004_vm6 = vmor %vm5236_vm9, %vm5620_vm15  ;;  %vm5895_vm8 = vcmp.eq.s32.totalorder %v5127_v57, 1  ;;  %vm5228_vm15 = vcmp.eq.s32.totalorder %v4844_v43, 0  ;;  %vm5304_vm0 = vcmp.eq.s32.totalorder %v4920_v17, 0  ;;  %v19187_v57 = vld [vmem:[#allocation41_spill] sm:$0xff] }
 0xc41   : > { %10417 = vmatpush.msk.msrb.mxu2 %vm6004_vm6, %v18392_v50  ;;  %vm6151_vm5 = vmor %vm5383_vm4, %vm5767_vm13  ;;  %vm5612_vm4 = vcmp.eq.s32.totalorder %v4844_v43, 1  ;;  %vm5367_vm6 = vcmp.eq.s32.totalorder %v4983_v53, 0  ;;  %v19188_v43 = vld [vmem:[#allocation63_spill] sm:$0xff] }
 0xc42   : > { %10390 = vmatpush.msk.msrb.mxu0 %vm6151_vm5, %v18392_v50  ;;  %vm6287_vm2 = vmor %vm5519_vm1, %vm5903_vm3  ;;  %vm5688_vm1 = vcmp.eq.s32.totalorder %v4920_v17, 1  ;;  %vm5503_vm5 = vcmp.eq.s32.totalorder %v5119_v30, 0  ;;  %v4912_v18 = vsub.s32 %v15564_v39, %v19188_v43  ;;  %v4967_v17 = vsub.s32 %v19166_v38, %v19119_v3 }
 0xc43   : > { %7470 = vmatmul.f32.gmra.mxu2 %v14947_v42  ;;  %10405 = vmatpush.msk.msrb.mxu1 %vm6287_vm2, %v18392_v50  ;;  %vm6000_vm9 = vmor %vm5232_vm14, %vm5616_vm7  ;;  %v4916_v42 = vsub.s32 %v15564_v39, %v19186_v11  ;;  %vm5751_vm14 = vcmp.eq.s32.totalorder %v4983_v53, 1  ;;  %vm5224_vm2 = vcmp.eq.s32.totalorder %v4840_v31, 0  ;;  %v5103_v53 = vsub.s32 %v19166_v38, %v19120_v28 }
 0xc44   : > { %10418 = vmatpush.msk.msrb.mxu2 %vm6000_vm9, %v18392_v50  ;;  %vm6143_vm13 = vmor %vm5375_vm10, %vm5759_vm12  ;;  %vm5887_vm10 = vcmp.eq.s32.totalorder %v5119_v30, 1  ;;  %v19189_v30 = vld [vmem:[#allocation48_spill] sm:$0xff] }
 0xc45   : > { %7412 = vmatmul.f32.gmra.mxu0 %v15171_v25  ;;  %vm6279_vm3 = vmor %vm5511_vm11, %vm5895_vm8  ;;  %7496 = vmatmul.f32.gmra.mxu3 %v14934_v15  ;;  %vm5608_vm11 = vcmp.eq.s32.totalorder %v4840_v31, 1  ;;  %v4836_v15 = vsub.s32 %v15564_v39, %v19187_v57  ;;  %vm5300_vm9 = vcmp.eq.s32.totalorder %v4916_v42, 0  ;;  %v4832_v3 = vsub.s32 %v15564_v39, %v19189_v30  ;;  %v19190_v31 = vld [vmem:[#allocation65_spill] sm:$0xff] }
 0xc46   : > { %10391 = vmatpush.msk.msrb.mxu0 %vm6143_vm13, %v18392_v50  ;;  %10406 = vmatpush.msk.msrb.mxu1 %vm6279_vm3, %v18392_v50  ;;  %vm5996_vm7 = vmor %vm5228_vm15, %vm5612_vm4  ;;  %vm5684_vm15 = vcmp.eq.s32.totalorder %v4916_v42, 1  ;;  %vm5359_vm13 = vcmp.eq.s32.totalorder %v4975_v6, 0  ;;  %vm5495_vm3 = vcmp.eq.s32.totalorder %v5111_v41, 0  ;;  %v4908_v28 = vsub.s32 %v15564_v39, %v19190_v31 }
 0xc47   : > { %10419 = vmatpush.msk.msrb.mxu2 %vm5996_vm7, %v18392_v50  ;;  %vm6072_vm12 = vmor %vm5304_vm0, %vm5688_vm1  ;;  %7441 = vmatmul.f32.gmra.mxu1 %v15181_v36  ;;  %vm5743_vm0 = vcmp.eq.s32.totalorder %v4975_v6, 1  ;;  %vm5220_vm7 = vcmp.eq.s32.totalorder %v4836_v15, 0  ;;  %v4959_v42 = vsub.s32 %v19166_v38, %v19121_v63  ;;  %v5095_v6 = vsub.s32 %v19166_v38, %v19122_v59 }
 0xc48   : > { %10432 = vmatpush.msk.msrb.mxu3 %vm6072_vm12, %v18392_v50  ;;  %vm6135_vm8 = vmor %vm5367_vm6, %vm5751_vm14  ;;  %vm5879_vm6 = vcmp.eq.s32.totalorder %v5111_v41, 1  ;;  %vm5296_vm12 = vcmp.eq.s32.totalorder %v4912_v18, 0  ;;  %v19191_v41 = vld [vmem:[#allocation49_spill] sm:$0xff] }
 0xc49   : > { %10392 = vmatpush.msk.msrb.mxu0 %vm6135_vm8, %v18392_v50  ;;  %vm6271_vm4 = vmor %vm5503_vm5, %vm5887_vm10  ;;  %vm5604_vm5 = vcmp.eq.s32.totalorder %v4836_v15, 1  ;;  %vm5351_vm8 = vcmp.eq.s32.totalorder %v4967_v17, 0  ;;  %v19192_v15 = vld [vmem:[#allocation66_spill] sm:$0xff] }
 0xc4a   : > { %10407 = vmatpush.msk.msrb.mxu1 %vm6271_vm4, %v18392_v50  ;;  %vm5992_vm1 = vmor %vm5224_vm2, %vm5608_vm11  ;;  %vm5680_vm2 = vcmp.eq.s32.totalorder %v4912_v18, 1  ;;  %vm5487_vm4 = vcmp.eq.s32.totalorder %v5103_v53, 0  ;;  %v4951_v18 = vsub.s32 %v19166_v38, %v14840_v13 }
 0xc4b   : > { %7473 = vmatmul.f32.gmra.mxu2 %v15014_v0  ;;  %vm6068_vm14 = vmor %vm5300_vm9, %vm5684_vm15  ;;  %vm5735_vm9 = vcmp.eq.s32.totalorder %v4967_v17, 1  ;;  %v4904_v0 = vsub.s32 %v15564_v39, %v19192_v15  ;;  %v19193_v17 = vld [vmem:[#allocation27_spill] sm:$0xff] }
 0xc4c   : > { %10420 = vmatpush.msk.msrb.mxu2 %vm5992_vm1, %v18392_v50  ;;  %10433 = vmatpush.msk.msrb.mxu3 %vm6068_vm14, %v18392_v50  ;;  %vm6127_vm10 = vmor %vm5359_vm13, %vm5743_vm0  ;;  %vm5871_vm13 = vcmp.eq.s32.totalorder %v5103_v53, 1  ;;  %vm5216_vm1 = vcmp.eq.s32.totalorder %v4832_v3, 0  ;;  %vm5292_vm14 = vcmp.eq.s32.totalorder %v4908_v28, 0  ;;  %v4824_v53 = vsub.s32 %v15564_v39, %v19193_v17 }
 0xc4d   : > { %7415 = vmatmul.f32.gmra.mxu0 %v15220_v20  ;;  %vm6263_vm11 = vmor %vm5495_vm3, %vm5879_vm6  ;;  %7499 = vmatmul.f32.gmra.mxu3 %v15002_v49  ;;  %vm5600_vm3 = vcmp.eq.s32.totalorder %v4832_v3, 1  ;;  %v4828_v49 = vsub.s32 %v15564_v39, %v19191_v41  ;;  %v19194_v3 = vld [vmem:[#allocation69_spill] sm:$0xff]  ;;  %v5079_v17 = vsub.s32 %v19166_v38, %v14921_v46 }
 0xc4e   : > { %10393 = vmatpush.msk.msrb.mxu0 %vm6127_vm10, %v18392_v50  ;;  %10408 = vmatpush.msk.msrb.mxu1 %vm6263_vm11, %v18392_v50  ;;  %vm5988_vm15 = vmor %vm5220_vm7, %vm5604_vm5  ;;  %vm5676_vm7 = vcmp.eq.s32.totalorder %v4908_v28, 1  ;;  %vm5343_vm10 = vcmp.eq.s32.totalorder %v4959_v42, 0  ;;  %vm5479_vm11 = vcmp.eq.s32.totalorder %v5095_v6, 0  ;;  %v5087_v28 = vsub.s32 %v19166_v38, %v14842_v27 }
 0xc4f   : > { %10421 = vmatpush.msk.msrb.mxu2 %vm5988_vm15, %v18392_v50  ;;  %vm6064_vm0 = vmor %vm5296_vm12, %vm5680_vm2  ;;  %7444 = vmatmul.f32.gmra.mxu1 %v15252_v33  ;;  %vm5727_vm12 = vcmp.eq.s32.totalorder %v4959_v42, 1  ;;  %vm5212_vm15 = vcmp.eq.s32.totalorder %v4828_v49, 0  ;;  %v4900_v42 = vsub.s32 %v15564_v39, %v19194_v3  ;;  %v19195_v3 = vld [vmem:[#allocation28_spill] sm:$0xff] }
 0xc50   : > { %10434 = vmatpush.msk.msrb.mxu3 %vm6064_vm0, %v18392_v50  ;;  %vm6119_vm6 = vmor %vm5351_vm8, %vm5735_vm9  ;;  %vm5863_vm8 = vcmp.eq.s32.totalorder %v5095_v6, 1  ;;  %vm5596_vm0 = vcmp.eq.s32.totalorder %v4828_v49, 1  ;;  %v4943_v6 = vsub.s32 %v19166_v38, %v14870_v26  ;;  %v4820_v26 = vsub.s32 %v15564_v39, %v19195_v3  ;;  %v19196_v49 = vld [vmem:[#allocation71_spill] sm:$0xff] }
 0xc51   : > { %10394 = vmatpush.msk.msrb.mxu0 %vm6119_vm6, %v18392_v50  ;;  %vm6255_vm5 = vmor %vm5487_vm4, %vm5871_vm13  ;;  %vm5288_vm13 = vcmp.eq.s32.totalorder %v4904_v0, 0  ;;  %vm5672_vm6 = vcmp.eq.s32.totalorder %v4904_v0, 1  ;;  %v4935_v0 = vsub.s32 %v19166_v38, %v14951_v61 }
 0xc52   : > { %10409 = vmatpush.msk.msrb.mxu1 %vm6255_vm5, %v18392_v50  ;;  %vm5984_vm2 = vmor %vm5216_vm1, %vm5600_vm3  ;;  %vm5335_vm3 = vcmp.eq.s32.totalorder %v4951_v18, 0  ;;  %vm5719_vm5 = vcmp.eq.s32.totalorder %v4951_v18, 1  ;;  %v5071_v18 = vsub.s32 %v19166_v38, %v14968_v2 }
 0xc53   : > { %10422 = vmatpush.msk.msrb.mxu2 %vm5984_vm2, %v18392_v50  ;;  %vm6060_vm9 = vmor %vm5292_vm14, %vm5676_vm7  ;;  %vm5471_vm7 = vcmp.eq.s32.totalorder %v5087_v28, 0  ;;  %vm5208_vm2 = vcmp.eq.s32.totalorder %v4824_v53, 0 }
 0xc54   : > { %10435 = vmatpush.msk.msrb.mxu3 %vm6060_vm9, %v18392_v50  ;;  %vm6111_vm4 = vmor %vm5343_vm10, %vm5727_vm12  ;;  %vm5855_vm10 = vcmp.eq.s32.totalorder %v5087_v28, 1  ;;  %vm5284_vm9 = vcmp.eq.s32.totalorder %v4900_v42, 0  ;;  %v4896_v28 = vsub.s32 %v15564_v39, %v19196_v49 }
 0xc55   : > { %10395 = vmatpush.msk.msrb.mxu0 %vm6111_vm4, %v18392_v50  ;;  %vm6247_vm1 = vmor %vm5479_vm11, %vm5863_vm8  ;;  %7502 = vmatmul.f32.gmra.mxu3 %v15079_v40  ;;  %vm5592_vm11 = vcmp.eq.s32.totalorder %v4824_v53, 1  ;;  %vm5327_vm4 = vcmp.eq.s32.totalorder %v4943_v6, 0  ;;  %v19197_v53 = vld [vmem:[#allocation29_spill] sm:$0xff] }
 0xc56   : > { %10410 = vmatpush.msk.msrb.mxu1 %vm6247_vm1, %v18392_v50  ;;  %vm5980_vm14 = vmor %vm5212_vm15, %vm5596_vm0  ;;  %vm5668_vm15 = vcmp.eq.s32.totalorder %v4900_v42, 1  ;;  %vm5711_vm1 = vcmp.eq.s32.totalorder %v4943_v6, 1  ;;  %v4816_v42 = vsub.s32 %v15564_v39, %v19197_v53  ;;  %v19198_v6 = vld [vmem:[#allocation72_spill] sm:$0xff] }
 0xc57   : > { %10423 = vmatpush.msk.msrb.mxu2 %vm5980_vm14, %v18392_v50  ;;  %vm6056_vm12 = vmor %vm5288_vm13, %vm5672_vm6  ;;  %vm5463_vm6 = vcmp.eq.s32.totalorder %v5079_v17, 0  ;;  %vm5847_vm14 = vcmp.eq.s32.totalorder %v5079_v17, 1  ;;  %v4892_v40 = vsub.s32 %v15564_v39, %v19198_v6  ;;  %v4927_v17 = vsub.s32 %v19166_v38, %v15017_v37 }
 0xc58   : > { %10436 = vmatpush.msk.msrb.mxu3 %vm6056_vm12, %v18392_v50  ;;  %vm6103_vm8 = vmor %vm5335_vm3, %vm5719_vm5  ;;  %vm5204_vm5 = vcmp.eq.s32.totalorder %v4820_v26, 0  ;;  %vm5588_vm12 = vcmp.eq.s32.totalorder %v4820_v26, 1  ;;  %v5063_v26 = vsub.s32 %v19166_v38, %v15029_v56 }
 0xc59   : > { %10396 = vmatpush.msk.msrb.mxu0 %vm6103_vm8, %v18392_v50  ;;  %vm6239_vm0 = vmor %vm5471_vm7, %vm5855_vm10  ;;  %vm5280_vm10 = vcmp.eq.s32.totalorder %v4896_v28, 0  ;;  %vm5664_vm8 = vcmp.eq.s32.totalorder %v4896_v28, 1  ;;  %v19199_v28 = vld [vmem:[#allocation32_spill] sm:$0xff] }
 0xc5a   : > { %10411 = vmatpush.msk.msrb.mxu1 %vm6239_vm0, %v18392_v50  ;;  %vm5976_vm13 = vmor %vm5208_vm2, %vm5592_vm11  ;;  %vm5319_vm11 = vcmp.eq.s32.totalorder %v4935_v0, 0  ;;  %vm5703_vm0 = vcmp.eq.s32.totalorder %v4935_v0, 1  ;;  %v4812_v6 = vsub.s32 %v15564_v39, %v19199_v28  ;;  %v19200_v0 = vld [vmem:[#allocation75_spill] sm:$0xff] }
 0xc5b   : > { %10424 = vmatpush.msk.msrb.mxu2 %vm5976_vm13, %v18392_v50  ;;  %vm6052_vm3 = vmor %vm5284_vm9, %vm5668_vm15  ;;  %vm5455_vm15 = vcmp.eq.s32.totalorder %v5071_v18, 0  ;;  %vm5839_vm13 = vcmp.eq.s32.totalorder %v5071_v18, 1  ;;  %v4888_v37 = vsub.s32 %v15564_v39, %v19200_v0  ;;  %v5055_v18 = vsub.s32 %v19166_v38, %v15039_v7 }
 0xc5c   : > { %10437 = vmatpush.msk.msrb.mxu3 %vm6052_vm3, %v18392_v50  ;;  %vm6095_vm7 = vmor %vm5327_vm4, %vm5711_vm1  ;;  %vm5200_vm1 = vcmp.eq.s32.totalorder %v4816_v42, 0  ;;  %vm5584_vm3 = vcmp.eq.s32.totalorder %v4816_v42, 1  ;;  %v19201_v42 = vld [vmem:[#allocation19_spill] sm:$0xff]  ;;  %v5048_v38 = vsub.s32 %v15564_v39, %v14622_v19  ;;  %v5040_v19 = vsub.s32 %v15564_v39, %v14628_v5 }
 0xc5d   : > { %10397 = vmatpush.msk.msrb.mxu0 %vm6095_vm7, %v18392_v50  ;;  %vm6231_vm2 = vmor %vm5463_vm6, %vm5847_vm14  ;;  %vm5276_vm14 = vcmp.eq.s32.totalorder %v4892_v40, 0  ;;  %vm5660_vm7 = vcmp.eq.s32.totalorder %v4892_v40, 1  ;;  %v4808_v28 = vsub.s32 %v15564_v39, %v19201_v42  ;;  %v19202_v40 = vld [vmem:[#allocation76_spill] sm:$0xff] }
 0xc5e   : > { %10412 = vmatpush.msk.msrb.mxu1 %vm6231_vm2, %v18392_v50  ;;  %vm5972_vm9 = vmor %vm5204_vm5, %vm5588_vm12  ;;  %vm5311_vm12 = vcmp.eq.s32.totalorder %v4927_v17, 0  ;;  %vm5695_vm2 = vcmp.eq.s32.totalorder %v4927_v17, 1  ;;  %v4884_v0 = vsub.s32 %v15564_v39, %v19202_v40  ;;  %v19203_v17 = vld [vmem:[#allocation20_spill] sm:$0xff] }
 0xc5f   : > { %10425 = vmatpush.msk.msrb.mxu2 %vm5972_vm9, %v18392_v50  ;;  %vm6048_vm4 = vmor %vm5280_vm10, %vm5664_vm8  ;;  %vm5447_vm8 = vcmp.eq.s32.totalorder %v5063_v26, 0  ;;  %vm5831_vm9 = vcmp.eq.s32.totalorder %v5063_v26, 1  ;;  %v4804_v26 = vsub.s32 %v15564_v39, %v19203_v17 }
 0xc60   : > { %10438 = vmatpush.msk.msrb.mxu3 %vm6048_vm4, %v18392_v50  ;;  %vm6087_vm6 = vmor %vm5319_vm11, %vm5703_vm0  ;;  %vm5196_vm0 = vcmp.eq.s32.totalorder %v4812_v6, 0  ;;  %vm5580_vm4 = vcmp.eq.s32.totalorder %v4812_v6, 1  ;;  %v19204_v6 = vld [vmem:[#allocation82_spill] sm:$0xff] }
 0xc61   : > { %10398 = vmatpush.msk.msrb.mxu0 %vm6087_vm6, %v18392_v50  ;;  %vm6223_vm5 = vmor %vm5455_vm15, %vm5839_vm13  ;;  %vm5272_vm13 = vcmp.eq.s32.totalorder %v4888_v37, 0  ;;  %vm5656_vm6 = vcmp.eq.s32.totalorder %v4888_v37, 1  ;;  %v4880_v40 = vsub.s32 %v15564_v39, %v19204_v6  ;;  %v19205_v37 = vld [vmem:[#allocation21_spill] sm:$0xff] }
 0xc62   : > { %10413 = vmatpush.msk.msrb.mxu1 %vm6223_vm5, %v18392_v50  ;;  %vm5968_vm10 = vmor %vm5200_vm1, %vm5584_vm3  ;;  %vm5439_vm3 = vcmp.eq.s32.totalorder %v5055_v18, 0  ;;  %vm5823_vm5 = vcmp.eq.s32.totalorder %v5055_v18, 1  ;;  %v19206_v18 = vld [vmem:[#allocation83_spill] sm:$0xff] }
 0xc63   : > { %10426 = vmatpush.msk.msrb.mxu2 %vm5968_vm10, %v18392_v50  ;;  %vm6044_vm11 = vmor %vm5276_vm14, %vm5660_vm7  ;;  %vm5192_vm7 = vcmp.eq.s32.totalorder %v4808_v28, 0  ;;  %vm5268_vm10 = vcmp.eq.s32.totalorder %v4884_v0, 0  ;;  %v4876_v5 = vsub.s32 %v15564_v39, %v19206_v18 }
 0xc64   : > { %10439 = vmatpush.msk.msrb.mxu3 %vm6044_vm11, %v18392_v50  ;;  %vm6079_vm15 = vmor %vm5311_vm12, %vm5695_vm2  ;;  %vm5576_vm12 = vcmp.eq.s32.totalorder %v4808_v28, 1  ;;  %vm5432_vm11 = vcmp.eq.s32.totalorder %v5048_v38, 0  ;;  %v5176_v28 = vsub.s32 %v15564_v39, %v14630_v47  ;;  %v5032_v47 = vsub.s32 %v15564_v39, %v14644_v23 }
 0xc65   : > { %10399 = vmatpush.msk.msrb.mxu0 %vm6079_vm15, %v18392_v50  ;;  %vm6215_vm1 = vmor %vm5447_vm8, %vm5831_vm9  ;;  %vm5652_vm8 = vcmp.eq.s32.totalorder %v4884_v0, 1  ;;  %vm5188_vm15 = vcmp.eq.s32.totalorder %v4804_v26, 0  ;;  %v4800_v0 = vsub.s32 %v15564_v39, %v19205_v37 }
 0xc66   : > { %10414 = vmatpush.msk.msrb.mxu1 %vm6215_vm1, %v18392_v50  ;;  %vm5964_vm14 = vmor %vm5196_vm0, %vm5580_vm4  ;;  %7522 = vmatmul.f32.vlgmr.msrb.gmra.mxu0 %v15025_v58  ;;  %vm5816_vm0 = vcmp.eq.s32.totalorder %v5048_v38, 1  ;;  %vm5572_vm1 = vcmp.eq.s32.totalorder %v4804_v26, 1  ;;  %v19207_v38 = vld [vmem:[#allocation23_spill] sm:$0xff]  ;;  %v19208_v26 = vld [vmem:[#allocation84_spill] sm:$0xff] }
 0xc67   : > { %10427 = vmatpush.msk.msrb.mxu2 %vm5964_vm14, %v18392_v50  ;;  %vm6040_vm2 = vmor %vm5272_vm13, %vm5656_vm6  ;;  %vm5264_vm6 = vcmp.eq.s32.totalorder %v4880_v40, 0  ;;  %vm5424_vm14 = vcmp.eq.s32.totalorder %v5040_v19, 0  ;;  %v4872_v23 = vsub.s32 %v15564_v39, %v19208_v26  ;;  %v5160_v26 = vsub.s32 %v15564_v39, %v14661_v62 }
 0xc68   : > { %10440 = vmatpush.msk.msrb.mxu3 %vm6040_vm2, %v18392_v50  ;;  %vm6207_vm9 = vmor %vm5439_vm3, %vm5823_vm5  ;;  %vm5648_vm3 = vcmp.eq.s32.totalorder %v4880_v40, 1  ;;  %vm5560_vm2 = vcmp.eq.s32.totalorder %v5176_v28, 0  ;;  %v5168_v40 = vsub.s32 %v15564_v39, %v14646_v24  ;;  %v5024_v24 = vsub.s32 %v15564_v39, %v14659_v12 }
 0xc69   : > { %10415 = vmatpush.msk.msrb.mxu1 %vm6207_vm9, %v18392_v50  ;;  %vm5960_vm4 = vmor %vm5192_vm7, %vm5576_vm12  ;;  %vm5808_vm7 = vcmp.eq.s32.totalorder %v5040_v19, 1  ;;  %vm5184_vm9 = vcmp.eq.s32.totalorder %v4800_v0, 0  ;;  %v4796_v19 = vsub.s32 %v15564_v39, %v19207_v38 }
 0xc6a   : > { %10428 = vmatpush.msk.msrb.mxu2 %vm5960_vm4, %v18392_v50  ;;  %vm6036_vm13 = vmor %vm5268_vm10, %vm5652_vm8  ;;  %7551 = vmatmul.f32.vlgmr.msrb.gmra.mxu1 %v15056_v48  ;;  %vm5944_vm10 = vcmp.eq.s32.totalorder %v5176_v28, 1  ;;  %vm5568_vm4 = vcmp.eq.s32.totalorder %v4800_v0, 1  ;;  %v19209_v28 = vld [vmem:[#allocation87_spill] sm:$0xff]  ;;  %v5016_v0 = vsub.s32 %v15564_v39, %v14663_v35 }
 0xc6b   : > { %10441 = vmatpush.msk.msrb.mxu3 %vm6036_vm13, %v18392_v50  ;;  %vm6200_vm5 = vmor %vm5432_vm11, %vm5816_vm0  ;;  %vm5260_vm0 = vcmp.eq.s32.totalorder %v4876_v5, 0  ;;  %vm5644_vm13 = vcmp.eq.s32.totalorder %v4876_v5, 1  ;;  %v4868_v12 = vsub.s32 %v15564_v39, %v19209_v28  ;;  %v5152_v5 = vsub.s32 %v15564_v39, %v14673_v51 }
 0xc6c   : > { %10448 = vmatpush.msk.msra.mxu0 %vm6200_vm5, %v18392_v50  ;;  %vm5956_vm12 = vmor %vm5188_vm15, %vm5572_vm1  ;;  %vm5416_vm1 = vcmp.eq.s32.totalorder %v5032_v47, 0  ;;  %vm5552_vm5 = vcmp.eq.s32.totalorder %v5168_v40, 0 }
 0xc6d   : > { %10429 = vmatpush.msk.msrb.mxu2 %vm5956_vm12, %v18392_v50  ;;  %vm6032_vm8 = vmor %vm5264_vm6, %vm5648_vm3  ;;  %vm5800_vm6 = vcmp.eq.s32.totalorder %v5032_v47, 1  ;;  %vm5180_vm12 = vcmp.eq.s32.totalorder %v4796_v19, 0 }
 0xc6e   : > { %10442 = vmatpush.msk.msrb.mxu3 %vm6032_vm8, %v18392_v50  ;;  %vm6192_vm11 = vmor %vm5424_vm14, %vm5808_vm7  ;;  %7525 = vmatmul.f32.gmra.mxu0 %v15117_v34  ;;  %vm5936_vm14 = vcmp.eq.s32.totalorder %v5168_v40, 1  ;;  %v15841_v34 = vadd.s32 640, %v19015_v29  ;;  %vm5256_vm8 = vcmp.eq.s32.totalorder %v4872_v23, 0  ;;  %v19210_v40 = vld [vmem:[#allocation88_spill] sm:$0xff] }
 0xc6f   : > { %10449 = vmatpush.msk.msra.mxu0 %vm6192_vm11, %v18392_v50  ;;  %vm6328_vm15 = vmor %vm5560_vm2, %vm5944_vm10  ;;  %vm5564_vm2 = vcmp.eq.s32.totalorder %v4796_v19, 1  ;;  %vm5408_vm11 = vcmp.eq.s32.totalorder %v5024_v24, 0  ;;  %v5008_v19 = vsub.s32 %v15564_v39, %v14692_v16 }
 0xc70   : > { %10464 = vmatpush.msk.msra.mxu1 %vm6328_vm15, %v18392_v50  ;;  %vm5952_vm3 = vmor %vm5184_vm9, %vm5568_vm4  ;;  %vm5640_vm9 = vcmp.eq.s32.totalorder %v4872_v23, 1  ;;  %vm5544_vm15 = vcmp.eq.s32.totalorder %v5160_v26, 0  ;;  %v4857_v47 = vsub.s32 %v15841_v34, %v19176_v14  ;;  %v5144_v23 = vsub.s32 %v15564_v39, %v14694_v54 }
 0xc71   : > { %10430 = vmatpush.msk.msrb.mxu2 %vm5952_vm3, %v18392_v50  ;;  %vm6028_vm7 = vmor %vm5260_vm0, %vm5644_vm13  ;;  %vm5792_vm0 = vcmp.eq.s32.totalorder %v5024_v24, 1  ;;  %vm5252_vm3 = vcmp.eq.s32.totalorder %v4868_v12, 0  ;;  %v4864_v24 = vsub.s32 %v15564_v39, %v19210_v40 }
 0xc72   : > { %10443 = vmatpush.msk.msrb.mxu3 %vm6028_vm7, %v18392_v50  ;;  %vm6184_vm10 = vmor %vm5416_vm1, %vm5800_vm6  ;;  %7554 = vmatmul.f32.gmra.mxu1 %v15138_v21  ;;  %vm5928_vm1 = vcmp.eq.s32.totalorder %v5160_v26, 1  ;;  %vm5400_vm7 = vcmp.eq.s32.totalorder %v5016_v0, 0  ;;  %v19211_v26 = vld [vmem:[#allocation96_spill] sm:$0xff] }
 0xc73   : > { %10450 = vmatpush.msk.msra.mxu0 %vm6184_vm10, %v18392_v50  ;;  %vm6320_vm4 = vmor %vm5552_vm5, %vm5936_vm14  ;;  %vm5636_vm5 = vcmp.eq.s32.totalorder %v4868_v12, 1  ;;  %vm5536_vm10 = vcmp.eq.s32.totalorder %v5152_v5, 0  ;;  %v4860_v54 = vsub.s32 %v15564_v39, %v19211_v26  ;;  %v5000_v12 = vsub.s32 %v15564_v39, %v14696_v60 }
 0xc74   : > { %10465 = vmatpush.msk.msra.mxu1 %vm6320_vm4, %v18392_v50  ;;  %vm5948_vm13 = vmor %vm5180_vm12, %vm5564_vm2  ;;  %vm5784_vm12 = vcmp.eq.s32.totalorder %v5016_v0, 1  ;;  %vm5241_vm4 = vcmp.eq.s32.totalorder %v4857_v47, 0  ;;  %v5136_v0 = vsub.s32 %v15564_v39, %v14712_v4 }
 0xc75   : > { %10431 = vmatpush.msk.msrb.mxu2 %vm5948_vm13, %v18392_v50  ;;  %vm6024_vm6 = vmor %vm5256_vm8, %vm5640_vm9  ;;  %vm5920_vm8 = vcmp.eq.s32.totalorder %v5152_v5, 1  ;;  %vm5248_vm13 = vcmp.eq.s32.totalorder %v4864_v24, 0  ;;  %v4849_v5 = vsub.s32 %v15841_v34, %v19182_v44 }
 0xc76   : > { %10444 = vmatpush.msk.msrb.mxu3 %vm6024_vm6, %v18392_v50  ;;  %vm6176_vm14 = vmor %vm5408_vm11, %vm5792_vm0  ;;  %7580 = vmatmul.f32.vlgmr.msrb.gmra.mxu2 %v14813_v10  ;;  %vm5625_vm11 = vcmp.eq.s32.totalorder %v4857_v47, 1  ;;  %v4853_v10 = vsub.s32 %v15841_v34, %v19179_v32  ;;  %vm5392_vm6 = vcmp.eq.s32.totalorder %v5008_v19, 0  ;;  %v4992_v47 = vsub.s32 %v15564_v39, %v14714_v9 }
 0xc77   : > { %10451 = vmatpush.msk.msra.mxu0 %vm6176_vm14, %v18392_v50  ;;  %vm6312_vm2 = vmor %vm5544_vm15, %vm5928_vm1  ;;  %vm5632_vm15 = vcmp.eq.s32.totalorder %v4864_v24, 1  ;;  %vm5528_vm14 = vcmp.eq.s32.totalorder %v5144_v23, 0  ;;  %v5128_v24 = vsub.s32 %v15564_v39, %v14716_v8 }
 0xc78   : > { %10466 = vmatpush.msk.msra.mxu1 %vm6312_vm2, %v18392_v50  ;;  %vm6020_vm9 = vmor %vm5252_vm3, %vm5636_vm5  ;;  %7528 = vmatmul.f32.gmra.mxu0 %v15171_v25  ;;  %vm5776_vm3 = vcmp.eq.s32.totalorder %v5008_v19, 1  ;;  %vm5237_vm2 = vcmp.eq.s32.totalorder %v4853_v10, 0  ;;  %v4845_v19 = vsub.s32 %v15841_v34, %v19183_v1 }
 0xc79   : > { %10445 = vmatpush.msk.msrb.mxu3 %vm6020_vm9, %v18392_v50  ;;  %vm6168_vm0 = vmor %vm5400_vm7, %vm5784_vm12  ;;  %vm5912_vm7 = vcmp.eq.s32.totalorder %v5144_v23, 1  ;;  %vm5244_vm9 = vcmp.eq.s32.totalorder %v4860_v54, 0  ;;  %v19212_v23 = vld [vmem:[#allocation61_spill] sm:$0xff] }
 0xc7a   : > { %10452 = vmatpush.msk.msra.mxu0 %vm6168_vm0, %v18392_v50  ;;  %vm6304_vm1 = vmor %vm5536_vm10, %vm5920_vm8  ;;  %7557 = vmatmul.f32.gmra.mxu1 %v15181_v36  ;;  %vm5621_vm10 = vcmp.eq.s32.totalorder %v4853_v10, 1  ;;  %vm5384_vm0 = vcmp.eq.s32.totalorder %v5000_v12, 0  ;;  %v4921_v8 = vsub.s32 %v15841_v34, %v19212_v23  ;;  %v4984_v10 = vsub.s32 %v15564_v39, %v14746_v22  ;;  %v19214_v23 = vld [vmem:[#allocation22_spill] sm:$0xff] }
 0xc7b   : > { %10467 = vmatpush.msk.msra.mxu1 %vm6304_vm1, %v18392_v50  ;;  %vm6009_vm5 = vmor %vm5241_vm4, %vm5625_vm11  ;;  %vm5628_vm4 = vcmp.eq.s32.totalorder %v4860_v54, 1  ;;  %vm5768_vm1 = vcmp.eq.s32.totalorder %v5000_v12, 1  ;;  %v19213_v54 = vld [vmem:[#allocation70_spill] sm:$0xff]  ;;  %v4841_v12 = vsub.s32 %v15841_v34, %v19185_v52  ;;  %v19216_v52 = vld [vmem:[#allocation45_spill] sm:$0xff] }
 0xc7c   : > { %10480 = vmatpush.msk.msra.mxu2 %vm6009_vm5, %v18392_v50  ;;  %vm6016_vm12 = vmor %vm5248_vm13, %vm5632_vm15  ;;  %vm5520_vm15 = vcmp.eq.s32.totalorder %v5136_v0, 0  ;;  %vm5233_vm5 = vcmp.eq.s32.totalorder %v4849_v5, 0 }
 0xc7d   : > { %10446 = vmatpush.msk.msrb.mxu3 %vm6016_vm12, %v18392_v50  ;;  %vm6160_vm8 = vmor %vm5392_vm6, %vm5776_vm3  ;;  %vm5904_vm6 = vcmp.eq.s32.totalorder %v5136_v0, 1  ;;  %vm5376_vm12 = vcmp.eq.s32.totalorder %v4992_v47, 0  ;;  %v4917_v0 = vsub.s32 %v15841_v34, %v19186_v11 }
 0xc7e   : > { %10453 = vmatpush.msk.msra.mxu0 %vm6160_vm8, %v18392_v50  ;;  %vm6296_vm11 = vmor %vm5528_vm14, %vm5912_vm7  ;;  %7583 = vmatmul.f32.gmra.mxu2 %v14875_v45  ;;  %vm5617_vm14 = vcmp.eq.s32.totalorder %v4849_v5, 1  ;;  %vm5512_vm8 = vcmp.eq.s32.totalorder %v5128_v24, 0  ;;  %v4976_v5 = vsub.s32 %v15564_v39, %v14767_v55 }
 0xc7f   : > { %10468 = vmatpush.msk.msra.mxu1 %vm6296_vm11, %v18392_v50  ;;  %vm6005_vm13 = vmor %vm5237_vm2, %vm5621_vm10  ;;  %vm5760_vm2 = vcmp.eq.s32.totalorder %v4992_v47, 1  ;;  %vm5229_vm11 = vcmp.eq.s32.totalorder %v4845_v19, 0  ;;  %v19215_v47 = vld [vmem:[#allocation24_spill] sm:$0xff] }
 0xc80   : > { %10481 = vmatpush.msk.msra.mxu2 %vm6005_vm13, %v18392_v50  ;;  %vm6012_vm3 = vmor %vm5244_vm9, %vm5628_vm4  ;;  %7531 = vmatmul.f32.gmra.mxu0 %v15220_v20  ;;  %vm5896_vm9 = vcmp.eq.s32.totalorder %v5128_v24, 1  ;;  %v5120_v20 = vsub.s32 %v15564_v39, %v19214_v23  ;;  %vm5305_vm13 = vcmp.eq.s32.totalorder %v4921_v8, 0  ;;  %v5112_v11 = vsub.s32 %v15564_v39, %v19215_v47 }
 0xc81   : > { %10447 = vmatpush.msk.msrb.mxu3 %vm6012_vm3, %v18392_v50  ;;  %vm6152_vm7 = vmor %vm5384_vm0, %vm5768_vm1  ;;  %vm5613_vm0 = vcmp.eq.s32.totalorder %v4845_v19, 1  ;;  %vm5368_vm3 = vcmp.eq.s32.totalorder %v4984_v10, 0  ;;  %v4837_v24 = vsub.s32 %v15841_v34, %v19187_v57  ;;  %v4913_v19 = vsub.s32 %v15841_v34, %v19188_v43 }
 0xc82   : > { %10454 = vmatpush.msk.msra.mxu0 %vm6152_vm7, %v18392_v50  ;;  %vm6288_vm10 = vmor %vm5520_vm15, %vm5904_vm6  ;;  %7609 = vmatmul.f32.vlgmr.msrb.gmra.mxu3 %v19213_v54  ;;  %vm5689_vm15 = vcmp.eq.s32.totalorder %v4921_v8, 1  ;;  %vm5504_vm7 = vcmp.eq.s32.totalorder %v5120_v20, 0  ;;  %v19217_v8 = vld [vmem:[#allocation64_spill] sm:$0xff] }
 0xc83   : > { %10469 = vmatpush.msk.msra.mxu1 %vm6288_vm10, %v18392_v50  ;;  %vm6001_vm4 = vmor %vm5233_vm5, %vm5617_vm14  ;;  %vm5752_vm5 = vcmp.eq.s32.totalorder %v4984_v10, 1  ;;  %vm5225_vm10 = vcmp.eq.s32.totalorder %v4841_v12, 0  ;;  %v19218_v10 = vld [vmem:[#allocation67_spill] sm:$0xff] }
 0xc84   : > { %10482 = vmatpush.msk.msra.mxu2 %vm6001_vm4, %v18392_v50  ;;  %vm6144_vm1 = vmor %vm5376_vm12, %vm5760_vm2  ;;  %7560 = vmatmul.f32.gmra.mxu1 %v15252_v33  ;;  %vm5888_vm12 = vcmp.eq.s32.totalorder %v5120_v20, 1  ;;  %vm5301_vm4 = vcmp.eq.s32.totalorder %v4917_v0, 0  ;;  %v5104_v57 = vsub.s32 %v15564_v39, %v19218_v10  ;;  %v4833_v20 = vsub.s32 %v15841_v34, %v19189_v30 }
 0xc85   : > { %10455 = vmatpush.msk.msra.mxu0 %vm6144_vm1, %v18392_v50  ;;  %vm6280_vm6 = vmor %vm5512_vm8, %vm5896_vm9  ;;  %vm5609_vm8 = vcmp.eq.s32.totalorder %v4841_v12, 1  ;;  %vm5360_vm1 = vcmp.eq.s32.totalorder %v4976_v5, 0  ;;  %v4968_v12 = vsub.s32 %v15564_v39, %v19217_v8  ;;  %v4909_v10 = vsub.s32 %v15841_v34, %v19190_v31  ;;  %v19220_v31 = vld [vmem:[#allocation47_spill] sm:$0xff] }
 0xc86   : > { %10470 = vmatpush.msk.msra.mxu1 %vm6280_vm6, %v18392_v50  ;;  %vm5997_vm14 = vmor %vm5229_vm11, %vm5613_vm0  ;;  %7586 = vmatmul.f32.gmra.mxu2 %v19216_v52  ;;  %vm5685_vm11 = vcmp.eq.s32.totalorder %v4917_v0, 1  ;;  %vm5496_vm6 = vcmp.eq.s32.totalorder %v5112_v11, 0  ;;  %v19219_v52 = vld [vmem:[#allocation74_spill] sm:$0xff]  ;;  %v4960_v0 = vsub.s32 %v15564_v39, %v19121_v63  ;;  %v15984_v63 = vpop.f32.mrf.mxu2 }
 0xc87   : > { %10483 = vmatpush.msk.msra.mxu2 %vm5997_vm14, %v18392_v50  ;;  %vm6073_vm2 = vmor %vm5305_vm13, %vm5689_vm15  ;;  %vm5744_vm13 = vcmp.eq.s32.totalorder %v4976_v5, 1  ;;  %vm5880_vm14 = vcmp.eq.s32.totalorder %v5112_v11, 1  ;;  %v5096_v5 = vsub.s32 %v15564_v39, %v19122_v59  ;;  %v4829_v11 = vsub.s32 %v15841_v34, %v19191_v41  ;;  %v19221_v41 = vld [vmem:[#allocation79_spill] sm:$0xff] }
 0xc88   : > { %10496 = vmatpush.msk.msra.mxu3 %vm6073_vm2, %v18392_v50  ;;  %vm6136_vm9 = vmor %vm5368_vm3, %vm5752_vm5  ;;  %vm5221_vm5 = vcmp.eq.s32.totalorder %v4837_v24, 0  ;;  %vm5297_vm2 = vcmp.eq.s32.totalorder %v4913_v19, 0 }
 0xc89   : > { %10456 = vmatpush.msk.msra.mxu0 %vm6136_vm9, %v18392_v50  ;;  %vm6272_vm0 = vmor %vm5504_vm7, %vm5888_vm12  ;;  %vm5605_vm7 = vcmp.eq.s32.totalorder %v4837_v24, 1  ;;  %vm5352_vm9 = vcmp.eq.s32.totalorder %v4968_v12, 0  ;;  %v4905_v24 = vsub.s32 %v15841_v34, %v19192_v15  ;;  %v16000_v15 = vpop.f32.mrf.mxu0 }
 0xc8a   : > { %10471 = vmatpush.msk.msra.mxu1 %vm6272_vm0, %v18392_v50  ;;  %vm5993_vm15 = vmor %vm5225_vm10, %vm5609_vm8  ;;  %7612 = vmatmul.f32.gmra.mxu3 %v19219_v52  ;;  %vm5681_vm10 = vcmp.eq.s32.totalorder %v4913_v19, 1  ;;  %v15972_v52 = vpop.f32.mrf.mxu3  ;;  %vm5488_vm0 = vcmp.eq.s32.totalorder %v5104_v57, 0  ;;  %v4952_v19 = vsub.s32 %v15564_v39, %v14840_v13 }
 0xc8b   : > { %10484 = vmatpush.msk.msra.mxu2 %vm5993_vm15, %v18392_v50  ;;  %vm6069_vm3 = vmor %vm5301_vm4, %vm5685_vm11  ;;  %vm5736_vm4 = vcmp.eq.s32.totalorder %v4968_v12, 1  ;;  %vm5217_vm15 = vcmp.eq.s32.totalorder %v4833_v20, 0  ;;  %v5088_v12 = vsub.s32 %v15564_v39, %v14842_v27  ;;  %v19223_v27 = vld [vmem:[#allocation69_spill] sm:$0xff] }
 0xc8c   : > { %10497 = vmatpush.msk.msra.mxu3 %vm6069_vm3, %v18392_v50  ;;  %vm6128_vm12 = vmor %vm5360_vm1, %vm5744_vm13  ;;  %vm5872_vm1 = vcmp.eq.s32.totalorder %v5104_v57, 1  ;;  %vm5293_vm3 = vcmp.eq.s32.totalorder %v4909_v10, 0  ;;  %v19222_v57 = vld [vmem:[#allocation27_spill] sm:$0xff] }
 0xc8d   : > { %10457 = vmatpush.msk.msra.mxu0 %vm6128_vm12, %v18392_v50  ;;  %vm6264_vm8 = vmor %vm5496_vm6, %vm5880_vm14  ;;  %vm5601_vm6 = vcmp.eq.s32.totalorder %v4833_v20, 1  ;;  %vm5344_vm12 = vcmp.eq.s32.totalorder %v4960_v0, 0  ;;  %v4825_v20 = vsub.s32 %v15841_v34, %v19222_v57  ;;  %v16021_v57 = vpop.f32.mrf.mxu1 }
 0xc8e   : > { %10472 = vmatpush.msk.msra.mxu1 %vm6264_vm8, %v18392_v50  ;;  %vm5989_vm11 = vmor %vm5221_vm5, %vm5605_vm7  ;;  %7589 = vmatmul.f32.gmra.mxu2 %v19220_v31  ;;  %vm5677_vm5 = vcmp.eq.s32.totalorder %v4909_v10, 1  ;;  %vm5480_vm8 = vcmp.eq.s32.totalorder %v5096_v5, 0  ;;  %v19224_v10 = vld [vmem:[#allocation43_spill] sm:$0xff] }
 0xc8f   : > { %10485 = vmatpush.msk.msra.mxu2 %vm5989_vm11, %v18392_v50  ;;  %vm6065_vm13 = vmor %vm5297_vm2, %vm5681_vm10  ;;  %vm5728_vm2 = vcmp.eq.s32.totalorder %v4960_v0, 1  ;;  %vm5213_vm11 = vcmp.eq.s32.totalorder %v4829_v11, 0  ;;  %v5080_v0 = vsub.s32 %v15564_v39, %v14921_v46  ;;  %v4897_v46 = vsub.s32 %v15841_v34, %v19196_v49  ;;  %v19225_v49 = vld [vmem:[#allocation53_spill] sm:$0xff] }
 0xc90   : > { %10498 = vmatpush.msk.msra.mxu3 %vm6065_vm13, %v18392_v50  ;;  %vm6120_vm14 = vmor %vm5352_vm9, %vm5736_vm4  ;;  %vm5864_vm9 = vcmp.eq.s32.totalorder %v5096_v5, 1  ;;  %vm5289_vm13 = vcmp.eq.s32.totalorder %v4905_v24, 0  ;;  %v4821_v5 = vsub.s32 %v15841_v34, %v19195_v3  ;;  %v16039_v3 = vpop.f32.mrf.mxu2 }
 0xc91   : > { %10458 = vmatpush.msk.msra.mxu0 %vm6120_vm14, %v18392_v50  ;;  %vm6256_vm7 = vmor %vm5488_vm0, %vm5872_vm1  ;;  %vm5597_vm0 = vcmp.eq.s32.totalorder %v4829_v11, 1  ;;  %vm5336_vm14 = vcmp.eq.s32.totalorder %v4952_v19, 0  ;;  %v4944_v11 = vsub.s32 %v15564_v39, %v19224_v10 }
 0xc92   : > { %10473 = vmatpush.msk.msra.mxu1 %vm6256_vm7, %v18392_v50  ;;  %vm5985_vm10 = vmor %vm5217_vm15, %vm5601_vm6  ;;  %7615 = vmatmul.f32.gmra.mxu3 %v19221_v41  ;;  %vm5673_vm15 = vcmp.eq.s32.totalorder %v4905_v24, 1  ;;  %v4901_v41 = vsub.s32 %v15841_v34, %v19223_v27  ;;  %vm5472_vm7 = vcmp.eq.s32.totalorder %v5088_v12, 0  ;;  %v16028_v10 = vpop.f32.mrf.mxu3  ;;  %v4936_v24 = vsub.s32 %v15564_v39, %v14951_v61 }
 0xc93   : > { %10486 = vmatpush.msk.msra.mxu2 %vm5985_vm10, %v18392_v50  ;;  %vm6061_vm4 = vmor %vm5293_vm3, %vm5677_vm5  ;;  %vm5720_vm3 = vcmp.eq.s32.totalorder %v4952_v19, 1  ;;  %vm5209_vm10 = vcmp.eq.s32.totalorder %v4825_v20, 0  ;;  %v5072_v19 = vsub.s32 %v15564_v39, %v14968_v2  ;;  %v16057_v2 = vpop.f32.mrf.mxu0 }
 0xc94   : > { %10499 = vmatpush.msk.msra.mxu3 %vm6061_vm4, %v18392_v50  ;;  %vm6112_vm1 = vmor %vm5344_vm12, %vm5728_vm2  ;;  %vm5856_vm12 = vcmp.eq.s32.totalorder %v5088_v12, 1  ;;  %vm5285_vm4 = vcmp.eq.s32.totalorder %v4901_v41, 0  ;;  %v4817_v12 = vsub.s32 %v15841_v34, %v19197_v53 }
 0xc95   : > { %10459 = vmatpush.msk.msra.mxu0 %vm6112_vm1, %v18392_v50  ;;  %vm6248_vm6 = vmor %vm5480_vm8, %vm5864_vm9  ;;  %vm5593_vm8 = vcmp.eq.s32.totalorder %v4825_v20, 1  ;;  %vm5328_vm1 = vcmp.eq.s32.totalorder %v4944_v11, 0  ;;  %v19226_v20 = vld [vmem:[#allocation72_spill] sm:$0xff] }
 0xc96   : > { %10474 = vmatpush.msk.msra.mxu1 %vm6248_vm6, %v18392_v50  ;;  %vm5981_vm5 = vmor %vm5213_vm11, %vm5597_vm0  ;;  %vm5669_vm11 = vcmp.eq.s32.totalorder %v4901_v41, 1  ;;  %vm5464_vm6 = vcmp.eq.s32.totalorder %v5080_v0, 0  ;;  %v19227_v41 = vld [vmem:[#allocation81_spill] sm:$0xff] }
 0xc97   : > { %10487 = vmatpush.msk.msra.mxu2 %vm5981_vm5, %v18392_v50  ;;  %vm6057_vm2 = vmor %vm5289_vm13, %vm5673_vm15  ;;  %vm5712_vm13 = vcmp.eq.s32.totalorder %v4944_v11, 1  ;;  %vm5205_vm5 = vcmp.eq.s32.totalorder %v4821_v5, 0  ;;  %v4928_v53 = vsub.s32 %v15564_v39, %v19227_v41  ;;  %v5064_v11 = vsub.s32 %v15564_v39, %v15029_v56 }
 0xc98   : > { %10500 = vmatpush.msk.msra.mxu3 %vm6057_vm2, %v18392_v50  ;;  %vm6104_vm9 = vmor %vm5336_vm14, %vm5720_vm3  ;;  %vm5848_vm14 = vcmp.eq.s32.totalorder %v5080_v0, 1  ;;  %vm5281_vm2 = vcmp.eq.s32.totalorder %v4897_v46, 0  ;;  %v19228_v0 = vld [vmem:[#allocation32_spill] sm:$0xff] }
 0xc99   : > { %10460 = vmatpush.msk.msra.mxu0 %vm6104_vm9, %v18392_v50  ;;  %vm6240_vm0 = vmor %vm5472_vm7, %vm5856_vm12  ;;  %vm5589_vm7 = vcmp.eq.s32.totalorder %v4821_v5, 1  ;;  %vm5320_vm9 = vcmp.eq.s32.totalorder %v4936_v24, 0  ;;  %v19229_v5 = vld [vmem:[#allocation75_spill] sm:$0xff] }
 0xc9a   : > { %10475 = vmatpush.msk.msra.mxu1 %vm6240_vm0, %v18392_v50  ;;  %vm5977_vm15 = vmor %vm5209_vm10, %vm5593_vm8  ;;  %7618 = vmatmul.f32.gmra.mxu3 %v19225_v49  ;;  %vm5665_vm10 = vcmp.eq.s32.totalorder %v4897_v46, 1  ;;  %v4893_v49 = vsub.s32 %v15841_v34, %v19226_v20  ;;  %vm5456_vm0 = vcmp.eq.s32.totalorder %v5072_v19, 0  ;;  %v4889_v41 = vsub.s32 %v15841_v34, %v19229_v5  ;;  %v16075_v20 = vpop.f32.mrf.mxu1 }
 0xc9b   : > { %10488 = vmatpush.msk.msra.mxu2 %vm5977_vm15, %v18392_v50  ;;  %vm6053_vm3 = vmor %vm5285_vm4, %vm5669_vm11  ;;  %vm5704_vm4 = vcmp.eq.s32.totalorder %v4936_v24, 1  ;;  %vm5201_vm15 = vcmp.eq.s32.totalorder %v4817_v12, 0  ;;  %v4813_v24 = vsub.s32 %v15841_v34, %v19228_v0  ;;  %v5056_v46 = vsub.s32 %v15564_v39, %v15039_v7  ;;  %v16083_v0 = vpop.f32.mrf.mxu3  ;;  %v16092_v7 = vpop.f32.mrf.mxu2 }
 0xc9c   : > { %10501 = vmatpush.msk.msra.mxu3 %vm6053_vm3, %v18392_v50  ;;  %vm6096_vm12 = vmor %vm5328_vm1, %vm5712_vm13  ;;  %vm5840_vm1 = vcmp.eq.s32.totalorder %v5072_v19, 1  ;;  %vm5277_vm3 = vcmp.eq.s32.totalorder %v4893_v49, 0  ;;  %19230 = vst [vmem:[#allocation55_spill] sm:$0xff] %v16083_v0  ;;  %v4809_v5 = vsub.s32 %v15841_v34, %v19201_v42  ;;  %v19231_v19 = vld [vmem:[#allocation76_spill] sm:$0xff] }
 0xc9d   : > { %10461 = vmatpush.msk.msra.mxu0 %vm6096_vm12, %v18392_v50  ;;  %vm6232_vm8 = vmor %vm5464_vm6, %vm5848_vm14  ;;  %vm5585_vm6 = vcmp.eq.s32.totalorder %v4817_v12, 1  ;;  %vm5661_vm12 = vcmp.eq.s32.totalorder %v4893_v49, 1  ;;  %v4885_v39 = vsub.s32 %v15841_v34, %v19231_v19  ;;  %19232 = vst [vmem:[#allocation97_spill] sm:$0xff] %v16092_v7  ;;  %v19233_v12 = vld [vmem:[#allocation78_spill] sm:$0xff]  ;;  %v4805_v49 = vsub.s32 %v15841_v34, %v19203_v17  ;;  %v16109_v7 = vpop.f32.mrf.mxu0 }
 0xc9e   : > { %10476 = vmatpush.msk.msra.mxu1 %vm6232_vm8, %v18392_v50  ;;  %vm5973_vm11 = vmor %vm5205_vm5, %vm5589_vm7  ;;  %vm5312_vm7 = vcmp.eq.s32.totalorder %v4928_v53, 0  ;;  %vm5448_vm8 = vcmp.eq.s32.totalorder %v5064_v11, 0  ;;  %v5049_v0 = vsub.s32 %v15841_v34, %v19233_v12  ;;  %19234 = vst [vmem:[#allocation56_spill] sm:$0xff] %v16109_v7 }
 0xc9f   : > { %10489 = vmatpush.msk.msra.mxu2 %vm5973_vm11, %v18392_v50  ;;  %vm6049_vm13 = vmor %vm5281_vm2, %vm5665_vm10  ;;  %vm5696_vm2 = vcmp.eq.s32.totalorder %v4928_v53, 1  ;;  %vm5197_vm11 = vcmp.eq.s32.totalorder %v4813_v24, 0  ;;  %v4881_v53 = vsub.s32 %v15841_v34, %v19204_v6  ;;  %v19236_v6 = vld [vmem:[#allocation80_spill] sm:$0xff] }
 0xca0   : > { %10502 = vmatpush.msk.msra.mxu3 %vm6049_vm13, %v18392_v50  ;;  %vm6088_vm14 = vmor %vm5320_vm9, %vm5704_vm4  ;;  %vm5832_vm9 = vcmp.eq.s32.totalorder %v5064_v11, 1  ;;  %vm5273_vm13 = vcmp.eq.s32.totalorder %v4889_v41, 0  ;;  %v19235_v11 = vld [vmem:[#allocation51_spill] sm:$0xff]  ;;  %v5177_v7 = vsub.s32 %v15841_v34, %v19236_v6  ;;  %v19241_v6 = vld [vmem:[#allocation92_spill] sm:$0xff] }
 0xca1   : > { %10462 = vmatpush.msk.msra.mxu0 %vm6088_vm14, %v18392_v50  ;;  %vm6224_vm5 = vmor %vm5456_vm0, %vm5840_vm1  ;;  %vm5581_vm0 = vcmp.eq.s32.totalorder %v4813_v24, 1  ;;  %vm5440_vm14 = vcmp.eq.s32.totalorder %v5056_v46, 0  ;;  %v5041_v24 = vsub.s32 %v15841_v34, %v19235_v11 }
 0xca2   : > { %10477 = vmatpush.msk.msra.mxu1 %vm6224_vm5, %v18392_v50  ;;  %vm5969_vm10 = vmor %vm5201_vm15, %vm5585_vm6  ;;  %vm5657_vm15 = vcmp.eq.s32.totalorder %v4889_v41, 1  ;;  %vm5193_vm5 = vcmp.eq.s32.totalorder %v4809_v5, 0  ;;  %v4801_v41 = vsub.s32 %v15841_v34, %v19205_v37 }
 0xca3   : > { %10490 = vmatpush.msk.msra.mxu2 %vm5969_vm10, %v18392_v50  ;;  %vm6045_vm4 = vmor %vm5277_vm3, %vm5661_vm12  ;;  %vm5824_vm3 = vcmp.eq.s32.totalorder %v5056_v46, 1  ;;  %vm5269_vm10 = vcmp.eq.s32.totalorder %v4885_v39, 0  ;;  %v4877_v46 = vsub.s32 %v15841_v34, %v19206_v18  ;;  %v19239_v18 = vld [vmem:[#allocation30_spill] sm:$0xff] }
 0xca4   : > { %10503 = vmatpush.msk.msra.mxu3 %vm6045_vm4, %v18392_v50  ;;  %vm6080_vm1 = vmor %vm5312_vm7, %vm5696_vm2  ;;  %vm5577_vm7 = vcmp.eq.s32.totalorder %v4809_v5, 1  ;;  %vm5433_vm4 = vcmp.eq.s32.totalorder %v5049_v0, 0  ;;  %v19238_v5 = vld [vmem:[#allocation85_spill] sm:$0xff] }
 0xca5   : > { %10463 = vmatpush.msk.msra.mxu0 %vm6080_vm1, %v18392_v50  ;;  %vm6216_vm6 = vmor %vm5448_vm8, %vm5832_vm9  ;;  %vm5653_vm8 = vcmp.eq.s32.totalorder %v4885_v39, 1  ;;  %vm5189_vm1 = vcmp.eq.s32.totalorder %v4805_v49, 0  ;;  %v16129_v39 = vpop.f32.mrf.mxu1  ;;  %v5033_v37 = vsub.s32 %v15841_v34, %v19238_v5  ;;  %v7126_v5 = vpop.f32.mrf.mxu2 }
 0xca6   : > { %10478 = vmatpush.msk.msra.mxu1 %vm6216_vm6, %v18392_v50  ;;  %vm5965_vm12 = vmor %vm5197_vm11, %vm5581_vm0  ;;  %7638 = vmatmul.f32.vlgmr.msra.gmra.mxu0 %v15025_v58  ;;  %vm5817_vm11 = vcmp.eq.s32.totalorder %v5049_v0, 1  ;;  %vm5265_vm6 = vcmp.eq.s32.totalorder %v4881_v53, 0  ;;  %19237 = vst [vmem:[#allocation98_spill] sm:$0xff] %v16129_v39  ;;  %v5169_v39 = vsub.s32 %v15841_v34, %v19239_v18  ;;  %v4797_v0 = vsub.s32 %v15841_v34, %v19207_v38 }
 0xca7   : > { %10491 = vmatpush.msk.msra.mxu2 %vm5965_vm12, %v18392_v50  ;;  %vm6041_vm2 = vmor %vm5273_vm13, %vm5657_vm15  ;;  %vm5573_vm13 = vcmp.eq.s32.totalorder %v4805_v49, 1  ;;  %vm5425_vm12 = vcmp.eq.s32.totalorder %v5041_v24, 0  ;;  %v19240_v49 = vld [vmem:[#allocation84_spill] sm:$0xff] }
 0xca8   : > { %10504 = vmatpush.msk.msra.mxu3 %vm6041_vm2, %v18392_v50  ;;  %vm6208_vm9 = vmor %vm5440_vm14, %vm5824_vm3  ;;  %vm5649_vm14 = vcmp.eq.s32.totalorder %v4881_v53, 1  ;;  %vm5561_vm2 = vcmp.eq.s32.totalorder %v5177_v7, 0  ;;  %v4873_v18 = vsub.s32 %v15841_v34, %v19240_v49  ;;  %v19242_v53 = vld [vmem:[#allocation89_spill] sm:$0xff] }
 0xca9   : > { %10479 = vmatpush.msk.msra.mxu1 %vm6208_vm9, %v18392_v50  ;;  %vm5961_vm0 = vmor %vm5193_vm5, %vm5577_vm7  ;;  %vm5809_vm5 = vcmp.eq.s32.totalorder %v5041_v24, 1  ;;  %vm5185_vm9 = vcmp.eq.s32.totalorder %v4801_v41, 0  ;;  %v5025_v38 = vsub.s32 %v15841_v34, %v19242_v53  ;;  %v5161_v24 = vsub.s32 %v15841_v34, %v14661_v62 }
 0xcaa   : > { %10492 = vmatpush.msk.msra.mxu2 %vm5961_vm0, %v18392_v50  ;;  %vm6037_vm15 = vmor %vm5269_vm10, %vm5653_vm8  ;;  %7667 = vmatmul.f32.vlgmr.msra.gmra.mxu1 %v15056_v48  ;;  %vm5945_vm10 = vcmp.eq.s32.totalorder %v5177_v7, 1  ;;  %v7155_v48 = vpop.f32.mrf.mxu3  ;;  %vm5261_vm0 = vcmp.eq.s32.totalorder %v4877_v46, 0  ;;  %v7184_v7 = vpop.f32.mrf.mxu0 }
 0xcab   : > { %10505 = vmatpush.msk.msra.mxu3 %vm6037_vm15, %v18392_v50  ;;  %vm6201_vm3 = vmor %vm5433_vm4, %vm5817_vm11  ;;  %vm5569_vm4 = vcmp.eq.s32.totalorder %v4801_v41, 1  ;;  %vm5417_vm15 = vcmp.eq.s32.totalorder %v5033_v37, 0  ;;  %v7156_v11 = vadd.f32 %v7155_v48, %v7126_v5  ;;  %v4869_v48 = vsub.s32 %v15841_v34, %v19209_v28 }
 0xcac   : > { %10512 = vmatpush.msk.msrb.mxu0 %vm6201_vm3, %v18392_v50  ;;  %vm5957_vm7 = vmor %vm5189_vm1, %vm5573_vm13  ;;  %vm5645_vm1 = vcmp.eq.s32.totalorder %v4877_v46, 1  ;;  %vm5553_vm3 = vcmp.eq.s32.totalorder %v5169_v39, 0  ;;  %v5017_v5 = vsub.s32 %v15841_v34, %v14663_v35 }
 0xcad   : > { %10493 = vmatpush.msk.msra.mxu2 %vm5957_vm7, %v18392_v50  ;;  %vm6033_vm8 = vmor %vm5265_vm6, %vm5649_vm14  ;;  %vm5801_vm6 = vcmp.eq.s32.totalorder %v5033_v37, 1  ;;  %vm5181_vm7 = vcmp.eq.s32.totalorder %v4797_v0, 0  ;;  %v7185_v41 = vadd.f32 %v7184_v7, %v7156_v11  ;;  %v5153_v11 = vsub.s32 %v15841_v34, %v14673_v51  ;;  %v7213_v46 = vpop.f32.mrf.mxu1 }
 0xcae   : > { %10506 = vmatpush.msk.msra.mxu3 %vm6033_vm8, %v18392_v50  ;;  %vm6193_vm11 = vmor %vm5425_vm12, %vm5809_vm5  ;;  %7641 = vmatmul.f32.gmra.mxu0 %v19241_v6  ;;  %vm5937_vm12 = vcmp.eq.s32.totalorder %v5169_v39, 1  ;;  %v16163_v6 = vadd.s32 768, %v19015_v29  ;;  %vm5257_vm8 = vcmp.eq.s32.totalorder %v4873_v18, 0  ;;  %v4865_v39 = vsub.s32 %v15841_v34, %v19210_v40 }
 0xcaf   : > { %10513 = vmatpush.msk.msrb.mxu0 %vm6193_vm11, %v18392_v50  ;;  %vm6329_vm13 = vmor %vm5561_vm2, %vm5945_vm10  ;;  %vm5565_vm2 = vcmp.eq.s32.totalorder %v4797_v0, 1  ;;  %vm5409_vm11 = vcmp.eq.s32.totalorder %v5025_v38, 0  ;;  %v7214_v7 = vadd.f32 %v7213_v46, %v7185_v41  ;;  %v19243_v0 = vld [vmem:[#allocation68_spill] sm:$0xff] }
 0xcb0   : > { %10528 = vmatpush.msk.msrb.mxu1 %vm6329_vm13, %v18392_v50  ;;  %vm5953_vm14 = vmor %vm5185_vm9, %vm5569_vm4  ;;  %vm5641_vm9 = vcmp.eq.s32.totalorder %v4873_v18, 1  ;;  %vm5545_vm13 = vcmp.eq.s32.totalorder %v5161_v24, 0  ;;  %v4858_v37 = vsub.s32 %v16163_v6, %v19176_v14  ;;  %v5009_v14 = vsub.s32 %v15841_v34, %v14692_v16  ;;  %v19244_v18 = vld [vmem:[#allocation91_spill] sm:$0xff] }
 0xcb1   : > { %10494 = vmatpush.msk.msra.mxu2 %vm5953_vm14, %v18392_v50  ;;  %vm6029_vm5 = vmor %vm5261_vm0, %vm5645_vm1  ;;  %vm5793_vm0 = vcmp.eq.s32.totalorder %v5025_v38, 1  ;;  %vm5253_vm14 = vcmp.eq.s32.totalorder %v4869_v48, 0  ;;  %v5145_v41 = vsub.s32 %v15841_v34, %v19244_v18  ;;  %8108 = vrot.lane.b32.xlu0 %v7214_v7, %s11716_s1  ;;  %v4854_v38 = vsub.s32 %v16163_v6, %v19179_v32  ;;  %v7233_v7 = vpop.f32.mrf.mxu2 }
 0xcb2   : > { %10507 = vmatpush.msk.msra.mxu3 %vm6029_vm5, %v18392_v50  ;;  %vm6185_vm10 = vmor %vm5417_vm15, %vm5801_vm6  ;;  %7670 = vmatmul.f32.gmra.mxu1 %v15138_v21  ;;  %vm5929_vm15 = vcmp.eq.s32.totalorder %v5161_v24, 1  ;;  %vm5401_vm5 = vcmp.eq.s32.totalorder %v5017_v5, 0  ;;  %v4861_v24 = vsub.s32 %v15841_v34, %v19211_v26  ;;  %v7262_v46 = vpop.f32.mrf.mxu3 }
 0xcb3   : > { %10514 = vmatpush.msk.msrb.mxu0 %vm6185_vm10, %v18392_v50  ;;  %vm6321_vm4 = vmor %vm5553_vm3, %vm5937_vm12  ;;  %vm5637_vm3 = vcmp.eq.s32.totalorder %v4869_v48, 1  ;;  %vm5537_vm10 = vcmp.eq.s32.totalorder %v5153_v11, 0  ;;  %v5001_v48 = vsub.s32 %v15841_v34, %v14696_v60 }
 0xcb4   : > { %10529 = vmatpush.msk.msrb.mxu1 %vm6321_vm4, %v18392_v50  ;;  %vm5949_vm1 = vmor %vm5181_vm7, %vm5565_vm2  ;;  %vm5785_vm7 = vcmp.eq.s32.totalorder %v5017_v5, 1  ;;  %vm5242_vm4 = vcmp.eq.s32.totalorder %v4858_v37, 0  ;;  %v5137_v5 = vsub.s32 %v15841_v34, %v14712_v4 }
 0xcb5   : > { %10495 = vmatpush.msk.msra.mxu2 %vm5949_vm1, %v18392_v50  ;;  %vm6025_vm6 = vmor %vm5257_vm8, %vm5641_vm9  ;;  %vm5921_vm8 = vcmp.eq.s32.totalorder %v5153_v11, 1  ;;  %vm5249_vm1 = vcmp.eq.s32.totalorder %v4865_v39, 0  ;;  %v4850_v11 = vsub.s32 %v16163_v6, %v19182_v44  ;;  %v19245_v44 = vld [vmem:[#allocation34_spill] sm:$0xff] }
 0xcb6   : > { %10508 = vmatpush.msk.msra.mxu3 %vm6025_vm6, %v18392_v50  ;;  %vm6177_vm12 = vmor %vm5409_vm11, %vm5793_vm0  ;;  %7696 = vmatmul.f32.vlgmr.msra.gmra.mxu2 %v19243_v0  ;;  %vm5626_vm11 = vcmp.eq.s32.totalorder %v4858_v37, 1  ;;  %vm5393_vm6 = vcmp.eq.s32.totalorder %v5009_v14, 0  ;;  %v4993_v37 = vsub.s32 %v15841_v34, %v14714_v9  ;;  %v7291_v9 = vpop.f32.mrf.mxu0 }
 0xcb7   : > { %10515 = vmatpush.msk.msrb.mxu0 %vm6177_vm12, %v18392_v50  ;;  %vm6313_vm2 = vmor %vm5545_vm13, %vm5929_vm15  ;;  %vm5633_vm13 = vcmp.eq.s32.totalorder %v4865_v39, 1  ;;  %vm5529_vm12 = vcmp.eq.s32.totalorder %v5145_v41, 0  ;;  %v7147_v39 = vadd.f32 %v15972_v52, %v15984_v63  ;;  %v4846_v63 = vsub.s32 %v16163_v6, %v19183_v1 }
 0xcb8   : > { %10530 = vmatpush.msk.msrb.mxu1 %vm6313_vm2, %v18392_v50  ;;  %vm6021_vm9 = vmor %vm5253_vm14, %vm5637_vm3  ;;  %7644 = vmatmul.f32.gmra.mxu0 %v15171_v25  ;;  %vm5777_vm14 = vcmp.eq.s32.totalorder %v5009_v14, 1  ;;  %vm5238_vm2 = vcmp.eq.s32.totalorder %v4854_v38, 0  ;;  %v5129_v14 = vsub.s32 %v15841_v34, %v19245_v44  ;;  %v7263_v52 = vadd.f32 %v7262_v46, %v7233_v7 }
 0xcb9   : > { %10509 = vmatpush.msk.msra.mxu3 %vm6021_vm9, %v18392_v50  ;;  %vm6169_vm0 = vmor %vm5401_vm5, %vm5785_vm7  ;;  %vm5913_vm5 = vcmp.eq.s32.totalorder %v5145_v41, 1  ;;  %vm5245_vm9 = vcmp.eq.s32.totalorder %v4861_v24, 0  ;;  %v7176_v41 = vadd.f32 %v16000_v15, %v7147_v39  ;;  %v4985_v15 = vsub.s32 %v15841_v34, %v14746_v22  ;;  %v19249_v39 = vld [vmem:[#allocation62_spill] sm:$0xff] }
 0xcba   : > { %10516 = vmatpush.msk.msrb.mxu0 %vm6169_vm0, %v18392_v50  ;;  %vm6305_vm15 = vmor %vm5537_vm10, %vm5921_vm8  ;;  %7673 = vmatmul.f32.gmra.mxu1 %v15181_v36  ;;  %vm5622_vm10 = vcmp.eq.s32.totalorder %v4854_v38, 1  ;;  %vm5385_vm0 = vcmp.eq.s32.totalorder %v5001_v48, 0  ;;  %v19247_v38 = vld [vmem:[#allocation54_spill] sm:$0xff]  ;;  %v5121_v46 = vsub.s32 %v15841_v34, %v19214_v23  ;;  %v4918_v7 = vsub.s32 %v16163_v6, %v19249_v39 }
 0xcbb   : > { %10531 = vmatpush.msk.msrb.mxu1 %vm6305_vm15, %v18392_v50  ;;  %vm6010_vm3 = vmor %vm5242_vm4, %vm5626_vm11  ;;  %vm5629_vm4 = vcmp.eq.s32.totalorder %v4861_v24, 1  ;;  %vm5521_vm15 = vcmp.eq.s32.totalorder %v5137_v5, 0  ;;  %v7292_v24 = vadd.f32 %v7291_v9, %v7263_v52  ;;  %v19248_v9 = vld [vmem:[#allocation40_spill] sm:$0xff]  ;;  %v5113_v52 = vsub.s32 %v15841_v34, %v19215_v47 }
 0xcbc   : > { %10544 = vmatpush.msk.msrb.mxu2 %vm6010_vm3, %v18392_v50  ;;  %vm6017_vm7 = vmor %vm5249_vm1, %vm5633_vm13  ;;  %vm5769_vm1 = vcmp.eq.s32.totalorder %v5001_v48, 1  ;;  %vm5234_vm3 = vcmp.eq.s32.totalorder %v4850_v11, 0  ;;  %v4842_v48 = vsub.s32 %v16163_v6, %v19248_v9 }
 0xcbd   : > { %10510 = vmatpush.msk.msra.mxu3 %vm6017_vm7, %v18392_v50  ;;  %vm6161_vm8 = vmor %vm5393_vm6, %vm5777_vm14  ;;  %vm5905_vm6 = vcmp.eq.s32.totalorder %v5137_v5, 1  ;;  %vm5377_vm7 = vcmp.eq.s32.totalorder %v4993_v37, 0  ;;  %v7205_v5 = vadd.f32 %v16021_v57, %v7176_v41  ;;  %v4977_v57 = vsub.s32 %v15841_v34, %v14767_v55  ;;  %v19250_v41 = vld [vmem:[#allocation45_spill] sm:$0xff] }
 0xcbe   : > { %10517 = vmatpush.msk.msrb.mxu0 %vm6161_vm8, %v18392_v50  ;;  %vm6297_vm11 = vmor %vm5529_vm12, %vm5913_vm5  ;;  %7699 = vmatmul.f32.gmra.mxu2 %v14875_v45  ;;  %vm5618_vm12 = vcmp.eq.s32.totalorder %v4850_v11, 1  ;;  %v19246_v45 = vld [vmem:[#allocation61_spill] sm:$0xff]  ;;  %vm5513_vm8 = vcmp.eq.s32.totalorder %v5129_v14, 0  ;;  %v7320_v11 = vpop.f32.mrf.mxu1 }
 0xcbf   : > { %10532 = vmatpush.msk.msrb.mxu1 %vm6297_vm11, %v18392_v50  ;;  %vm6006_vm13 = vmor %vm5238_vm2, %vm5622_vm10  ;;  %v4922_v44 = vsub.s32 %v16163_v6, %v19246_v45  ;;  %vm5761_vm2 = vcmp.eq.s32.totalorder %v4993_v37, 1  ;;  %vm5230_vm11 = vcmp.eq.s32.totalorder %v4846_v63, 0  ;;  %v7321_v37 = vadd.f32 %v7320_v11, %v7292_v24 }
 0xcc0   : > { %10545 = vmatpush.msk.msrb.mxu2 %vm6006_vm13, %v18392_v50  ;;  %vm6013_vm14 = vmor %vm5245_vm9, %vm5629_vm4  ;;  %7647 = vmatmul.f32.gmra.mxu0 %v19247_v38  ;;  %vm5897_vm9 = vcmp.eq.s32.totalorder %v5129_v14, 1  ;;  %v19251_v14 = vld [vmem:[#allocation41_spill] sm:$0xff] }
 0xcc1   : > { %10511 = vmatpush.msk.msra.mxu3 %vm6013_vm14, %v18392_v50  ;;  %vm6153_vm5 = vmor %vm5385_vm0, %vm5769_vm1  ;;  %vm5614_vm0 = vcmp.eq.s32.totalorder %v4846_v63, 1  ;;  %vm5306_vm13 = vcmp.eq.s32.totalorder %v4922_v44, 0  ;;  %vm5369_vm14 = vcmp.eq.s32.totalorder %v4985_v15, 0  ;;  %v4838_v24 = vsub.s32 %v16163_v6, %v19251_v14 }
 0xcc2   : > { %10518 = vmatpush.msk.msrb.mxu0 %vm6153_vm5, %v18392_v50  ;;  %vm6289_vm10 = vmor %vm5521_vm15, %vm5905_vm6  ;;  %7725 = vmatmul.f32.vlgmr.msra.gmra.mxu3 %v19213_v54  ;;  %vm5690_vm15 = vcmp.eq.s32.totalorder %v4922_v44, 1  ;;  %vm5505_vm5 = vcmp.eq.s32.totalorder %v5121_v46, 0  ;;  %v11229_v11 = vpack.i.bf16 %v7321_v37, %v7205_v5  ;;  %v4914_v63 = vsub.s32 %v16163_v6, %v19188_v43  ;;  %v19253_v37 = vld [vmem:[#allocation74_spill] sm:$0xff] }
 0xcc3   : > { %10533 = vmatpush.msk.msrb.mxu1 %vm6289_vm10, %v18392_v50  ;;  %vm6002_vm4 = vmor %vm5234_vm3, %vm5618_vm12  ;;  %vm5753_vm3 = vcmp.eq.s32.totalorder %v4985_v15, 1  ;;  %vm5226_vm10 = vcmp.eq.s32.totalorder %v4842_v48, 0  ;;  %v4969_v44 = vsub.s32 %v15841_v34, %v19217_v8  ;;  %v19252_v15 = vld [vmem:[#allocation67_spill] sm:$0xff] }
 0xcc4   : > { %10546 = vmatpush.msk.msrb.mxu2 %vm6002_vm4, %v18392_v50  ;;  %vm6145_vm1 = vmor %vm5377_vm7, %vm5761_vm2  ;;  %7676 = vmatmul.f32.gmra.mxu1 %v15252_v33  ;;  %vm5889_vm7 = vcmp.eq.s32.totalorder %v5121_v46, 1  ;;  %vm5302_vm4 = vcmp.eq.s32.totalorder %v4918_v7, 0  ;;  %v5105_v5 = vsub.s32 %v15841_v34, %v19252_v15  ;;  %v4834_v46 = vsub.s32 %v16163_v6, %v19189_v30  ;;  %v7236_v15 = vpop.f32.mrf.mxu2 }
 0xcc5   : > { %10519 = vmatpush.msk.msrb.mxu0 %vm6145_vm1, %v18392_v50  ;;  %vm6281_vm6 = vmor %vm5513_vm8, %vm5897_vm9  ;;  %vm5610_vm8 = vcmp.eq.s32.totalorder %v4842_v48, 1  ;;  %vm5361_vm1 = vcmp.eq.s32.totalorder %v4977_v57, 0  ;;  %11230 = vrot.lane.b32.xlu0 %v11229_v11, %s11716_s1  ;;  %v19254_v48 = vld [vmem:[#allocation65_spill] sm:$0xff] }
 0xcc6   : > { %10534 = vmatpush.msk.msrb.mxu1 %vm6281_vm6, %v18392_v50  ;;  %vm5998_vm12 = vmor %vm5230_vm11, %vm5614_vm0  ;;  %7702 = vmatmul.f32.gmra.mxu2 %v19250_v41  ;;  %vm5686_vm11 = vcmp.eq.s32.totalorder %v4918_v7, 1  ;;  %vm5497_vm6 = vcmp.eq.s32.totalorder %v5113_v52, 0  ;;  %v4910_v11 = vsub.s32 %v16163_v6, %v19254_v48  ;;  %v19255_v7 = vld [vmem:[#allocation25_spill] sm:$0xff] }
 0xcc7   : > { %10547 = vmatpush.msk.msrb.mxu2 %vm5998_vm12, %v18392_v50  ;;  %vm6074_vm2 = vmor %vm5306_vm13, %vm5690_vm15  ;;  %vm5745_vm13 = vcmp.eq.s32.totalorder %v4977_v57, 1  ;;  %vm5222_vm12 = vcmp.eq.s32.totalorder %v4838_v24, 0  ;;  %v4961_v30 = vsub.s32 %v15841_v34, %v19255_v7  ;;  %v7150_v57 = vadd.f32 %v16028_v10, %v16039_v3  ;;  %v19256_v3 = vld [vmem:[#allocation49_spill] sm:$0xff] }
 0xcc8   : > { %10560 = vmatpush.msk.msrb.mxu3 %vm6074_vm2, %v18392_v50  ;;  %vm6137_vm9 = vmor %vm5369_vm14, %vm5753_vm3  ;;  %vm5881_vm14 = vcmp.eq.s32.totalorder %v5113_v52, 1  ;;  %vm5298_vm2 = vcmp.eq.s32.totalorder %v4914_v63, 0  ;;  %v5097_v52 = vsub.s32 %v15841_v34, %v19122_v59  ;;  %v4830_v10 = vsub.s32 %v16163_v6, %v19256_v3 }
 0xcc9   : > { %10520 = vmatpush.msk.msrb.mxu0 %vm6137_vm9, %v18392_v50  ;;  %vm6273_vm0 = vmor %vm5505_vm5, %vm5889_vm7  ;;  %vm5606_vm5 = vcmp.eq.s32.totalorder %v4838_v24, 1  ;;  %vm5353_vm9 = vcmp.eq.s32.totalorder %v4969_v44, 0  ;;  %v7179_v24 = vadd.f32 %v16057_v2, %v7150_v57  ;;  %v4953_v2 = vsub.s32 %v15841_v34, %v14840_v13  ;;  %v19259_v57 = vld [vmem:[#allocation79_spill] sm:$0xff] }
 0xcca   : > { %10535 = vmatpush.msk.msrb.mxu1 %vm6273_vm0, %v18392_v50  ;;  %vm5994_vm15 = vmor %vm5226_vm10, %vm5610_vm8  ;;  %7728 = vmatmul.f32.gmra.mxu3 %v19253_v37  ;;  %vm5682_vm10 = vcmp.eq.s32.totalorder %v4914_v63, 1  ;;  %v7265_v37 = vpop.f32.mrf.mxu3  ;;  %vm5489_vm0 = vcmp.eq.s32.totalorder %v5105_v5, 0  ;;  %v7294_v63 = vpop.f32.mrf.mxu0 }
 0xccb   : > { %10548 = vmatpush.msk.msrb.mxu2 %vm5994_vm15, %v18392_v50  ;;  %vm6070_vm3 = vmor %vm5302_vm4, %vm5686_vm11  ;;  %vm5737_vm4 = vcmp.eq.s32.totalorder %v4969_v44, 1  ;;  %vm5218_vm15 = vcmp.eq.s32.totalorder %v4834_v46, 0  ;;  %v7266_v7 = vadd.f32 %v7265_v37, %v7236_v15  ;;  %v19258_v44 = vld [vmem:[#allocation42_spill] sm:$0xff] }
 0xccc   : > { %10561 = vmatpush.msk.msrb.mxu3 %vm6070_vm3, %v18392_v50  ;;  %vm6129_vm7 = vmor %vm5361_vm1, %vm5745_vm13  ;;  %vm5873_vm1 = vcmp.eq.s32.totalorder %v5105_v5, 1  ;;  %vm5294_vm3 = vcmp.eq.s32.totalorder %v4910_v11, 0  ;;  %v5089_v37 = vsub.s32 %v15841_v34, %v19258_v44  ;;  %v19260_v5 = vld [vmem:[#allocation27_spill] sm:$0xff] }
 0xccd   : > { %10521 = vmatpush.msk.msrb.mxu0 %vm6129_vm7, %v18392_v50  ;;  %vm6265_vm8 = vmor %vm5497_vm6, %vm5881_vm14  ;;  %vm5602_vm6 = vcmp.eq.s32.totalorder %v4834_v46, 1  ;;  %vm5345_vm7 = vcmp.eq.s32.totalorder %v4961_v30, 0  ;;  %v7295_v15 = vadd.f32 %v7294_v63, %v7266_v7  ;;  %v4826_v7 = vsub.s32 %v16163_v6, %v19260_v5 }
 0xcce   : > { %10536 = vmatpush.msk.msrb.mxu1 %vm6265_vm8, %v18392_v50  ;;  %vm5990_vm11 = vmor %vm5222_vm12, %vm5606_vm5  ;;  %7705 = vmatmul.f32.gmra.mxu2 %v19220_v31  ;;  %vm5678_vm12 = vcmp.eq.s32.totalorder %v4910_v11, 1  ;;  %v19257_v31 = vld [vmem:[#allocation66_spill] sm:$0xff]  ;;  %vm5481_vm8 = vcmp.eq.s32.totalorder %v5097_v52, 0  ;;  %v7208_v46 = vadd.f32 %v16075_v20, %v7179_v24  ;;  %v4902_v63 = vsub.s32 %v16163_v6, %v19223_v27  ;;  %v19261_v11 = vld [vmem:[#allocation43_spill] sm:$0xff] }
 0xccf   : > { %10549 = vmatpush.msk.msrb.mxu2 %vm5990_vm11, %v18392_v50  ;;  %vm6066_vm13 = vmor %vm5298_vm2, %vm5682_vm10  ;;  %v4906_v59 = vsub.s32 %v16163_v6, %v19257_v31  ;;  %vm5729_vm2 = vcmp.eq.s32.totalorder %v4961_v30, 1  ;;  %vm5214_vm11 = vcmp.eq.s32.totalorder %v4830_v10, 0  ;;  %v4945_v20 = vsub.s32 %v15841_v34, %v19261_v11  ;;  %v19262_v30 = vld [vmem:[#allocation44_spill] sm:$0xff] }
 0xcd0   : > { %10562 = vmatpush.msk.msrb.mxu3 %vm6066_vm13, %v18392_v50  ;;  %vm6121_vm14 = vmor %vm5353_vm9, %vm5737_vm4  ;;  %vm5865_vm9 = vcmp.eq.s32.totalorder %v5097_v52, 1  ;;  %v5081_v27 = vsub.s32 %v15841_v34, %v19262_v30  ;;  %v19263_v52 = vld [vmem:[#allocation28_spill] sm:$0xff] }
 0xcd1   : > { %10522 = vmatpush.msk.msrb.mxu0 %vm6121_vm14, %v18392_v50  ;;  %vm6257_vm5 = vmor %vm5489_vm0, %vm5873_vm1  ;;  %vm5598_vm0 = vcmp.eq.s32.totalorder %v4830_v10, 1  ;;  %vm5290_vm13 = vcmp.eq.s32.totalorder %v4906_v59, 0  ;;  %vm5337_vm14 = vcmp.eq.s32.totalorder %v4953_v2, 0  ;;  %v19264_v10 = vld [vmem:[#allocation71_spill] sm:$0xff] }
 0xcd2   : > { %10537 = vmatpush.msk.msrb.mxu1 %vm6257_vm5, %v18392_v50  ;;  %vm5986_vm10 = vmor %vm5218_vm15, %vm5602_vm6  ;;  %7731 = vmatmul.f32.gmra.mxu3 %v19259_v57  ;;  %vm5674_vm15 = vcmp.eq.s32.totalorder %v4906_v59, 1  ;;  %v7323_v57 = vpop.f32.mrf.mxu1  ;;  %vm5473_vm5 = vcmp.eq.s32.totalorder %v5089_v37, 0  ;;  %v4898_v30 = vsub.s32 %v16163_v6, %v19264_v10  ;;  %v4937_v59 = vsub.s32 %v15841_v34, %v14951_v61 }
 0xcd3   : > { %10550 = vmatpush.msk.msrb.mxu2 %vm5986_vm10, %v18392_v50  ;;  %vm6062_vm4 = vmor %vm5294_vm3, %vm5678_vm12  ;;  %vm5721_vm3 = vcmp.eq.s32.totalorder %v4953_v2, 1  ;;  %v7324_v24 = vadd.f32 %v7323_v57, %v7295_v15  ;;  %vm5210_vm10 = vcmp.eq.s32.totalorder %v4826_v7, 0  ;;  %v4822_v15 = vsub.s32 %v16163_v6, %v19263_v52  ;;  %v19265_v2 = vld [vmem:[#allocation46_spill] sm:$0xff] }
 0xcd4   : > { %10563 = vmatpush.msk.msrb.mxu3 %vm6062_vm4, %v18392_v50  ;;  %vm6113_vm1 = vmor %vm5345_vm7, %vm5729_vm2  ;;  %vm5857_vm7 = vcmp.eq.s32.totalorder %v5089_v37, 1  ;;  %vm5286_vm4 = vcmp.eq.s32.totalorder %v4902_v63, 0  ;;  %v19267_v37 = vld [vmem:[#allocation29_spill] sm:$0xff] }
 0xcd5   : > { %10523 = vmatpush.msk.msrb.mxu0 %vm6113_vm1, %v18392_v50  ;;  %vm6249_vm6 = vmor %vm5481_vm8, %vm5865_vm9  ;;  %vm5594_vm8 = vcmp.eq.s32.totalorder %v4826_v7, 1  ;;  %v11234_v57 = vpack.i.bf16 %v7324_v24, %v7208_v46  ;;  %vm5329_vm1 = vcmp.eq.s32.totalorder %v4945_v20, 0  ;;  %v5073_v46 = vsub.s32 %v15841_v34, %v19265_v2  ;;  %v19266_v24 = vld [vmem:[#allocation53_spill] sm:$0xff]  ;;  %v19268_v7 = vld [vmem:[#allocation72_spill] sm:$0xff] }
 0xcd6   : > { %10538 = vmatpush.msk.msrb.mxu1 %vm6249_vm6, %v18392_v50  ;;  %vm5982_vm12 = vmor %vm5214_vm11, %vm5598_vm0  ;;  %vm5670_vm11 = vcmp.eq.s32.totalorder %v4902_v63, 1  ;;  %vm5465_vm6 = vcmp.eq.s32.totalorder %v5081_v27, 0  ;;  %v19269_v63 = vld [vmem:[#allocation81_spill] sm:$0xff] }
 0xcd7   : > { %10551 = vmatpush.msk.msrb.mxu2 %vm5982_vm12, %v18392_v50  ;;  %vm6058_vm2 = vmor %vm5290_vm13, %vm5674_vm15  ;;  %vm5713_vm13 = vcmp.eq.s32.totalorder %v4945_v20, 1  ;;  %11235 = vrot.lane.b32.xlu1 %v11234_v57, %s11716_s1  ;;  %vm5206_vm12 = vcmp.eq.s32.totalorder %v4822_v15, 0  ;;  %v4818_v57 = vsub.s32 %v16163_v6, %v19267_v37  ;;  %v5065_v20 = vsub.s32 %v15841_v34, %v15029_v56  ;;  %v16414_v37 = vpop.f32.mrf.mxu2 }
 0xcd8   : > { %10564 = vmatpush.msk.msrb.mxu3 %vm6058_vm2, %v18392_v50  ;;  %vm6105_vm9 = vmor %vm5337_vm14, %vm5721_vm3  ;;  %vm5849_vm14 = vcmp.eq.s32.totalorder %v5081_v27, 1  ;;  %vm5282_vm2 = vcmp.eq.s32.totalorder %v4898_v30, 0  ;;  %v19270_v27 = vld [vmem:[#allocation32_spill] sm:$0xff] }
 0xcd9   : > { %10524 = vmatpush.msk.msrb.mxu0 %vm6105_vm9, %v18392_v50  ;;  %vm6241_vm0 = vmor %vm5473_vm5, %vm5857_vm7  ;;  %vm5590_vm5 = vcmp.eq.s32.totalorder %v4822_v15, 1  ;;  %vm5321_vm9 = vcmp.eq.s32.totalorder %v4937_v59, 0  ;;  %v4929_v15 = vsub.s32 %v15841_v34, %v19269_v63  ;;  %v19271_v63 = vld [vmem:[#allocation75_spill] sm:$0xff] }
 0xcda   : > { %10539 = vmatpush.msk.msrb.mxu1 %vm6241_vm0, %v18392_v50  ;;  %vm5978_vm15 = vmor %vm5210_vm10, %vm5594_vm8  ;;  %7734 = vmatmul.f32.gmra.mxu3 %v19266_v24  ;;  %vm5666_vm10 = vcmp.eq.s32.totalorder %v4898_v30, 1  ;;  %v4894_v24 = vsub.s32 %v16163_v6, %v19268_v7  ;;  %vm5457_vm0 = vcmp.eq.s32.totalorder %v5073_v46, 0  ;;  %v4814_v7 = vsub.s32 %v16163_v6, %v19270_v27  ;;  %v19272_v30 = vld [vmem:[#allocation52_spill] sm:$0xff] }
 0xcdb   : > { %10552 = vmatpush.msk.msrb.mxu2 %vm5978_vm15, %v18392_v50  ;;  %vm6054_vm3 = vmor %vm5286_vm4, %vm5670_vm11  ;;  %vm5705_vm4 = vcmp.eq.s32.totalorder %v4937_v59, 1  ;;  %vm5841_vm15 = vcmp.eq.s32.totalorder %v5073_v46, 1  ;;  %v4890_v56 = vsub.s32 %v16163_v6, %v19271_v63  ;;  %v16429_v59 = vpop.f32.mrf.mxu3  ;;  %v4810_v27 = vsub.s32 %v16163_v6, %v19201_v42  ;;  %v19278_v42 = vld [vmem:[#allocation83_spill] sm:$0xff] }
 0xcdc   : > { %10565 = vmatpush.msk.msrb.mxu3 %vm6054_vm3, %v18392_v50  ;;  %vm6097_vm7 = vmor %vm5329_vm1, %vm5713_vm13  ;;  %vm5202_vm13 = vcmp.eq.s32.totalorder %v4818_v57, 0  ;;  %vm5278_vm3 = vcmp.eq.s32.totalorder %v4894_v24, 0  ;;  %v4886_v46 = vsub.s32 %v16163_v6, %v19231_v19  ;;  %v19276_v19 = vld [vmem:[#allocation21_spill] sm:$0xff] }
 0xcdd   : > { %10525 = vmatpush.msk.msrb.mxu0 %vm6097_vm7, %v18392_v50  ;;  %vm6233_vm8 = vmor %vm5465_vm6, %vm5849_vm14  ;;  %vm5586_vm6 = vcmp.eq.s32.totalorder %v4818_v57, 1  ;;  %vm5313_vm7 = vcmp.eq.s32.totalorder %v4929_v15, 0  ;;  %v5057_v57 = vsub.s32 %v15841_v34, %v19272_v30  ;;  %v5050_v34 = vsub.s32 %v16163_v6, %v19233_v12  ;;  %v16449_v12 = vpop.f32.mrf.mxu0  ;;  %v16470_v30 = vpop.f32.mrf.mxu1 }
 0xcde   : > { %10540 = vmatpush.msk.msrb.mxu1 %vm6233_vm8, %v18392_v50  ;;  %vm5974_vm11 = vmor %vm5206_vm12, %vm5590_vm5  ;;  %vm5662_vm12 = vcmp.eq.s32.totalorder %v4894_v24, 1  ;;  %vm5449_vm8 = vcmp.eq.s32.totalorder %v5065_v20, 0  ;;  %v4806_v24 = vsub.s32 %v16163_v6, %v19203_v17 }
 0xcdf   : > { %10553 = vmatpush.msk.msrb.mxu2 %vm5974_vm11, %v18392_v50  ;;  %vm6050_vm1 = vmor %vm5282_vm2, %vm5666_vm10  ;;  %vm5697_vm2 = vcmp.eq.s32.totalorder %v4929_v15, 1  ;;  %vm5833_vm11 = vcmp.eq.s32.totalorder %v5065_v20, 1  ;;  %v19274_v20 = vld [vmem:[#allocation51_spill] sm:$0xff] }
 0xce0   : > { %10566 = vmatpush.msk.msrb.mxu3 %vm6050_vm1, %v18392_v50  ;;  %vm6089_vm14 = vmor %vm5321_vm9, %vm5705_vm4  ;;  %vm5198_vm4 = vcmp.eq.s32.totalorder %v4814_v7, 0  ;;  %vm5274_vm1 = vcmp.eq.s32.totalorder %v4890_v56, 0  ;;  %v5042_v17 = vsub.s32 %v16163_v6, %v19274_v20  ;;  %v4802_v20 = vsub.s32 %v16163_v6, %v19276_v19 }
 0xce1   : > { %10526 = vmatpush.msk.msrb.mxu0 %vm6089_vm14, %v18392_v50  ;;  %vm6225_vm5 = vmor %vm5457_vm0, %vm5841_vm15  ;;  %vm5582_vm0 = vcmp.eq.s32.totalorder %v4814_v7, 1  ;;  %vm5441_vm14 = vcmp.eq.s32.totalorder %v5057_v57, 0  ;;  %v19273_v7 = vld [vmem:[#allocation82_spill] sm:$0xff] }
 0xce2   : > { %10541 = vmatpush.msk.msrb.mxu1 %vm6225_vm5, %v18392_v50  ;;  %vm5970_vm10 = vmor %vm5202_vm13, %vm5586_vm6  ;;  %vm5658_vm13 = vcmp.eq.s32.totalorder %v4890_v56, 1  ;;  %vm5194_vm5 = vcmp.eq.s32.totalorder %v4810_v27, 0  ;;  %v4882_v15 = vsub.s32 %v16163_v6, %v19273_v7  ;;  %v19275_v7 = vld [vmem:[#allocation80_spill] sm:$0xff]  ;;  %v7242_v56 = vpop.f32.mrf.mxu2 }
 0xce3   : > { %10554 = vmatpush.msk.msrb.mxu2 %vm5970_vm10, %v18392_v50  ;;  %vm6046_vm9 = vmor %vm5278_vm3, %vm5662_vm12  ;;  %vm5825_vm3 = vcmp.eq.s32.totalorder %v5057_v57, 1  ;;  %vm5270_vm10 = vcmp.eq.s32.totalorder %v4886_v46, 0  ;;  %v19277_v57 = vld [vmem:[#allocation90_spill] sm:$0xff]  ;;  %v7271_v19 = vpop.f32.mrf.mxu3 }
 0xce4   : > { %10567 = vmatpush.msk.msrb.mxu3 %vm6046_vm9, %v18392_v50  ;;  %vm6081_vm15 = vmor %vm5313_vm7, %vm5697_vm2  ;;  %vm5578_vm7 = vcmp.eq.s32.totalorder %v4810_v27, 1  ;;  %vm5434_vm9 = vcmp.eq.s32.totalorder %v5050_v34, 0  ;;  %v19279_v27 = vld [vmem:[#allocation85_spill] sm:$0xff] }
 0xce5   : > { %10527 = vmatpush.msk.msrb.mxu0 %vm6081_vm15, %v18392_v50  ;;  %vm6217_vm6 = vmor %vm5449_vm8, %vm5833_vm11  ;;  %vm5654_vm8 = vcmp.eq.s32.totalorder %v4886_v46, 1  ;;  %vm5190_vm15 = vcmp.eq.s32.totalorder %v4806_v24, 0  ;;  %v5034_v46 = vsub.s32 %v16163_v6, %v19279_v27 }
 0xce6   : > { %10542 = vmatpush.msk.msrb.mxu1 %vm6217_vm6, %v18392_v50  ;;  %vm5966_vm12 = vmor %vm5198_vm4, %vm5582_vm0  ;;  %7754 = vmatmul.f32.vlgmr.msrb.gmra.mxu0 %v15025_v58  ;;  %vm5818_vm4 = vcmp.eq.s32.totalorder %v5050_v34, 1  ;;  %v5178_v58 = vsub.s32 %v16163_v6, %v19275_v7  ;;  %vm5266_vm6 = vcmp.eq.s32.totalorder %v4882_v15, 0  ;;  %v4878_v7 = vsub.s32 %v16163_v6, %v19278_v42  ;;  %v19280_v42 = vld [vmem:[#allocation30_spill] sm:$0xff]  ;;  %v19281_v34 = vld [vmem:[#allocation23_spill] sm:$0xff] }
 0xce7   : > { %10555 = vmatpush.msk.msrb.mxu2 %vm5966_vm12, %v18392_v50  ;;  %vm6042_vm2 = vmor %vm5274_vm1, %vm5658_vm13  ;;  %vm5574_vm1 = vcmp.eq.s32.totalorder %v4806_v24, 1  ;;  %vm5426_vm12 = vcmp.eq.s32.totalorder %v5042_v17, 0  ;;  %v4798_v27 = vsub.s32 %v16163_v6, %v19281_v34  ;;  %v4874_v24 = vsub.s32 %v16163_v6, %v19240_v49 }
 0xce8   : > { %10568 = vmatpush.msk.msrb.mxu3 %vm6042_vm2, %v18392_v50  ;;  %vm6209_vm11 = vmor %vm5441_vm14, %vm5825_vm3  ;;  %vm5650_vm14 = vcmp.eq.s32.totalorder %v4882_v15, 1  ;;  %vm5562_vm2 = vcmp.eq.s32.totalorder %v5178_v58, 0  ;;  %v5026_v15 = vsub.s32 %v16163_v6, %v19242_v53  ;;  %v7272_v34 = vadd.f32 %v7271_v19, %v7242_v56 }
 0xce9   : > { %10543 = vmatpush.msk.msrb.mxu1 %vm6209_vm11, %v18392_v50  ;;  %vm5962_vm0 = vmor %vm5194_vm5, %vm5578_vm7  ;;  %vm5810_vm5 = vcmp.eq.s32.totalorder %v5042_v17, 1  ;;  %vm5186_vm11 = vcmp.eq.s32.totalorder %v4802_v20, 0  ;;  %v5162_v17 = vsub.s32 %v16163_v6, %v14661_v62  ;;  %v4870_v19 = vsub.s32 %v16163_v6, %v19209_v28 }
 0xcea   : > { %10556 = vmatpush.msk.msrb.mxu2 %vm5962_vm0, %v18392_v50  ;;  %vm6038_vm13 = vmor %vm5270_vm10, %vm5654_vm8  ;;  %7783 = vmatmul.f32.vlgmr.msrb.gmra.mxu1 %v19277_v57  ;;  %vm5946_vm10 = vcmp.eq.s32.totalorder %v5178_v58, 1  ;;  %v5170_v57 = vsub.s32 %v16163_v6, %v19280_v42  ;;  %vm5262_vm0 = vcmp.eq.s32.totalorder %v4878_v7, 0  ;;  %v19282_v42 = vld [vmem:[#allocation92_spill] sm:$0xff]  ;;  %v7300_v58 = vpop.f32.mrf.mxu0  ;;  %v16521_v56 = vpop.f32.mrf.mxu2 }
 0xceb   : > { %10569 = vmatpush.msk.msrb.mxu3 %vm6038_vm13, %v18392_v50  ;;  %vm6202_vm3 = vmor %vm5434_vm9, %vm5818_vm4  ;;  %vm5570_vm9 = vcmp.eq.s32.totalorder %v4802_v20, 1  ;;  %vm5418_vm13 = vcmp.eq.s32.totalorder %v5034_v46, 0  ;;  %v7301_v20 = vadd.f32 %v7300_v58, %v7272_v34  ;;  %v7329_v58 = vpop.f32.mrf.mxu1 }
 0xcec   : > { %10576 = vmatpush.msk.msra.mxu0 %vm6202_vm3, %v18392_v50  ;;  %vm5958_vm7 = vmor %vm5190_vm15, %vm5574_vm1  ;;  %vm5646_vm15 = vcmp.eq.s32.totalorder %v4878_v7, 1  ;;  %vm5554_vm3 = vcmp.eq.s32.totalorder %v5170_v57, 0  ;;  %v5154_v7 = vsub.s32 %v16163_v6, %v14673_v51 }
 0xced   : > { %10557 = vmatpush.msk.msrb.mxu2 %vm5958_vm7, %v18392_v50  ;;  %vm6034_vm8 = vmor %vm5266_vm6, %vm5650_vm14  ;;  %vm5802_vm6 = vcmp.eq.s32.totalorder %v5034_v46, 1  ;;  %vm5182_vm7 = vcmp.eq.s32.totalorder %v4798_v27, 0  ;;  %v19283_v46 = vld [vmem:[#allocation36_spill] sm:$0xff]  ;;  %v7330_v51 = vadd.f32 %v7329_v58, %v7301_v20  ;;  %v19284_v20 = vld [vmem:[#allocation38_spill] sm:$0xff] }
 0xcee   : > { %10570 = vmatpush.msk.msrb.mxu3 %vm6034_vm8, %v18392_v50  ;;  %vm6194_vm4 = vmor %vm5426_vm12, %vm5810_vm5  ;;  %7757 = vmatmul.f32.gmra.mxu0 %v19282_v42  ;;  %vm5938_vm12 = vcmp.eq.s32.totalorder %v5170_v57, 1  ;;  %v16503_v42 = vadd.s32 896, %v19015_v29  ;;  %vm5258_vm8 = vcmp.eq.s32.totalorder %v4874_v24, 0  ;;  %v5018_v29 = vsub.s32 %v16163_v6, %v14663_v35  ;;  %v19286_v58 = vld [vmem:[#allocation34_spill] sm:$0xff] }
 0xcef   : > { %10577 = vmatpush.msk.msra.mxu0 %vm6194_vm4, %v18392_v50  ;;  %vm6330_vm1 = vmor %vm5562_vm2, %vm5946_vm10  ;;  %vm5566_vm2 = vcmp.eq.s32.totalorder %v4798_v27, 1  ;;  %vm5410_vm4 = vcmp.eq.s32.totalorder %v5026_v15, 0  ;;  %v4866_v57 = vsub.s32 %v16163_v6, %v19210_v40  ;;  %v5010_v27 = vsub.s32 %v16163_v6, %v14692_v16  ;;  %8110 = vrot.lane.b32.xlu1 %v7330_v51, %s11716_s1 }
 0xcf0   : > { %10592 = vmatpush.msk.msra.mxu1 %vm6330_vm1, %v18392_v50  ;;  %vm5954_vm14 = vmor %vm5186_vm11, %vm5570_vm9  ;;  %vm5642_vm11 = vcmp.eq.s32.totalorder %v4874_v24, 1  ;;  %vm5546_vm1 = vcmp.eq.s32.totalorder %v5162_v17, 0  ;;  %v4859_v34 = vsub.s32 %v16503_v42, %v19283_v46  ;;  %v5146_v24 = vsub.s32 %v16163_v6, %v19244_v18 }
 0xcf1   : > { %10558 = vmatpush.msk.msrb.mxu2 %vm5954_vm14, %v18392_v50  ;;  %vm6030_vm5 = vmor %vm5262_vm0, %vm5646_vm15  ;;  %vm5794_vm0 = vcmp.eq.s32.totalorder %v5026_v15, 1  ;;  %vm5254_vm14 = vcmp.eq.s32.totalorder %v4870_v19, 0  ;;  %v4855_v15 = vsub.s32 %v16503_v42, %v19179_v32  ;;  %v4862_v51 = vsub.s32 %v16163_v6, %v19211_v26 }
 0xcf2   : > { %10571 = vmatpush.msk.msrb.mxu3 %vm6030_vm5, %v18392_v50  ;;  %vm6186_vm10 = vmor %vm5418_vm13, %vm5802_vm6  ;;  %7786 = vmatmul.f32.gmra.mxu1 %v15138_v21  ;;  %vm5930_vm13 = vcmp.eq.s32.totalorder %v5162_v17, 1  ;;  %vm5402_vm5 = vcmp.eq.s32.totalorder %v5018_v29, 0  ;;  %v5002_v32 = vsub.s32 %v16163_v6, %v14696_v60  ;;  %v5138_v17 = vsub.s32 %v16163_v6, %v14712_v4 }
 0xcf3   : > { %10578 = vmatpush.msk.msra.mxu0 %vm6186_vm10, %v18392_v50  ;;  %vm6322_vm9 = vmor %vm5554_vm3, %vm5938_vm12  ;;  %vm5638_vm3 = vcmp.eq.s32.totalorder %v4870_v19, 1  ;;  %vm5538_vm10 = vcmp.eq.s32.totalorder %v5154_v7, 0  ;;  %v16567_v19 = vpop.f32.mrf.mxu3 }
 0xcf4   : > { %10593 = vmatpush.msk.msra.mxu1 %vm6322_vm9, %v18392_v50  ;;  %vm5950_vm15 = vmor %vm5182_vm7, %vm5566_vm2  ;;  %vm5786_vm7 = vcmp.eq.s32.totalorder %v5018_v29, 1  ;;  %vm5243_vm9 = vcmp.eq.s32.totalorder %v4859_v34, 0  ;;  %v4851_v29 = vsub.s32 %v16503_v42, %v19284_v20  ;;  %v19287_v20 = vld [vmem:[#allocation73_spill] sm:$0xff] }
 0xcf5   : > { %10559 = vmatpush.msk.msrb.mxu2 %vm5950_vm15, %v18392_v50  ;;  %vm6026_vm6 = vmor %vm5258_vm8, %vm5642_vm11  ;;  %vm5922_vm8 = vcmp.eq.s32.totalorder %v5154_v7, 1  ;;  %vm5250_vm15 = vcmp.eq.s32.totalorder %v4866_v57, 0  ;;  %v19285_v7 = vld [vmem:[#allocation33_spill] sm:$0xff] }
 0xcf6   : > { %10572 = vmatpush.msk.msrb.mxu3 %vm6026_vm6, %v18392_v50  ;;  %vm6178_vm12 = vmor %vm5410_vm4, %vm5794_vm0  ;;  %7812 = vmatmul.f32.vlgmr.msrb.gmra.mxu2 %v19243_v0  ;;  %vm5627_vm4 = vcmp.eq.s32.totalorder %v4859_v34, 1  ;;  %vm5394_vm6 = vcmp.eq.s32.totalorder %v5010_v27, 0  ;;  %v4994_v46 = vsub.s32 %v16163_v6, %v19285_v7  ;;  %v16579_v34 = vpop.f32.mrf.mxu2 }
 0xcf7   : > { %10579 = vmatpush.msk.msra.mxu0 %vm6178_vm12, %v18392_v50  ;;  %vm6314_vm2 = vmor %vm5546_vm1, %vm5930_vm13  ;;  %vm5634_vm1 = vcmp.eq.s32.totalorder %v4866_v57, 1  ;;  %vm5530_vm12 = vcmp.eq.s32.totalorder %v5146_v24, 0  ;;  %v5130_v57 = vsub.s32 %v16163_v6, %v19286_v58 }
 0xcf8   : > { %10594 = vmatpush.msk.msra.mxu1 %vm6314_vm2, %v18392_v50  ;;  %vm6022_vm11 = vmor %vm5254_vm14, %vm5638_vm3  ;;  %7760 = vmatmul.f32.gmra.mxu0 %v15171_v25  ;;  %vm5778_vm14 = vcmp.eq.s32.totalorder %v5010_v27, 1  ;;  %vm5239_vm2 = vcmp.eq.s32.totalorder %v4855_v15, 0  ;;  %v4847_v27 = vsub.s32 %v16503_v42, %v19183_v1  ;;  %v4986_v1 = vsub.s32 %v16163_v6, %v14746_v22 }
 0xcf9   : > { %10573 = vmatpush.msk.msrb.mxu3 %vm6022_vm11, %v18392_v50  ;;  %vm6170_vm0 = vmor %vm5402_vm5, %vm5786_vm7  ;;  %vm5914_vm5 = vcmp.eq.s32.totalorder %v5146_v24, 1  ;;  %vm5246_vm11 = vcmp.eq.s32.totalorder %v4862_v51, 0  ;;  %v4923_v24 = vsub.s32 %v16503_v42, %v19246_v45  ;;  %v5122_v45 = vsub.s32 %v16163_v6, %v19214_v23 }
 0xcfa   : > { %10580 = vmatpush.msk.msra.mxu0 %vm6170_vm0, %v18392_v50  ;;  %vm6306_vm13 = vmor %vm5538_vm10, %vm5922_vm8  ;;  %7789 = vmatmul.f32.gmra.mxu1 %v15181_v36  ;;  %vm5623_vm10 = vcmp.eq.s32.totalorder %v4855_v15, 1  ;;  %vm5386_vm0 = vcmp.eq.s32.totalorder %v5002_v32, 0  ;;  %v4843_v15 = vsub.s32 %v16503_v42, %v19248_v9  ;;  %v4978_v9 = vsub.s32 %v16163_v6, %v14767_v55 }
 0xcfb   : > { %10595 = vmatpush.msk.msra.mxu1 %vm6306_vm13, %v18392_v50  ;;  %vm6011_vm3 = vmor %vm5243_vm9, %vm5627_vm4  ;;  %vm5630_vm9 = vcmp.eq.s32.totalorder %v4862_v51, 1  ;;  %vm5522_vm13 = vcmp.eq.s32.totalorder %v5138_v17, 0  ;;  %v4919_v51 = vsub.s32 %v16503_v42, %v19249_v39  ;;  %v5114_v39 = vsub.s32 %v16163_v6, %v19215_v47 }
 0xcfc   : > { %10608 = vmatpush.msk.msra.mxu2 %vm6011_vm3, %v18392_v50  ;;  %vm6018_vm7 = vmor %vm5250_vm15, %vm5634_vm1  ;;  %vm5770_vm15 = vcmp.eq.s32.totalorder %v5002_v32, 1  ;;  %vm5235_vm3 = vcmp.eq.s32.totalorder %v4851_v29, 0  ;;  %v16622_v32 = vpop.f32.mrf.mxu3 }
 0xcfd   : > { %10574 = vmatpush.msk.msrb.mxu3 %vm6018_vm7, %v18392_v50  ;;  %vm6162_vm8 = vmor %vm5394_vm6, %vm5778_vm14  ;;  %vm5906_vm6 = vcmp.eq.s32.totalorder %v5138_v17, 1  ;;  %vm5378_vm7 = vcmp.eq.s32.totalorder %v4994_v46, 0  ;;  %v4839_v17 = vsub.s32 %v16503_v42, %v19251_v14  ;;  %v4970_v14 = vsub.s32 %v16163_v6, %v19217_v8 }
 0xcfe   : > { %10581 = vmatpush.msk.msra.mxu0 %vm6162_vm8, %v18392_v50  ;;  %vm6298_vm4 = vmor %vm5530_vm12, %vm5914_vm5  ;;  %7815 = vmatmul.f32.gmra.mxu2 %v19287_v20  ;;  %vm5619_vm12 = vcmp.eq.s32.totalorder %v4851_v29, 1  ;;  %vm5514_vm8 = vcmp.eq.s32.totalorder %v5130_v57, 0  ;;  %v16635_v29 = vpop.f32.mrf.mxu2 }
 0xcff   : > { %10596 = vmatpush.msk.msra.mxu1 %vm6298_vm4, %v18392_v50  ;;  %vm6007_vm1 = vmor %vm5239_vm2, %vm5623_vm10  ;;  %vm5762_vm2 = vcmp.eq.s32.totalorder %v4994_v46, 1  ;;  %vm5231_vm4 = vcmp.eq.s32.totalorder %v4847_v27, 0  ;;  %v4915_v46 = vsub.s32 %v16503_v42, %v19188_v43  ;;  %v19289_v43 = vld [vmem:[#allocation74_spill] sm:$0xff] }
 0xd00   : > { %10609 = vmatpush.msk.msra.mxu2 %vm6007_vm1, %v18392_v50  ;;  %vm6014_vm14 = vmor %vm5246_vm11, %vm5630_vm9  ;;  %7763 = vmatmul.f32.gmra.mxu0 %v19247_v38  ;;  %vm5898_vm11 = vcmp.eq.s32.totalorder %v5130_v57, 1  ;;  %vm5307_vm1 = vcmp.eq.s32.totalorder %v4923_v24, 0  ;;  %v19288_v57 = vld [vmem:[#allocation67_spill] sm:$0xff] }
 0xd01   : > { %10575 = vmatpush.msk.msrb.mxu3 %vm6014_vm14, %v18392_v50  ;;  %vm6154_vm5 = vmor %vm5386_vm0, %vm5770_vm15  ;;  %vm5615_vm0 = vcmp.eq.s32.totalorder %v4847_v27, 1  ;;  %vm5370_vm14 = vcmp.eq.s32.totalorder %v4986_v1, 0  ;;  %v5106_v27 = vsub.s32 %v16163_v6, %v19288_v57 }
 0xd02   : > { %10582 = vmatpush.msk.msra.mxu0 %vm6154_vm5, %v18392_v50  ;;  %vm6290_vm10 = vmor %vm5522_vm13, %vm5906_vm6  ;;  %7841 = vmatmul.f32.vlgmr.msrb.gmra.mxu3 %v19213_v54  ;;  %vm5691_vm13 = vcmp.eq.s32.totalorder %v4923_v24, 1  ;;  %vm5506_vm5 = vcmp.eq.s32.totalorder %v5122_v45, 0  ;;  %v16652_v24 = vpop.f32.mrf.mxu0 }
 0xd03   : > { %10597 = vmatpush.msk.msra.mxu1 %vm6290_vm10, %v18392_v50  ;;  %vm6003_vm9 = vmor %vm5235_vm3, %vm5619_vm12  ;;  %vm5754_vm3 = vcmp.eq.s32.totalorder %v4986_v1, 1  ;;  %vm5227_vm10 = vcmp.eq.s32.totalorder %v4843_v15, 0  ;;  %v19290_v1 = vld [vmem:[#allocation48_spill] sm:$0xff] }
 0xd04   : > { %10610 = vmatpush.msk.msra.mxu2 %vm6003_vm9, %v18392_v50  ;;  %vm6146_vm15 = vmor %vm5378_vm7, %vm5762_vm2  ;;  %7792 = vmatmul.f32.gmra.mxu1 %v15252_v33  ;;  %vm5890_vm7 = vcmp.eq.s32.totalorder %v5122_v45, 1  ;;  %vm5303_vm9 = vcmp.eq.s32.totalorder %v4919_v51, 0  ;;  %v4835_v45 = vsub.s32 %v16503_v42, %v19290_v1  ;;  %v16681_v33 = vpop.f32.mrf.mxu3 }
 0xd05   : > { %10583 = vmatpush.msk.msra.mxu0 %vm6146_vm15, %v18392_v50  ;;  %vm6282_vm6 = vmor %vm5514_vm8, %vm5898_vm11  ;;  %vm5611_vm8 = vcmp.eq.s32.totalorder %v4843_v15, 1  ;;  %vm5362_vm15 = vcmp.eq.s32.totalorder %v4978_v9, 0  ;;  %v4911_v15 = vsub.s32 %v16503_v42, %v19254_v48 }
 0xd06   : > { %10598 = vmatpush.msk.msra.mxu1 %vm6282_vm6, %v18392_v50  ;;  %vm5999_vm12 = vmor %vm5231_vm4, %vm5615_vm0  ;;  %7818 = vmatmul.f32.gmra.mxu2 %v19250_v41  ;;  %vm5687_vm4 = vcmp.eq.s32.totalorder %v4919_v51, 1  ;;  %vm5498_vm6 = vcmp.eq.s32.totalorder %v5114_v39, 0  ;;  %v19291_v51 = vld [vmem:[#allocation25_spill] sm:$0xff]  ;;  %v19293_v41 = vld [vmem:[#allocation47_spill] sm:$0xff] }
 0xd07   : > { %10611 = vmatpush.msk.msra.mxu2 %vm5999_vm12, %v18392_v50  ;;  %vm6075_vm2 = vmor %vm5307_vm1, %vm5691_vm13  ;;  %vm5746_vm1 = vcmp.eq.s32.totalorder %v4978_v9, 1  ;;  %vm5223_vm12 = vcmp.eq.s32.totalorder %v4839_v17, 0  ;;  %v4962_v1 = vsub.s32 %v16163_v6, %v19291_v51  ;;  %v19292_v9 = vld [vmem:[#allocation26_spill] sm:$0xff] }
 0xd08   : > { %10624 = vmatpush.msk.msra.mxu3 %vm6075_vm2, %v18392_v50  ;;  %vm6138_vm11 = vmor %vm5370_vm14, %vm5754_vm3  ;;  %vm5882_vm14 = vcmp.eq.s32.totalorder %v5114_v39, 1  ;;  %vm5299_vm2 = vcmp.eq.s32.totalorder %v4915_v46, 0  ;;  %v5098_v48 = vsub.s32 %v16163_v6, %v19292_v9  ;;  %v4831_v39 = vsub.s32 %v16503_v42, %v19256_v3 }
 0xd09   : > { %10584 = vmatpush.msk.msra.mxu0 %vm6138_vm11, %v18392_v50  ;;  %vm6274_vm0 = vmor %vm5506_vm5, %vm5890_vm7  ;;  %vm5607_vm5 = vcmp.eq.s32.totalorder %v4839_v17, 1  ;;  %vm5354_vm11 = vcmp.eq.s32.totalorder %v4970_v14, 0  ;;  %v4907_v17 = vsub.s32 %v16503_v42, %v19257_v31  ;;  %v4954_v3 = vsub.s32 %v16163_v6, %v14840_v13 }
 0xd0a   : > { %10599 = vmatpush.msk.msra.mxu1 %vm6274_vm0, %v18392_v50  ;;  %vm5995_vm13 = vmor %vm5227_vm10, %vm5611_vm8  ;;  %7844 = vmatmul.f32.gmra.mxu3 %v19289_v43  ;;  %vm5683_vm10 = vcmp.eq.s32.totalorder %v4915_v46, 1  ;;  %v16669_v43 = vpop.f32.mrf.mxu1  ;;  %vm5490_vm0 = vcmp.eq.s32.totalorder %v5106_v27, 0  ;;  %v16693_v46 = vpop.f32.mrf.mxu2  ;;  %v5090_v31 = vsub.s32 %v16163_v6, %v19258_v44 }
 0xd0b   : > { %10612 = vmatpush.msk.msra.mxu2 %vm5995_vm13, %v18392_v50  ;;  %vm6071_vm3 = vmor %vm5303_vm9, %vm5687_vm4  ;;  %vm5738_vm9 = vcmp.eq.s32.totalorder %v4970_v14, 1  ;;  %vm5219_vm13 = vcmp.eq.s32.totalorder %v4835_v45, 0  ;;  %v19294_v14 = vld [vmem:[#allocation79_spill] sm:$0xff] }
 0xd0c   : > { %10625 = vmatpush.msk.msra.mxu3 %vm6071_vm3, %v18392_v50  ;;  %vm6130_vm7 = vmor %vm5362_vm15, %vm5746_vm1  ;;  %vm5874_vm15 = vcmp.eq.s32.totalorder %v5106_v27, 1  ;;  %vm5295_vm3 = vcmp.eq.s32.totalorder %v4911_v15, 0  ;;  %v4827_v27 = vsub.s32 %v16503_v42, %v19260_v5  ;;  %v4946_v5 = vsub.s32 %v16163_v6, %v19261_v11 }
 0xd0d   : > { %10585 = vmatpush.msk.msra.mxu0 %vm6130_vm7, %v18392_v50  ;;  %vm6266_vm8 = vmor %vm5498_vm6, %vm5882_vm14  ;;  %vm5603_vm6 = vcmp.eq.s32.totalorder %v4835_v45, 1  ;;  %vm5346_vm7 = vcmp.eq.s32.totalorder %v4962_v1, 0  ;;  %v19295_v45 = vld [vmem:[#allocation69_spill] sm:$0xff] }
 0xd0e   : > { %10600 = vmatpush.msk.msra.mxu1 %vm6266_vm8, %v18392_v50  ;;  %vm5991_vm4 = vmor %vm5223_vm12, %vm5607_vm5  ;;  %7821 = vmatmul.f32.gmra.mxu2 %v19293_v41  ;;  %vm5679_vm12 = vcmp.eq.s32.totalorder %v4911_v15, 1  ;;  %vm5482_vm8 = vcmp.eq.s32.totalorder %v5098_v48, 0  ;;  %v16711_v41 = vpop.f32.mrf.mxu0  ;;  %v19296_v15 = vld [vmem:[#allocation44_spill] sm:$0xff] }
 0xd0f   : > { %10613 = vmatpush.msk.msra.mxu2 %vm5991_vm4, %v18392_v50  ;;  %vm6067_vm1 = vmor %vm5299_vm2, %vm5683_vm10  ;;  %vm5730_vm2 = vcmp.eq.s32.totalorder %v4962_v1, 1  ;;  %vm5215_vm4 = vcmp.eq.s32.totalorder %v4831_v39, 0  ;;  %v5082_v1 = vsub.s32 %v16163_v6, %v19296_v15 }
 0xd10   : > { %10626 = vmatpush.msk.msra.mxu3 %vm6067_vm1, %v18392_v50  ;;  %vm6122_vm14 = vmor %vm5354_vm11, %vm5738_vm9  ;;  %vm5866_vm11 = vcmp.eq.s32.totalorder %v5098_v48, 1  ;;  %vm5291_vm1 = vcmp.eq.s32.totalorder %v4907_v17, 0  ;;  %v4823_v48 = vsub.s32 %v16503_v42, %v19263_v52  ;;  %v4938_v52 = vsub.s32 %v16163_v6, %v14951_v61 }
 0xd11   : > { %10586 = vmatpush.msk.msra.mxu0 %vm6122_vm14, %v18392_v50  ;;  %vm6258_vm5 = vmor %vm5490_vm0, %vm5874_vm15  ;;  %vm5599_vm0 = vcmp.eq.s32.totalorder %v4831_v39, 1  ;;  %vm5338_vm14 = vcmp.eq.s32.totalorder %v4954_v3, 0  ;;  %v4899_v39 = vsub.s32 %v16503_v42, %v19264_v10  ;;  %v5074_v10 = vsub.s32 %v16163_v6, %v19265_v2 }
 0xd12   : > { %10601 = vmatpush.msk.msra.mxu1 %vm6258_vm5, %v18392_v50  ;;  %vm5987_vm10 = vmor %vm5219_vm13, %vm5603_vm6  ;;  %7847 = vmatmul.f32.gmra.mxu3 %v19294_v14  ;;  %vm5675_vm13 = vcmp.eq.s32.totalorder %v4907_v17, 1  ;;  %v4903_v14 = vsub.s32 %v16503_v42, %v19295_v45  ;;  %vm5474_vm5 = vcmp.eq.s32.totalorder %v5090_v31, 0  ;;  %v16726_v45 = vpop.f32.mrf.mxu1  ;;  %v16736_v17 = vpop.f32.mrf.mxu3 }
 0xd13   : > { %10614 = vmatpush.msk.msra.mxu2 %vm5987_vm10, %v18392_v50  ;;  %vm6063_vm9 = vmor %vm5295_vm3, %vm5679_vm12  ;;  %vm5722_vm3 = vcmp.eq.s32.totalorder %v4954_v3, 1  ;;  %vm5211_vm10 = vcmp.eq.s32.totalorder %v4827_v27, 0  ;;  %v7269_v3 = vadd.f32 %v16429_v59, %v16414_v37  ;;  %v19298_v37 = vld [vmem:[#allocation29_spill] sm:$0xff]  ;;  %v16751_v61 = vpop.f32.mrf.mxu2 }
 0xd14   : > { %10627 = vmatpush.msk.msra.mxu3 %vm6063_vm9, %v18392_v50  ;;  %vm6114_vm15 = vmor %vm5346_vm7, %vm5730_vm2  ;;  %vm5858_vm7 = vcmp.eq.s32.totalorder %v5090_v31, 1  ;;  %vm5287_vm9 = vcmp.eq.s32.totalorder %v4903_v14, 0  ;;  %v19297_v31 = vld [vmem:[#allocation53_spill] sm:$0xff]  ;;  %v4819_v59 = vsub.s32 %v16503_v42, %v19298_v37 }
 0xd15   : > { %10587 = vmatpush.msk.msra.mxu0 %vm6114_vm15, %v18392_v50  ;;  %vm6250_vm6 = vmor %vm5482_vm8, %vm5866_vm11  ;;  %vm5595_vm8 = vcmp.eq.s32.totalorder %v4827_v27, 1  ;;  %vm5330_vm15 = vcmp.eq.s32.totalorder %v4946_v5, 0  ;;  %v7298_v27 = vadd.f32 %v16449_v12, %v7269_v3  ;;  %v19300_v37 = vld [vmem:[#allocation81_spill] sm:$0xff]  ;;  %v7385_v3 = vadd.f32 %v16681_v33, %v16635_v29 }
 0xd16   : > { %10602 = vmatpush.msk.msra.mxu1 %vm6250_vm6, %v18392_v50  ;;  %vm5983_vm12 = vmor %vm5215_vm4, %vm5599_vm0  ;;  %vm5671_vm4 = vcmp.eq.s32.totalorder %v4903_v14, 1  ;;  %vm5466_vm6 = vcmp.eq.s32.totalorder %v5082_v1, 0  ;;  %v4930_v12 = vsub.s32 %v16163_v6, %v19300_v37  ;;  %v19302_v37 = vld [vmem:[#allocation32_spill] sm:$0xff] }
 0xd17   : > { %10615 = vmatpush.msk.msra.mxu2 %vm5983_vm12, %v18392_v50  ;;  %vm6059_vm2 = vmor %vm5291_vm1, %vm5675_vm13  ;;  %vm5714_vm1 = vcmp.eq.s32.totalorder %v4946_v5, 1  ;;  %vm5207_vm12 = vcmp.eq.s32.totalorder %v4823_v48, 0  ;;  %v19301_v5 = vld [vmem:[#allocation86_spill] sm:$0xff]  ;;  %v4815_v33 = vsub.s32 %v16503_v42, %v19302_v37 }
 0xd18   : > { %10628 = vmatpush.msk.msra.mxu3 %vm6059_vm2, %v18392_v50  ;;  %vm6106_vm11 = vmor %vm5338_vm14, %vm5722_vm3  ;;  %vm5850_vm14 = vcmp.eq.s32.totalorder %v5082_v1, 1  ;;  %vm5283_vm2 = vcmp.eq.s32.totalorder %v4899_v39, 0  ;;  %v7413_v1 = vpop.f32.mrf.mxu0 }
 0xd19   : > { %10588 = vmatpush.msk.msra.mxu0 %vm6106_vm11, %v18392_v50  ;;  %vm6242_vm0 = vmor %vm5474_vm5, %vm5858_vm7  ;;  %vm5591_vm5 = vcmp.eq.s32.totalorder %v4823_v48, 1  ;;  %vm5322_vm11 = vcmp.eq.s32.totalorder %v4938_v52, 0  ;;  %v7414_v29 = vadd.f32 %v7413_v1, %v7385_v3  ;;  %v4891_v48 = vsub.s32 %v16503_v42, %v19271_v63  ;;  %v19304_v63 = vld [vmem:[#allocation19_spill] sm:$0xff] }
 0xd1a   : > { %10603 = vmatpush.msk.msra.mxu1 %vm6242_vm0, %v18392_v50  ;;  %vm5979_vm13 = vmor %vm5211_vm10, %vm5595_vm8  ;;  %7850 = vmatmul.f32.gmra.mxu3 %v19297_v31  ;;  %vm5667_vm10 = vcmp.eq.s32.totalorder %v4899_v39, 1  ;;  %v19299_v31 = vld [vmem:[#allocation72_spill] sm:$0xff]  ;;  %vm5458_vm0 = vcmp.eq.s32.totalorder %v5074_v10, 0  ;;  %v7442_v3 = vpop.f32.mrf.mxu1 }
 0xd1b   : > { %10616 = vmatpush.msk.msra.mxu2 %vm5979_vm13, %v18392_v50  ;;  %vm6055_vm3 = vmor %vm5287_vm9, %vm5671_vm4  ;;  %v4895_v14 = vsub.s32 %v16503_v42, %v19299_v31  ;;  %vm5706_vm9 = vcmp.eq.s32.totalorder %v4938_v52, 1  ;;  %v5066_v31 = vsub.s32 %v16163_v6, %v19301_v5  ;;  %vm5203_vm13 = vcmp.eq.s32.totalorder %v4819_v59, 0  ;;  %v19303_v39 = vld [vmem:[#allocation52_spill] sm:$0xff] }
 0xd1c   : > { %10629 = vmatpush.msk.msra.mxu3 %vm6055_vm3, %v18392_v50  ;;  %vm6098_vm7 = vmor %vm5330_vm15, %vm5714_vm1  ;;  %vm5842_vm15 = vcmp.eq.s32.totalorder %v5074_v10, 1  ;;  %v7327_v5 = vadd.f32 %v16470_v30, %v7298_v27  ;;  %v5058_v37 = vsub.s32 %v16163_v6, %v19303_v39  ;;  %v4811_v30 = vsub.s32 %v16503_v42, %v19304_v63  ;;  %v19305_v6 = vld [vmem:[#allocation76_spill] sm:$0xff]  ;;  %v16797_v27 = vpop.f32.mrf.mxu3  ;;  %v16809_v63 = vpop.f32.mrf.mxu2 }
 0xd1d   : > { %10589 = vmatpush.msk.msra.mxu0 %vm6098_vm7, %v18392_v50  ;;  %vm6234_vm8 = vmor %vm5466_vm6, %vm5850_vm14  ;;  %vm5587_vm6 = vcmp.eq.s32.totalorder %v4819_v59, 1  ;;  %vm5279_vm3 = vcmp.eq.s32.totalorder %v4895_v14, 0  ;;  %vm5314_vm7 = vcmp.eq.s32.totalorder %v4930_v12, 0  ;;  %v7443_v52 = vadd.f32 %v7442_v3, %v7414_v29  ;;  %v19306_v59 = vld [vmem:[#allocation78_spill] sm:$0xff] }
 0xd1e   : > { %10604 = vmatpush.msk.msra.mxu1 %vm6234_vm8, %v18392_v50  ;;  %vm5975_vm4 = vmor %vm5207_vm12, %vm5591_vm5  ;;  %vm5663_vm12 = vcmp.eq.s32.totalorder %v4895_v14, 1  ;;  %vm5450_vm8 = vcmp.eq.s32.totalorder %v5066_v31, 0  ;;  %v4887_v10 = vsub.s32 %v16503_v42, %v19305_v6  ;;  %v5051_v1 = vsub.s32 %v16503_v42, %v19306_v59  ;;  %v19307_v14 = vld [vmem:[#allocation20_spill] sm:$0xff]  ;;  %v19310_v6 = vld [vmem:[#allocation51_spill] sm:$0xff] }
 0xd1f   : > { %10617 = vmatpush.msk.msra.mxu2 %vm5975_vm4, %v18392_v50  ;;  %vm6051_vm1 = vmor %vm5283_vm2, %vm5667_vm10  ;;  %vm5698_vm2 = vcmp.eq.s32.totalorder %v4930_v12, 1  ;;  %vm5199_vm4 = vcmp.eq.s32.totalorder %v4815_v33, 0  ;;  %v11239_v29 = vpack.i.bf16 %v7443_v52, %v7327_v5  ;;  %v4807_v3 = vsub.s32 %v16503_v42, %v19307_v14  ;;  %v19308_v12 = vld [vmem:[#allocation50_spill] sm:$0xff] }
 0xd20   : > { %10630 = vmatpush.msk.msra.mxu3 %vm6051_vm1, %v18392_v50  ;;  %vm6090_vm14 = vmor %vm5322_vm11, %vm5706_vm9  ;;  %vm5834_vm11 = vcmp.eq.s32.totalorder %v5066_v31, 1  ;;  %vm5275_vm1 = vcmp.eq.s32.totalorder %v4891_v48, 0  ;;  %v19309_v5 = vld [vmem:[#allocation82_spill] sm:$0xff]  ;;  %v7388_v52 = vadd.f32 %v16736_v17, %v16693_v46  ;;  %v7416_v59 = vpop.f32.mrf.mxu0  ;;  %v19311_v46 = vld [vmem:[#allocation80_spill] sm:$0xff] }
 0xd21   : > { %10590 = vmatpush.msk.msra.mxu0 %vm6090_vm14, %v18392_v50  ;;  %vm6226_vm5 = vmor %vm5458_vm0, %vm5842_vm15  ;;  %vm5583_vm0 = vcmp.eq.s32.totalorder %v4815_v33, 1  ;;  %vm5442_vm14 = vcmp.eq.s32.totalorder %v5058_v37, 0  ;;  %v4883_v31 = vsub.s32 %v16503_v42, %v19309_v5  ;;  %v5043_v33 = vsub.s32 %v16503_v42, %v19310_v6  ;;  %11240 = vrot.lane.b32.xlu0 %v11239_v29, %s11716_s1  ;;  %v19312_v29 = vld [vmem:[#allocation21_spill] sm:$0xff] }
 0xd22   : > { %10605 = vmatpush.msk.msra.mxu1 %vm6226_vm5, %v18392_v50  ;;  %vm5971_vm10 = vmor %vm5203_vm13, %vm5587_vm6  ;;  %vm5659_vm13 = vcmp.eq.s32.totalorder %v4891_v48, 1  ;;  %vm5195_vm5 = vcmp.eq.s32.totalorder %v4811_v30, 0  ;;  %v5179_v17 = vsub.s32 %v16503_v42, %v19311_v46  ;;  %v7417_v48 = vadd.f32 %v7416_v59, %v7388_v52  ;;  %v7445_v5 = vpop.f32.mrf.mxu1  ;;  %v19314_v52 = vld [vmem:[#allocation83_spill] sm:$0xff] }
 0xd23   : > { %10618 = vmatpush.msk.msra.mxu2 %vm5971_vm10, %v18392_v50  ;;  %vm6047_vm9 = vmor %vm5279_vm3, %vm5663_vm12  ;;  %vm5826_vm3 = vcmp.eq.s32.totalorder %v5058_v37, 1  ;;  %vm5271_vm10 = vcmp.eq.s32.totalorder %v4887_v10, 0  ;;  %v4803_v14 = vsub.s32 %v16503_v42, %v19312_v29  ;;  %v19313_v37 = vld [vmem:[#allocation90_spill] sm:$0xff]  ;;  %v4879_v6 = vsub.s32 %v16503_v42, %v19314_v52  ;;  %v19318_v52 = vld [vmem:[#allocation92_spill] sm:$0xff] }
 0xd24   : > { %10631 = vmatpush.msk.msra.mxu3 %vm6047_vm9, %v18392_v50  ;;  %vm6082_vm15 = vmor %vm5314_vm7, %vm5698_vm2  ;;  %vm5579_vm7 = vcmp.eq.s32.totalorder %v4811_v30, 1  ;;  %vm5435_vm9 = vcmp.eq.s32.totalorder %v5051_v1, 0  ;;  %v7446_v30 = vadd.f32 %v7445_v5, %v7417_v48  ;;  %v7379_v59 = vadd.f32 %v16567_v19, %v16521_v56  ;;  %v16848_v29 = vpop.f32.mrf.mxu3  ;;  %v19316_v56 = vld [vmem:[#allocation30_spill] sm:$0xff]  ;;  %v19317_v48 = vld [vmem:[#allocation23_spill] sm:$0xff]  ;;  %v16862_v5 = vpop.f32.mrf.mxu2 }
 0xd25   : > { %10591 = vmatpush.msk.msra.mxu0 %vm6082_vm15, %v18392_v50  ;;  %vm6218_vm6 = vmor %vm5450_vm8, %vm5834_vm11  ;;  %vm5655_vm8 = vcmp.eq.s32.totalorder %v4887_v10, 1  ;;  %vm5191_vm15 = vcmp.eq.s32.totalorder %v4807_v3, 0  ;;  %v19315_v10 = vld [vmem:[#allocation85_spill] sm:$0xff]  ;;  %v5171_v19 = vsub.s32 %v16503_v42, %v19316_v56 }
 0xd26   : > { %10606 = vmatpush.msk.msra.mxu1 %vm6218_vm6, %v18392_v50  ;;  %vm5967_vm12 = vmor %vm5199_vm4, %vm5583_vm0  ;;  %7870 = vmatmul.f32.vlgmr.msra.gmra.mxu0 %v19308_v12  ;;  %vm5819_vm4 = vcmp.eq.s32.totalorder %v5051_v1, 1  ;;  %vm5267_vm6 = vcmp.eq.s32.totalorder %v4883_v31, 0  ;;  %v5035_v46 = vsub.s32 %v16503_v42, %v19315_v10  ;;  %v7408_v1 = vadd.f32 %v16652_v24, %v7379_v59 }
 0xd27   : > { %10619 = vmatpush.msk.msra.mxu2 %vm5967_vm12, %v18392_v50  ;;  %vm6043_vm2 = vmor %vm5275_vm1, %vm5659_vm13  ;;  %vm5575_vm1 = vcmp.eq.s32.totalorder %v4807_v3, 1  ;;  %vm5427_vm12 = vcmp.eq.s32.totalorder %v5043_v33, 0  ;;  %8112 = vrot.lane.b32.xlu2 %v7446_v30, %s11716_s1  ;;  %v4799_v3 = vsub.s32 %v16503_v42, %v19317_v48  ;;  %v4875_v24 = vsub.s32 %v16503_v42, %v19240_v49 }
 0xd28   : > { %10632 = vmatpush.msk.msra.mxu3 %vm6043_vm2, %v18392_v50  ;;  %vm6210_vm11 = vmor %vm5442_vm14, %vm5826_vm3  ;;  %vm5651_vm14 = vcmp.eq.s32.totalorder %v4883_v31, 1  ;;  %vm5563_vm2 = vcmp.eq.s32.totalorder %v5179_v17, 0  ;;  %v7495_v31 = vadd.f32 %v16797_v27, %v16751_v61  ;;  %v7523_v30 = vpop.f32.mrf.mxu0  ;;  %v5163_v61 = vsub.s32 %v16503_v42, %v14661_v62 }
 0xd29   : > { %10607 = vmatpush.msk.msra.mxu1 %vm6210_vm11, %v18392_v50  ;;  %vm5963_vm0 = vmor %vm5195_vm5, %vm5579_vm7  ;;  %vm5811_vm5 = vcmp.eq.s32.totalorder %v5043_v33, 1  ;;  %vm5187_vm11 = vcmp.eq.s32.totalorder %v4803_v14, 0  ;;  %v5027_v33 = vsub.s32 %v16503_v42, %v19242_v53  ;;  %v7437_v27 = vadd.f32 %v16669_v43, %v7408_v1 }
 0xd2a   : > { %10620 = vmatpush.msk.msra.mxu2 %vm5963_vm0, %v18392_v50  ;;  %vm6039_vm13 = vmor %vm5271_vm10, %vm5655_vm8  ;;  %7899 = vmatmul.f32.vlgmr.msra.gmra.mxu1 %v19313_v37  ;;  %vm5947_vm10 = vcmp.eq.s32.totalorder %v5179_v17, 1  ;;  %vm5263_vm0 = vcmp.eq.s32.totalorder %v4879_v6, 0  ;;  %v7524_v49 = vadd.f32 %v7523_v30, %v7495_v31  ;;  %v4871_v53 = vsub.s32 %v16503_v42, %v19209_v28  ;;  %v7552_v17 = vpop.f32.mrf.mxu1  ;;  %v19319_v28 = vld [vmem:[#allocation31_spill] sm:$0xff] }
 0xd2b   : > { %10633 = vmatpush.msk.msra.mxu3 %vm6039_vm13, %v18392_v50  ;;  %vm6203_vm3 = vmor %vm5435_vm9, %vm5819_vm4  ;;  %vm5571_vm9 = vcmp.eq.s32.totalorder %v4803_v14, 1  ;;  %vm5419_vm13 = vcmp.eq.s32.totalorder %v5035_v46, 0  ;;  %v5019_v62 = vsub.s32 %v16503_v42, %v14663_v35  ;;  %v5155_v14 = vsub.s32 %v16503_v42, %v19319_v28 }
 0xd2c   : > { %10640 = vmatpush.msk.msrb.mxu0 %vm6203_vm3, %v18392_v50  ;;  %vm5959_vm7 = vmor %vm5191_vm15, %vm5575_vm1  ;;  %vm5647_vm15 = vcmp.eq.s32.totalorder %v4879_v6, 1  ;;  %vm5555_vm3 = vcmp.eq.s32.totalorder %v5171_v19, 0  ;;  %v7553_v43 = vadd.f32 %v7552_v17, %v7524_v49  ;;  %v16899_v6 = vpop.f32.mrf.mxu3  ;;  %v4867_v35 = vsub.s32 %v16503_v42, %v19210_v40 }
 0xd2d   : > { %10621 = vmatpush.msk.msra.mxu2 %vm5959_vm7, %v18392_v50  ;;  %vm6035_vm8 = vmor %vm5267_vm6, %vm5651_vm14  ;;  %vm5803_vm6 = vcmp.eq.s32.totalorder %v5035_v46, 1  ;;  %vm5183_vm7 = vcmp.eq.s32.totalorder %v4799_v3, 0  ;;  %v5011_v10 = vsub.s32 %v16503_v42, %v14692_v16  ;;  %v5147_v40 = vsub.s32 %v16503_v42, %v19244_v18  ;;  %v16917_v46 = vpop.f32.mrf.mxu2 }
 0xd2e   : > { %10634 = vmatpush.msk.msra.mxu3 %vm6035_vm8, %v18392_v50  ;;  %vm6195_vm4 = vmor %vm5427_vm12, %vm5811_vm5  ;;  %7873 = vmatmul.f32.gmra.mxu0 %v19318_v52  ;;  %vm5939_vm12 = vcmp.eq.s32.totalorder %v5171_v19, 1  ;;  %vm5259_vm8 = vcmp.eq.s32.totalorder %v4875_v24, 0  ;;  %v11244_v59 = vpack.i.bf16 %v7553_v43, %v7437_v27  ;;  %v4863_v16 = vsub.s32 %v16503_v42, %v19211_v26 }
 0xd2f   : > { %10641 = vmatpush.msk.msrb.mxu0 %vm6195_vm4, %v18392_v50  ;;  %vm6331_vm1 = vmor %vm5563_vm2, %vm5947_vm10  ;;  %vm5567_vm2 = vcmp.eq.s32.totalorder %v4799_v3, 1  ;;  %vm5411_vm4 = vcmp.eq.s32.totalorder %v5027_v33, 0  ;;  %v5003_v18 = vsub.s32 %v16503_v42, %v14696_v60  ;;  %v5139_v26 = vsub.s32 %v16503_v42, %v14712_v4 }
 0xd30   : > { %10656 = vmatpush.msk.msrb.mxu1 %vm6331_vm1, %v18392_v50  ;;  %vm5955_vm14 = vmor %vm5187_vm11, %vm5571_vm9  ;;  %vm5643_vm11 = vcmp.eq.s32.totalorder %v4875_v24, 1  ;;  %vm5547_vm1 = vcmp.eq.s32.totalorder %v5163_v61, 0  ;;  %11245 = vrot.lane.b32.xlu1 %v11244_v59, %s11716_s1  ;;  %v16925_v56 = vpop.f32.mrf.mxu0  ;;  %v4995_v60 = vsub.s32 %v16503_v42, %v19285_v7  ;;  %v7382_v1 = vadd.f32 %v16622_v32, %v16579_v34 }
 0xd31   : > { %10622 = vmatpush.msk.msra.mxu2 %vm5955_vm14, %v18392_v50  ;;  %vm6031_vm5 = vmor %vm5263_vm0, %vm5647_vm15  ;;  %vm5795_vm0 = vcmp.eq.s32.totalorder %v5027_v33, 1  ;;  %vm5255_vm14 = vcmp.eq.s32.totalorder %v4871_v53, 0  ;;  %v5131_v4 = vsub.s32 %v16503_v42, %v19286_v58  ;;  %v4987_v7 = vsub.s32 %v16503_v42, %v14746_v22 }
 0xd32   : > { %10635 = vmatpush.msk.msra.mxu3 %vm6031_vm5, %v18392_v50  ;;  %vm6187_vm10 = vmor %vm5419_vm13, %vm5803_vm6  ;;  %7902 = vmatmul.f32.gmra.mxu1 %v15138_v21  ;;  %vm5931_vm13 = vcmp.eq.s32.totalorder %v5163_v61, 1  ;;  %vm5403_vm5 = vcmp.eq.s32.totalorder %v5019_v62, 0  ;;  %v16938_v19 = vpop.f32.mrf.mxu1  ;;  %v7411_v34 = vadd.f32 %v16711_v41, %v7382_v1  ;;  %v5123_v58 = vsub.s32 %v16503_v42, %v19214_v23  ;;  %v19321_v61 = vld [vmem:[#allocation45_spill] sm:$0xff]  ;;  %v19329_v1 = vld [vmem:[#allocation47_spill] sm:$0xff] }
 0xd33   : > { %10642 = vmatpush.msk.msrb.mxu0 %vm6187_vm10, %v18392_v50  ;;  %vm6323_vm9 = vmor %vm5555_vm3, %vm5939_vm12  ;;  %vm5639_vm3 = vcmp.eq.s32.totalorder %v4871_v53, 1  ;;  %vm5539_vm10 = vcmp.eq.s32.totalorder %v5155_v14, 0  ;;  %v4979_v22 = vsub.s32 %v16503_v42, %v14767_v55  ;;  %v7501_v41 = vadd.f32 %v16899_v6, %v16862_v5  ;;  %v19323_v53 = vld [vmem:[#allocation77_spill] sm:$0xff] }
 0xd34   : > { %10657 = vmatpush.msk.msrb.mxu1 %vm6323_vm9, %v18392_v50  ;;  %vm5951_vm15 = vmor %vm5183_vm7, %vm5567_vm2  ;;  %vm5787_vm7 = vcmp.eq.s32.totalorder %v5019_v62, 1  ;;  %vm5251_vm9 = vcmp.eq.s32.totalorder %v4867_v35, 0  ;;  %v16953_v48 = vpop.f32.mrf.mxu3  ;;  %v5115_v23 = vsub.s32 %v16503_v42, %v19215_v47  ;;  %v4971_v55 = vsub.s32 %v16503_v42, %v19217_v8 }
 0xd35   : > { %10623 = vmatpush.msk.msra.mxu2 %vm5951_vm15, %v18392_v50  ;;  %vm6027_vm6 = vmor %vm5259_vm8, %vm5643_vm11  ;;  %vm5923_vm8 = vcmp.eq.s32.totalorder %v5155_v14, 1  ;;  %vm5395_vm15 = vcmp.eq.s32.totalorder %v5011_v10, 0  ;;  %v16979_v32 = vpop.f32.mrf.mxu2  ;;  %v7440_v24 = vadd.f32 %v16726_v45, %v7411_v34  ;;  %v5107_v47 = vsub.s32 %v16503_v42, %v19288_v57  ;;  %v19320_v45 = vld [vmem:[#allocation95_spill] sm:$0xff]  ;;  %v19324_v14 = vld [vmem:[#allocation81_spill] sm:$0xff] }
 0xd36   : > { %10636 = vmatpush.msk.msra.mxu3 %vm6027_vm6, %v18392_v50  ;;  %vm6179_vm12 = vmor %vm5411_vm4, %vm5795_vm0  ;;  %7928 = vmatmul.f32.vlgmr.msra.gmra.mxu2 %v19243_v0  ;;  %vm5635_vm4 = vcmp.eq.s32.totalorder %v4867_v35, 1  ;;  %vm5531_vm6 = vcmp.eq.s32.totalorder %v5147_v40, 0  ;;  %v4963_v8 = vsub.s32 %v16503_v42, %v19291_v51  ;;  %v5099_v57 = vsub.s32 %v16503_v42, %v19292_v9 }
 0xd37   : > { %10643 = vmatpush.msk.msrb.mxu0 %vm6179_vm12, %v18392_v50  ;;  %vm6315_vm2 = vmor %vm5547_vm1, %vm5931_vm13  ;;  %vm5779_vm1 = vcmp.eq.s32.totalorder %v5011_v10, 1  ;;  %vm5247_vm12 = vcmp.eq.s32.totalorder %v4863_v16, 0  ;;  %v4955_v51 = vsub.s32 %v16503_v42, %v14840_v13  ;;  %v5091_v9 = vsub.s32 %v16503_v42, %v19258_v44 }
 0xd38   : > { %10658 = vmatpush.msk.msrb.mxu1 %vm6315_vm2, %v18392_v50  ;;  %vm6023_vm11 = vmor %vm5255_vm14, %vm5639_vm3  ;;  %7876 = vmatmul.f32.gmra.mxu0 %v15171_v25  ;;  %vm5915_vm14 = vcmp.eq.s32.totalorder %v5147_v40, 1  ;;  %vm5387_vm2 = vcmp.eq.s32.totalorder %v5003_v18, 0  ;;  %v7529_v3 = vpop.f32.mrf.mxu0  ;;  %v4947_v13 = vsub.s32 %v16503_v42, %v19261_v11  ;;  %v7504_v49 = vadd.f32 %v16953_v48, %v16917_v46  ;;  %v19322_v11 = vld [vmem:[#allocation74_spill] sm:$0xff]  ;;  %v19326_v40 = vld [vmem:[#allocation97_spill] sm:$0xff] }
 0xd39   : > { %10637 = vmatpush.msk.msra.mxu3 %vm6023_vm11, %v18392_v50  ;;  %vm6171_vm0 = vmor %vm5403_vm5, %vm5787_vm7  ;;  %vm5631_vm5 = vcmp.eq.s32.totalorder %v4863_v16, 1  ;;  %vm5523_vm11 = vcmp.eq.s32.totalorder %v5139_v26, 0  ;;  %v7530_v5 = vadd.f32 %v7529_v3, %v7501_v41  ;;  %v5083_v44 = vsub.s32 %v16503_v42, %v19296_v15  ;;  %v19327_v46 = vld [vmem:[#allocation55_spill] sm:$0xff] }
 0xd3a   : > { %10644 = vmatpush.msk.msrb.mxu0 %vm6171_vm0, %v18392_v50  ;;  %vm6307_vm13 = vmor %vm5539_vm10, %vm5923_vm8  ;;  %7905 = vmatmul.f32.gmra.mxu1 %v15181_v36  ;;  %vm5771_vm10 = vcmp.eq.s32.totalorder %v5003_v18, 1  ;;  %vm5379_vm0 = vcmp.eq.s32.totalorder %v4995_v60, 0  ;;  %v4939_v17 = vsub.s32 %v16503_v42, %v19323_v53  ;;  %v5075_v15 = vsub.s32 %v16503_v42, %v19265_v2  ;;  %v19325_v2 = vld [vmem:[#allocation86_spill] sm:$0xff] }
 0xd3b   : > { %10659 = vmatpush.msk.msrb.mxu1 %vm6307_vm13, %v18392_v50  ;;  %vm6019_vm3 = vmor %vm5251_vm9, %vm5635_vm4  ;;  %vm5907_vm9 = vcmp.eq.s32.totalorder %v5139_v26, 1  ;;  %vm5515_vm13 = vcmp.eq.s32.totalorder %v5131_v4, 0  ;;  %v4931_v6 = vsub.s32 %v16503_v42, %v19324_v14  ;;  %v5067_v59 = vsub.s32 %v16503_v42, %v19325_v2  ;;  %v19328_v26 = vld [vmem:[#allocation56_spill] sm:$0xff] }
 0xd3c   : > { %10638 = vmatpush.msk.msra.mxu3 %vm6019_vm3, %v18392_v50  ;;  %vm6163_vm7 = vmor %vm5395_vm15, %vm5779_vm1  ;;  %vm5763_vm15 = vcmp.eq.s32.totalorder %v4995_v60, 1  ;;  %vm5371_vm3 = vcmp.eq.s32.totalorder %v4987_v7, 0  ;;  %v17005_v33 = vpop.f32.mrf.mxu3  ;;  %v7153_v16 = vadd.f32 %v19327_v46, %v19326_v40  ;;  %v5059_v18 = vsub.s32 %v16503_v42, %v19303_v39 }
 0xd3d   : > { %10645 = vmatpush.msk.msrb.mxu0 %vm6163_vm7, %v18392_v50  ;;  %vm6299_vm8 = vmor %vm5531_vm6, %vm5915_vm14  ;;  %vm5899_vm6 = vcmp.eq.s32.totalorder %v5131_v4, 1  ;;  %vm5507_vm7 = vcmp.eq.s32.totalorder %v5123_v58, 0  ;;  %v17042_v43 = vpop.f32.mrf.mxu2  ;;  %v7611_v42 = vadd.f32 %v17005_v33, %v16979_v32  ;;  %v19330_v4 = vld [vmem:[#allocation79_spill] sm:$0xff] }
 0xd3e   : > { %10660 = vmatpush.msk.msrb.mxu1 %vm6299_vm8, %v18392_v50  ;;  %vm6015_vm4 = vmor %vm5247_vm12, %vm5631_vm5  ;;  %7931 = vmatmul.f32.gmra.mxu2 %v19287_v20  ;;  %vm5755_vm12 = vcmp.eq.s32.totalorder %v4987_v7, 1  ;;  %vm5363_vm8 = vcmp.eq.s32.totalorder %v4979_v22, 0  ;;  %v7182_v60 = vadd.f32 %v19328_v26, %v7153_v16  ;;  %v17080_v7 = vpop.permute.xlu1 %8185 }
 0xd3f   : > { %10639 = vmatpush.msk.msra.mxu3 %vm6015_vm4, %v18392_v50  ;;  %vm6155_vm1 = vmor %vm5387_vm2, %vm5771_vm10  ;;  %vm5891_vm2 = vcmp.eq.s32.totalorder %v5123_v58, 1  ;;  %vm5499_vm4 = vcmp.eq.s32.totalorder %v5115_v23, 0  ;;  %v19331_v58 = vld [vmem:[#allocation98_spill] sm:$0xff] }
 0xd40   : > { %10646 = vmatpush.msk.msrb.mxu0 %vm6155_vm1, %v18392_v50  ;;  %vm6291_vm14 = vmor %vm5523_vm11, %vm5907_vm9  ;;  %7957 = vmatmul.f32.vlgmr.msra.gmra.mxu3 %v19213_v54  ;;  %v7558_v54 = vpop.f32.mrf.mxu1  ;;  %vm5747_vm11 = vcmp.eq.s32.totalorder %v4979_v22, 1  ;;  %vm5355_vm1 = vcmp.eq.s32.totalorder %v4971_v55, 0  ;;  %v7532_v27 = vpop.f32.mrf.mxu0  ;;  %v7211_v22 = vadd.f32 %v19331_v58, %v7182_v60 }
 0xd41   : > { %10661 = vmatpush.msk.msrb.mxu1 %vm6291_vm14, %v18392_v50  ;;  %vm6147_vm5 = vmor %vm5379_vm0, %vm5763_vm15  ;;  %7879 = vmatmul.f32.gmra.mxu0 %v19247_v38  ;;  %v7559_v31 = vadd.f32 %v7558_v54, %v7530_v5  ;;  %vm5883_vm0 = vcmp.eq.s32.totalorder %v5115_v23, 1  ;;  %vm5491_vm14 = vcmp.eq.s32.totalorder %v5107_v47, 0  ;;  %v7533_v62 = vadd.f32 %v7532_v27, %v7504_v49  ;;  %v19332_v5 = vld [vmem:[#allocation53_spill] sm:$0xff] }
 0xd42   : > { %10647 = vmatpush.msk.msrb.mxu0 %vm6147_vm5, %v18392_v50  ;;  %vm6283_vm10 = vmor %vm5515_vm13, %vm5899_vm6  ;;  %7908 = vmatmul.f32.gmra.mxu1 %v19320_v45  ;;  %vm5739_vm13 = vcmp.eq.s32.totalorder %v4971_v55, 1  ;;  %vm5347_vm5 = vcmp.eq.s32.totalorder %v4963_v8, 0 }
 0xd43   : > { %10662 = vmatpush.msk.msrb.mxu1 %vm6283_vm10, %v18392_v50  ;;  %vm6139_vm9 = vmor %vm5371_vm3, %vm5755_vm12  ;;  %v11249_v30 = vpack.i.bf16 %v7559_v31, %v7440_v24  ;;  %vm5875_vm3 = vcmp.eq.s32.totalorder %v5107_v47, 1  ;;  %vm5483_vm10 = vcmp.eq.s32.totalorder %v5099_v57, 0  ;;  %v8109_v24 = vpop.permute.xlu0 %8108 }
 0xd44   : > { %10648 = vmatpush.msk.msrb.mxu0 %vm6139_vm9, %v18392_v50  ;;  %vm6275_vm15 = vmor %vm5507_vm7, %vm5891_vm2  ;;  %vm5731_vm7 = vcmp.eq.s32.totalorder %v4963_v8, 1  ;;  %vm5339_vm9 = vcmp.eq.s32.totalorder %v4955_v51, 0  ;;  %v17054_v10 = vpop.f32.mrf.mxu3 }
 0xd45   : > { %10663 = vmatpush.msk.msrb.mxu1 %vm6275_vm15, %v18392_v50  ;;  %vm6131_vm6 = vmor %vm5363_vm8, %vm5747_vm11  ;;  %vm5867_vm8 = vcmp.eq.s32.totalorder %v5099_v57, 1  ;;  %11250 = vrot.lane.b32.xlu2 %v11249_v30, %s11716_s1  ;;  %vm5475_vm15 = vcmp.eq.s32.totalorder %v5091_v9, 0  ;;  %v7587_v23 = vpop.f32.mrf.mxu2 }
 0xd46   : > { %10649 = vmatpush.msk.msrb.mxu0 %vm6131_vm6, %v18392_v50  ;;  %vm6267_vm12 = vmor %vm5499_vm4, %vm5883_vm0  ;;  %7934 = vmatmul.f32.gmra.mxu2 %v19321_v61  ;;  %vm5723_vm4 = vcmp.eq.s32.totalorder %v4955_v51, 1  ;;  %vm5331_vm6 = vcmp.eq.s32.totalorder %v4947_v13, 0  ;;  %v17094_v47 = vpop.permute.xlu1 %8191 }
 0xd47   : > { %10664 = vmatpush.msk.msrb.mxu1 %vm6267_vm12, %v18392_v50  ;;  %vm6123_vm2 = vmor %vm5355_vm1, %vm5739_vm13  ;;  %vm5859_vm1 = vcmp.eq.s32.totalorder %v5091_v9, 1  ;;  %vm5467_vm12 = vcmp.eq.s32.totalorder %v5083_v44, 0 }
 0xd48   : > { %10650 = vmatpush.msk.msrb.mxu0 %vm6123_vm2, %v18392_v50  ;;  %vm6259_vm11 = vmor %vm5491_vm14, %vm5875_vm3  ;;  %7960 = vmatmul.f32.gmra.mxu3 %v19322_v11  ;;  %v7561_v28 = vpop.f32.mrf.mxu1  ;;  %vm5715_vm14 = vcmp.eq.s32.totalorder %v4947_v13, 1  ;;  %vm5323_vm2 = vcmp.eq.s32.totalorder %v4939_v17, 0  ;;  %v7639_v39 = vpop.f32.mrf.mxu0 }
 0xd49   : > { %10665 = vmatpush.msk.msrb.mxu1 %vm6259_vm11, %v18392_v50  ;;  %vm6115_vm0 = vmor %vm5347_vm5, %vm5731_vm7  ;;  %v7562_v35 = vadd.f32 %v7561_v28, %v7533_v62  ;;  %vm5851_vm5 = vcmp.eq.s32.totalorder %v5083_v44, 1  ;;  %vm5459_vm11 = vcmp.eq.s32.totalorder %v5075_v15, 0  ;;  %v7640_v48 = vadd.f32 %v7639_v39, %v7611_v42 }
 0xd4a   : > { %10651 = vmatpush.msk.msrb.mxu0 %vm6115_vm0, %v18392_v50  ;;  %vm6251_vm13 = vmor %vm5483_vm10, %vm5867_vm8  ;;  %vm5707_vm10 = vcmp.eq.s32.totalorder %v4939_v17, 1  ;;  %vm5315_vm0 = vcmp.eq.s32.totalorder %v4931_v6, 0 }
 0xd4b   : > { %10666 = vmatpush.msk.msrb.mxu1 %vm6251_vm13, %v18392_v50  ;;  %vm6107_vm3 = vmor %vm5339_vm9, %vm5723_vm4  ;;  %8114 = vrot.lane.b32.xlu0 %v7562_v35, %s11716_s1  ;;  %vm5843_vm9 = vcmp.eq.s32.totalorder %v5075_v15, 1  ;;  %vm5451_vm13 = vcmp.eq.s32.totalorder %v5067_v59, 0  ;;  %v7614_v35 = vadd.f32 %v17054_v10, %v17042_v43  ;;  %v17134_v43 = vpop.permute.xlu2 %11225  ;;  %v17136_v10 = vpop.permute.xlu0 %11230 }
 0xd4c   : > { %10652 = vmatpush.msk.msrb.mxu0 %vm6107_vm3, %v18392_v50  ;;  %vm6243_vm7 = vmor %vm5475_vm15, %vm5859_vm1  ;;  %vm5699_vm15 = vcmp.eq.s32.totalorder %v4931_v6, 1  ;;  %vm5443_vm3 = vcmp.eq.s32.totalorder %v5059_v18, 0  ;;  %v7616_v32 = vpop.f32.mrf.mxu3 }
 0xd4d   : > { %10667 = vmatpush.msk.msrb.mxu1 %vm6243_vm7, %v18392_v50  ;;  %vm6099_vm8 = vmor %vm5331_vm6, %vm5715_vm14  ;;  %vm5835_vm6 = vcmp.eq.s32.totalorder %v5067_v59, 1  ;;  %v7617_v57 = vadd.f32 %v7616_v32, %v7587_v23 }
 0xd4e   : > { %10653 = vmatpush.msk.msrb.mxu0 %vm6099_vm8, %v18392_v50  ;;  %vm6235_vm4 = vmor %vm5467_vm12, %vm5851_vm5  ;;  %7937 = vmatmul.f32.gmra.mxu2 %v19329_v1  ;;  %vm5827_vm12 = vcmp.eq.s32.totalorder %v5059_v18, 1  ;;  %v17107_v30 = vpop.permute.xlu1 %11235 }
 0xd4f   : > { %10668 = vmatpush.msk.msrb.mxu1 %vm6235_vm4, %v18392_v50  ;;  %vm6091_vm1 = vmor %vm5323_vm2, %vm5707_vm10  ;;  %vm19333_vm10 = vcmask 7168  }
 0xd50   : > { %10654 = vmatpush.msk.msrb.mxu0 %vm6091_vm1, %v18392_v50  ;;  %vm6227_vm14 = vmor %vm5459_vm11, %vm5843_vm9  ;;  %7963 = vmatmul.f32.gmra.mxu3 %v19330_v4  ;;  %v7668_v34 = vpop.f32.mrf.mxu1  ;;  %v7642_v55 = vpop.f32.mrf.mxu0  ;;  %v17099_v8 = vsel %vm19333_vm10, %v19329_v1, %v8109_v24 }
 0xd51   : > { %10669 = vmatpush.msk.msrb.mxu1 %vm6227_vm14, %v18392_v50  ;;  %vm6083_vm5 = vmor %vm5315_vm0, %vm5699_vm15  ;;  %v7669_v41 = vadd.f32 %v7668_v34, %v7640_v48  ;;  %v11237_v34 = vunpack.i.l.bf16 %v17107_v30 }
 0xd52   : > { %10655 = vmatpush.msk.msrb.mxu0 %vm6083_vm5, %v18392_v50  ;;  %vm6219_vm7 = vmor %vm5451_vm13, %vm5835_vm6 }
 0xd53   : > { %10670 = vmatpush.msk.msrb.mxu1 %vm6219_vm7, %v18392_v50  ;;  %7986 = vmatmul.f32.vlgmr.msrb.gmra.mxu0 %v19308_v12  ;;  %vm6211_vm2 = vmor %vm5443_vm3, %vm5827_vm12  ;;  %v11254_v3 = vpack.i.bf16 %v7211_v22, %v7669_v41  ;;  %vm19344_vm3 = vcmask 1039360   ;;  %vm19345_vm12 = vcmask 1045504  }
 0xd54   : > { %v7619_v12 = vpop.f32.mrf.mxu3  ;;  %vm19334_vm8 = vmmov %vm19333_vm10 }
 0xd55   : > { %10671 = vmatpush.msk.msrb.mxu1 %vm6211_vm2, %v18392_v50  ;;  %11255 = vrot.lane.b32.xlu2 %v11254_v3, %s11716_s1  ;;  %v7498_v50 = vadd.f32 %v16848_v29, %v16809_v63  ;;  %vm19335_vm11 = vmmov %vm19334_vm8 }
 0xd56   : > { %8015 = vmatmul.f32.vlgmr.msrb.gmra.mxu1 %v19313_v37  ;;  %v7590_v37 = vpop.f32.mrf.mxu2  ;;  %v17141_v32 = vsel %vm19335_vm11, %v19287_v20, %v11237_v34  ;;  %vm19336_vm9 = vmmov %vm19334_vm8 }
 0xd57   : > { %v7527_v31 = vadd.f32 %v16925_v56, %v7498_v50  ;;  %vm19337_vm4 = vmmov %vm19334_vm8 }
 0xd58   : > { %7966 = vmatmul.f32.gmra.mxu3 %v19332_v5  ;;  %v7671_v54 = vpop.f32.mrf.mxu1  ;;  %v7645_v33 = vpop.f32.mrf.mxu0  ;;  %vm19338_vm0 = vmmov %vm19337_vm4 }
 0xd59   : > { %v7646_v51 = vadd.f32 %v7645_v33, %v7617_v57  ;;  %v7556_v9 = vadd.f32 %v16938_v19, %v7527_v31  ;;  %vm19339_vm15 = vmmov %vm19338_vm0 }
 0xd5a   : > { %vm19340_vm1 = vmmov %vm19338_vm0 }
 0xd5b   : > { %7989 = vmatmul.f32.gmra.mxu0 %v19318_v52  ;;  %vm19341_vm13 = vmmov %vm19338_vm0 }
 0xd5c   : > { %v17111_v29 = vpop.f32.mrf.mxu3  ;;  %vm19342_vm6 = vmmov %vm19338_vm0 }
 0xd5d   : > { %8272 = vrot.lane.b32.xlu2 %v17099_v8, %s11717_s22  ;;  %vm19343_vm14 = vmmov %vm19338_vm0 }
 0xd5e   : > { %8018 = vmatmul.f32.gmra.mxu1 %v15138_v21  ;;  %v7620_v21 = vadd.f32 %v7619_v12, %v7590_v37  ;;  %v17115_v56 = vpop.f32.mrf.mxu2  ;;  %vm19346_vm5 = vmmov %vm19338_vm0 }
 0xd5f   : > { %vm19347_vm7 = vmmov %vm19338_vm0 }
 0xd60   : > { %v7674_v52 = vpop.f32.mrf.mxu1  ;;  %v7648_v49 = vpop.f32.mrf.mxu0  ;;  %vm19348_vm2 = vmmov %vm19338_vm0 }
 0xd61   : > { %v7675_v13 = vadd.f32 %v7674_v52, %v7646_v51  ;;  %v7649_v44 = vadd.f32 %v7648_v49, %v7620_v21  ;;  %v17117_v11 = vpop.permute.xlu1 %8110  ;;  %vm19349_vm10 = vmmov %vm19338_vm0 }
 0xd62   : > { %v17121_v19 = vsel %vm19334_vm8, %v8109_v24, %v17117_v11  ;;  %vm19350_vm8 = vmmov %vm19338_vm0 }
 0xd63   : > { %7992 = vmatmul.f32.gmra.mxu0 %v15171_v25  ;;  %v11259_v63 = vpack.i.bf16 %v7556_v9, %v7675_v13  ;;  %8274 = vrot.lane.b32.xlu0 %v17121_v19, %s11717_s22  ;;  %v7727_v13 = vadd.f32 %v17111_v29, %v17115_v56  ;;  %vm19351_vm11 = vmmov %vm19338_vm0 }
 0xd64   : > { %v7729_v25 = vpop.f32.mrf.mxu3 }
 0xd65   : > { %11260 = vrot.lane.b32.xlu2 %v11259_v63, %s11716_s1 }
 0xd66   : > { %8021 = vmatmul.f32.gmra.mxu1 %v15181_v36  ;;  %v7700_v17 = vpop.f32.mrf.mxu2 }
 0xd68   : > { %v7677_v27 = vpop.f32.mrf.mxu1  ;;  %v7755_v36 = vpop.f32.mrf.mxu0 }
 0xd69   : > { %v7678_v53 = vadd.f32 %v7677_v27, %v7649_v44  ;;  %v7756_v49 = vadd.f32 %v7755_v36, %v7727_v13 }
 0xd6b   : > { %7995 = vmatmul.f32.gmra.mxu0 %v19247_v38  ;;  %8116 = vrot.lane.b32.xlu1 %v7678_v53, %s11716_s1  ;;  %v7643_v38 = vadd.f32 %v7642_v55, %v7614_v35 }
 0xd6c   : > { %v7732_v28 = vpop.f32.mrf.mxu3 }
 0xd6d   : > { %v7672_v16 = vadd.f32 %v7671_v54, %v7643_v38  ;;  %v11238_v54 = vunpack.i.h.bf16 %v17107_v30  ;;  %v7730_v38 = vadd.f32 %v7729_v25, %v7700_v17 }
 0xd6e   : > { %8024 = vmatmul.f32.gmra.mxu1 %v19320_v45  ;;  %v7703_v6 = vpop.f32.mrf.mxu2 }
 0xd6f   : > { %v7733_v2 = vadd.f32 %v7732_v28, %v7703_v6  ;;  %v17164_v31 = vsel %vm19337_vm4, %v11237_v34, %v11238_v54  ;;  %vm19353_vm4 = vmmov %vm19338_vm0 }
 0xd70   : > { %v7784_v62 = vpop.f32.mrf.mxu1  ;;  %v7758_v15 = vpop.f32.mrf.mxu0 }
 0xd71   : > { %v7785_v53 = vadd.f32 %v7784_v62, %v7756_v49 }
 0xd74   : > { %v7735_v45 = vpop.f32.mrf.mxu3 }
 0xd76   : > { %v7706_v60 = vpop.f32.mrf.mxu2 }
 0xd77   : > { %v7736_v1 = vadd.f32 %v7735_v45, %v7706_v60 }
 0xd78   : > { %v17128_v14 = vpop.f32.mrf.mxu1  ;;  %v7761_v59 = vpop.f32.mrf.mxu0 }
 0xd79   : > { %v7762_v40 = vadd.f32 %v7761_v59, %v7733_v2 }
 0xd7e   : > { %v17152_v24 = vpop.f32.mrf.mxu2 }
 0xd80   : > { %v7790_v46 = vpop.f32.mrf.mxu1  ;;  %v7764_v42 = vpop.f32.mrf.mxu0 }
 0xd81   : > { %v7791_v18 = vadd.f32 %v7790_v46, %v7762_v40  ;;  %v7765_v39 = vadd.f32 %v7764_v42, %v7736_v1  ;;  %v8113_v58 = vpop.permute.xlu2 %8112  ;;  %v7759_v46 = vadd.f32 %v7758_v15, %v7730_v38 }
 0xd83   : > { %v11269_v26 = vpack.i.bf16 %v7791_v18, %v7672_v16  ;;  %v7788_v15 = vadd.f32 %v17128_v14, %v7759_v46 }
 0xd85   : > { %11270 = vrot.lane.b32.xlu0 %v11269_v26, %s11716_s1  ;;  %v17143_v3 = vpop.f32.mrf.mxu3 }
 0xd86   : > { %v7816_v9 = vpop.f32.mrf.mxu2 }
 0xd88   : > { %v7793_v4 = vpop.f32.mrf.mxu1 }
 0xd89   : > { %v7794_v48 = vadd.f32 %v7793_v4, %v7765_v39 }
 0xd8b   : > { %8118 = vrot.lane.b32.xlu1 %v7794_v48, %s11716_s1 }
 0xd8d   : > { %v7845_v52 = vpop.f32.mrf.mxu3 }
 0xd8e   : > { %v7846_v63 = vadd.f32 %v7845_v52, %v7816_v9  ;;  %v7819_v2 = vpop.f32.mrf.mxu2 }
 0xd93   : > { %v11241_v22 = vpop.permute.xlu0 %11240 }
 0xd94   : > { %v11243_v41 = vunpack.i.h.bf16 %v11241_v22  ;;  %v11242_v23 = vunpack.i.l.bf16 %v11241_v22 }
 0xd95   : > { %v7848_v28 = vpop.f32.mrf.mxu3 }
 0xd96   : > { %v17146_v55 = vsel %vm19336_vm9, %v11242_v23, %v11243_v41  ;;  %v7849_v16 = vadd.f32 %v7848_v28, %v7819_v2  ;;  %v7822_v60 = vpop.f32.mrf.mxu2  ;;  %vm19352_vm9 = vmmov %vm19338_vm0 }
 0xd97   : > { %v17150_v5 = vpack.i.bf16 %v17141_v32, %v17146_v55 }
 0xd99   : > { %11280 = vrot.lane.b32.xlu0 %v17150_v5, %s11717_s22 }
 0xd9d   : > { %v7851_v45 = vpop.f32.mrf.mxu3 }
 0xd9e   : > { %v7852_v1 = vadd.f32 %v7851_v45, %v7822_v60  ;;  %v11232_v60 = vunpack.i.l.bf16 %v17136_v10 }
 0xd9f   : > { %v17157_v12 = vpop.permute.xlu2 %11250 }
 0xda0   : > { %v11253_v20 = vunpack.i.h.bf16 %v17157_v12  ;;  %v11252_v50 = vunpack.i.l.bf16 %v17157_v12 }
 0xda2   : > { %v17169_v57 = vsel %vm19338_vm0, %v11238_v54, %v11252_v50  ;;  %v17174_v33 = vsel %vm19339_vm15, %v11243_v41, %v11253_v20  ;;  %vm19354_vm15 = vmmov %vm19338_vm0 }
 0xda3   : > { %v17161_v37 = vpop.f32.mrf.mxu0  ;;  %v17178_v51 = vpack.i.bf16 %v17169_v57, %v17164_v31 }
 0xda5   : > { %11275 = vrot.lane.b32.xlu1 %v17178_v51, %s11717_s22 }
 0xda7   : > { %v17180_v30 = vpop.f32.mrf.mxu1 }
 0xdab   : > { %v7874_v21 = vpop.f32.mrf.mxu0 }
 0xdac   : > { %v7875_v44 = vadd.f32 %v7874_v21, %v7846_v63 }
 0xdaf   : > { %v7903_v27 = vpop.f32.mrf.mxu1  ;;  %v17186_v35 = vpop.permute.xlu2 %11255 }
 0xdb0   : > { %v7904_v6 = vadd.f32 %v7903_v27, %v7875_v44  ;;  %v11258_v40 = vunpack.i.h.bf16 %v17186_v35 }
 0xdb2   : > { %v11284_v59 = vpack.i.bf16 %v7785_v53, %v7904_v6  ;;  %v17192_v29 = vsel %vm19340_vm1, %v19321_v61, %v11258_v40  ;;  %v17195_v56 = vsel %vm19341_vm13, %v11258_v40, %v11242_v23  ;;  %v17206_v61 = vsel %vm19342_vm6, %v17117_v11, %v8113_v58  ;;  %vm19355_vm1 = vmmov %vm19338_vm0 }
 0xdb3   : > { %v17199_v62 = vpack.i.bf16 %v17195_v56, %v17192_v29  ;;  %v7843_v6 = vadd.f32 %v17143_v3, %v17152_v24  ;;  %vm19356_vm13 = vmmov %vm19344_vm3 }
 0xdb4   : > { %11285 = vrot.lane.b32.xlu1 %v11284_v59, %s11716_s1  ;;  %vm19357_vm6 = vmmov %vm19344_vm3 }
 0xdb5   : > { %v7877_v36 = vpop.f32.mrf.mxu0  ;;  %11265 = vrot.lane.b32.xlu2 %v17199_v62, %s11717_s22 }
 0xdb6   : > { %v7878_v25 = vadd.f32 %v7877_v36, %v7849_v16  ;;  %v7872_v16 = vadd.f32 %v17161_v37, %v7843_v6 }
 0xdb7   : > { %v7906_v17 = vpop.f32.mrf.mxu1  ;;  %v8273_v2 = vpop.permute.xlu2 %8272 }
 0xdb8   : > { %v7907_v18 = vadd.f32 %v7906_v17, %v7878_v25 }
 0xdb9   : > { %v7929_v22 = vpop.f32.mrf.mxu2 }
 0xdba   : > { %v11289_v26 = vpack.i.bf16 %v7788_v15, %v7907_v18  ;;  %v7901_v15 = vadd.f32 %v17180_v30, %v7872_v16  ;;  %v17235_v30 = vsel %vm19347_vm7, %v19243_v0, %v11232_v60  ;;  %vm19362_vm7 = vmmov %vm19338_vm0 }
 0xdbc   : > { %11290 = vrot.lane.b32.xlu0 %v11289_v26, %s11716_s1  ;;  %8276 = vrot.lane.b32.xlu1 %v17206_v61, %s11717_s22  ;;  %v11233_v26 = vunpack.i.h.bf16 %v17136_v10 }
 0xdbd   : > { %v8115_v39 = vpop.permute.xlu0 %8114 }
 0xdbe   : > { %v7880_v42 = vpop.f32.mrf.mxu0  ;;  %v17212_v14 = vsel %vm19343_vm14, %v8113_v58, %v8115_v39  ;;  %vm19358_vm14 = vmmov %vm19338_vm0 }
 0xdbf   : > { %v7881_v4 = vadd.f32 %v7880_v42, %v7852_v1  ;;  %v7909_v48 = vpop.f32.mrf.mxu1 }
 0xdc1   : > { %v7910_v34 = vadd.f32 %v7909_v48, %v7881_v4  ;;  %v7932_v54 = vpop.f32.mrf.mxu2  ;;  %v11246_v4 = vpop.permute.xlu1 %11245  ;;  %v17231_v48 = vsel %vm19346_vm5, %v11232_v60, %v11233_v26  ;;  %vm19361_vm5 = vcmask 1045504  }
 0xdc2   : > { %v17240_v10 = vpack.i.bf16 %v17231_v48, %v17235_v30 }
 0xdc3   : > { %8120 = vrot.lane.b32.xlu2 %v7910_v34, %s11716_s1  ;;  %v7958_v11 = vpop.f32.mrf.mxu3 }
 0xdc4   : > { %8278 = vrot.lane.b32.xlu1 %v17212_v14, %s11717_s22  ;;  %v7959_v9 = vadd.f32 %v7958_v11, %v7929_v22  ;;  %v11247_v22 = vunpack.i.l.bf16 %v11246_v4 }
 0xdc9   : > { %v7935_v58 = vpop.f32.mrf.mxu2 }
 0xdcb   : > { %v7961_v41 = vpop.f32.mrf.mxu3 }
 0xdcc   : > { %v7962_v13 = vadd.f32 %v7961_v41, %v7932_v54  ;;  %v17245_v41 = vsel %vm19348_vm2, %v11233_v26, %v11247_v22  ;;  %vm19363_vm2 = vmmov %vm19338_vm0 }
 0xdcd   : > { %v17249_v0 = vpack.i.bf16 %v17174_v33, %v17245_v41 }
 0xdd0   : > { %v7987_v23 = vpop.f32.mrf.mxu0 }
 0xdd1   : > { %v7988_v63 = vadd.f32 %v7987_v23, %v7959_v9  ;;  %v7938_v18 = vpop.f32.mrf.mxu2  ;;  %v11261_v23 = vpop.permute.xlu2 %11260 }
 0xdd2   : > { %v11262_v9 = vunpack.i.l.bf16 %v11261_v23 }
 0xdd3   : > { %v8016_v52 = vpop.f32.mrf.mxu1  ;;  %v7964_v44 = vpop.f32.mrf.mxu3 }
 0xdd4   : > { %v8017_v53 = vadd.f32 %v8016_v52, %v7988_v63  ;;  %v7965_v40 = vadd.f32 %v7964_v44, %v7935_v58  ;;  %v11263_v52 = vunpack.i.h.bf16 %v11261_v23  ;;  %v11248_v63 = vunpack.i.h.bf16 %v11246_v4 }
 0xdd5   : > { %v17219_v59 = vpop.permute.xlu0 %8274 }
 0xdd6   : > { %v8314_v46 = vsel %vm19344_vm3, %v8273_v2, %v17219_v59  ;;  %v17262_v44 = vsel %vm19350_vm8, %v11252_v50, %v11263_v52  ;;  %vm19359_vm3 = vmmov %vm19338_vm0 }
 0xdd7   : > { %10674 = vmatpush.msk.msrb.mxu2 %vm19345_vm12, %v8314_v46  ;;  %vm19360_vm12 = vmmov %vm19357_vm6 }
 0xdd8   : > { %v7990_v21 = vpop.f32.mrf.mxu0  ;;  %vm19365_vm8 = vmmov %vm19357_vm6 }
 0xdd9   : > { %v7991_v49 = vadd.f32 %v7990_v21, %v7962_v13  ;;  %v11257_v21 = vunpack.i.l.bf16 %v17186_v35 }
 0xddb   : > { %v8019_v27 = vpop.f32.mrf.mxu1  ;;  %v7967_v3 = vpop.f32.mrf.mxu3  ;;  %v17273_v35 = vsel %vm19353_vm4, %v11248_v63, %v11257_v21  ;;  %vm19368_vm4 = vmmov %vm19361_vm5 }
 0xddc   : > { %v8020_v28 = vadd.f32 %v8019_v27, %v7991_v49  ;;  %v7968_v1 = vadd.f32 %v7967_v3, %v7938_v18 }
 0xddd   : > { %v8117_v54 = vpop.permute.xlu1 %8116 }
 0xdde   : > { %v11294_v38 = vpack.i.bf16 %v8017_v53, %v8020_v28  ;;  %v17252_v13 = vsel %vm19349_vm10, %v8115_v39, %v8117_v54  ;;  %v17267_v39 = vsel %vm19351_vm11, %v11253_v20, %v11262_v9  ;;  %v17270_v53 = vsel %vm19352_vm9, %v11247_v22, %v11248_v63  ;;  %vm19364_vm10 = vmmov %vm19338_vm0 }
 0xddf   : > { %v17283_v12 = vpack.i.bf16 %v17262_v44, %v17267_v39  ;;  %vm19366_vm11 = vmmov %vm19357_vm6 }
 0xde0   : > { %11295 = vrot.lane.b32.xlu0 %v11294_v38, %s11716_s1  ;;  %v7993_v36 = vpop.f32.mrf.mxu0  ;;  %vm19367_vm9 = vmmov %vm19357_vm6 }
 0xde1   : > { %v7994_v25 = vadd.f32 %v7993_v36, %v7965_v40 }
 0xde3   : > { %v8022_v17 = vpop.f32.mrf.mxu1 }
 0xde4   : > { %v8023_v24 = vadd.f32 %v8022_v17, %v7994_v25 }
 0xde6   : > { %v11299_v45 = vpack.i.bf16 %v8023_v24, %v7901_v15 }
 0xde8   : > { %11300 = vrot.lane.b32.xlu2 %v11299_v45, %s11716_s1  ;;  %v7996_v37 = vpop.f32.mrf.mxu0 }
 0xde9   : > { %v7997_v42 = vadd.f32 %v7996_v37, %v7968_v1 }
 0xdeb   : > { %v8025_v34 = vpop.f32.mrf.mxu1 }
 0xdec   : > { %v8026_v11 = vadd.f32 %v8025_v34, %v7997_v42 }
 0xdee   : > { %8122 = vrot.lane.b32.xlu0 %v8026_v11, %s11716_s1 }
 0xdf0   : > { %11305 = vrot.lane.b32.xlu2 %v17240_v10, %s11717_s22 }
 0xdf6   : > { %11310 = vrot.lane.b32.xlu0 %v17249_v0, %s11717_s22 }
 0xdf7   : > { %v11271_v49 = vpop.permute.xlu0 %11270 }
 0xdf8   : > { %8280 = vrot.lane.b32.xlu2 %v17252_v13, %s11717_s22  ;;  %v11273_v27 = vunpack.i.h.bf16 %v11271_v49  ;;  %v11272_v58 = vunpack.i.l.bf16 %v11271_v49 }
 0xdfa   : > { %v17276_v28 = vsel %vm19338_vm0, %v11262_v9, %v11273_v27  ;;  %v17279_v6 = vsel %vm19354_vm15, %v11263_v52, %v11272_v58  ;;  %vm19369_vm15 = vmmov %vm19338_vm0 }
 0xdfb   : > { %v17287_v20 = vpack.i.bf16 %v17270_v53, %v17279_v6  ;;  %v17291_v50 = vpack.i.bf16 %v17276_v28, %v17273_v35 }
 0xdfd   : > { %11315 = vrot.lane.b32.xlu1 %v17287_v20, %s11717_s22  ;;  %v8119_v38 = vpop.permute.xlu1 %8118 }
 0xdfe   : > { %11320 = vrot.lane.b32.xlu0 %v17283_v12, %s11717_s22  ;;  %v17300_v2 = vsel %vm19355_vm1, %v8117_v54, %v8119_v38  ;;  %vm19370_vm1 = vmmov %vm19357_vm6 }
 0xe00   : > { %11325 = vrot.lane.b32.xlu2 %v17291_v50, %s11717_s22 }
 0xe06   : > { %8282 = vrot.lane.b32.xlu0 %v17300_v2, %s11717_s22 }
 0xe0b   : > { %v17305_v25 = vpop.permute.xlu0 %11280 }
 0xe0c   : > { %v11283_v15 = vunpack.i.h.bf16 %v17305_v25  ;;  %v11282_v1 = vunpack.i.l.bf16 %v17305_v25 }
 0xe0f   : > { %v11266_v40 = vpop.permute.xlu2 %11265 }
 0xe10   : > { %v11268_v46 = vunpack.i.h.bf16 %v11266_v40  ;;  %v11267_v16 = vunpack.i.l.bf16 %v11266_v40 }
 0xe12   : > { %v8306_v36 = vsel %vm19356_vm13, %v11267_v16, %v11268_v46  ;;  %vm19371_vm13 = vmmov %vm19370_vm1 }
 0xe13   : > { %8381 = vmatpush.msrb.mxu2 %v8306_v36 }
 0xe17   : > { %v17307_v17 = vpop.permute.xlu1 %11275 }
 0xe18   : > { %v11277_v3 = vunpack.i.l.bf16 %v17307_v17  ;;  %v11278_v54 = vunpack.i.h.bf16 %v17307_v17 }
 0xe1a   : > { %v8298_v24 = vsel %vm19357_vm6, %v11283_v15, %v11277_v3  ;;  %vm19372_vm6 = vmmov %vm19368_vm4 }
 0xe1b   : > { %8382 = vmatpush.msrb.mxu2 %v8298_v24 }
 0xe1d   : > { %v8121_v18 = vpop.permute.xlu2 %8120 }
 0xe1e   : > { %v17313_v45 = vsel %vm19358_vm14, %v8119_v38, %v8121_v18  ;;  %vm19373_vm14 = vmmov %vm19338_vm0 }
 0xe1f   : > { %8284 = vrot.lane.b32.xlu1 %v17313_v45, %s11717_s22 }
 0xe26   : > { %v11286_v26 = vpop.permute.xlu1 %11285 }
 0xe27   : > { %v11288_v60 = vunpack.i.h.bf16 %v11286_v26  ;;  %v11287_v37 = vunpack.i.l.bf16 %v11286_v26 }
 0xe29   : > { %v17319_v22 = vsel %vm19359_vm3, %v11257_v21, %v11288_v60  ;;  %v8307_v21 = vsel %vm19365_vm8, %v11268_v46, %v11282_v1  ;;  %vm19374_vm3 = vmmov %vm19338_vm0 }
 0xe2a   : > { %vm19380_vm8 = vmmov %vm19370_vm1 }
 0xe2e   : > { %v11291_v42 = vpop.permute.xlu0 %11290  ;;  %v8277_v4 = vpop.permute.xlu1 %8276 }
 0xe2f   : > { %v11293_v34 = vunpack.i.h.bf16 %v11291_v42  ;;  %v11292_v11 = vunpack.i.l.bf16 %v11291_v42  ;;  %v8315_v23 = vsel %vm19360_vm12, %v17219_v59, %v8277_v4  ;;  %vm19375_vm12 = vmmov %vm19338_vm0 }
 0xe30   : > { %10677 = vmatpush.msk.msrb.mxu3 %vm19361_vm5, %v8315_v23  ;;  %vm19376_vm5 = vmmov %vm19338_vm0 }
 0xe31   : > { %v17326_v52 = vsel %vm19362_vm7, %v11272_v58, %v11293_v34  ;;  %v17329_v9 = vsel %vm19363_vm2, %v11273_v27, %v11292_v11  ;;  %v17332_v63 = vsel %vm19364_vm10, %v11293_v34, %v11287_v37  ;;  %v8299_v27 = vsel %vm19366_vm11, %v11277_v3, %v11278_v54  ;;  %vm19377_vm7 = vmmov %vm19338_vm0 }
 0xe32   : > { %v17339_v59 = vpack.i.bf16 %v17326_v52, %v17329_v9  ;;  %v17343_v49 = vpack.i.bf16 %v17319_v22, %v17332_v63  ;;  %8404 = vmatpush.msrb.mxu3 %v8307_v21  ;;  %vm19378_vm2 = vmmov %vm19338_vm0 }
 0xe33   : > { %vm19379_vm10 = vmmov %vm19338_vm0 }
 0xe34   : > { %11335 = vrot.lane.b32.xlu2 %v17339_v59, %s11717_s22  ;;  %11330 = vrot.lane.b32.xlu0 %v17343_v49, %s11717_s22  ;;  %vm19381_vm11 = vmmov %vm19370_vm1 }
 0xe35   : > { %8405 = vmatpush.msrb.mxu3 %v8299_v27 }
 0xe36   : > { %v8279_v58 = vpop.permute.xlu1 %8278 }
 0xe37   : > { %v8316_v38 = vsel %vm19367_vm9, %v8277_v4, %v8279_v58  ;;  %vm19382_vm9 = vmmov %vm19370_vm1 }
 0xe38   : > { %10680 = vmatpush.msk.msra.mxu0 %vm19368_vm4, %v8316_v38  ;;  %vm19383_vm4 = vmmov %vm19370_vm1 }
 0xe42   : > { %v11301_v40 = vpop.permute.xlu2 %11300 }
 0xe43   : > { %v11303_v46 = vunpack.i.h.bf16 %v11301_v40  ;;  %v11302_v16 = vunpack.i.l.bf16 %v11301_v40 }
 0xe45   : > { %v17355_v36 = vsel %vm19338_vm0, %v11292_v11, %v11303_v46  ;;  %v17358_v15 = vsel %vm19369_vm15, %v11288_v60, %v11302_v16  ;;  %v11227_v11 = vunpack.i.l.bf16 %v17134_v43  ;;  %vm19384_vm0 = vmmov %vm19370_vm1 }
 0xe46   : > { %v17362_v24 = vpack.i.bf16 %v17355_v36, %v17358_v15  ;;  %vm19385_vm15 = vmmov %vm19384_vm0 }
 0xe47   : > { %v8203_v27 = vsel %vm19373_vm14, %v11303_v46, %v11227_v11  ;;  %vm19388_vm14 = vmmov %vm19384_vm0 }
 0xe48   : > { %11340 = vrot.lane.b32.xlu1 %v17362_v24, %s11717_s22 }
 0xe4a   : > { %v11306_v3 = vpop.permute.xlu2 %11305 }
 0xe4b   : > { %v11308_v26 = vunpack.i.h.bf16 %v11306_v3  ;;  %v11307_v42 = vunpack.i.l.bf16 %v11306_v3 }
 0xe4d   : > { %v8290_v4 = vsel %vm19370_vm1, %v11307_v42, %v11308_v26  ;;  %vm19386_vm1 = vmmov %vm19384_vm0 }
 0xe4e   : > { %8383 = vmatpush.msrb.mxu2 %v8290_v4 }
 0xe52   : > { %v11296_v34 = vpop.permute.xlu0 %11295  ;;  %v8281_v23 = vpop.permute.xlu2 %8280 }
 0xe53   : > { %v11297_v21 = vunpack.i.l.bf16 %v11296_v34  ;;  %v8317_v60 = vsel %vm19371_vm13, %v8279_v58, %v8281_v23  ;;  %v11298_v42 = vunpack.i.h.bf16 %v11296_v34  ;;  %vm19387_vm13 = vmmov %vm19384_vm0 }
 0xe54   : > { %10683 = vmatpush.msk.msra.mxu1 %vm19372_vm6, %v8317_v60 }
 0xe55   : > { %v17372_v38 = vsel %vm19374_vm3, %v11287_v37, %v11297_v21  ;;  %v11228_v37 = vunpack.i.h.bf16 %v17134_v43  ;;  %v17394_v4 = vsel %vm19377_vm7, %v11302_v16, %v11298_v42  ;;  %vm19390_vm3 = vcmask 244736  }
 0xe56   : > { %v17375_v40 = vpack.i.bf16 %v17372_v38, %v8203_v27  ;;  %v17404_v27 = vsel %vm19379_vm10, %v11298_v42, %v17080_v7  ;;  %vm19393_vm7 = vmmov %vm19390_vm3 }
 0xe57   : > { %v8202_v34 = vsel %vm19378_vm2, %v11297_v21, %v11228_v37  ;;  %vm19394_vm2 = vmmov %vm19384_vm0 }
 0xe58   : > { %11345 = vrot.lane.b32.xlu1 %v17375_v40, %s11717_s22  ;;  %vm19395_vm10 = vmmov %vm19384_vm0 }
 0xe60   : > { %v8123_v3 = vpop.permute.xlu0 %8122  ;;  %8815 = vrot.lane.b32.xlu1 %v17099_v8, %s11718_s18 }
 0xe61   : > { %v17382_v58 = vsel %vm19375_vm12, %v8121_v18, %v8123_v3  ;;  %v17386_v46 = vsel %vm19376_vm5, %v8123_v3, %v17094_v47  ;;  %v17398_v18 = vpack.i.bf16 %v17394_v4, %v8202_v34  ;;  %vm19391_vm12 = vmmov %vm19390_vm3 }
 0xe62   : > { %8288 = vrot.lane.b32.xlu0 %v17386_v46, %s11717_s22  ;;  %8286 = vrot.lane.b32.xlu2 %v17382_v58, %s11717_s22  ;;  %vm19392_vm5 = vmmov %vm19390_vm3 }
 0xe68   : > { %11355 = vrot.lane.b32.xlu1 %v17199_v62, %s11718_s18  ;;  %v11311_v47 = vpop.permute.xlu0 %11310 }
 0xe69   : > { %v11313_v11 = vunpack.i.h.bf16 %v11311_v47  ;;  %v11312_v60 = vunpack.i.l.bf16 %v11311_v47 }
 0xe6a   : > { %8234 = vrot.lane.b32.xlu0 %v17404_v27, %s11717_s22  ;;  %11350 = vrot.lane.b32.xlu2 %v17398_v18, %s11717_s22 }
 0xe6b   : > { %v8291_v43 = vsel %vm19380_vm8, %v11308_v26, %v11312_v60  ;;  %v8308_v16 = vsel %vm19381_vm11, %v11282_v1, %v11313_v11  ;;  %vm19396_vm8 = vmmov %vm19372_vm6 }
 0xe6c   : > { %8406 = vmatpush.msrb.mxu3 %v8291_v43  ;;  %8427 = vmatpush.msra.mxu0 %v8308_v16  ;;  %vm19397_vm11 = vmmov %vm19384_vm0  ;;  %v17474_v16 = vld [vmem:[%s19389_s19 + $0x18] sm:$0xf] }
 0xe6f   : > { %v11316_v3 = vpop.permute.xlu1 %11315 }
 0xe70   : > { %v11321_v62 = vpop.permute.xlu0 %11320  ;;  %11370 = vrot.lane.b32.xlu1 %v17240_v10, %s11718_s18  ;;  %v11318_v26 = vunpack.i.h.bf16 %v11316_v3  ;;  %v11317_v42 = vunpack.i.l.bf16 %v11316_v3  ;;  %v11326_v10 = vpop.permute.xlu2 %11325 }
 0xe71   : > { %v11323_v7 = vunpack.i.h.bf16 %v11321_v62  ;;  %v11322_v21 = vunpack.i.l.bf16 %v11321_v62  ;;  %v11328_v47 = vunpack.i.h.bf16 %v11326_v10  ;;  %v11327_v43 = vunpack.i.l.bf16 %v11326_v10 }
 0xe72   : > { %8819 = vrot.lane.b32.xlu0 %v17206_v61, %s11718_s18  ;;  %8817 = vrot.lane.b32.xlu2 %v17121_v19, %s11718_s18  ;;  %v8292_v37 = vsel %vm19384_vm0, %v11312_v60, %v11318_v26  ;;  %vm19400_vm0 = vmmov %vm19390_vm3 }
 0xe73   : > { %v8300_v25 = vsel %vm19382_vm9, %v11278_v54, %v11323_v7  ;;  %v8309_v1 = vsel %vm19383_vm4, %v11313_v11, %v11322_v21  ;;  %v8301_v34 = vsel %vm19385_vm15, %v11323_v7, %v11317_v42  ;;  %v8293_v11 = vsel %vm19387_vm13, %v11318_v26, %v11327_v43  ;;  %vm19398_vm9 = vmmov %vm19390_vm3 }
 0xe74   : > { %8428 = vmatpush.msra.mxu0 %v8300_v25  ;;  %8450 = vmatpush.msra.mxu1 %v8309_v1  ;;  %v8310_v60 = vsel %vm19388_vm14, %v11322_v21, %v11328_v47  ;;  %vm19399_vm4 = vmmov %vm19390_vm3 }
 0xe75   : > { %vm19401_vm15 = vmmov %vm19400_vm0 }
 0xe76   : > { %8429 = vmatpush.msra.mxu0 %v8292_v37  ;;  %8451 = vmatpush.msra.mxu1 %v8301_v34  ;;  %vm19402_vm13 = vmmov %vm19386_vm1 }
 0xe77   : > { %vm19403_vm14 = vmmov %vm19400_vm0 }
 0xe78   : > { %8823 = vrot.lane.b32.xlu1 %v17252_v13, %s11718_s18  ;;  %v8283_v17 = vpop.permute.xlu0 %8282  ;;  %8452 = vmatpush.msra.mxu1 %v8293_v11 }
 0xe79   : > { %v8318_v54 = vsel %vm19386_vm1, %v8281_v23, %v8283_v17 }
 0xe7a   : > { %11365 = vrot.lane.b32.xlu0 %v17178_v51, %s11718_s18  ;;  %11360 = vrot.lane.b32.xlu2 %v17150_v5, %s11718_s18  ;;  %v17451_v5 = vld [vmem:[%s19389_s19 + $0x10] sm:$0xff] }
 0xe7b   : > { %10686 = vmatpush.msk.msra.mxu2 %vm19372_vm6, %v8318_v54  ;;  %10678 = vmatmul.msk.f32.vlgmr.msrb.gmra.mxu3 %vm19391_vm12, %v17451_v5  ;;  %vm19405_vm12 = vmmov %vm19400_vm0 }
 0xe7c   : > { %10675 = vmatmul.msk.f32.vlgmr.msrb.gmra.mxu2 %vm19390_vm3, %v17451_v5  ;;  %10681 = vmatmul.msk.f32.vlgmr.msra.gmra.mxu0 %vm19392_vm5, %v17451_v5  ;;  %vm19404_vm3 = vmmov %vm19372_vm6 }
 0xe7d   : > { %8473 = vmatpush.msra.mxu2 %v8310_v60  ;;  %10684 = vmatmul.msk.f32.vlgmr.msra.gmra.mxu1 %vm19393_vm7, %v17451_v5  ;;  %vm19406_vm5 = vmmov %vm19386_vm1 }
 0xe7e   : > { %vm19407_vm7 = vmmov %vm19386_vm1 }
 0xe80   : > { %11390 = vrot.lane.b32.xlu1 %v17291_v50, %s11718_s18 }
 0xe82   : > { %8821 = vrot.lane.b32.xlu0 %v17212_v14, %s11718_s18  ;;  %11375 = vrot.lane.b32.xlu2 %v17249_v0, %s11718_s18 }
 0xe83   : > { %10679 = vmatmul.msk.f32.gmra.mxu3 %vm19399_vm4, %v17474_v16  ;;  %vm19413_vm4 = vmmov %vm19400_vm0 }
 0xe84   : > { %10676 = vmatmul.msk.f32.gmra.mxu2 %vm19398_vm9, %v17474_v16  ;;  %10682 = vmatmul.msk.f32.gmra.mxu0 %vm19400_vm0, %v17474_v16  ;;  %vm19412_vm9 = vmmov %vm19400_vm0 }
 0xe85   : > { %10685 = vmatmul.msk.f32.gmra.mxu1 %vm19401_vm15, %v17474_v16 }
 0xe88   : > { %11395 = vrot.lane.b32.xlu1 %v17339_v59, %s11718_s18 }
 0xe8a   : > { %11385 = vrot.lane.b32.xlu0 %v17287_v20, %s11718_s18  ;;  %11380 = vrot.lane.b32.xlu2 %v17283_v12, %s11718_s18 }
 0xe8e   : > { %v11336_v51 = vpop.permute.xlu2 %11335 }
 0xe8f   : > { %v11338_v0 = vunpack.i.h.bf16 %v11336_v51  ;;  %v11337_v12 = vunpack.i.l.bf16 %v11336_v51 }
 0xe90   : > { %8829 = vrot.lane.b32.xlu1 %v17382_v58, %s11718_s18 }
 0xe91   : > { %v8302_v20 = vsel %vm19394_vm2, %v11317_v42, %v11338_v0  ;;  %v8285_v50 = vpop.permute.xlu1 %8284  ;;  %v8311_v23 = vsel %vm19397_vm11, %v11328_v47, %v11337_v12  ;;  %vm19408_vm2 = vmmov %vm19400_vm0 }
 0xe92   : > { %8827 = vrot.lane.b32.xlu0 %v17313_v45, %s11718_s18  ;;  %8825 = vrot.lane.b32.xlu2 %v17300_v2, %s11718_s18  ;;  %v8319_v59 = vsel %vm19395_vm10, %v8283_v17, %v8285_v50  ;;  %vm19409_vm10 = vmmov %vm19404_vm3 }
 0xe93   : > { %8474 = vmatpush.msra.mxu2 %v8302_v20  ;;  %10689 = vmatpush.msk.msra.mxu3 %vm19396_vm8, %v8319_v59  ;;  %vm19410_vm8 = vmmov %vm19386_vm1 }
 0xe94   : > { %vm19411_vm11 = vmmov %vm19404_vm3 }
 0xe95   : > { %8496 = vmatpush.msra.mxu3 %v8311_v23  ;;  %vm19414_vm0 = vmmov %vm19404_vm3 }
 0xe96   : > { %vm19415_vm15 = vmmov %vm19408_vm2 }
 0xe98   : > { %11415 = vrot.lane.b32.xlu1 %v17398_v18, %s11718_s18 }
 0xe9a   : > { %11405 = vrot.lane.b32.xlu0 %v17362_v24, %s11718_s18  ;;  %11400 = vrot.lane.b32.xlu2 %v17343_v49, %s11718_s18 }
 0xea2   : > { %11410 = vrot.lane.b32.xlu0 %v17375_v40, %s11718_s18  ;;  %8831 = vrot.lane.b32.xlu2 %v17386_v46, %s11718_s18 }
 0xea6   : > { %v11331_v62 = vpop.permute.xlu0 %11330 }
 0xea7   : > { %v11333_v18 = vunpack.i.h.bf16 %v11331_v62  ;;  %v11332_v7 = vunpack.i.l.bf16 %v11331_v62 }
 0xea9   : > { %v8294_v21 = vsel %vm19386_vm1, %v11327_v43, %v11333_v18  ;;  %v8303_v3 = vsel %vm19402_vm13, %v11338_v0, %v11332_v7  ;;  %vm19416_vm13 = vmmov %vm19408_vm2 }
 0xeaa   : > { %8777 = vrot.lane.b32.xlu2 %v17404_v27, %s11718_s18  ;;  %8475 = vmatpush.msra.mxu2 %v8294_v21 }
 0xeab   : > { %8497 = vmatpush.msra.mxu3 %v8303_v3  ;;  %10687 = vmatmul.msk.f32.vlgmr.msra.gmra.mxu2 %vm19403_vm14, %v17451_v5  ;;  %vm19418_vm14 = vmmov %vm19408_vm2 }
 0xeac   : > { %10698 = vmatpush.msk.msrb.mxu2 %vm19372_vm6, %v17099_v8  ;;  %vm19417_vm6 = vmmov %vm19386_vm1 }
 0xeae   : > { %8587 = vmatpush.msrb.mxu2 %v17192_v29  ;;  %v17515_v29 = vld [vmem:[%s19389_s19] sm:$0xff] }
 0xeb0   : > { %8588 = vmatpush.msrb.mxu2 %v17141_v32 }
 0xeb2   : > { %8589 = vmatpush.msrb.mxu2 %v17235_v30 }
 0xeb3   : > { %10688 = vmatmul.msk.f32.gmra.mxu2 %vm19405_vm12, %v17474_v16  ;;  %vm19420_vm12 = vmmov %vm19414_vm0 }
 0xeb4   : > { %10710 = vmatpush.msk.msra.mxu2 %vm19404_vm3, %v17252_v13  ;;  %vm19419_vm3 = vmmov %vm19408_vm2 }
 0xeb6   : > { %8679 = vmatpush.msra.mxu2 %v17267_v39 }
 0xeb8   : > { %8680 = vmatpush.msra.mxu2 %v17279_v6  ;;  %v17531_v6 = vld [vmem:[%s19389_s19 + $0x8] sm:$0xf] }
 0xeba   : > { %8681 = vmatpush.msra.mxu2 %v17273_v35  ;;  %v11341_v8 = vpop.permute.xlu1 %11340 }
 0xebb   : > { %v11343_v32 = vunpack.i.h.bf16 %v11341_v8  ;;  %v11342_v30 = vunpack.i.l.bf16 %v11341_v8  ;;  %10699 = vmatmul.msk.f32.vlgmr.msrb.gmra.mxu2 %vm19408_vm2, %v17515_v29  ;;  %vm19423_vm2 = vmmov %vm19386_vm1 }
 0xebc   : > { %v8287_v49 = vpop.permute.xlu2 %8286 }
 0xebd   : > { %v8320_v13 = vsel %vm19406_vm5, %v8285_v50, %v8287_v49  ;;  %v8295_v39 = vsel %vm19407_vm7, %v11333_v18, %v11342_v30  ;;  %v8312_v35 = vsel %vm19410_vm8, %v11337_v12, %v11343_v32  ;;  %vm19421_vm5 = vcmask 1031168   ;;  %vm19422_vm7 = vmmov %vm19414_vm0 }
 0xebe   : > { %10692 = vmatpush.msk.msrb.mxu0 %vm19409_vm10, %v8320_v13  ;;  %8498 = vmatpush.msra.mxu3 %v8295_v39  ;;  %vm19424_vm10 = vmmov %vm19419_vm3 }
 0xebf   : > { %10690 = vmatmul.msk.f32.vlgmr.msra.gmra.mxu3 %vm19412_vm9, %v17451_v5  ;;  %vm19425_vm8 = vmmov %vm19414_vm0 }
 0xec0   : > { %10701 = vmatpush.msk.msrb.mxu3 %vm19411_vm11, %v17121_v19  ;;  %8519 = vmatpush.msrb.mxu0 %v8312_v35  ;;  %vm19426_vm11 = vmmov %vm19386_vm1 }
 0xec1   : > { %vm19427_vm9 = vmmov %vm19414_vm0 }
 0xec2   : > { %8610 = vmatpush.msrb.mxu3 %v17195_v56 }
 0xec3   : > { %10700 = vmatmul.msk.f32.gmra.mxu2 %vm19413_vm4, %v17531_v6  ;;  %vm19428_vm4 = vmmov %vm19386_vm1 }
 0xec4   : > { %8611 = vmatpush.msrb.mxu3 %v17164_v31  ;;  %v11351_v24 = vpop.permute.xlu2 %11350 }
 0xec5   : > { %v11353_v56 = vunpack.i.h.bf16 %v11351_v24 }
 0xec6   : > { %8612 = vmatpush.msrb.mxu3 %v17231_v48 }
 0xec7   : > { %10691 = vmatmul.msk.f32.gmra.mxu3 %vm19415_vm15, %v17474_v16 }
 0xec8   : > { %10713 = vmatpush.msk.msra.mxu3 %vm19414_vm0, %v17300_v2  ;;  %v8296_v2 = vsel %vm19417_vm6, %v11342_v30, %v11353_v56  ;;  %vm19429_vm0 = vmmov %vm19419_vm3 }
 0xec9   : > { %vm19430_vm15 = vmmov %vm19429_vm0 }
 0xeca   : > { %8702 = vmatpush.msra.mxu3 %v17276_v28  ;;  %v11346_v19 = vpop.permute.xlu1 %11345  ;;  %vm19432_vm6 = vmmov %vm19429_vm0 }
 0xecb   : > { %v11348_v40 = vunpack.i.h.bf16 %v11346_v19  ;;  %10711 = vmatmul.msk.f32.vlgmr.msra.gmra.mxu2 %vm19416_vm13, %v17515_v29  ;;  %vm19431_vm13 = vmmov %vm19421_vm5 }
 0xecc   : > { %8703 = vmatpush.msra.mxu3 %v17326_v52  ;;  %v8818_v31 = vpop.permute.xlu2 %8817 }
 0xecd   : > { %v8304_v48 = vsel %vm19386_vm1, %v11332_v7, %v11348_v40 }
 0xece   : > { %8704 = vmatpush.msra.mxu3 %v17319_v22  ;;  %8520 = vmatpush.msrb.mxu0 %v8304_v48  ;;  %v11347_v22 = vunpack.i.l.bf16 %v11346_v19 }
 0xecf   : > { %10702 = vmatmul.msk.f32.vlgmr.msrb.gmra.mxu3 %vm19419_vm3, %v17515_v29  ;;  %vm19434_vm3 = vmmov %vm19429_vm0 }
 0xed0   : > { %8521 = vmatpush.msrb.mxu0 %v8296_v2  ;;  %v8313_v1 = vsel %vm19426_vm11, %v11343_v32, %v11347_v22  ;;  %vm19439_vm11 = vmmov %vm19429_vm0  ;;  %v17652_v32 = vld [vmem:[%s19389_s19 + $0x28] sm:$0xf] }
 0xed1   : > { %10693 = vmatmul.msk.f32.vlgmr.msrb.gmra.mxu0 %vm19418_vm14, %v17451_v5  ;;  %vm19433_vm14 = vmmov %vm19422_vm7 }
 0xed2   : > { %10704 = vmatpush.msk.msra.mxu0 %vm19420_vm12, %v17206_v61  ;;  %v8816_v28 = vpop.permute.xlu1 %8815  ;;  %v11352_v61 = vunpack.i.l.bf16 %v11351_v24  ;;  %vm19435_vm12 = vmmov %vm19429_vm0 }
 0xed3   : > { %v8857_v52 = vsel %vm19421_vm5, %v8816_v28, %v8818_v31  ;;  %10712 = vmatmul.msk.f32.gmra.mxu2 %vm19424_vm10, %v17531_v6  ;;  %vm19437_vm10 = vmmov %vm19421_vm5 }
 0xed4   : > { %8633 = vmatpush.msra.mxu0 %v17146_v55  ;;  %v8289_v46 = vpop.permute.xlu0 %8288  ;;  %v17556_v27 = vpop.permute.xlu2 %11360  ;;  %10724 = vmatpush.msk.msrb.mxu2 %vm19422_vm7, %v8857_v52  ;;  %v8305_v55 = vsel %vm19428_vm4, %v11348_v40, %v11352_v61  ;;  %vm19441_vm4 = vmmov %vm19421_vm5 }
 0xed5   : > { %v8321_v25 = vsel %vm19423_vm2, %v8287_v49, %v8289_v46  ;;  %vm19436_vm2 = vmmov %vm19422_vm7 }
 0xed6   : > { %8634 = vmatpush.msra.mxu0 %v17169_v57  ;;  %10695 = vmatpush.msk.msrb.mxu1 %vm19425_vm8, %v8321_v25  ;;  %vm19438_vm8 = vmmov %vm19429_vm0 }
 0xed7   : > { %10703 = vmatmul.msk.f32.gmra.mxu3 %vm19429_vm0, %v17531_v6 }
 0xed8   : > { %8635 = vmatpush.msra.mxu0 %v17245_v41  ;;  %8542 = vmatpush.msrb.mxu1 %v8313_v1 }
 0xed9   : > { %10694 = vmatmul.msk.f32.gmra.mxu0 %vm19430_vm15, %v17474_v16  ;;  %vm19443_vm15 = vmmov %vm19434_vm3 }
 0xeda   : > { %10716 = vmatpush.msk.msrb.mxu0 %vm19427_vm9, %v17313_v45  ;;  %v11356_v57 = vpop.permute.xlu1 %11355  ;;  %8543 = vmatpush.msrb.mxu1 %v8305_v55  ;;  %vm19440_vm9 = vmmov %vm19429_vm0 }
 0xedb   : > { %v11358_v26 = vunpack.i.h.bf16 %v11356_v57  ;;  %v11357_v42 = vunpack.i.l.bf16 %v11356_v57  ;;  %vm19442_vm0 = vmmov %vm19441_vm4 }
 0xedc   : > { %8725 = vmatpush.msrb.mxu0 %v17329_v9  ;;  %v8235_v10 = vpop.permute.xlu0 %8234  ;;  %v17574_v41 = vpop.permute.xlu2 %11375 }
 0xedd   : > { %v8297_v45 = vsel %vm19386_vm1, %v11353_v56, %v8235_v10  ;;  %v8849_v37 = vsel %vm19431_vm13, %v11357_v42, %v11358_v26  ;;  %vm19444_vm1 = vmmov %vm19442_vm0  ;;  %v11378_v12 = vunpack.i.h.bf16 %v17574_v41 }
 0xede   : > { %8726 = vmatpush.msrb.mxu0 %v17332_v63  ;;  %8544 = vmatpush.msrb.mxu1 %v8297_v45  ;;  %vm19445_vm13 = vmmov %vm19434_vm3 }
 0xedf   : > { %8924 = vmatpush.msrb.mxu2 %v8849_v37  ;;  %10696 = vmatmul.msk.f32.vlgmr.msrb.gmra.mxu1 %vm19432_vm6, %v17451_v5  ;;  %v11377_v5 = vunpack.i.l.bf16 %v17574_v41  ;;  %vm19446_vm6 = vmmov %vm19442_vm0 }
 0xee0   : > { %8727 = vmatpush.msrb.mxu0 %v17358_v15  ;;  %10707 = vmatpush.msk.msra.mxu1 %vm19433_vm14, %v17212_v14  ;;  %v11362_v15 = vunpack.i.l.bf16 %v17556_v27  ;;  %vm19447_vm14 = vmmov %vm19442_vm0 }
 0xee1   : > { %10714 = vmatmul.msk.f32.vlgmr.msra.gmra.mxu3 %vm19434_vm3, %v17515_v29  ;;  %10705 = vmatmul.msk.f32.vlgmr.msra.gmra.mxu0 %vm19435_vm12, %v17515_v29  ;;  %vm19448_vm12 = vmmov %vm19434_vm3 }
 0xee2   : > { %8656 = vmatpush.msra.mxu1 %v17174_v33  ;;  %v11371_v9 = vpop.permute.xlu1 %11370  ;;  %v8850_v14 = vsel %vm19437_vm10, %v11358_v26, %v11362_v15 }
 0xee3   : > { %v11372_v43 = vunpack.i.l.bf16 %v11371_v9 }
 0xee4   : > { %8657 = vmatpush.msra.mxu1 %v17262_v44  ;;  %v8820_v63 = vpop.permute.xlu0 %8819  ;;  %v17590_v34 = vpop.permute.xlu2 %11380  ;;  %v11363_v44 = vunpack.i.h.bf16 %v17556_v27 }
 0xee5   : > { %v8858_v47 = vsel %vm19421_vm5, %v8818_v31, %v8820_v63  ;;  %v11382_v59 = vunpack.i.l.bf16 %v17590_v34  ;;  %vm19449_vm5 = vmmov %vm19436_vm2  ;;  %v11383_v21 = vunpack.i.h.bf16 %v17590_v34 }
 0xee6   : > { %8658 = vmatpush.msra.mxu1 %v17270_v53  ;;  %10727 = vmatpush.msk.msrb.mxu3 %vm19422_vm7, %v8858_v47  ;;  %vm19450_vm7 = vmmov %vm19442_vm0 }
 0xee7   : > { %10697 = vmatmul.msk.f32.gmra.mxu1 %vm19438_vm8, %v17474_v16  ;;  %vm19452_vm10 = vmmov %vm19449_vm5  ;;  %v8852_v8 = vsel %vm19442_vm0, %v11378_v12, %v11382_v59 }
 0xee8   : > { %10719 = vmatpush.msk.msrb.mxu1 %vm19436_vm2, %v17382_v58  ;;  %8947 = vmatpush.msrb.mxu3 %v8850_v14  ;;  %v11373_v58 = vunpack.i.h.bf16 %v11371_v9  ;;  %vm19451_vm2 = vmmov %vm19442_vm0 }
 0xee9   : > { %10715 = vmatmul.msk.f32.gmra.mxu3 %vm19439_vm11, %v17531_v6  ;;  %10706 = vmatmul.msk.f32.gmra.mxu0 %vm19440_vm9, %v17531_v6  ;;  %vm19453_vm8 = vmmov %vm19449_vm5 }
 0xeea   : > { %8748 = vmatpush.msrb.mxu1 %v17355_v36  ;;  %v8824_v33 = vpop.permute.xlu1 %8823  ;;  %v8834_v0 = vsel %vm19446_vm6, %v11373_v58, %v11377_v5  ;;  %vm19454_vm11 = vmmov %vm19442_vm0 }
 0xeeb   : > { %vm19455_vm9 = vmmov %vm19442_vm0 }
 0xeec   : > { %8749 = vmatpush.msrb.mxu1 %v17372_v38  ;;  %v11366_v53 = vpop.permute.xlu0 %11365  ;;  %v17609_v11 = vpop.permute.xlu2 %8825  ;;  %v17619_v38 = vld [vmem:[%s19389_s19 + $0x20] sm:$0xff]  ;;  %v8851_v7 = vsel %vm19455_vm9, %v11362_v15, %v11378_v12  ;;  %vm19460_vm6 = vmmov %vm19434_vm3  ;;  %vm19470_vm9 = vcmask 1045504  }
 0xeed   : > { %v11368_v17 = vunpack.i.h.bf16 %v11366_v53  ;;  %v11367_v54 = vunpack.i.l.bf16 %v11366_v53  ;;  %v8861_v20 = vsel %vm19447_vm14, %v8824_v33, %v17609_v11  ;;  %vm19461_vm14 = vmmov %vm19442_vm0 }
 0xeee   : > { %8750 = vmatpush.msrb.mxu1 %v17394_v4  ;;  %v8833_v4 = vsel %vm19444_vm1, %v11372_v43, %v11373_v58  ;;  %vm19458_vm1 = vmmov %vm19442_vm0 }
 0xeef   : > { %v8841_v36 = vsel %vm19441_vm4, %v11363_v44, %v11367_v54  ;;  %v8842_v60 = vsel %vm19442_vm0, %v11367_v54, %v11368_v17  ;;  %10708 = vmatmul.msk.f32.vlgmr.msra.gmra.mxu1 %vm19443_vm15, %v17515_v29  ;;  %vm19456_vm4 = vmmov %vm19434_vm3  ;;  %v8843_v49 = vsel %vm19458_vm1, %v11368_v17, %v11383_v21 }
 0xef0   : > { %8925 = vmatpush.msrb.mxu2 %v8841_v36  ;;  %8948 = vmatpush.msrb.mxu3 %v8842_v60  ;;  %vm19457_vm15 = vmmov %vm19434_vm3 }
 0xef1   : > { %10717 = vmatmul.msk.f32.vlgmr.msrb.gmra.mxu0 %vm19445_vm13, %v17515_v29  ;;  %vm19459_vm13 = vmmov %vm19434_vm3 }
 0xef2   : > { %v17624_v51 = vpop.permute.xlu1 %11390  ;;  %8926 = vmatpush.msrb.mxu2 %v8833_v4  ;;  %8949 = vmatpush.msrb.mxu3 %v8834_v0  ;;  %vm19473_vm1 = vmmov %vm19470_vm9 }
 0xef3   : > { %v11393_v50 = vunpack.i.h.bf16 %v17624_v51  ;;  %10725 = vmatmul.msk.f32.vlgmr.msrb.gmra.mxu2 %vm19434_vm3, %v17619_v38  ;;  %10728 = vmatmul.msk.f32.vlgmr.msrb.gmra.mxu3 %vm19448_vm12, %v17619_v38  ;;  %vm19462_vm3 = vmmov %vm19442_vm0  ;;  %v11392_v48 = vunpack.i.l.bf16 %v17624_v51 }
 0xef4   : > { %10736 = vmatpush.msk.msra.mxu2 %vm19449_vm5, %v8861_v20  ;;  %v8822_v23 = vpop.permute.xlu0 %8821  ;;  %v17644_v3 = vpop.permute.xlu2 %11400  ;;  %vm19463_vm12 = vmmov %vm19442_vm0 }
 0xef5   : > { %v8859_v16 = vsel %vm19450_vm7, %v8820_v63, %v8822_v23  ;;  %v8860_v62 = vsel %vm19451_vm2, %v8822_v23, %v8824_v33  ;;  %v8853_v18 = vsel %vm19454_vm11, %v11382_v59, %v11393_v50  ;;  %v11403_v19 = vunpack.i.h.bf16 %v17644_v3  ;;  %vm19464_vm5 = vmmov %vm19456_vm4 }
 0xef6   : > { %10730 = vmatpush.msk.msra.mxu0 %vm19452_vm10, %v8859_v16  ;;  %10733 = vmatpush.msk.msra.mxu1 %vm19453_vm8, %v8860_v62  ;;  %vm19465_vm7 = vmmov %vm19456_vm4  ;;  %v11402_v1 = vunpack.i.l.bf16 %v17644_v3 }
 0xef7   : > { %9016 = vmatpush.msra.mxu2 %v8853_v18  ;;  %10709 = vmatmul.msk.f32.gmra.mxu1 %vm19456_vm4, %v17531_v6  ;;  %vm19466_vm2 = vmmov %vm19442_vm0 }
 0xef8   : > { %8970 = vmatpush.msra.mxu0 %v8851_v7  ;;  %8993 = vmatpush.msra.mxu1 %v8852_v8  ;;  %vm19467_vm10 = vmmov %vm19442_vm0 }
 0xef9   : > { %10718 = vmatmul.msk.f32.gmra.mxu0 %vm19457_vm15, %v17531_v6  ;;  %v8837_v52 = vsel %vm19467_vm10, %v11392_v48, %v11403_v19  ;;  %vm19468_vm8 = vmmov %vm19442_vm0  ;;  %v8431_v36 = vpop.f32.mrf.mxu0 }
 0xefa   : > { %v11396_v30 = vpop.permute.xlu1 %11395  ;;  %8971 = vmatpush.msra.mxu0 %v8843_v49  ;;  %vm19469_vm11 = vmmov %vm19456_vm4  ;;  %v17717_v0 = vpop.f32.mrf.mxu1 }
 0xefb   : > { %10726 = vmatmul.msk.f32.gmra.mxu2 %vm19459_vm13, %v17652_v32  ;;  %10729 = vmatmul.msk.f32.gmra.mxu3 %vm19460_vm6, %v17652_v32  ;;  %v11398_v39 = vunpack.i.h.bf16 %v11396_v30  ;;  %v11397_v46 = vunpack.i.l.bf16 %v11396_v30  ;;  %vm19471_vm4 = vmmov %vm19442_vm0 }
 0xefc   : > { %v11386_v13 = vpop.permute.xlu0 %11385  ;;  %v8832_v2 = vpop.permute.xlu2 %8831  ;;  %vm19472_vm15 = vmmov %vm19470_vm9 }
 0xefd   : > { %v11388_v35 = vunpack.i.h.bf16 %v11386_v13  ;;  %v11387_v24 = vunpack.i.l.bf16 %v11386_v13  ;;  %vm19474_vm13 = vmmov %vm19442_vm0 }
 0xefe   : > { %v8854_v55 = vsel %vm19474_vm13, %v11393_v50, %v11397_v46  ;;  %vm19475_vm6 = vmmov %vm19464_vm5  ;;  %v8408_v17 = vpop.f32.mrf.mxu3 }
 0xeff   : > { %v8835_v56 = vsel %vm19461_vm14, %v11377_v5, %v11388_v35  ;;  %v8844_v40 = vsel %vm19462_vm3, %v11383_v21, %v11387_v24  ;;  %v8845_v31 = vsel %vm19463_vm12, %v11387_v24, %v11398_v39  ;;  %10720 = vmatmul.msk.f32.vlgmr.msrb.gmra.mxu1 %vm19464_vm5, %v17515_v29  ;;  %v8836_v22 = vsel %vm19466_vm2, %v11388_v35, %v11392_v48  ;;  %vm19476_vm14 = vmmov %vm19442_vm0  ;;  %v8385_v43 = vpop.f32.mrf.mxu2 }
 0xf00   : > { %8972 = vmatpush.msra.mxu0 %v8835_v56  ;;  %8994 = vmatpush.msra.mxu1 %v8844_v40  ;;  %v8846_v57 = vsel %vm19476_vm14, %v11398_v39, %v11402_v1  ;;  %vm19477_vm3 = vmmov %vm19464_vm5  ;;  %v9111_v40 = vld [vmem:[#allocation10] sm:$0xff] }
 0xf01   : > { %9017 = vmatpush.msra.mxu2 %v8845_v31  ;;  %10731 = vmatmul.msk.f32.vlgmr.msra.gmra.mxu0 %vm19465_vm7, %v17619_v38  ;;  %vm19478_vm12 = vmmov %vm19477_vm3  ;;  %v8434_v4 = vpop.f32.mrf.mxu0 }
 0xf02   : > { %v8830_v28 = vpop.permute.xlu1 %8829  ;;  %8995 = vmatpush.msra.mxu1 %v8836_v22  ;;  %vm19479_vm5 = vmmov %vm19442_vm0  ;;  %v17723_v50 = vpop.f32.mrf.mxu1 }
 0xf03   : > { %v8864_v27 = vsel %vm19468_vm8, %v8830_v28, %v8832_v2  ;;  %9018 = vmatpush.msra.mxu2 %v8837_v52  ;;  %vm19480_vm7 = vmmov %vm19442_vm0 }
 0xf04   : > { %10737 = vmatmul.msk.f32.vlgmr.msra.gmra.mxu2 %vm19469_vm11, %v17619_v38  ;;  %v8828_v29 = vpop.permute.xlu0 %8827  ;;  %10745 = vmatpush.msk.msrb.mxu1 %vm19470_vm9, %v8864_v27  ;;  %vm19481_vm2 = vmmov %vm19477_vm3  ;;  %v8778_v53 = vpop.permute.xlu2 %8777 }
 0xf05   : > { %v8862_v25 = vsel %vm19471_vm4, %v17609_v11, %v8828_v29  ;;  %v8863_v61 = vsel %vm19442_vm0, %v8828_v29, %v8830_v28  ;;  %vm19482_vm10 = vmmov %vm19481_vm2  ;;  %v9112_v28 = vld [vmem:[#allocation10 + $0x8] sm:$0xff] }
 0xf06   : > { %10739 = vmatpush.msk.msra.mxu3 %vm19472_vm15, %v8862_v25  ;;  %10742 = vmatpush.msk.msrb.mxu0 %vm19473_vm1, %v8863_v61  ;;  %vm19483_vm8 = vmmov %vm19442_vm0  ;;  %v8411_v11 = vpop.f32.mrf.mxu3 }
 0xf07   : > { %10721 = vmatmul.msk.f32.gmra.mxu1 %vm19475_vm6, %v17531_v6  ;;  %vm19484_vm11 = vmmov %vm19442_vm0  ;;  %v8388_v54 = vpop.f32.mrf.mxu2 }
 0xf08   : > { %9039 = vmatpush.msra.mxu3 %v8854_v55  ;;  %vm19485_vm9 = vmmov %vm19481_vm2  ;;  %v9119_v55 = vld [vmem:[#allocation10 + $0x40] sm:$0xf] }
 0xf09   : > { %10732 = vmatmul.msk.f32.gmra.mxu0 %vm19477_vm3, %v17652_v32  ;;  %vm19486_vm4 = vmmov %vm19481_vm2 }
 0xf0a   : > { %9040 = vmatpush.msra.mxu3 %v8846_v57  ;;  %v11416_v6 = vpop.permute.xlu1 %11415  ;;  %vm19487_vm15 = vmmov %vm19442_vm0 }
 0xf0b   : > { %v11418_v34 = vunpack.i.h.bf16 %v11416_v6  ;;  %v11417_v14 = vunpack.i.l.bf16 %v11416_v6  ;;  %vm19488_vm1 = vmmov %vm19481_vm2 }
 0xf0c   : > { %10738 = vmatmul.msk.f32.gmra.mxu2 %vm19478_vm12, %v17652_v32  ;;  %v11406_v26 = vpop.permute.xlu0 %11405  ;;  %vm19489_vm13 = vmmov %vm19442_vm0 }
 0xf0d   : > { %v11408_v42 = vunpack.i.h.bf16 %v11406_v26  ;;  %v11407_v10 = vunpack.i.l.bf16 %v11406_v26  ;;  %v8840_v58 = vsel %vm19489_vm13, %v11418_v34, %v8778_v53  ;;  %vm19490_vm6 = vmmov %vm19488_vm1  ;;  %v9115_v53 = vld [vmem:[#allocation10 + $0x20] sm:$0xff] }
 0xf0e   : > { %vm19491_vm14 = vmmov %vm19488_vm1 }
 0xf0f   : > { %v8838_v41 = vsel %vm19479_vm5, %v11403_v19, %v11407_v10  ;;  %v8855_v45 = vsel %vm19480_vm7, %v11397_v46, %v11408_v42  ;;  %10734 = vmatmul.msk.f32.vlgmr.msra.gmra.mxu1 %vm19481_vm2, %v17619_v38  ;;  %v8839_v33 = vsel %vm19442_vm0, %v11407_v10, %v11418_v34  ;;  %vm19492_vm3 = vmmov %vm19488_vm1 }
 0xf10   : > { %9041 = vmatpush.msra.mxu3 %v8838_v41  ;;  %9062 = vmatpush.msrb.mxu0 %v8855_v45  ;;  %v9113_v41 = vld [vmem:[#allocation10 + $0x10] sm:$0xff] }
 0xf11   : > { %10740 = vmatmul.msk.f32.vlgmr.msra.gmra.mxu3 %vm19482_vm10, %v17619_v38 }
 0xf14   : > { %v11411_v37 = vpop.permute.xlu0 %11410 }
 0xf15   : > { %v11413_v9 = vunpack.i.h.bf16 %v11411_v37  ;;  %v11412_v63 = vunpack.i.l.bf16 %v11411_v37 }
 0xf17   : > { %v8847_v15 = vsel %vm19483_vm8, %v11402_v1, %v11413_v9  ;;  %v8856_v47 = vsel %vm19484_vm11, %v11408_v42, %v11412_v63  ;;  %10735 = vmatmul.msk.f32.gmra.mxu1 %vm19485_vm9, %v17652_v32  ;;  %v8848_v44 = vsel %vm19487_vm15, %v11413_v9, %v11417_v14  ;;  %v9120_v42 = vld [vmem:[#allocation10 + $0x48] sm:$0xf] }
 0xf18   : > { %9063 = vmatpush.msrb.mxu0 %v8847_v15  ;;  %9085 = vmatpush.msrb.mxu1 %v8856_v47 }
 0xf19   : > { %10741 = vmatmul.msk.f32.gmra.mxu3 %vm19486_vm4, %v17652_v32 }
 0xf1a   : > { %9064 = vmatpush.msrb.mxu0 %v8839_v33  ;;  %9086 = vmatpush.msrb.mxu1 %v8848_v44  ;;  %v9121_v33 = vld [vmem:[#allocation10 + $0x50] sm:$0xf] }
 0xf1b   : > { %10743 = vmatmul.msk.f32.vlgmr.msrb.gmra.mxu0 %vm19488_vm1, %v17619_v38 }
 0xf1c   : > { %9087 = vmatpush.msrb.mxu1 %v8840_v58 }
 0xf1f   : > { %10746 = vmatmul.msk.f32.vlgmr.msrb.gmra.mxu1 %vm19490_vm6, %v17619_v38 }
 0xf23   : > { %10744 = vmatmul.msk.f32.gmra.mxu0 %vm19491_vm14, %v17652_v32 }
 0xf27   : > { %10747 = vmatmul.msk.f32.gmra.mxu1 %vm19492_vm3, %v17652_v32 }
 0xf2e   : > { %v8477_v60 = vpop.f32.mrf.mxu2 }
 0xf36   : > { %v17715_v51 = vpop.f32.mrf.mxu2 }
 0xf3e   : > { %v8591_v20 = vpop.f32.mrf.mxu2 }
 0xf3f   : > { %v8592_v35 = vadd.f32 %v8591_v20, %v8385_v43  ;;  %v9114_v20 = vld [vmem:[#allocation10 + $0x18] sm:$0xff] }
 0xf42   : > { %v17713_v5 = vpop.f32.mrf.mxu3 }
 0xf46   : > { %v8594_v16 = vpop.f32.mrf.mxu2 }
 0xf47   : > { %v8595_v27 = vadd.f32 %v8594_v16, %v8388_v54  ;;  %v9123_v16 = vld [vmem:[#allocation10 + $0x60] sm:$0xf] }
 0xf4a   : > { %v17719_v38 = vpop.f32.mrf.mxu3 }
 0xf4e   : > { %v17721_v12 = vpop.f32.mrf.mxu0  ;;  %v8683_v21 = vpop.f32.mrf.mxu2 }
 0xf4f   : > { %v8684_v47 = vadd.f32 %v8683_v21, %v8477_v60 }
 0xf52   : > { %v8614_v59 = vpop.f32.mrf.mxu3 }
 0xf53   : > { %v8615_v19 = vadd.f32 %v8614_v59, %v8408_v17 }
 0xf56   : > { %v17725_v23 = vpop.f32.mrf.mxu0  ;;  %v8686_v49 = vpop.f32.mrf.mxu2 }
 0xf57   : > { %v8687_v59 = vadd.f32 %v8686_v49, %v17715_v51 }
 0xf5a   : > { %v8617_v18 = vpop.f32.mrf.mxu3 }
 0xf5b   : > { %v8618_v25 = vadd.f32 %v8617_v18, %v8411_v11 }
 0xf5c   : > { %v17727_v62 = vpop.f32.mrf.mxu1 }
 0xf5e   : > { %v8637_v7 = vpop.f32.mrf.mxu0 }
 0xf5f   : > { %v8638_v61 = vadd.f32 %v8637_v7, %v8431_v36 }
 0xf64   : > { %v17729_v3 = vpop.f32.mrf.mxu1  ;;  %v17731_v8 = vpop.f32.mrf.mxu3 }
 0xf66   : > { %v8640_v32 = vpop.f32.mrf.mxu0 }
 0xf67   : > { %v8641_v15 = vadd.f32 %v8640_v32, %v8434_v4  ;;  %v8707_v32 = vadd.f32 %v17731_v8, %v17713_v5 }
 0xf6c   : > { %v8660_v30 = vpop.f32.mrf.mxu1  ;;  %v17733_v13 = vpop.f32.mrf.mxu3 }
 0xf6d   : > { %v8661_v11 = vadd.f32 %v8660_v30, %v17717_v0 }
 0xf6e   : > { %v17735_v39 = vpop.f32.mrf.mxu0 }
 0xf74   : > { %v8663_v24 = vpop.f32.mrf.mxu1 }
 0xf75   : > { %v8664_v0 = vadd.f32 %v8663_v24, %v17723_v50  ;;  %v8710_v50 = vadd.f32 %v17733_v13, %v17719_v38  ;;  %v9125_v38 = vld [vmem:[#allocation10 + $0x70] sm:$0xf] }
 0xf76   : > { %v8928_v56 = vpop.f32.mrf.mxu2  ;;  %v17738_v31 = vpop.f32.mrf.mxu0 }
 0xf77   : > { %v9095_v48 = vadd.f32 %v8928_v56, %v8592_v35  ;;  %v8951_v2 = vpop.f32.mrf.mxu3  ;;  %v9116_v35 = vld [vmem:[#allocation10 + $0x28] sm:$0xff]  ;;  %v9122_v56 = vld [vmem:[#allocation10 + $0x58] sm:$0xf] }
 0xf78   : > { %v9096_v22 = vadd.f32 %v8951_v2, %v8615_v19 }
 0xf79   : > { %v9127_v52 = vadd.f32 %v9111_v40, %v9095_v48  ;;  %v8730_v40 = vadd.f32 %v17735_v39, %v17721_v12 }
 0xf7a   : > { %v9128_v46 = vadd.f32 %v9112_v28, %v9096_v22  ;;  %v9117_v22 = vld [vmem:[#allocation10 + $0x30] sm:$0xff] }
 0xf7b   : > { %9143 = vst [vmem:[%s17743_s26] sm:$0xff] %v9127_v52 }
 0xf7c   : > { %9144 = vst [vmem:[%s17743_s26 + $0x8] sm:$0xff] %v9128_v46  ;;  %v8752_v29 = vpop.f32.mrf.mxu1  ;;  %v9124_v46 = vld [vmem:[#allocation10 + $0x68] sm:$0xf] }
 0xf7d   : > { %v8753_v24 = vadd.f32 %v8752_v29, %v17727_v62 }
 0xf7e   : > { %v8931_v1 = vpop.f32.mrf.mxu2  ;;  %v8974_v10 = vpop.f32.mrf.mxu0 }
 0xf7f   : > { %v9103_v57 = vadd.f32 %v8931_v1, %v8595_v27  ;;  %v8954_v26 = vpop.f32.mrf.mxu3  ;;  %v9097_v6 = vadd.f32 %v8974_v10, %v8638_v61  ;;  %v9118_v27 = vld [vmem:[#allocation10 + $0x38] sm:$0xff]  ;;  %v8733_v61 = vadd.f32 %v17738_v31, %v17725_v23 }
 0xf80   : > { %v9104_v45 = vadd.f32 %v8954_v26, %v8618_v25 }
 0xf81   : > { %v9135_v37 = vadd.f32 %v9119_v55, %v9103_v57  ;;  %v9129_v63 = vadd.f32 %v9113_v41, %v9097_v6 }
 0xf82   : > { %v9136_v9 = vadd.f32 %v9120_v42, %v9104_v45  ;;  %v9126_v42 = vld [vmem:[#allocation10 + $0x78] sm:$0xf] }
 0xf83   : > { %9151 = vst [vmem:[%s17743_s26 + $0x40] sm:$0xf] %v9135_v37 }
 0xf84   : > { %9152 = vst [vmem:[%s17743_s26 + $0x48] sm:$0xf] %v9136_v9  ;;  %v8755_v34 = vpop.f32.mrf.mxu1 }
 0xf85   : > { %9145 = vst [vmem:[%s17743_s26 + $0x10] sm:$0xff] %v9129_v63  ;;  %v8756_v29 = vadd.f32 %v8755_v34, %v17729_v3 }
 0xf86   : > { %v8977_v14 = vpop.f32.mrf.mxu0 }
 0xf87   : > { %v9020_v44 = vpop.f32.mrf.mxu2  ;;  %v9105_v58 = vadd.f32 %v8977_v14, %v8641_v15 }
 0xf88   : > { %v9099_v43 = vadd.f32 %v9020_v44, %v8684_v47 }
 0xf89   : > { %v9137_v17 = vadd.f32 %v9121_v33, %v9105_v58 }
 0xf8a   : > { %v9131_v54 = vadd.f32 %v9115_v53, %v9099_v43 }
 0xf8b   : > { %9153 = vst [vmem:[%s17743_s26 + $0x50] sm:$0xf] %v9137_v17 }
 0xf8c   : > { %9147 = vst [vmem:[%s17743_s26 + $0x20] sm:$0xff] %v9131_v54  ;;  %v8997_v36 = vpop.f32.mrf.mxu1 }
 0xf8d   : > { %v9098_v4 = vadd.f32 %v8997_v36, %v8661_v11 }
 0xf8f   : > { %v9023_v60 = vpop.f32.mrf.mxu2  ;;  %v9130_v18 = vadd.f32 %v9114_v20, %v9098_v4 }
 0xf90   : > { %v9107_v7 = vadd.f32 %v9023_v60, %v8687_v59 }
 0xf91   : > { %9146 = vst [vmem:[%s17743_s26 + $0x18] sm:$0xff] %v9130_v18 }
 0xf92   : > { %v9139_v21 = vadd.f32 %v9123_v16, %v9107_v7 }
 0xf94   : > { %9155 = vst [vmem:[%s17743_s26 + $0x60] sm:$0xf] %v9139_v21  ;;  %v9043_v30 = vpop.f32.mrf.mxu3  ;;  %v9000_v19 = vpop.f32.mrf.mxu1 }
 0xf95   : > { %v9100_v51 = vadd.f32 %v9043_v30, %v8707_v32  ;;  %v9106_v49 = vadd.f32 %v9000_v19, %v8664_v0 }
 0xf97   : > { %v9132_v48 = vadd.f32 %v9116_v35, %v9100_v51  ;;  %v9138_v2 = vadd.f32 %v9122_v56, %v9106_v49 }
 0xf98   : > { %v9066_v28 = vpop.f32.mrf.mxu0 }
 0xf99   : > { %9148 = vst [vmem:[%s17743_s26 + $0x28] sm:$0xff] %v9132_v48  ;;  %v9101_v5 = vadd.f32 %v9066_v28, %v8730_v40 }
 0xf9a   : > { %9154 = vst [vmem:[%s17743_s26 + $0x58] sm:$0xf] %v9138_v2 }
 0xf9b   : > { %v9133_v8 = vadd.f32 %v9117_v22, %v9101_v5 }
 0xf9c   : > { %v9046_v52 = vpop.f32.mrf.mxu3  ;;  %v9089_v39 = vpop.f32.mrf.mxu1 }
 0xf9d   : > { %9149 = vst [vmem:[%s17743_s26 + $0x30] sm:$0xff] %v9133_v8  ;;  %v9108_v12 = vadd.f32 %v9046_v52, %v8710_v50  ;;  %v9102_v25 = vadd.f32 %v9089_v39, %v8753_v24 }
 0xf9f   : > { %v9140_v1 = vadd.f32 %v9124_v46, %v9108_v12  ;;  %v9134_v55 = vadd.f32 %v9118_v27, %v9102_v25 }
 0xfa0   : > { %v9069_v57 = vpop.f32.mrf.mxu0 }
 0xfa1   : > { %9156 = vst [vmem:[%s17743_s26 + $0x68] sm:$0xf] %v9140_v1  ;;  %v9109_v13 = vadd.f32 %v9069_v57, %v8733_v61 }
 0xfa2   : > { %9150 = vst [vmem:[%s17743_s26 + $0x38] sm:$0xff] %v9134_v55 }
 0xfa3   : > { %v9141_v62 = vadd.f32 %v9125_v38, %v9109_v13 }
 0xfa4   : > { %v9092_v26 = vpop.f32.mrf.mxu1 }
 0xfa5   : > { %9157 = vst [vmem:[%s17743_s26 + $0x70] sm:$0xf] %v9141_v62  ;;  %v9110_v10 = vadd.f32 %v9092_v26, %v8756_v29 }
 0xfa7   : > { %v9142_v41 = vadd.f32 %v9126_v42, %v9110_v10 }
 0xfa9   : > { %9158 = vst [vmem:[%s17743_s26 + $0x78] sm:$0xf] %v9142_v41 }
 0xfaa PF: > { %s19494_s28 = sld [smem:[#allocation16_spill]] }
 0xfb0   : > { %s31_s24 = sadd.s32 1, %s19494_s28  }
 0xfb1   : > { %p28_p7 = scmp.ge.s32.totalorder %s31_s24, 4  }
 0xfb3   :  { %30 = sbr.rel (!%p28_p7) target bundleno = 12 (0xc), region = 153 }
 0xfb8   :  { %9180 = vsyncpa [#allocation3], 1 }
 0xfb9   :  { %9182 = vsyncpa [#allocation3 + $0x1], 1 }
 0xfba   :  { %9183 = vsyncpa [#allocation5], 1 }
 0xfbb   :  { %9184 = vsyncpa [#allocation8], 1 }
 0xfbc   :  { %9185 = vsyncpa [#allocation11], 1 }

</bundles_post_ra>
